<compile_context>
chip_gen: v7x
topology: tpu7x:2x2x1
jax: 0.10.0
libtpu: 0.0.40
codegen_flags: <defaults>
</compile_context>

<pallas_src>
import math
import numpy as np
import jax
import jax.numpy as jnp
from jax.experimental import pallas as pl
from jax.experimental.pallas import tpu as pltpu  # noqa: F401  (kept for TPU-specific tuning hooks)


# ---------------- config (mirrors the argparse namespace `a`) ----------------
class Cfg:
    pass


A_CFG = Cfg()
A_CFG.loss = "pairwise_svm"            # -> out() returns preds (no 'final' cost given)
A_CFG.hidden_dims = [32, 32]           # one path-attention layer, embed dim 32
A_CFG.features = []                    # no 'shortest' feature
A_CFG.T, A_CFG.dT = 16, 2              # T_ = 8
A_CFG.num_heads = 4
A_CFG.ff_factor = 2
A_CFG.ff_factor_sub = 2
A_CFG.num_subset_attention_layers = 2
A_CFG.out_dims = [16]
A_CFG.num_subset_agents = 2
A_CFG.use_3d_convolution = False       # convs are None in the reference module
A_CFG.use_path_attention = True
A_CFG.prepool = 1                      # -> grid[:, obstacles] = obstacle_embedding
A_CFG.obstacles = [5, 10]
G_ROWS, G_COLS = 4, 4
G_SIZE = G_ROWS * G_COLS
LN_EPS = 1e-5
BIG = 1e30                             # additive key-mask magnitude (== -inf numerically)


# ------------------------------ fused kernel ----------------------------------
def make_fused_kernel(a, B, A, S, SA):
    E = a.hidden_dims[0]
    H = a.num_heads
    hd = E // H
    T_ = a.T // a.dT
    F = a.ff_factor * E
    NLAYER = 1 + a.num_subset_attention_layers
    BA, BAT = B * A, B * A * T_
    BS = B * S
    LS = 1 + SA
    BGT = B * G_SIZE * T_
    OUT_ROWS = max(8, ((BS + 7) // 8) * 8)
    scale = 1.0 / math.sqrt(hd)
    f32 = jnp.float32

    def layernorm(y, g, b):
        mu = jnp.mean(y, axis=-1, keepdims=True)
        var = jnp.mean((y - mu) ** 2, axis=-1, keepdims=True)
        return (y - mu) * jax.lax.rsqrt(var + LN_EPS) * g + b

    def encoder(x2, n_seq, L, mask_add, wqkv, wo, w1_, w2_, vec):
        """One TransformerEncoderLayer on n_seq sequences of length L; x2: (n_seq*L, E)."""
        bqkv, bo = vec[0:1, 0:3 * E], vec[1:2, 0:E]
        g1, beta1 = vec[2:3, 0:E], vec[3:4, 0:E]
        bb1, bb2 = vec[4:5, 0:F], vec[5:6, 0:E]
        g2, beta2 = vec[6:7, 0:E], vec[7:8, 0:E]

        # one batched QKV projection for all sequences
        qkv = jnp.dot(x2, wqkv, preferred_element_type=f32) + bqkv            # (n*L, 3E)

        def merge_heads(z):                                                   # (n*L, E) -> (H*n, L, hd)
            return jnp.concatenate(
                [z[:, h * hd:(h + 1) * hd].reshape(n_seq, L, hd) for h in range(H)],
                axis=0)

        qm = merge_heads(qkv[:, 0:E])
        km = merge_heads(qkv[:, E:2 * E])
        vm = merge_heads(qkv[:, 2 * E:3 * E])

        # single batched score einsum + one-shot softmax over all heads/sequences
        s = jnp.einsum("bqd,bkd->bqk", qm, km, preferred_element_type=f32) * scale
        if mask_add is not None:
            s = s + mask_add                                                  # (H*n, 1, L) key mask
        m = jnp.max(s, axis=-1, keepdims=True)
        p = jnp.exp(s - m)
        p = p * pl.reciprocal(jnp.sum(p, axis=-1, keepdims=True), approx=True)
        o = jnp.einsum("bqk,bkd->bqd", p, vm, preferred_element_type=f32)     # (H*n, L, hd)

        # out-projection as a sum of per-head matmuls (no lane concat needed)
        attn = bo                                                             # (1, E) broadcasts
        for h in range(H):
            o_h = o[h * n_seq:(h + 1) * n_seq].reshape(n_seq * L, hd)
            attn = attn + jnp.dot(o_h, wo[h * hd:(h + 1) * hd, :],
                                  preferred_element_type=f32)

        y = layernorm(x2 + attn, g1, beta1)
        h1 = jnp.maximum(jnp.dot(y, w1_, preferred_element_type=f32) + bb1, 0.0)
        z = y + jnp.dot(h1, w2_, preferred_element_type=f32) + bb2
        return layernorm(z, g2, beta2)

    def kernel(idxs_row_ref, idxs_col_ref, mask_col_ref, maskf_ref,
               seqsel_ref, tokmask_ref, gbias_ref, gkeep_ref, emb_ref,
               wqkv_ref, wo_ref, w1_ref, w2_ref, vec_ref, fc_ref, out_ref):
        # ---- grid build: scatter-add of time embeddings as a one-hot matmul ----
        init_rows = emb_ref[0:T_, :]                                          # (T_, E)
        vals = jnp.concatenate([init_rows] * BA, axis=0) * mask_col_ref[...]  # (BAT, E)
        j_iota = jax.lax.broadcasted_iota(jnp.int32, (BGT, BAT), 0)
        scat_t = (idxs_row_ref[...] == j_iota).astype(f32)                    # (BGT, BAT)
        gridf = jnp.dot(scat_t, vals, preferred_element_type=f32)             # (BGT, E)
        # obstacle-cell overwrite + location embedding (per-row keep/bias, precomputed)
        gridf = gridf * gkeep_ref[...] + gbias_ref[...]

        # ---- gather per-(agent, time) rows: another one-hot matmul ----
        c_iota = jax.lax.broadcasted_iota(jnp.int32, (BAT, BGT), 1)
        gath_oh = (idxs_col_ref[...] == c_iota).astype(f32)                   # (BAT, BGT)
        x_path = jnp.dot(gath_oh, gridf, preferred_element_type=f32)          # (BAT, E)

        # ---- path attention layer (padded time steps masked as keys) ----
        addm = ((maskf_ref[...] - 1.0) * BIG).reshape(BA, 1, T_)
        addm = jnp.concatenate([addm] * H, axis=0)                            # (H*BA, 1, T_)
        x_path = encoder(x_path, BA, T_, addm,
                         wqkv_ref[0], wo_ref[0], w1_ref[0], w2_ref[0], vec_ref[0])

        # ---- subset sequences: [CLS token, agents @ t=0] via one-hot gather ----
        q_iota = jax.lax.broadcasted_iota(jnp.int32, (BS * LS, BAT), 1)
        seq_oh = (seqsel_ref[...] == q_iota).astype(f32)                      # (BS*LS, BAT)
        token = emb_ref[T_:T_ + 1, :]                                         # (1, E)
        seq = jnp.dot(seq_oh, x_path, preferred_element_type=f32) + tokmask_ref[...] * token

        # ---- subset attention stack (no mask, as in the reference) ----
        for l in range(1, NLAYER):
            seq = encoder(seq, BS, LS, None,
                          wqkv_ref[l], wo_ref[l], w1_ref[l], w2_ref[l], vec_ref[l])

        cls = seq.reshape(BS, LS, E)[:, 0:1, :].reshape(BS, E)                # (BS, E)

        # ---- out_fc head: Linear -> ReLU -> Linear ----
        fc = fc_ref[...]
        w1f, b1f = fc[0:E, :], fc[E:E + 1, :]
        w2r, b2f = fc[E + 1:E + 2, :], fc[E + 2:E + 3, 0:1]
        hfc = jnp.maximum(jnp.dot(cls, w1f, preferred_element_type=f32) + b1f, 0.0)
        pred = jnp.sum(hfc * w2r, axis=-1, keepdims=True) + b2f               # (BS, 1)

        # lane-dense padded output tile (single unmasked store); wrapper slices [:BS, 0]
        out_tile = jnp.concatenate([pred, jnp.zeros((BS, 127), f32)], axis=1)
        if OUT_ROWS > BS:
            out_tile = jnp.concatenate(
                [out_tile, jnp.zeros((OUT_ROWS - BS, 128), f32)], axis=0)
        out_ref[...] = out_tile

    return kernel, OUT_ROWS


# ------------------------------ parameters -----------------------------------
def init_params(key, a):
    E = a.hidden_dims[0]
    keys = iter(jax.random.split(key, 64))

    def nrm(shape, scale=0.1):
        return (scale * jax.random.normal(next(keys), shape)).astype(jnp.float32)

    n_time_emb = (a.T - 1) // a.dT + 1
    params = {
        "init_embedding": nrm((n_time_emb, E)),
        "obstacle_embedding": nrm((1, E)),
        "location_embedding": nrm((G_SIZE, E)),
        "sub_attn_embedding": nrm((1, E)),
        "svm_bias": jnp.zeros((), jnp.float32),      # pairwise_svm bias (loss-only)
        "label_shift": jnp.zeros((), jnp.float32),   # buffer (train_data=None)
    }

    def layer_params(F):
        return dict(
            wqkv=nrm((E, 3 * E)), bqkv=jnp.zeros((1, 3 * E), jnp.float32),
            wo=nrm((E, E)), bo=jnp.zeros((1, E), jnp.float32),
            g1=jnp.ones((1, E), jnp.float32), beta1=jnp.zeros((1, E), jnp.float32),
            w1=nrm((E, F)), bb1=nrm((1, F), 0.01),
            w2=nrm((F, E)), bb2=nrm((1, E), 0.01),
            g2=jnp.ones((1, E), jnp.float32), beta2=jnp.zeros((1, E), jnp.float32),
        )

    params["path_layer"] = layer_params(a.ff_factor * E)
    params["sub_layers"] = [layer_params(a.ff_factor_sub * E)
                            for _ in range(a.num_subset_attention_layers)]
    od = [E] + a.out_dims  # [32, 16]
    params["out_fc"] = dict(
        w1=nrm((od[0], od[1])), b1=jnp.zeros((1, od[1]), jnp.float32),
        w2=nrm((od[1], 1)), b2=jnp.zeros((1, 1), jnp.float32))
    return params


# ------------------------------ forward pass ----------------------------------
def forward(params, init_lengths, init_locations, subagents, a):
    """MultiSubsetNetwork.forward (eval mode). loss=='pairwise_svm' and no 'final'
    cost supplied -> Network.out() returns the raw preds."""
    assert not a.use_3d_convolution and a.use_path_attention
    assert len(a.hidden_dims) == 2 and "shortest" not in a.features
    assert a.ff_factor == a.ff_factor_sub and a.prepool == 1

    E = a.hidden_dims[0]
    T_ = a.T // a.dT
    B, A = init_lengths.shape
    _, S, SA = subagents.shape
    BA, BAT = B * A, B * A * T_
    BS, LS = B * S, 1 + SA
    BGT = B * G_SIZE * T_
    F = a.ff_factor * E
    VW = max(3 * E, F)
    OD = a.out_dims[0]
    f32, i32 = jnp.float32, jnp.int32

    # ---- index / mask construction (elementwise only; scatter & gather run in-kernel) ----
    times_ = jnp.arange(T_, dtype=i32).reshape(1, 1, T_)
    batch_ = jnp.arange(B, dtype=i32).reshape(B, 1, 1)
    mask_ = times_ < init_lengths[..., None]                                  # (B, A, T_)
    idxs_ = (batch_ * G_SIZE + init_locations.astype(i32)) * T_ + times_
    idxs_ = jnp.where(mask_, idxs_, 0).astype(i32)
    idxs_row = idxs_.reshape(1, BAT)
    idxs_col = idxs_.reshape(BAT, 1)
    maskf = mask_.reshape(BA, T_).astype(f32)
    mask_col = mask_.reshape(BAT, 1).astype(f32)

    # subset gather selectors: slot 0 of each subset sequence is the CLS token (-1 => no gather)
    agent_rows = (batch_ * A + subagents.astype(i32)) * T_                    # (B, S, SA)
    seqsel = jnp.concatenate(
        [jnp.full((B, S, 1), -1, i32), agent_rows], axis=2).reshape(BS * LS, 1)
    tokmask = jnp.concatenate(
        [jnp.ones((B, S, 1), f32), jnp.zeros((B, S, SA), f32)], axis=2).reshape(BS * LS, 1)

    # ---- per-grid-row obstacle-overwrite keep mask + (location [+ obstacle]) bias ----
    obst_ind_np = np.zeros((G_SIZE, 1), np.float32)
    obst_ind_np[np.asarray(a.obstacles)] = 1.0
    obst_ind = jnp.asarray(obst_ind_np)                                       # (G, 1)
    bias_g = params["location_embedding"] + obst_ind * params["obstacle_embedding"]
    keep_g = 1.0 - obst_ind
    gbias = jnp.broadcast_to(bias_g[None, :, None, :], (B, G_SIZE, T_, E)).reshape(BGT, E)
    gkeep = jnp.broadcast_to(keep_g[None, :, None, :], (B, G_SIZE, T_, 1)).reshape(BGT, 1)

    # ---- packed parameters: a few consolidated VMEM streams instead of ~40 tiny ones ----
    emb_pad = (-(T_ + 1)) % 8
    emb_pack = jnp.concatenate(
        [params["init_embedding"][:T_], params["sub_attn_embedding"],
         jnp.zeros((emb_pad, E), f32)], axis=0)                               # (T_+1+pad, E)

    layers = [params["path_layer"]] + list(params["sub_layers"])
    wqkv_all = jnp.stack([lp["wqkv"] for lp in layers])                       # (L, E, 3E)
    wo_all = jnp.stack([lp["wo"] for lp in layers])                           # (L, E, E)
    w1_all = jnp.stack([lp["w1"] for lp in layers])                           # (L, E, F)
    w2_all = jnp.stack([lp["w2"] for lp in layers])                           # (L, F, E)

    def pad_row(v):
        return jnp.pad(v, ((0, 0), (0, VW - v.shape[1])))

    vec_all = jnp.stack([
        jnp.concatenate([pad_row(lp[k]) for k in
                         ("bqkv", "bo", "g1", "beta1", "bb1", "bb2", "g2", "beta2")],
                        axis=0)
        for lp in layers])                                                    # (L, 8, VW)

    ofc = params["out_fc"]
    fc_pad = (-(E + 3)) % 8
    fc_pack = jnp.concatenate(
        [ofc["w1"], ofc["b1"], ofc["w2"].T,
         jnp.pad(ofc["b2"], ((0, 0), (0, OD - 1))),
         jnp.zeros((fc_pad, OD), f32)], axis=0)                               # (E+3+pad, OD)

    kernel, out_rows = make_fused_kernel(a, B, A, S, SA)
    out = pl.pallas_call(
        kernel,
        out_shape=jax.ShapeDtypeStruct((out_rows, 128), f32),
    )(idxs_row, idxs_col, mask_col, maskf, seqsel, tokmask,
      gbias, gkeep, emb_pack,
      wqkv_all, wo_all, w1_all, w2_all, vec_all, fc_pack)

    preds = out[0:BS, 0].reshape(B, S)
    # Network.out(): loss == 'pairwise_svm' and costs has no 'final' -> preds only.
    # TODO(synk): pairwise_svm hinge loss / mse label-shift path not computed (inference only).
    return preds


# --------------------------------- main ---------------------------------------
if __name__ == "__main__":
    key = jax.random.PRNGKey(0)
    kp, k1, k2, k3 = jax.random.split(key, 4)
    params = init_params(kp, A_CFG)

    B, A, S = 2, 3, 2
    T_ = A_CFG.T // A_CFG.dT
    init_lengths = jax.random.randint(k1, (B, A), 1, T_ + 1, dtype=jnp.int32)        # (2, 3)
    init_locations = jax.random.randint(k2, (B, A, T_), 0, G_SIZE, dtype=jnp.int32)  # (2, 3, 8)
    subagents = jax.random.randint(k3, (B, S, A_CFG.num_subset_agents), 0, A,
                                   dtype=jnp.int32)                                  # (2, 2, 2)

    fwd = jax.jit(lambda p, le, lo, su: forward(p, le, lo, su, A_CFG))
    preds = fwd(params, init_lengths, init_locations, subagents)
    preds = jax.block_until_ready(preds)
    assert preds.shape == (B, S) and preds.dtype == jnp.float32
    print("KERNEL_OK")
</pallas_src>

<mosaic_0001>
module attributes {stable_mosaic.version = 11 : i64} {
  func.func @kernel(%arg0: memref<1x48xi32, #tpu.memory_space<vmem>>, %arg1: memref<48x1xi32, #tpu.memory_space<vmem>>, %arg2: memref<48x1xf32, #tpu.memory_space<vmem>>, %arg3: memref<6x8xf32, #tpu.memory_space<vmem>>, %arg4: memref<12x1xi32, #tpu.memory_space<vmem>>, %arg5: memref<12x1xf32, #tpu.memory_space<vmem>>, %arg6: memref<256x32xf32, #tpu.memory_space<vmem>>, %arg7: memref<256x1xf32, #tpu.memory_space<vmem>>, %arg8: memref<16x32xf32, #tpu.memory_space<vmem>>, %arg9: memref<3x32x96xf32, #tpu.memory_space<vmem>>, %arg10: memref<3x32x32xf32, #tpu.memory_space<vmem>>, %arg11: memref<3x32x64xf32, #tpu.memory_space<vmem>>, %arg12: memref<3x64x32xf32, #tpu.memory_space<vmem>>, %arg13: memref<3x8x96xf32, #tpu.memory_space<vmem>>, %arg14: memref<40x16xf32, #tpu.memory_space<vmem>>, %arg15: memref<8x128xf32, #tpu.memory_space<vmem>>) attributes {dimension_semantics = [], scalar_prefetch = 0 : i64, scratch_operands = 0 : i64, tpu.core_type = #tpu.core_type<tc>} {
    %c0 = arith.constant 0 : index
    %c0_0 = arith.constant 0 : index
    %0 = vector.load %arg8[%c0, %c0_0] : memref<16x32xf32, #tpu.memory_space<vmem>>, vector<8x32xf32>
    %1 = tpu.concatenate %0, %0, %0, %0, %0, %0 in 0 : vector<8x32xf32>, vector<8x32xf32>, vector<8x32xf32>, vector<8x32xf32>, vector<8x32xf32>, vector<8x32xf32> -> vector<48x32xf32>
    %c0_1 = arith.constant 0 : index
    %c0_2 = arith.constant 0 : index
    %2 = vector.load %arg2[%c0_1, %c0_2] : memref<48x1xf32, #tpu.memory_space<vmem>>, vector<48x1xf32>
    %3 = vector.broadcast %2 : vector<48x1xf32> to vector<48x32xf32>
    %4 = arith.mulf %1, %3 : vector<48x32xf32>
    %5 = tpu.iota {dimensions = array<i32: 0>} : vector<256x48xi32>
    %c0_3 = arith.constant 0 : index
    %c0_4 = arith.constant 0 : index
    %6 = vector.load %arg0[%c0_3, %c0_4] : memref<1x48xi32, #tpu.memory_space<vmem>>, vector<1x48xi32>
    %7 = vector.broadcast %6 : vector<1x48xi32> to vector<256x48xi32>
    %8 = arith.cmpi eq, %7, %5 : vector<256x48xi32>
    %9 = arith.extui %8 : vector<256x48xi1> to vector<256x48xi32>
    %10 = arith.sitofp %9 : vector<256x48xi32> to vector<256x48xf32>
    %cst = arith.constant dense<0.000000e+00> : vector<256x32xf32>
    %11 = tpu.matmul %10, %4, %cst {dimension_numbers = #tpu.dot_dimension_numbers<[1], [0], [0], [1], [0, 0, 1, 1], [], []>} : vector<256x48xf32>, vector<48x32xf32>, vector<256x32xf32> -> vector<256x32xf32>
    %c0_5 = arith.constant 0 : index
    %c0_6 = arith.constant 0 : index
    %12 = vector.load %arg7[%c0_5, %c0_6] : memref<256x1xf32, #tpu.memory_space<vmem>>, vector<256x1xf32>
    %13 = vector.broadcast %12 : vector<256x1xf32> to vector<256x32xf32>
    %14 = arith.mulf %11, %13 : vector<256x32xf32>
    %c0_7 = arith.constant 0 : index
    %c0_8 = arith.constant 0 : index
    %15 = vector.load %arg6[%c0_7, %c0_8] : memref<256x32xf32, #tpu.memory_space<vmem>>, vector<256x32xf32>
    %16 = arith.addf %14, %15 : vector<256x32xf32>
    %17 = tpu.iota {dimensions = array<i32: 1>} : vector<48x256xi32>
    %c0_9 = arith.constant 0 : index
    %c0_10 = arith.constant 0 : index
    %18 = vector.load %arg1[%c0_9, %c0_10] : memref<48x1xi32, #tpu.memory_space<vmem>>, vector<48x1xi32>
    %19 = vector.broadcast %18 : vector<48x1xi32> to vector<48x256xi32>
    %20 = arith.cmpi eq, %19, %17 : vector<48x256xi32>
    %21 = arith.extui %20 : vector<48x256xi1> to vector<48x256xi32>
    %22 = arith.sitofp %21 : vector<48x256xi32> to vector<48x256xf32>
    %cst_11 = arith.constant dense<0.000000e+00> : vector<48x32xf32>
    %23 = tpu.matmul %22, %16, %cst_11 {dimension_numbers = #tpu.dot_dimension_numbers<[1], [0], [0], [1], [0, 0, 1, 1], [], []>} : vector<48x256xf32>, vector<256x32xf32>, vector<48x32xf32> -> vector<48x32xf32>
    %c0_12 = arith.constant 0 : index
    %c0_13 = arith.constant 0 : index
    %24 = vector.load %arg3[%c0_12, %c0_13] : memref<6x8xf32, #tpu.memory_space<vmem>>, vector<6x8xf32>
    %cst_14 = arith.constant 1.000000e+00 : f32
    %25 = vector.broadcast %cst_14 : f32 to vector<6x8xf32>
    %26 = arith.subf %24, %25 : vector<6x8xf32>
    %cst_15 = arith.constant 1.000000e+30 : f32
    %27 = vector.broadcast %cst_15 : f32 to vector<6x8xf32>
    %28 = arith.mulf %26, %27 : vector<6x8xf32>
    %29 = vector.shape_cast %28 : vector<6x8xf32> to vector<6x1x8xf32>
    %30 = tpu.concatenate %29, %29, %29, %29 in 0 : vector<6x1x8xf32>, vector<6x1x8xf32>, vector<6x1x8xf32>, vector<6x1x8xf32> -> vector<24x1x8xf32>
    %c0_16 = arith.constant 0 : index
    %c0_17 = arith.constant 0 : index
    %c0_18 = arith.constant 0 : index
    %31 = vector.load %arg9[%c0_16, %c0_17, %c0_18] : memref<3x32x96xf32, #tpu.memory_space<vmem>>, vector<1x32x96xf32>
    %32 = vector.shape_cast %31 : vector<1x32x96xf32> to vector<32x96xf32>
    %c0_19 = arith.constant 0 : index
    %c0_20 = arith.constant 0 : index
    %c0_21 = arith.constant 0 : index
    %33 = vector.load %arg10[%c0_19, %c0_20, %c0_21] : memref<3x32x32xf32, #tpu.memory_space<vmem>>, vector<1x32x32xf32>
    %34 = vector.shape_cast %33 : vector<1x32x32xf32> to vector<32x32xf32>
    %c0_22 = arith.constant 0 : index
    %c0_23 = arith.constant 0 : index
    %c0_24 = arith.constant 0 : index
    %35 = vector.load %arg11[%c0_22, %c0_23, %c0_24] : memref<3x32x64xf32, #tpu.memory_space<vmem>>, vector<1x32x64xf32>
    %36 = vector.shape_cast %35 : vector<1x32x64xf32> to vector<32x64xf32>
    %c0_25 = arith.constant 0 : index
    %c0_26 = arith.constant 0 : index
    %c0_27 = arith.constant 0 : index
    %37 = vector.load %arg12[%c0_25, %c0_26, %c0_27] : memref<3x64x32xf32, #tpu.memory_space<vmem>>, vector<1x64x32xf32>
    %38 = vector.shape_cast %37 : vector<1x64x32xf32> to vector<64x32xf32>
    %c0_28 = arith.constant 0 : index
    %c0_29 = arith.constant 0 : index
    %c0_30 = arith.constant 0 : index
    %39 = vector.load %arg13[%c0_28, %c0_29, %c0_30] : memref<3x8x96xf32, #tpu.memory_space<vmem>>, vector<1x8x96xf32>
    %40 = vector.shape_cast %39 : vector<1x8x96xf32> to vector<8x96xf32>
    %41 = vector.extract_strided_slice %40 {offsets = [0, 0], sizes = [1, 96], strides = [1, 1]} : vector<8x96xf32> to vector<1x96xf32>
    %42 = vector.extract_strided_slice %40 {offsets = [1, 0], sizes = [1, 32], strides = [1, 1]} : vector<8x96xf32> to vector<1x32xf32>
    %43 = vector.extract_strided_slice %40 {offsets = [2, 0], sizes = [1, 32], strides = [1, 1]} : vector<8x96xf32> to vector<1x32xf32>
    %44 = vector.extract_strided_slice %40 {offsets = [3, 0], sizes = [1, 32], strides = [1, 1]} : vector<8x96xf32> to vector<1x32xf32>
    %45 = vector.extract_strided_slice %40 {offsets = [4, 0], sizes = [1, 64], strides = [1, 1]} : vector<8x96xf32> to vector<1x64xf32>
    %46 = vector.extract_strided_slice %40 {offsets = [5, 0], sizes = [1, 32], strides = [1, 1]} : vector<8x96xf32> to vector<1x32xf32>
    %47 = vector.extract_strided_slice %40 {offsets = [6, 0], sizes = [1, 32], strides = [1, 1]} : vector<8x96xf32> to vector<1x32xf32>
    %48 = vector.extract_strided_slice %40 {offsets = [7, 0], sizes = [1, 32], strides = [1, 1]} : vector<8x96xf32> to vector<1x32xf32>
    %cst_31 = arith.constant dense<0.000000e+00> : vector<48x96xf32>
    %49 = tpu.matmul %23, %32, %cst_31 {dimension_numbers = #tpu.dot_dimension_numbers<[1], [0], [0], [1], [0, 0, 1, 1], [], []>} : vector<48x32xf32>, vector<32x96xf32>, vector<48x96xf32> -> vector<48x96xf32>
    %50 = vector.broadcast %41 : vector<1x96xf32> to vector<48x96xf32>
    %51 = arith.addf %49, %50 : vector<48x96xf32>
    %52 = vector.extract_strided_slice %51 {offsets = [0, 0], sizes = [48, 32], strides = [1, 1]} : vector<48x96xf32> to vector<48x32xf32>
    %53 = vector.extract_strided_slice %52 {offsets = [0, 0], sizes = [48, 8], strides = [1, 1]} : vector<48x32xf32> to vector<48x8xf32>
    %54 = vector.shape_cast %53 : vector<48x8xf32> to vector<6x8x8xf32>
    %55 = vector.extract_strided_slice %52 {offsets = [0, 8], sizes = [48, 8], strides = [1, 1]} : vector<48x32xf32> to vector<48x8xf32>
    %56 = vector.shape_cast %55 : vector<48x8xf32> to vector<6x8x8xf32>
    %57 = vector.extract_strided_slice %52 {offsets = [0, 16], sizes = [48, 8], strides = [1, 1]} : vector<48x32xf32> to vector<48x8xf32>
    %58 = vector.shape_cast %57 : vector<48x8xf32> to vector<6x8x8xf32>
    %59 = vector.extract_strided_slice %52 {offsets = [0, 24], sizes = [48, 8], strides = [1, 1]} : vector<48x32xf32> to vector<48x8xf32>
    %60 = vector.shape_cast %59 : vector<48x8xf32> to vector<6x8x8xf32>
    %61 = tpu.concatenate %54, %56, %58, %60 in 0 : vector<6x8x8xf32>, vector<6x8x8xf32>, vector<6x8x8xf32>, vector<6x8x8xf32> -> vector<24x8x8xf32>
    %62 = vector.extract_strided_slice %51 {offsets = [0, 32], sizes = [48, 32], strides = [1, 1]} : vector<48x96xf32> to vector<48x32xf32>
    %63 = vector.extract_strided_slice %62 {offsets = [0, 0], sizes = [48, 8], strides = [1, 1]} : vector<48x32xf32> to vector<48x8xf32>
    %64 = vector.shape_cast %63 : vector<48x8xf32> to vector<6x8x8xf32>
    %65 = vector.extract_strided_slice %62 {offsets = [0, 8], sizes = [48, 8], strides = [1, 1]} : vector<48x32xf32> to vector<48x8xf32>
    %66 = vector.shape_cast %65 : vector<48x8xf32> to vector<6x8x8xf32>
    %67 = vector.extract_strided_slice %62 {offsets = [0, 16], sizes = [48, 8], strides = [1, 1]} : vector<48x32xf32> to vector<48x8xf32>
    %68 = vector.shape_cast %67 : vector<48x8xf32> to vector<6x8x8xf32>
    %69 = vector.extract_strided_slice %62 {offsets = [0, 24], sizes = [48, 8], strides = [1, 1]} : vector<48x32xf32> to vector<48x8xf32>
    %70 = vector.shape_cast %69 : vector<48x8xf32> to vector<6x8x8xf32>
    %71 = tpu.concatenate %64, %66, %68, %70 in 0 : vector<6x8x8xf32>, vector<6x8x8xf32>, vector<6x8x8xf32>, vector<6x8x8xf32> -> vector<24x8x8xf32>
    %72 = vector.extract_strided_slice %51 {offsets = [0, 64], sizes = [48, 32], strides = [1, 1]} : vector<48x96xf32> to vector<48x32xf32>
    %73 = vector.extract_strided_slice %72 {offsets = [0, 0], sizes = [48, 8], strides = [1, 1]} : vector<48x32xf32> to vector<48x8xf32>
    %74 = vector.shape_cast %73 : vector<48x8xf32> to vector<6x8x8xf32>
    %75 = vector.extract_strided_slice %72 {offsets = [0, 8], sizes = [48, 8], strides = [1, 1]} : vector<48x32xf32> to vector<48x8xf32>
    %76 = vector.shape_cast %75 : vector<48x8xf32> to vector<6x8x8xf32>
    %77 = vector.extract_strided_slice %72 {offsets = [0, 16], sizes = [48, 8], strides = [1, 1]} : vector<48x32xf32> to vector<48x8xf32>
    %78 = vector.shape_cast %77 : vector<48x8xf32> to vector<6x8x8xf32>
    %79 = vector.extract_strided_slice %72 {offsets = [0, 24], sizes = [48, 8], strides = [1, 1]} : vector<48x32xf32> to vector<48x8xf32>
    %80 = vector.shape_cast %79 : vector<48x8xf32> to vector<6x8x8xf32>
    %81 = tpu.concatenate %74, %76, %78, %80 in 0 : vector<6x8x8xf32>, vector<6x8x8xf32>, vector<6x8x8xf32>, vector<6x8x8xf32> -> vector<24x8x8xf32>
    "tpu.trace_start"() <{level = 10 : i32, message = "bqd,bkd->bqk"}> : () -> ()
    %cst_32 = arith.constant dense<0.000000e+00> : vector<24x8x8xf32>
    %82 = tpu.matmul %61, %71, %cst_32 {dimension_numbers = #tpu.dot_dimension_numbers<[2], [2], [1], [1], [0, 0, 0, 1, 1, 1], [0], [0]>} : vector<24x8x8xf32>, vector<24x8x8xf32>, vector<24x8x8xf32> -> vector<24x8x8xf32>
    "tpu.trace_stop"() : () -> ()
    %cst_33 = arith.constant 0.353553385 : f32
    %83 = vector.broadcast %cst_33 : f32 to vector<24x8x8xf32>
    %84 = arith.mulf %82, %83 : vector<24x8x8xf32>
    %85 = vector.broadcast %30 : vector<24x1x8xf32> to vector<24x8x8xf32>
    %86 = arith.addf %84, %85 : vector<24x8x8xf32>
    %cst_34 = arith.constant dense<0xFF800000> : vector<24x8xf32>
    %87 = vector.multi_reduction <maximumf>, %86, %cst_34 [2] : vector<24x8x8xf32> to vector<24x8xf32>
    %88 = vector.shape_cast %87 : vector<24x8xf32> to vector<24x8x1xf32>
    %89 = vector.broadcast %88 : vector<24x8x1xf32> to vector<24x8x8xf32>
    %90 = arith.subf %86, %89 : vector<24x8x8xf32>
    %91 = math.exp %90 : vector<24x8x8xf32>
    %cst_35 = arith.constant dense<0.000000e+00> : vector<24x8xf32>
    %92 = vector.multi_reduction <add>, %91, %cst_35 [2] : vector<24x8x8xf32> to vector<24x8xf32>
    %93 = vector.shape_cast %92 : vector<24x8xf32> to vector<24x8x1xf32>
    %94 = tpu.reciprocal %93 {approx = true} : vector<24x8x1xf32> -> vector<24x8x1xf32>
    %95 = vector.broadcast %94 : vector<24x8x1xf32> to vector<24x8x8xf32>
    %96 = arith.mulf %91, %95 : vector<24x8x8xf32>
    "tpu.trace_start"() <{level = 10 : i32, message = "bqk,bkd->bqd"}> : () -> ()
    %cst_36 = arith.constant dense<0.000000e+00> : vector<24x8x8xf32>
    %97 = tpu.matmul %96, %81, %cst_36 {dimension_numbers = #tpu.dot_dimension_numbers<[2], [1], [1], [2], [0, 0, 0, 1, 1, 2], [0], [0]>} : vector<24x8x8xf32>, vector<24x8x8xf32>, vector<24x8x8xf32> -> vector<24x8x8xf32>
    "tpu.trace_stop"() : () -> ()
    %98 = vector.extract_strided_slice %97 {offsets = [0, 0, 0], sizes = [6, 8, 8], strides = [1, 1, 1]} : vector<24x8x8xf32> to vector<6x8x8xf32>
    %99 = vector.shape_cast %98 : vector<6x8x8xf32> to vector<48x8xf32>
    %100 = vector.extract_strided_slice %34 {offsets = [0, 0], sizes = [8, 32], strides = [1, 1]} : vector<32x32xf32> to vector<8x32xf32>
    %cst_37 = arith.constant dense<0.000000e+00> : vector<48x32xf32>
    %101 = tpu.matmul %99, %100, %cst_37 {dimension_numbers = #tpu.dot_dimension_numbers<[1], [0], [0], [1], [0, 0, 1, 1], [], []>} : vector<48x8xf32>, vector<8x32xf32>, vector<48x32xf32> -> vector<48x32xf32>
    %102 = vector.broadcast %42 : vector<1x32xf32> to vector<48x32xf32>
    %103 = arith.addf %102, %101 : vector<48x32xf32>
    %104 = vector.extract_strided_slice %97 {offsets = [6, 0, 0], sizes = [6, 8, 8], strides = [1, 1, 1]} : vector<24x8x8xf32> to vector<6x8x8xf32>
    %105 = vector.shape_cast %104 : vector<6x8x8xf32> to vector<48x8xf32>
    %106 = vector.extract_strided_slice %34 {offsets = [8, 0], sizes = [8, 32], strides = [1, 1]} : vector<32x32xf32> to vector<8x32xf32>
    %cst_38 = arith.constant dense<0.000000e+00> : vector<48x32xf32>
    %107 = tpu.matmul %105, %106, %cst_38 {dimension_numbers = #tpu.dot_dimension_numbers<[1], [0], [0], [1], [0, 0, 1, 1], [], []>} : vector<48x8xf32>, vector<8x32xf32>, vector<48x32xf32> -> vector<48x32xf32>
    %108 = arith.addf %103, %107 : vector<48x32xf32>
    %109 = vector.extract_strided_slice %97 {offsets = [12, 0, 0], sizes = [6, 8, 8], strides = [1, 1, 1]} : vector<24x8x8xf32> to vector<6x8x8xf32>
    %110 = vector.shape_cast %109 : vector<6x8x8xf32> to vector<48x8xf32>
    %111 = vector.extract_strided_slice %34 {offsets = [16, 0], sizes = [8, 32], strides = [1, 1]} : vector<32x32xf32> to vector<8x32xf32>
    %cst_39 = arith.constant dense<0.000000e+00> : vector<48x32xf32>
    %112 = tpu.matmul %110, %111, %cst_39 {dimension_numbers = #tpu.dot_dimension_numbers<[1], [0], [0], [1], [0, 0, 1, 1], [], []>} : vector<48x8xf32>, vector<8x32xf32>, vector<48x32xf32> -> vector<48x32xf32>
    %113 = arith.addf %108, %112 : vector<48x32xf32>
    %114 = vector.extract_strided_slice %97 {offsets = [18, 0, 0], sizes = [6, 8, 8], strides = [1, 1, 1]} : vector<24x8x8xf32> to vector<6x8x8xf32>
    %115 = vector.shape_cast %114 : vector<6x8x8xf32> to vector<48x8xf32>
    %116 = vector.extract_strided_slice %34 {offsets = [24, 0], sizes = [8, 32], strides = [1, 1]} : vector<32x32xf32> to vector<8x32xf32>
    %cst_40 = arith.constant dense<0.000000e+00> : vector<48x32xf32>
    %117 = tpu.matmul %115, %116, %cst_40 {dimension_numbers = #tpu.dot_dimension_numbers<[1], [0], [0], [1], [0, 0, 1, 1], [], []>} : vector<48x8xf32>, vector<8x32xf32>, vector<48x32xf32> -> vector<48x32xf32>
    %118 = arith.addf %113, %117 : vector<48x32xf32>
    %119 = arith.addf %23, %118 : vector<48x32xf32>
    %cst_41 = arith.constant dense<0.000000e+00> : vector<48xf32>
    %120 = vector.multi_reduction <add>, %119, %cst_41 [1] : vector<48x32xf32> to vector<48xf32>
    %121 = vector.shape_cast %120 : vector<48xf32> to vector<48x1xf32>
    %cst_42 = arith.constant 3.200000e+01 : f32
    %122 = vector.broadcast %cst_42 : f32 to vector<48x1xf32>
    %123 = arith.divf %121, %122 : vector<48x1xf32>
    %124 = vector.broadcast %123 : vector<48x1xf32> to vector<48x32xf32>
    %125 = arith.subf %119, %124 : vector<48x32xf32>
    %126 = arith.mulf %125, %125 : vector<48x32xf32>
    %cst_43 = arith.constant dense<0.000000e+00> : vector<48xf32>
    %127 = vector.multi_reduction <add>, %126, %cst_43 [1] : vector<48x32xf32> to vector<48xf32>
    %128 = vector.shape_cast %127 : vector<48xf32> to vector<48x1xf32>
    %cst_44 = arith.constant 3.200000e+01 : f32
    %129 = vector.broadcast %cst_44 : f32 to vector<48x1xf32>
    %130 = arith.divf %128, %129 : vector<48x1xf32>
    %131 = vector.broadcast %123 : vector<48x1xf32> to vector<48x32xf32>
    %132 = arith.subf %119, %131 : vector<48x32xf32>
    %cst_45 = arith.constant 9.99999974E-6 : f32
    %133 = vector.broadcast %cst_45 : f32 to vector<48x1xf32>
    %134 = arith.addf %130, %133 : vector<48x1xf32>
    %135 = math.rsqrt %134 : vector<48x1xf32>
    %136 = vector.broadcast %135 : vector<48x1xf32> to vector<48x32xf32>
    %137 = arith.mulf %132, %136 : vector<48x32xf32>
    %138 = vector.broadcast %43 : vector<1x32xf32> to vector<48x32xf32>
    %139 = arith.mulf %137, %138 : vector<48x32xf32>
    %140 = vector.broadcast %44 : vector<1x32xf32> to vector<48x32xf32>
    %141 = arith.addf %139, %140 : vector<48x32xf32>
    %cst_46 = arith.constant dense<0.000000e+00> : vector<48x64xf32>
    %142 = tpu.matmul %141, %36, %cst_46 {dimension_numbers = #tpu.dot_dimension_numbers<[1], [0], [0], [1], [0, 0, 1, 1], [], []>} : vector<48x32xf32>, vector<32x64xf32>, vector<48x64xf32> -> vector<48x64xf32>
    %143 = vector.broadcast %45 : vector<1x64xf32> to vector<48x64xf32>
    %144 = arith.addf %142, %143 : vector<48x64xf32>
    %cst_47 = arith.constant 0.000000e+00 : f32
    %145 = vector.broadcast %cst_47 : f32 to vector<48x64xf32>
    %146 = arith.maximumf %144, %145 : vector<48x64xf32>
    %cst_48 = arith.constant dense<0.000000e+00> : vector<48x32xf32>
    %147 = tpu.matmul %146, %38, %cst_48 {dimension_numbers = #tpu.dot_dimension_numbers<[1], [0], [0], [1], [0, 0, 1, 1], [], []>} : vector<48x64xf32>, vector<64x32xf32>, vector<48x32xf32> -> vector<48x32xf32>
    %148 = arith.addf %141, %147 : vector<48x32xf32>
    %149 = vector.broadcast %46 : vector<1x32xf32> to vector<48x32xf32>
    %150 = arith.addf %148, %149 : vector<48x32xf32>
    %cst_49 = arith.constant dense<0.000000e+00> : vector<48xf32>
    %151 = vector.multi_reduction <add>, %150, %cst_49 [1] : vector<48x32xf32> to vector<48xf32>
    %152 = vector.shape_cast %151 : vector<48xf32> to vector<48x1xf32>
    %cst_50 = arith.constant 3.200000e+01 : f32
    %153 = vector.broadcast %cst_50 : f32 to vector<48x1xf32>
    %154 = arith.divf %152, %153 : vector<48x1xf32>
    %155 = vector.broadcast %154 : vector<48x1xf32> to vector<48x32xf32>
    %156 = arith.subf %150, %155 : vector<48x32xf32>
    %157 = arith.mulf %156, %156 : vector<48x32xf32>
    %cst_51 = arith.constant dense<0.000000e+00> : vector<48xf32>
    %158 = vector.multi_reduction <add>, %157, %cst_51 [1] : vector<48x32xf32> to vector<48xf32>
    %159 = vector.shape_cast %158 : vector<48xf32> to vector<48x1xf32>
    %cst_52 = arith.constant 3.200000e+01 : f32
    %160 = vector.broadcast %cst_52 : f32 to vector<48x1xf32>
    %161 = arith.divf %159, %160 : vector<48x1xf32>
    %162 = vector.broadcast %154 : vector<48x1xf32> to vector<48x32xf32>
    %163 = arith.subf %150, %162 : vector<48x32xf32>
    %cst_53 = arith.constant 9.99999974E-6 : f32
    %164 = vector.broadcast %cst_53 : f32 to vector<48x1xf32>
    %165 = arith.addf %161, %164 : vector<48x1xf32>
    %166 = math.rsqrt %165 : vector<48x1xf32>
    %167 = vector.broadcast %166 : vector<48x1xf32> to vector<48x32xf32>
    %168 = arith.mulf %163, %167 : vector<48x32xf32>
    %169 = vector.broadcast %47 : vector<1x32xf32> to vector<48x32xf32>
    %170 = arith.mulf %168, %169 : vector<48x32xf32>
    %171 = vector.broadcast %48 : vector<1x32xf32> to vector<48x32xf32>
    %172 = arith.addf %170, %171 : vector<48x32xf32>
    %173 = tpu.iota {dimensions = array<i32: 1>} : vector<12x48xi32>
    %c0_54 = arith.constant 0 : index
    %c0_55 = arith.constant 0 : index
    %174 = vector.load %arg4[%c0_54, %c0_55] : memref<12x1xi32, #tpu.memory_space<vmem>>, vector<12x1xi32>
    %175 = vector.broadcast %174 : vector<12x1xi32> to vector<12x48xi32>
    %176 = arith.cmpi eq, %175, %173 : vector<12x48xi32>
    %177 = arith.extui %176 : vector<12x48xi1> to vector<12x48xi32>
    %178 = arith.sitofp %177 : vector<12x48xi32> to vector<12x48xf32>
    %c8 = arith.constant 8 : index
    %c0_56 = arith.constant 0 : index
    %179 = vector.load %arg8[%c8, %c0_56] : memref<16x32xf32, #tpu.memory_space<vmem>>, vector<1x32xf32>
    %cst_57 = arith.constant dense<0.000000e+00> : vector<12x32xf32>
    %180 = tpu.matmul %178, %172, %cst_57 {dimension_numbers = #tpu.dot_dimension_numbers<[1], [0], [0], [1], [0, 0, 1, 1], [], []>} : vector<12x48xf32>, vector<48x32xf32>, vector<12x32xf32> -> vector<12x32xf32>
    %c0_58 = arith.constant 0 : index
    %c0_59 = arith.constant 0 : index
    %181 = vector.load %arg5[%c0_58, %c0_59] : memref<12x1xf32, #tpu.memory_space<vmem>>, vector<12x1xf32>
    %182 = vector.broadcast %181 : vector<12x1xf32> to vector<12x32xf32>
    %183 = vector.broadcast %179 : vector<1x32xf32> to vector<12x32xf32>
    %184 = arith.mulf %182, %183 : vector<12x32xf32>
    %185 = arith.addf %180, %184 : vector<12x32xf32>
    %c1 = arith.constant 1 : index
    %c0_60 = arith.constant 0 : index
    %c0_61 = arith.constant 0 : index
    %186 = vector.load %arg9[%c1, %c0_60, %c0_61] : memref<3x32x96xf32, #tpu.memory_space<vmem>>, vector<1x32x96xf32>
    %187 = vector.shape_cast %186 : vector<1x32x96xf32> to vector<32x96xf32>
    %c1_62 = arith.constant 1 : index
    %c0_63 = arith.constant 0 : index
    %c0_64 = arith.constant 0 : index
    %188 = vector.load %arg10[%c1_62, %c0_63, %c0_64] : memref<3x32x32xf32, #tpu.memory_space<vmem>>, vector<1x32x32xf32>
    %189 = vector.shape_cast %188 : vector<1x32x32xf32> to vector<32x32xf32>
    %c1_65 = arith.constant 1 : index
    %c0_66 = arith.constant 0 : index
    %c0_67 = arith.constant 0 : index
    %190 = vector.load %arg11[%c1_65, %c0_66, %c0_67] : memref<3x32x64xf32, #tpu.memory_space<vmem>>, vector<1x32x64xf32>
    %191 = vector.shape_cast %190 : vector<1x32x64xf32> to vector<32x64xf32>
    %c1_68 = arith.constant 1 : index
    %c0_69 = arith.constant 0 : index
    %c0_70 = arith.constant 0 : index
    %192 = vector.load %arg12[%c1_68, %c0_69, %c0_70] : memref<3x64x32xf32, #tpu.memory_space<vmem>>, vector<1x64x32xf32>
    %193 = vector.shape_cast %192 : vector<1x64x32xf32> to vector<64x32xf32>
    %c1_71 = arith.constant 1 : index
    %c0_72 = arith.constant 0 : index
    %c0_73 = arith.constant 0 : index
    %194 = vector.load %arg13[%c1_71, %c0_72, %c0_73] : memref<3x8x96xf32, #tpu.memory_space<vmem>>, vector<1x8x96xf32>
    %195 = vector.shape_cast %194 : vector<1x8x96xf32> to vector<8x96xf32>
    %196 = vector.extract_strided_slice %195 {offsets = [0, 0], sizes = [1, 96], strides = [1, 1]} : vector<8x96xf32> to vector<1x96xf32>
    %197 = vector.extract_strided_slice %195 {offsets = [1, 0], sizes = [1, 32], strides = [1, 1]} : vector<8x96xf32> to vector<1x32xf32>
    %198 = vector.extract_strided_slice %195 {offsets = [2, 0], sizes = [1, 32], strides = [1, 1]} : vector<8x96xf32> to vector<1x32xf32>
    %199 = vector.extract_strided_slice %195 {offsets = [3, 0], sizes = [1, 32], strides = [1, 1]} : vector<8x96xf32> to vector<1x32xf32>
    %200 = vector.extract_strided_slice %195 {offsets = [4, 0], sizes = [1, 64], strides = [1, 1]} : vector<8x96xf32> to vector<1x64xf32>
    %201 = vector.extract_strided_slice %195 {offsets = [5, 0], sizes = [1, 32], strides = [1, 1]} : vector<8x96xf32> to vector<1x32xf32>
    %202 = vector.extract_strided_slice %195 {offsets = [6, 0], sizes = [1, 32], strides = [1, 1]} : vector<8x96xf32> to vector<1x32xf32>
    %203 = vector.extract_strided_slice %195 {offsets = [7, 0], sizes = [1, 32], strides = [1, 1]} : vector<8x96xf32> to vector<1x32xf32>
    %cst_74 = arith.constant dense<0.000000e+00> : vector<12x96xf32>
    %204 = tpu.matmul %185, %187, %cst_74 {dimension_numbers = #tpu.dot_dimension_numbers<[1], [0], [0], [1], [0, 0, 1, 1], [], []>} : vector<12x32xf32>, vector<32x96xf32>, vector<12x96xf32> -> vector<12x96xf32>
    %205 = vector.broadcast %196 : vector<1x96xf32> to vector<12x96xf32>
    %206 = arith.addf %204, %205 : vector<12x96xf32>
    %207 = vector.extract_strided_slice %206 {offsets = [0, 0], sizes = [12, 32], strides = [1, 1]} : vector<12x96xf32> to vector<12x32xf32>
    %208 = vector.extract_strided_slice %207 {offsets = [0, 0], sizes = [12, 8], strides = [1, 1]} : vector<12x32xf32> to vector<12x8xf32>
    %209 = vector.shape_cast %208 : vector<12x8xf32> to vector<4x3x8xf32>
    %210 = vector.extract_strided_slice %207 {offsets = [0, 8], sizes = [12, 8], strides = [1, 1]} : vector<12x32xf32> to vector<12x8xf32>
    %211 = vector.shape_cast %210 : vector<12x8xf32> to vector<4x3x8xf32>
    %212 = vector.extract_strided_slice %207 {offsets = [0, 16], sizes = [12, 8], strides = [1, 1]} : vector<12x32xf32> to vector<12x8xf32>
    %213 = vector.shape_cast %212 : vector<12x8xf32> to vector<4x3x8xf32>
    %214 = vector.extract_strided_slice %207 {offsets = [0, 24], sizes = [12, 8], strides = [1, 1]} : vector<12x32xf32> to vector<12x8xf32>
    %215 = vector.shape_cast %214 : vector<12x8xf32> to vector<4x3x8xf32>
    %216 = tpu.concatenate %209, %211, %213, %215 in 0 : vector<4x3x8xf32>, vector<4x3x8xf32>, vector<4x3x8xf32>, vector<4x3x8xf32> -> vector<16x3x8xf32>
    %217 = vector.extract_strided_slice %206 {offsets = [0, 32], sizes = [12, 32], strides = [1, 1]} : vector<12x96xf32> to vector<12x32xf32>
    %218 = vector.extract_strided_slice %217 {offsets = [0, 0], sizes = [12, 8], strides = [1, 1]} : vector<12x32xf32> to vector<12x8xf32>
    %219 = vector.shape_cast %218 : vector<12x8xf32> to vector<4x3x8xf32>
    %220 = vector.extract_strided_slice %217 {offsets = [0, 8], sizes = [12, 8], strides = [1, 1]} : vector<12x32xf32> to vector<12x8xf32>
    %221 = vector.shape_cast %220 : vector<12x8xf32> to vector<4x3x8xf32>
    %222 = vector.extract_strided_slice %217 {offsets = [0, 16], sizes = [12, 8], strides = [1, 1]} : vector<12x32xf32> to vector<12x8xf32>
    %223 = vector.shape_cast %222 : vector<12x8xf32> to vector<4x3x8xf32>
    %224 = vector.extract_strided_slice %217 {offsets = [0, 24], sizes = [12, 8], strides = [1, 1]} : vector<12x32xf32> to vector<12x8xf32>
    %225 = vector.shape_cast %224 : vector<12x8xf32> to vector<4x3x8xf32>
    %226 = tpu.concatenate %219, %221, %223, %225 in 0 : vector<4x3x8xf32>, vector<4x3x8xf32>, vector<4x3x8xf32>, vector<4x3x8xf32> -> vector<16x3x8xf32>
    %227 = vector.extract_strided_slice %206 {offsets = [0, 64], sizes = [12, 32], strides = [1, 1]} : vector<12x96xf32> to vector<12x32xf32>
    %228 = vector.extract_strided_slice %227 {offsets = [0, 0], sizes = [12, 8], strides = [1, 1]} : vector<12x32xf32> to vector<12x8xf32>
    %229 = vector.shape_cast %228 : vector<12x8xf32> to vector<4x3x8xf32>
    %230 = vector.extract_strided_slice %227 {offsets = [0, 8], sizes = [12, 8], strides = [1, 1]} : vector<12x32xf32> to vector<12x8xf32>
    %231 = vector.shape_cast %230 : vector<12x8xf32> to vector<4x3x8xf32>
    %232 = vector.extract_strided_slice %227 {offsets = [0, 16], sizes = [12, 8], strides = [1, 1]} : vector<12x32xf32> to vector<12x8xf32>
    %233 = vector.shape_cast %232 : vector<12x8xf32> to vector<4x3x8xf32>
    %234 = vector.extract_strided_slice %227 {offsets = [0, 24], sizes = [12, 8], strides = [1, 1]} : vector<12x32xf32> to vector<12x8xf32>
    %235 = vector.shape_cast %234 : vector<12x8xf32> to vector<4x3x8xf32>
    %236 = tpu.concatenate %229, %231, %233, %235 in 0 : vector<4x3x8xf32>, vector<4x3x8xf32>, vector<4x3x8xf32>, vector<4x3x8xf32> -> vector<16x3x8xf32>
    "tpu.trace_start"() <{level = 10 : i32, message = "bqd,bkd->bqk"}> : () -> ()
    %cst_75 = arith.constant dense<0.000000e+00> : vector<16x3x3xf32>
    %237 = tpu.matmul %216, %226, %cst_75 {dimension_numbers = #tpu.dot_dimension_numbers<[2], [2], [1], [1], [0, 0, 0, 1, 1, 1], [0], [0]>} : vector<16x3x8xf32>, vector<16x3x8xf32>, vector<16x3x3xf32> -> vector<16x3x3xf32>
    "tpu.trace_stop"() : () -> ()
    %cst_76 = arith.constant 0.353553385 : f32
    %238 = vector.broadcast %cst_76 : f32 to vector<16x3x3xf32>
    %239 = arith.mulf %237, %238 : vector<16x3x3xf32>
    %cst_77 = arith.constant dense<0xFF800000> : vector<16x3xf32>
    %240 = vector.multi_reduction <maximumf>, %239, %cst_77 [2] : vector<16x3x3xf32> to vector<16x3xf32>
    %241 = vector.shape_cast %240 : vector<16x3xf32> to vector<16x3x1xf32>
    %242 = vector.broadcast %241 : vector<16x3x1xf32> to vector<16x3x3xf32>
    %243 = arith.subf %239, %242 : vector<16x3x3xf32>
    %244 = math.exp %243 : vector<16x3x3xf32>
    %cst_78 = arith.constant dense<0.000000e+00> : vector<16x3xf32>
    %245 = vector.multi_reduction <add>, %244, %cst_78 [2] : vector<16x3x3xf32> to vector<16x3xf32>
    %246 = vector.shape_cast %245 : vector<16x3xf32> to vector<16x3x1xf32>
    %247 = tpu.reciprocal %246 {approx = true} : vector<16x3x1xf32> -> vector<16x3x1xf32>
    %248 = vector.broadcast %247 : vector<16x3x1xf32> to vector<16x3x3xf32>
    %249 = arith.mulf %244, %248 : vector<16x3x3xf32>
    "tpu.trace_start"() <{level = 10 : i32, message = "bqk,bkd->bqd"}> : () -> ()
    %cst_79 = arith.constant dense<0.000000e+00> : vector<16x3x8xf32>
    %250 = tpu.matmul %249, %236, %cst_79 {dimension_numbers = #tpu.dot_dimension_numbers<[2], [1], [1], [2], [0, 0, 0, 1, 1, 2], [0], [0]>} : vector<16x3x3xf32>, vector<16x3x8xf32>, vector<16x3x8xf32> -> vector<16x3x8xf32>
    "tpu.trace_stop"() : () -> ()
    %251 = vector.extract_strided_slice %250 {offsets = [0, 0, 0], sizes = [4, 3, 8], strides = [1, 1, 1]} : vector<16x3x8xf32> to vector<4x3x8xf32>
    %252 = vector.shape_cast %251 : vector<4x3x8xf32> to vector<12x8xf32>
    %253 = vector.extract_strided_slice %189 {offsets = [0, 0], sizes = [8, 32], strides = [1, 1]} : vector<32x32xf32> to vector<8x32xf32>
    %cst_80 = arith.constant dense<0.000000e+00> : vector<12x32xf32>
    %254 = tpu.matmul %252, %253, %cst_80 {dimension_numbers = #tpu.dot_dimension_numbers<[1], [0], [0], [1], [0, 0, 1, 1], [], []>} : vector<12x8xf32>, vector<8x32xf32>, vector<12x32xf32> -> vector<12x32xf32>
    %255 = vector.broadcast %197 : vector<1x32xf32> to vector<12x32xf32>
    %256 = arith.addf %255, %254 : vector<12x32xf32>
    %257 = vector.extract_strided_slice %250 {offsets = [4, 0, 0], sizes = [4, 3, 8], strides = [1, 1, 1]} : vector<16x3x8xf32> to vector<4x3x8xf32>
    %258 = vector.shape_cast %257 : vector<4x3x8xf32> to vector<12x8xf32>
    %259 = vector.extract_strided_slice %189 {offsets = [8, 0], sizes = [8, 32], strides = [1, 1]} : vector<32x32xf32> to vector<8x32xf32>
    %cst_81 = arith.constant dense<0.000000e+00> : vector<12x32xf32>
    %260 = tpu.matmul %258, %259, %cst_81 {dimension_numbers = #tpu.dot_dimension_numbers<[1], [0], [0], [1], [0, 0, 1, 1], [], []>} : vector<12x8xf32>, vector<8x32xf32>, vector<12x32xf32> -> vector<12x32xf32>
    %261 = arith.addf %256, %260 : vector<12x32xf32>
    %262 = vector.extract_strided_slice %250 {offsets = [8, 0, 0], sizes = [4, 3, 8], strides = [1, 1, 1]} : vector<16x3x8xf32> to vector<4x3x8xf32>
    %263 = vector.shape_cast %262 : vector<4x3x8xf32> to vector<12x8xf32>
    %264 = vector.extract_strided_slice %189 {offsets = [16, 0], sizes = [8, 32], strides = [1, 1]} : vector<32x32xf32> to vector<8x32xf32>
    %cst_82 = arith.constant dense<0.000000e+00> : vector<12x32xf32>
    %265 = tpu.matmul %263, %264, %cst_82 {dimension_numbers = #tpu.dot_dimension_numbers<[1], [0], [0], [1], [0, 0, 1, 1], [], []>} : vector<12x8xf32>, vector<8x32xf32>, vector<12x32xf32> -> vector<12x32xf32>
    %266 = arith.addf %261, %265 : vector<12x32xf32>
    %267 = vector.extract_strided_slice %250 {offsets = [12, 0, 0], sizes = [4, 3, 8], strides = [1, 1, 1]} : vector<16x3x8xf32> to vector<4x3x8xf32>
    %268 = vector.shape_cast %267 : vector<4x3x8xf32> to vector<12x8xf32>
    %269 = vector.extract_strided_slice %189 {offsets = [24, 0], sizes = [8, 32], strides = [1, 1]} : vector<32x32xf32> to vector<8x32xf32>
    %cst_83 = arith.constant dense<0.000000e+00> : vector<12x32xf32>
    %270 = tpu.matmul %268, %269, %cst_83 {dimension_numbers = #tpu.dot_dimension_numbers<[1], [0], [0], [1], [0, 0, 1, 1], [], []>} : vector<12x8xf32>, vector<8x32xf32>, vector<12x32xf32> -> vector<12x32xf32>
    %271 = arith.addf %266, %270 : vector<12x32xf32>
    %272 = arith.addf %185, %271 : vector<12x32xf32>
    %cst_84 = arith.constant dense<0.000000e+00> : vector<12xf32>
    %273 = vector.multi_reduction <add>, %272, %cst_84 [1] : vector<12x32xf32> to vector<12xf32>
    %274 = vector.shape_cast %273 : vector<12xf32> to vector<12x1xf32>
    %cst_85 = arith.constant 3.200000e+01 : f32
    %275 = vector.broadcast %cst_85 : f32 to vector<12x1xf32>
    %276 = arith.divf %274, %275 : vector<12x1xf32>
    %277 = vector.broadcast %276 : vector<12x1xf32> to vector<12x32xf32>
    %278 = arith.subf %272, %277 : vector<12x32xf32>
    %279 = arith.mulf %278, %278 : vector<12x32xf32>
    %cst_86 = arith.constant dense<0.000000e+00> : vector<12xf32>
    %280 = vector.multi_reduction <add>, %279, %cst_86 [1] : vector<12x32xf32> to vector<12xf32>
    %281 = vector.shape_cast %280 : vector<12xf32> to vector<12x1xf32>
    %cst_87 = arith.constant 3.200000e+01 : f32
    %282 = vector.broadcast %cst_87 : f32 to vector<12x1xf32>
    %283 = arith.divf %281, %282 : vector<12x1xf32>
    %284 = vector.broadcast %276 : vector<12x1xf32> to vector<12x32xf32>
    %285 = arith.subf %272, %284 : vector<12x32xf32>
    %cst_88 = arith.constant 9.99999974E-6 : f32
    %286 = vector.broadcast %cst_88 : f32 to vector<12x1xf32>
    %287 = arith.addf %283, %286 : vector<12x1xf32>
    %288 = math.rsqrt %287 : vector<12x1xf32>
    %289 = vector.broadcast %288 : vector<12x1xf32> to vector<12x32xf32>
    %290 = arith.mulf %285, %289 : vector<12x32xf32>
    %291 = vector.broadcast %198 : vector<1x32xf32> to vector<12x32xf32>
    %292 = arith.mulf %290, %291 : vector<12x32xf32>
    %293 = vector.broadcast %199 : vector<1x32xf32> to vector<12x32xf32>
    %294 = arith.addf %292, %293 : vector<12x32xf32>
    %cst_89 = arith.constant dense<0.000000e+00> : vector<12x64xf32>
    %295 = tpu.matmul %294, %191, %cst_89 {dimension_numbers = #tpu.dot_dimension_numbers<[1], [0], [0], [1], [0, 0, 1, 1], [], []>} : vector<12x32xf32>, vector<32x64xf32>, vector<12x64xf32> -> vector<12x64xf32>
    %296 = vector.broadcast %200 : vector<1x64xf32> to vector<12x64xf32>
    %297 = arith.addf %295, %296 : vector<12x64xf32>
    %cst_90 = arith.constant 0.000000e+00 : f32
    %298 = vector.broadcast %cst_90 : f32 to vector<12x64xf32>
    %299 = arith.maximumf %297, %298 : vector<12x64xf32>
    %cst_91 = arith.constant dense<0.000000e+00> : vector<12x32xf32>
    %300 = tpu.matmul %299, %193, %cst_91 {dimension_numbers = #tpu.dot_dimension_numbers<[1], [0], [0], [1], [0, 0, 1, 1], [], []>} : vector<12x64xf32>, vector<64x32xf32>, vector<12x32xf32> -> vector<12x32xf32>
    %301 = arith.addf %294, %300 : vector<12x32xf32>
    %302 = vector.broadcast %201 : vector<1x32xf32> to vector<12x32xf32>
    %303 = arith.addf %301, %302 : vector<12x32xf32>
    %cst_92 = arith.constant dense<0.000000e+00> : vector<12xf32>
    %304 = vector.multi_reduction <add>, %303, %cst_92 [1] : vector<12x32xf32> to vector<12xf32>
    %305 = vector.shape_cast %304 : vector<12xf32> to vector<12x1xf32>
    %cst_93 = arith.constant 3.200000e+01 : f32
    %306 = vector.broadcast %cst_93 : f32 to vector<12x1xf32>
    %307 = arith.divf %305, %306 : vector<12x1xf32>
    %308 = vector.broadcast %307 : vector<12x1xf32> to vector<12x32xf32>
    %309 = arith.subf %303, %308 : vector<12x32xf32>
    %310 = arith.mulf %309, %309 : vector<12x32xf32>
    %cst_94 = arith.constant dense<0.000000e+00> : vector<12xf32>
    %311 = vector.multi_reduction <add>, %310, %cst_94 [1] : vector<12x32xf32> to vector<12xf32>
    %312 = vector.shape_cast %311 : vector<12xf32> to vector<12x1xf32>
    %cst_95 = arith.constant 3.200000e+01 : f32
    %313 = vector.broadcast %cst_95 : f32 to vector<12x1xf32>
    %314 = arith.divf %312, %313 : vector<12x1xf32>
    %315 = vector.broadcast %307 : vector<12x1xf32> to vector<12x32xf32>
    %316 = arith.subf %303, %315 : vector<12x32xf32>
    %cst_96 = arith.constant 9.99999974E-6 : f32
    %317 = vector.broadcast %cst_96 : f32 to vector<12x1xf32>
    %318 = arith.addf %314, %317 : vector<12x1xf32>
    %319 = math.rsqrt %318 : vector<12x1xf32>
    %320 = vector.broadcast %319 : vector<12x1xf32> to vector<12x32xf32>
    %321 = arith.mulf %316, %320 : vector<12x32xf32>
    %322 = vector.broadcast %202 : vector<1x32xf32> to vector<12x32xf32>
    %323 = arith.mulf %321, %322 : vector<12x32xf32>
    %324 = vector.broadcast %203 : vector<1x32xf32> to vector<12x32xf32>
    %325 = arith.addf %323, %324 : vector<12x32xf32>
    %c2 = arith.constant 2 : index
    %c0_97 = arith.constant 0 : index
    %c0_98 = arith.constant 0 : index
    %326 = vector.load %arg9[%c2, %c0_97, %c0_98] : memref<3x32x96xf32, #tpu.memory_space<vmem>>, vector<1x32x96xf32>
    %327 = vector.shape_cast %326 : vector<1x32x96xf32> to vector<32x96xf32>
    %c2_99 = arith.constant 2 : index
    %c0_100 = arith.constant 0 : index
    %c0_101 = arith.constant 0 : index
    %328 = vector.load %arg10[%c2_99, %c0_100, %c0_101] : memref<3x32x32xf32, #tpu.memory_space<vmem>>, vector<1x32x32xf32>
    %329 = vector.shape_cast %328 : vector<1x32x32xf32> to vector<32x32xf32>
    %c2_102 = arith.constant 2 : index
    %c0_103 = arith.constant 0 : index
    %c0_104 = arith.constant 0 : index
    %330 = vector.load %arg11[%c2_102, %c0_103, %c0_104] : memref<3x32x64xf32, #tpu.memory_space<vmem>>, vector<1x32x64xf32>
    %331 = vector.shape_cast %330 : vector<1x32x64xf32> to vector<32x64xf32>
    %c2_105 = arith.constant 2 : index
    %c0_106 = arith.constant 0 : index
    %c0_107 = arith.constant 0 : index
    %332 = vector.load %arg12[%c2_105, %c0_106, %c0_107] : memref<3x64x32xf32, #tpu.memory_space<vmem>>, vector<1x64x32xf32>
    %333 = vector.shape_cast %332 : vector<1x64x32xf32> to vector<64x32xf32>
    %c2_108 = arith.constant 2 : index
    %c0_109 = arith.constant 0 : index
    %c0_110 = arith.constant 0 : index
    %334 = vector.load %arg13[%c2_108, %c0_109, %c0_110] : memref<3x8x96xf32, #tpu.memory_space<vmem>>, vector<1x8x96xf32>
    %335 = vector.shape_cast %334 : vector<1x8x96xf32> to vector<8x96xf32>
    %336 = vector.extract_strided_slice %335 {offsets = [0, 0], sizes = [1, 96], strides = [1, 1]} : vector<8x96xf32> to vector<1x96xf32>
    %337 = vector.extract_strided_slice %335 {offsets = [1, 0], sizes = [1, 32], strides = [1, 1]} : vector<8x96xf32> to vector<1x32xf32>
    %338 = vector.extract_strided_slice %335 {offsets = [2, 0], sizes = [1, 32], strides = [1, 1]} : vector<8x96xf32> to vector<1x32xf32>
    %339 = vector.extract_strided_slice %335 {offsets = [3, 0], sizes = [1, 32], strides = [1, 1]} : vector<8x96xf32> to vector<1x32xf32>
    %340 = vector.extract_strided_slice %335 {offsets = [4, 0], sizes = [1, 64], strides = [1, 1]} : vector<8x96xf32> to vector<1x64xf32>
    %341 = vector.extract_strided_slice %335 {offsets = [5, 0], sizes = [1, 32], strides = [1, 1]} : vector<8x96xf32> to vector<1x32xf32>
    %342 = vector.extract_strided_slice %335 {offsets = [6, 0], sizes = [1, 32], strides = [1, 1]} : vector<8x96xf32> to vector<1x32xf32>
    %343 = vector.extract_strided_slice %335 {offsets = [7, 0], sizes = [1, 32], strides = [1, 1]} : vector<8x96xf32> to vector<1x32xf32>
    %cst_111 = arith.constant dense<0.000000e+00> : vector<12x96xf32>
    %344 = tpu.matmul %325, %327, %cst_111 {dimension_numbers = #tpu.dot_dimension_numbers<[1], [0], [0], [1], [0, 0, 1, 1], [], []>} : vector<12x32xf32>, vector<32x96xf32>, vector<12x96xf32> -> vector<12x96xf32>
    %345 = vector.broadcast %336 : vector<1x96xf32> to vector<12x96xf32>
    %346 = arith.addf %344, %345 : vector<12x96xf32>
    %347 = vector.extract_strided_slice %346 {offsets = [0, 0], sizes = [12, 32], strides = [1, 1]} : vector<12x96xf32> to vector<12x32xf32>
    %348 = vector.extract_strided_slice %347 {offsets = [0, 0], sizes = [12, 8], strides = [1, 1]} : vector<12x32xf32> to vector<12x8xf32>
    %349 = vector.shape_cast %348 : vector<12x8xf32> to vector<4x3x8xf32>
    %350 = vector.extract_strided_slice %347 {offsets = [0, 8], sizes = [12, 8], strides = [1, 1]} : vector<12x32xf32> to vector<12x8xf32>
    %351 = vector.shape_cast %350 : vector<12x8xf32> to vector<4x3x8xf32>
    %352 = vector.extract_strided_slice %347 {offsets = [0, 16], sizes = [12, 8], strides = [1, 1]} : vector<12x32xf32> to vector<12x8xf32>
    %353 = vector.shape_cast %352 : vector<12x8xf32> to vector<4x3x8xf32>
    %354 = vector.extract_strided_slice %347 {offsets = [0, 24], sizes = [12, 8], strides = [1, 1]} : vector<12x32xf32> to vector<12x8xf32>
    %355 = vector.shape_cast %354 : vector<12x8xf32> to vector<4x3x8xf32>
    %356 = tpu.concatenate %349, %351, %353, %355 in 0 : vector<4x3x8xf32>, vector<4x3x8xf32>, vector<4x3x8xf32>, vector<4x3x8xf32> -> vector<16x3x8xf32>
    %357 = vector.extract_strided_slice %346 {offsets = [0, 32], sizes = [12, 32], strides = [1, 1]} : vector<12x96xf32> to vector<12x32xf32>
    %358 = vector.extract_strided_slice %357 {offsets = [0, 0], sizes = [12, 8], strides = [1, 1]} : vector<12x32xf32> to vector<12x8xf32>
    %359 = vector.shape_cast %358 : vector<12x8xf32> to vector<4x3x8xf32>
    %360 = vector.extract_strided_slice %357 {offsets = [0, 8], sizes = [12, 8], strides = [1, 1]} : vector<12x32xf32> to vector<12x8xf32>
    %361 = vector.shape_cast %360 : vector<12x8xf32> to vector<4x3x8xf32>
    %362 = vector.extract_strided_slice %357 {offsets = [0, 16], sizes = [12, 8], strides = [1, 1]} : vector<12x32xf32> to vector<12x8xf32>
    %363 = vector.shape_cast %362 : vector<12x8xf32> to vector<4x3x8xf32>
    %364 = vector.extract_strided_slice %357 {offsets = [0, 24], sizes = [12, 8], strides = [1, 1]} : vector<12x32xf32> to vector<12x8xf32>
    %365 = vector.shape_cast %364 : vector<12x8xf32> to vector<4x3x8xf32>
    %366 = tpu.concatenate %359, %361, %363, %365 in 0 : vector<4x3x8xf32>, vector<4x3x8xf32>, vector<4x3x8xf32>, vector<4x3x8xf32> -> vector<16x3x8xf32>
    %367 = vector.extract_strided_slice %346 {offsets = [0, 64], sizes = [12, 32], strides = [1, 1]} : vector<12x96xf32> to vector<12x32xf32>
    %368 = vector.extract_strided_slice %367 {offsets = [0, 0], sizes = [12, 8], strides = [1, 1]} : vector<12x32xf32> to vector<12x8xf32>
    %369 = vector.shape_cast %368 : vector<12x8xf32> to vector<4x3x8xf32>
    %370 = vector.extract_strided_slice %367 {offsets = [0, 8], sizes = [12, 8], strides = [1, 1]} : vector<12x32xf32> to vector<12x8xf32>
    %371 = vector.shape_cast %370 : vector<12x8xf32> to vector<4x3x8xf32>
    %372 = vector.extract_strided_slice %367 {offsets = [0, 16], sizes = [12, 8], strides = [1, 1]} : vector<12x32xf32> to vector<12x8xf32>
    %373 = vector.shape_cast %372 : vector<12x8xf32> to vector<4x3x8xf32>
    %374 = vector.extract_strided_slice %367 {offsets = [0, 24], sizes = [12, 8], strides = [1, 1]} : vector<12x32xf32> to vector<12x8xf32>
    %375 = vector.shape_cast %374 : vector<12x8xf32> to vector<4x3x8xf32>
    %376 = tpu.concatenate %369, %371, %373, %375 in 0 : vector<4x3x8xf32>, vector<4x3x8xf32>, vector<4x3x8xf32>, vector<4x3x8xf32> -> vector<16x3x8xf32>
    "tpu.trace_start"() <{level = 10 : i32, message = "bqd,bkd->bqk"}> : () -> ()
    %cst_112 = arith.constant dense<0.000000e+00> : vector<16x3x3xf32>
    %377 = tpu.matmul %356, %366, %cst_112 {dimension_numbers = #tpu.dot_dimension_numbers<[2], [2], [1], [1], [0, 0, 0, 1, 1, 1], [0], [0]>} : vector<16x3x8xf32>, vector<16x3x8xf32>, vector<16x3x3xf32> -> vector<16x3x3xf32>
    "tpu.trace_stop"() : () -> ()
    %cst_113 = arith.constant 0.353553385 : f32
    %378 = vector.broadcast %cst_113 : f32 to vector<16x3x3xf32>
    %379 = arith.mulf %377, %378 : vector<16x3x3xf32>
    %cst_114 = arith.constant dense<0xFF800000> : vector<16x3xf32>
    %380 = vector.multi_reduction <maximumf>, %379, %cst_114 [2] : vector<16x3x3xf32> to vector<16x3xf32>
    %381 = vector.shape_cast %380 : vector<16x3xf32> to vector<16x3x1xf32>
    %382 = vector.broadcast %381 : vector<16x3x1xf32> to vector<16x3x3xf32>
    %383 = arith.subf %379, %382 : vector<16x3x3xf32>
    %384 = math.exp %383 : vector<16x3x3xf32>
    %cst_115 = arith.constant dense<0.000000e+00> : vector<16x3xf32>
    %385 = vector.multi_reduction <add>, %384, %cst_115 [2] : vector<16x3x3xf32> to vector<16x3xf32>
    %386 = vector.shape_cast %385 : vector<16x3xf32> to vector<16x3x1xf32>
    %387 = tpu.reciprocal %386 {approx = true} : vector<16x3x1xf32> -> vector<16x3x1xf32>
    %388 = vector.broadcast %387 : vector<16x3x1xf32> to vector<16x3x3xf32>
    %389 = arith.mulf %384, %388 : vector<16x3x3xf32>
    "tpu.trace_start"() <{level = 10 : i32, message = "bqk,bkd->bqd"}> : () -> ()
    %cst_116 = arith.constant dense<0.000000e+00> : vector<16x3x8xf32>
    %390 = tpu.matmul %389, %376, %cst_116 {dimension_numbers = #tpu.dot_dimension_numbers<[2], [1], [1], [2], [0, 0, 0, 1, 1, 2], [0], [0]>} : vector<16x3x3xf32>, vector<16x3x8xf32>, vector<16x3x8xf32> -> vector<16x3x8xf32>
    "tpu.trace_stop"() : () -> ()
    %391 = vector.extract_strided_slice %390 {offsets = [0, 0, 0], sizes = [4, 3, 8], strides = [1, 1, 1]} : vector<16x3x8xf32> to vector<4x3x8xf32>
    %392 = vector.shape_cast %391 : vector<4x3x8xf32> to vector<12x8xf32>
    %393 = vector.extract_strided_slice %329 {offsets = [0, 0], sizes = [8, 32], strides = [1, 1]} : vector<32x32xf32> to vector<8x32xf32>
    %cst_117 = arith.constant dense<0.000000e+00> : vector<12x32xf32>
    %394 = tpu.matmul %392, %393, %cst_117 {dimension_numbers = #tpu.dot_dimension_numbers<[1], [0], [0], [1], [0, 0, 1, 1], [], []>} : vector<12x8xf32>, vector<8x32xf32>, vector<12x32xf32> -> vector<12x32xf32>
    %395 = vector.broadcast %337 : vector<1x32xf32> to vector<12x32xf32>
    %396 = arith.addf %395, %394 : vector<12x32xf32>
    %397 = vector.extract_strided_slice %390 {offsets = [4, 0, 0], sizes = [4, 3, 8], strides = [1, 1, 1]} : vector<16x3x8xf32> to vector<4x3x8xf32>
    %398 = vector.shape_cast %397 : vector<4x3x8xf32> to vector<12x8xf32>
    %399 = vector.extract_strided_slice %329 {offsets = [8, 0], sizes = [8, 32], strides = [1, 1]} : vector<32x32xf32> to vector<8x32xf32>
    %cst_118 = arith.constant dense<0.000000e+00> : vector<12x32xf32>
    %400 = tpu.matmul %398, %399, %cst_118 {dimension_numbers = #tpu.dot_dimension_numbers<[1], [0], [0], [1], [0, 0, 1, 1], [], []>} : vector<12x8xf32>, vector<8x32xf32>, vector<12x32xf32> -> vector<12x32xf32>
    %401 = arith.addf %396, %400 : vector<12x32xf32>
    %402 = vector.extract_strided_slice %390 {offsets = [8, 0, 0], sizes = [4, 3, 8], strides = [1, 1, 1]} : vector<16x3x8xf32> to vector<4x3x8xf32>
    %403 = vector.shape_cast %402 : vector<4x3x8xf32> to vector<12x8xf32>
    %404 = vector.extract_strided_slice %329 {offsets = [16, 0], sizes = [8, 32], strides = [1, 1]} : vector<32x32xf32> to vector<8x32xf32>
    %cst_119 = arith.constant dense<0.000000e+00> : vector<12x32xf32>
    %405 = tpu.matmul %403, %404, %cst_119 {dimension_numbers = #tpu.dot_dimension_numbers<[1], [0], [0], [1], [0, 0, 1, 1], [], []>} : vector<12x8xf32>, vector<8x32xf32>, vector<12x32xf32> -> vector<12x32xf32>
    %406 = arith.addf %401, %405 : vector<12x32xf32>
    %407 = vector.extract_strided_slice %390 {offsets = [12, 0, 0], sizes = [4, 3, 8], strides = [1, 1, 1]} : vector<16x3x8xf32> to vector<4x3x8xf32>
    %408 = vector.shape_cast %407 : vector<4x3x8xf32> to vector<12x8xf32>
    %409 = vector.extract_strided_slice %329 {offsets = [24, 0], sizes = [8, 32], strides = [1, 1]} : vector<32x32xf32> to vector<8x32xf32>
    %cst_120 = arith.constant dense<0.000000e+00> : vector<12x32xf32>
    %410 = tpu.matmul %408, %409, %cst_120 {dimension_numbers = #tpu.dot_dimension_numbers<[1], [0], [0], [1], [0, 0, 1, 1], [], []>} : vector<12x8xf32>, vector<8x32xf32>, vector<12x32xf32> -> vector<12x32xf32>
    %411 = arith.addf %406, %410 : vector<12x32xf32>
    %412 = arith.addf %325, %411 : vector<12x32xf32>
    %cst_121 = arith.constant dense<0.000000e+00> : vector<12xf32>
    %413 = vector.multi_reduction <add>, %412, %cst_121 [1] : vector<12x32xf32> to vector<12xf32>
    %414 = vector.shape_cast %413 : vector<12xf32> to vector<12x1xf32>
    %cst_122 = arith.constant 3.200000e+01 : f32
    %415 = vector.broadcast %cst_122 : f32 to vector<12x1xf32>
    %416 = arith.divf %414, %415 : vector<12x1xf32>
    %417 = vector.broadcast %416 : vector<12x1xf32> to vector<12x32xf32>
    %418 = arith.subf %412, %417 : vector<12x32xf32>
    %419 = arith.mulf %418, %418 : vector<12x32xf32>
    %cst_123 = arith.constant dense<0.000000e+00> : vector<12xf32>
    %420 = vector.multi_reduction <add>, %419, %cst_123 [1] : vector<12x32xf32> to vector<12xf32>
    %421 = vector.shape_cast %420 : vector<12xf32> to vector<12x1xf32>
    %cst_124 = arith.constant 3.200000e+01 : f32
    %422 = vector.broadcast %cst_124 : f32 to vector<12x1xf32>
    %423 = arith.divf %421, %422 : vector<12x1xf32>
    %424 = vector.broadcast %416 : vector<12x1xf32> to vector<12x32xf32>
    %425 = arith.subf %412, %424 : vector<12x32xf32>
    %cst_125 = arith.constant 9.99999974E-6 : f32
    %426 = vector.broadcast %cst_125 : f32 to vector<12x1xf32>
    %427 = arith.addf %423, %426 : vector<12x1xf32>
    %428 = math.rsqrt %427 : vector<12x1xf32>
    %429 = vector.broadcast %428 : vector<12x1xf32> to vector<12x32xf32>
    %430 = arith.mulf %425, %429 : vector<12x32xf32>
    %431 = vector.broadcast %338 : vector<1x32xf32> to vector<12x32xf32>
    %432 = arith.mulf %430, %431 : vector<12x32xf32>
    %433 = vector.broadcast %339 : vector<1x32xf32> to vector<12x32xf32>
    %434 = arith.addf %432, %433 : vector<12x32xf32>
    %cst_126 = arith.constant dense<0.000000e+00> : vector<12x64xf32>
    %435 = tpu.matmul %434, %331, %cst_126 {dimension_numbers = #tpu.dot_dimension_numbers<[1], [0], [0], [1], [0, 0, 1, 1], [], []>} : vector<12x32xf32>, vector<32x64xf32>, vector<12x64xf32> -> vector<12x64xf32>
    %436 = vector.broadcast %340 : vector<1x64xf32> to vector<12x64xf32>
    %437 = arith.addf %435, %436 : vector<12x64xf32>
    %cst_127 = arith.constant 0.000000e+00 : f32
    %438 = vector.broadcast %cst_127 : f32 to vector<12x64xf32>
    %439 = arith.maximumf %437, %438 : vector<12x64xf32>
    %cst_128 = arith.constant dense<0.000000e+00> : vector<12x32xf32>
    %440 = tpu.matmul %439, %333, %cst_128 {dimension_numbers = #tpu.dot_dimension_numbers<[1], [0], [0], [1], [0, 0, 1, 1], [], []>} : vector<12x64xf32>, vector<64x32xf32>, vector<12x32xf32> -> vector<12x32xf32>
    %441 = arith.addf %434, %440 : vector<12x32xf32>
    %442 = vector.broadcast %341 : vector<1x32xf32> to vector<12x32xf32>
    %443 = arith.addf %441, %442 : vector<12x32xf32>
    %cst_129 = arith.constant dense<0.000000e+00> : vector<12xf32>
    %444 = vector.multi_reduction <add>, %443, %cst_129 [1] : vector<12x32xf32> to vector<12xf32>
    %445 = vector.shape_cast %444 : vector<12xf32> to vector<12x1xf32>
    %cst_130 = arith.constant 3.200000e+01 : f32
    %446 = vector.broadcast %cst_130 : f32 to vector<12x1xf32>
    %447 = arith.divf %445, %446 : vector<12x1xf32>
    %448 = vector.broadcast %447 : vector<12x1xf32> to vector<12x32xf32>
    %449 = arith.subf %443, %448 : vector<12x32xf32>
    %450 = arith.mulf %449, %449 : vector<12x32xf32>
    %cst_131 = arith.constant dense<0.000000e+00> : vector<12xf32>
    %451 = vector.multi_reduction <add>, %450, %cst_131 [1] : vector<12x32xf32> to vector<12xf32>
    %452 = vector.shape_cast %451 : vector<12xf32> to vector<12x1xf32>
    %cst_132 = arith.constant 3.200000e+01 : f32
    %453 = vector.broadcast %cst_132 : f32 to vector<12x1xf32>
    %454 = arith.divf %452, %453 : vector<12x1xf32>
    %455 = vector.broadcast %447 : vector<12x1xf32> to vector<12x32xf32>
    %456 = arith.subf %443, %455 : vector<12x32xf32>
    %cst_133 = arith.constant 9.99999974E-6 : f32
    %457 = vector.broadcast %cst_133 : f32 to vector<12x1xf32>
    %458 = arith.addf %454, %457 : vector<12x1xf32>
    %459 = math.rsqrt %458 : vector<12x1xf32>
    %460 = vector.broadcast %459 : vector<12x1xf32> to vector<12x32xf32>
    %461 = arith.mulf %456, %460 : vector<12x32xf32>
    %462 = vector.broadcast %342 : vector<1x32xf32> to vector<12x32xf32>
    %463 = arith.mulf %461, %462 : vector<12x32xf32>
    %464 = vector.broadcast %343 : vector<1x32xf32> to vector<12x32xf32>
    %465 = arith.addf %463, %464 : vector<12x32xf32>
    %466 = vector.shape_cast %465 : vector<12x32xf32> to vector<4x3x32xf32>
    %467 = vector.extract_strided_slice %466 {offsets = [0, 0, 0], sizes = [4, 1, 32], strides = [1, 1, 1]} : vector<4x3x32xf32> to vector<4x1x32xf32>
    %468 = vector.shape_cast %467 : vector<4x1x32xf32> to vector<4x32xf32>
    %c0_134 = arith.constant 0 : index
    %c0_135 = arith.constant 0 : index
    %469 = vector.load %arg14[%c0_134, %c0_135] : memref<40x16xf32, #tpu.memory_space<vmem>>, vector<40x16xf32>
    %470 = vector.extract_strided_slice %469 {offsets = [0, 0], sizes = [32, 16], strides = [1, 1]} : vector<40x16xf32> to vector<32x16xf32>
    %471 = vector.extract_strided_slice %469 {offsets = [32, 0], sizes = [1, 16], strides = [1, 1]} : vector<40x16xf32> to vector<1x16xf32>
    %472 = vector.extract_strided_slice %469 {offsets = [33, 0], sizes = [1, 16], strides = [1, 1]} : vector<40x16xf32> to vector<1x16xf32>
    %473 = vector.extract_strided_slice %469 {offsets = [34, 0], sizes = [1, 1], strides = [1, 1]} : vector<40x16xf32> to vector<1x1xf32>
    %cst_136 = arith.constant dense<0.000000e+00> : vector<4x16xf32>
    %474 = tpu.matmul %468, %470, %cst_136 {dimension_numbers = #tpu.dot_dimension_numbers<[1], [0], [0], [1], [0, 0, 1, 1], [], []>} : vector<4x32xf32>, vector<32x16xf32>, vector<4x16xf32> -> vector<4x16xf32>
    %475 = vector.broadcast %471 : vector<1x16xf32> to vector<4x16xf32>
    %476 = arith.addf %474, %475 : vector<4x16xf32>
    %cst_137 = arith.constant 0.000000e+00 : f32
    %477 = vector.broadcast %cst_137 : f32 to vector<4x16xf32>
    %478 = arith.maximumf %476, %477 : vector<4x16xf32>
    %479 = vector.broadcast %472 : vector<1x16xf32> to vector<4x16xf32>
    %480 = arith.mulf %478, %479 : vector<4x16xf32>
    %cst_138 = arith.constant dense<0.000000e+00> : vector<4xf32>
    %481 = vector.multi_reduction <add>, %480, %cst_138 [1] : vector<4x16xf32> to vector<4xf32>
    %482 = vector.shape_cast %481 : vector<4xf32> to vector<4x1xf32>
    %483 = vector.broadcast %473 : vector<1x1xf32> to vector<4x1xf32>
    %484 = arith.addf %482, %483 : vector<4x1xf32>
    %cst_139 = arith.constant 0.000000e+00 : f32
    %485 = vector.broadcast %cst_139 : f32 to vector<4x127xf32>
    %486 = tpu.concatenate %484, %485 in 1 : vector<4x1xf32>, vector<4x127xf32> -> vector<4x128xf32>
    %cst_140 = arith.constant 0.000000e+00 : f32
    %487 = vector.broadcast %cst_140 : f32 to vector<4x128xf32>
    %488 = tpu.concatenate %486, %487 in 0 : vector<4x128xf32>, vector<4x128xf32> -> vector<8x128xf32>
    %c0_141 = arith.constant 0 : index
    %c0_142 = arith.constant 0 : index
    %489 = vector.load %arg15[%c0_141, %c0_142] : memref<8x128xf32, #tpu.memory_space<vmem>>, vector<8x128xf32>
    tpu.vector_store %arg15[%c0_141, %c0_142], %488 {strides = array<i32>} : memref<8x128xf32, #tpu.memory_space<vmem>>, vector<8x128xf32>,
    return
  }
}

</mosaic_0001>

<bundles_post_ra>
// kernel: squeeze.1
= control target key start
LH: loop header
LB: loop body
LE: loop exit
PB: predicated region body
PF: predicated region fallthrough
CT: control target
= control target key end

     0   :  { %s85_s0 = inlined_call_operand.vmem [shape: f32[4], index: 0, kind: input, shape index: {}]   ;;  %s86_s1 = inlined_call_operand.hbm [shape: f32[2,2], index: 1, kind: output, shape index: {}]  }
   0x1   :  { %v5_v0 = vld [vmem:[%s85_s0] sm:$0x1] }
   0x2   :  { %2 = vsyncpa [#allocation1], 0  ;;  %6 = vst [vmem:[#allocation3] sm:$0x1] %v5_v0  ;;  %vm8_vm0 = vcmask 15360   ;;  %s58_s0 = smov 126  }
   0x3   :  { %s59_s8 = smov [#allocation0]  }
   0x4   :  { %s26_s9 = sshll.u32 %s59_s8, 4  ;;  %s27_s9 = int_to_ptr.vmem [resolvable:$true] %s26_s9 }
   0x5   :  { %s34_s10 = scalar_lea.vmem %s27_s9, 32  ;;  %p39_p1 = scmp.lt.s32.totalorder %s27_s9, %s27_s9 }
   0x6   :  { %p35_p0 = scmp.ne.s32.totalorder %s27_s9, %s34_s10  ;;  %p40_p2 = scmp.lt.s32.totalorder %s34_s10, %s34_s10 }
   0x8   :  { %p41_p3 = por %p40_p2, %p39_p1 }
   0x9   :  { %v10_v1 = vld [vmem:[#allocation3] sm:$0x1]  }
   0xa   :  { %v7_v2 = vld [vmem:[#allocation3] sm:$0x1]   ;;  %11 = vrot.lane.b32.xlu0 %v10_v1, %s58_s0  ;;  %p42_p4 = pnand %p41_p3, %p35_p0 }
   0xb   :  { %9 = vst.msk [vmem:[#allocation2] sm:$0x1] %vm8_vm0, %v7_v2  }
  0x7c   :  { %v12_v3 = vpop.permute.xlu0 %11  }
  0x7d   :  { %15 = vst.msk [vmem:[#allocation2 + $0x1] sm:$0x1] %vm8_vm0, %v12_v3  }
  0x84   :  { %v19_v4 = vld [vmem:[#allocation2] sm:$0x3] }
  0x85   :  { %21 = vst [vmem:[#allocation0] sm:$0x3] %v19_v4 }
  0x86   :  { %45 = shalt.err (!%p42_p4)
}
  0x87   :  { %s46_s13 = scalar_lea.hbm %s86_s1, 32 }
  0x88   :  { %p47_p5 = scmp.ne.s32.totalorder %s86_s1, %s46_s13  ;;  %p50_p6 = scmp.lt.u32.totalorder %s46_s13, %s86_s1 }
  0x8a   :  { %p52_p7 = pnand %p50_p6, %p47_p5 }
  0x8c   :  { %55 = shalt.err (!%p52_p7)
}
  0x8d   :  { %29 = dma.vmem_to_hbm [thread:$0]  %s27_s9, 32, %s86_s1, [#allocation1]  }
  0x8e   :  { %56 = dma.done.wait [#allocation1], 32  }
  0x8f   :  { %57 = vsyncadd [#allocation1], 4294967264 }
  0x90   :  { %31 = vsyncpa [#allocation1], 1 }

// kernel: _lambda_.1
= control target key start
LH: loop header
LB: loop body
LE: loop exit
PB: predicated region body
PF: predicated region fallthrough
CT: control target
= control target key end

     0   :  { %v17719_v0 = vmov 0   ;;  %v93_v9 = vlaneseq  ;;  %v20960_v16 = vmov 0.0   ;;  %vm227_vm1 = vcmask 392192   ;;  %s17723_s23 = smov 112   ;;  %s17724_s24 = smov 104   ;;  %s20944_s2 = inlined_call_operand.vmem [shape: f32[48,1], index: 2, kind: input, shape index: {}]   ;;  %s20945_s7 = inlined_call_operand.vmem [shape: f32[256,1], index: 7, kind: input, shape index: {}]   ;;  %s20946_s0 = inlined_call_operand.vmem [shape: s32[1,48], index: 0, kind: input, shape index: {}]   ;;  %s20947_s1 = inlined_call_operand.vmem [shape: s32[48,1], index: 1, kind: input, shape index: {}]   ;;  %s20948_s8 = inlined_call_operand.vmem [shape: f32[16,32], index: 8, kind: input, shape index: {}]   ;;  %s20949_s6 = inlined_call_operand.vmem [shape: f32[256,32], index: 6, kind: input, shape index: {}]   ;;  %s20950_s9 = inlined_call_operand.vmem [shape: f32[3,32,96], index: 9, kind: input, shape index: {}]   ;;  %s20951_s13 = inlined_call_operand.vmem [shape: f32[3,8,96], index: 13, kind: input, shape index: {}]   ;;  %s20952_s3 = inlined_call_operand.vmem [shape: f32[6,8], index: 3, kind: input, shape index: {}]   ;;  %s20953_s10 = inlined_call_operand.vmem [shape: f32[3,32,32], index: 10, kind: input, shape index: {}]   ;;  %s20954_s11 = inlined_call_operand.vmem [shape: f32[3,32,64], index: 11, kind: input, shape index: {}]   ;;  %s20955_s12 = inlined_call_operand.vmem [shape: f32[3,64,32], index: 12, kind: input, shape index: {}]   ;;  %s20956_s4 = inlined_call_operand.vmem [shape: s32[12,1], index: 4, kind: input, shape index: {}]   ;;  %s20957_s5 = inlined_call_operand.vmem [shape: f32[12,1], index: 5, kind: input, shape index: {}]   ;;  %s20958_s14 = inlined_call_operand.vmem [shape: f32[40,16], index: 14, kind: input, shape index: {}]   ;;  %s20959_s15 = inlined_call_operand.vmem [shape: f32[8,128], index: 15, kind: output, shape index: {}]  }
   0x1   :  { %17451 = vset.pattern.permute.xlu1 %v17719_v0  ;;  %17450 = vset.pattern.permute.xlu0 %v17719_v0  ;;  %v53_v1 = vld [vmem:[%s20944_s2 + $0x10] sm:$0xff]  ;;  %v51_v2 = vld [vmem:[%s20944_s2] sm:$0xff]  ;;  %v54_v3 = vld [vmem:[%s20944_s2 + $0x18] sm:$0xff]  ;;  %s17727_s25 = smov 64  }
   0x2   :  { %69 = vperm.xlu1 %17451, %v53_v1   ;;  %59 = vperm.xlu0 %17450, %v51_v2   ;;  %v52_v4 = vld [vmem:[%s20944_s2 + $0x8] sm:$0xff]  ;;  %v55_v6 = vld [vmem:[%s20944_s2 + $0x20] sm:$0xff]  ;;  %v17841_v12 = vshrl.u32 %v93_v9, 7  ;;  %v568_v14 = vld [vmem:[%s20945_s7 + $0x98] sm:$0xff] }
   0x3   :  { %v56_v5 = vld [vmem:[%s20944_s2 + $0x28] sm:$0xff]  ;;  %v565_v8 = vld [vmem:[%s20945_s7 + $0x80] sm:$0xff]  ;;  %v567_v15 = vld [vmem:[%s20945_s7 + $0x90] sm:$0xff]  ;;  %s17722_s2 = smov 120  }
   0x4   :  { %v566_v7 = vld [vmem:[%s20945_s7 + $0x88] sm:$0xff]  ;;  %v549_v11 = vld [vmem:[%s20945_s7] sm:$0xff]  ;;  %v552_v18 = vld [vmem:[%s20945_s7 + $0x18] sm:$0xff]  ;;  %v95_v1 = vadd.s32 8, %v17841_v12 }
   0x5   :  { %v550_v10 = vld [vmem:[%s20945_s7 + $0x8] sm:$0xff]  ;;  %v17846_v13 = vld [vmem:[%s20946_s0] ss:$0 sm:$0xff]  ;;  %v551_v19 = vld [vmem:[%s20945_s7 + $0x10] sm:$0xff] }
   0x6   :  { %74 = vperm.xlu1 %17451, %v54_v3   ;;  %64 = vperm.xlu0 %17450, %v52_v4   ;;  %vm131_vm0 = vcmp.eq.s32.totalorder %v17846_v13, %v17841_v12  ;;  %v570_v20 = vld [vmem:[%s20945_s7 + $0xa8] sm:$0xff]  ;;  %v569_v21 = vld [vmem:[%s20945_s7 + $0xa0] sm:$0xff]  ;;  %v572_v24 = vld [vmem:[%s20945_s7 + $0xb8] sm:$0xff]  ;;  %v96_v3 = vadd.s32 16, %v17841_v12  ;;  %vm132_vm2 = vcmp.eq.s32.totalorder %v17846_v13, %v95_v1 }
   0x7   :  { %v15506_v17 = vsel %vm131_vm0, 1.0, %v20960_v16  ;;  %v554_v22 = vld [vmem:[%s20945_s7 + $0x28] sm:$0xff]  ;;  %v553_v23 = vld [vmem:[%s20945_s7 + $0x20] sm:$0xff]  ;;  %v571_v25 = vld [vmem:[%s20945_s7 + $0xb0] sm:$0xff] }
   0x8   :  { %16382 = vmatprep.mubr.msk.f32.mxu0 %vm227_vm1, %v15506_v17  ;;  %v556_v26 = vld [vmem:[%s20945_s7 + $0x38] sm:$0xff]  ;;  %v555_v27 = vld [vmem:[%s20945_s7 + $0x30] sm:$0xff]  ;;  %v574_v28 = vld [vmem:[%s20945_s7 + $0xc8] sm:$0xff]  ;;  %vm133_vm3 = vcmp.eq.s32.totalorder %v17846_v13, %v96_v3  ;;  %v120_v3 = vadd.s32 208, %v17841_v12 }
   0x9   :  { %v573_v29 = vld [vmem:[%s20945_s7 + $0xc0] sm:$0xff]  ;;  %v558_v30 = vld [vmem:[%s20945_s7 + $0x48] sm:$0xff]  ;;  %v576_v32 = vld [vmem:[%s20945_s7 + $0xd8] sm:$0xff] }
   0xa   :  { %84 = vperm.xlu1 %17451, %v56_v5   ;;  %79 = vperm.xlu0 %17450, %v55_v6   ;;  %v557_v31 = vld [vmem:[%s20945_s7 + $0x40] sm:$0xff]  ;;  %v575_v33 = vld [vmem:[%s20945_s7 + $0xd0] sm:$0xff]  ;;  %v560_v34 = vld [vmem:[%s20945_s7 + $0x58] sm:$0xff]  ;;  %v97_v5 = vadd.s32 24, %v17841_v12 }
   0xb   :  { %v559_v35 = vld [vmem:[%s20945_s7 + $0x50] sm:$0xff]  ;;  %v578_v36 = vld [vmem:[%s20945_s7 + $0xe8] sm:$0xff]  ;;  %v577_v37 = vld [vmem:[%s20945_s7 + $0xe0] sm:$0xff] }
   0xc   :  { %v562_v38 = vld [vmem:[%s20945_s7 + $0x68] sm:$0xff]  ;;  %v561_v39 = vld [vmem:[%s20945_s7 + $0x60] sm:$0xff]  ;;  %v580_v40 = vld [vmem:[%s20945_s7 + $0xf8] sm:$0xff]  ;;  %vm134_vm4 = vcmp.eq.s32.totalorder %v17846_v13, %v97_v5 }
   0xd   :  { %v579_v41 = vld [vmem:[%s20945_s7 + $0xf0] sm:$0xff]  ;;  %v564_v42 = vld [vmem:[%s20945_s7 + $0x78] sm:$0xff]  ;;  %v841_v44 = vld [vmem:[%s20947_s1 + $0x8] sm:$0xff]  ;;  %v15509_v17 = vsel %vm134_vm4, 1.0, %v20960_v16 }
   0xe   :  { %668 = vperm.xlu1 %17451, %v566_v7   ;;  %663 = vperm.xlu0 %17450, %v565_v8   ;;  %v563_v43 = vld [vmem:[%s20945_s7 + $0x70] sm:$0xff]  ;;  %v840_v45 = vld [vmem:[%s20947_s1] sm:$0xff]  ;;  %v843_v46 = vld [vmem:[%s20947_s1 + $0x18] sm:$0xff]  ;;  %v98_v7 = vadd.s32 32, %v17841_v12  ;;  %v15507_v8 = vsel %vm132_vm2, 1.0, %v20960_v16 }
   0xf   :  { %v842_v47 = vld [vmem:[%s20947_s1 + $0x10] sm:$0xff]  ;;  %v845_v48 = vld [vmem:[%s20947_s1 + $0x28] sm:$0xff]  ;;  %v844_v49 = vld [vmem:[%s20947_s1 + $0x20] sm:$0xff]  ;;  %s17726_s1 = smov 96  }
  0x10   :  { %v50_v52 = vld [vmem:[%s20948_s8] sm:$0xff]  ;;  %vm135_vm5 = vcmp.eq.s32.totalorder %v17846_v13, %v98_v7  ;;  %v121_v7 = vadd.s32 216, %v17841_v12 }
  0x12   :  { %588 = vperm.xlu1 %17451, %v550_v10   ;;  %583 = vperm.xlu0 %17450, %v549_v11   ;;  %v15508_v10 = vsel %vm133_vm3, 1.0, %v20960_v16  ;;  %v99_v11 = vadd.s32 40, %v17841_v12 }
  0x14   :  { %vm136_vm6 = vcmp.eq.s32.totalorder %v17846_v13, %v99_v11 }
  0x16   :  { %678 = vperm.xlu1 %17451, %v568_v14   ;;  %673 = vperm.xlu0 %17450, %v567_v15   ;;  %v100_v15 = vadd.s32 48, %v17841_v12 }
  0x18   :  { %vm137_vm7 = vcmp.eq.s32.totalorder %v17846_v13, %v100_v15 }
  0x1a   :  { %598 = vperm.xlu1 %17451, %v552_v18   ;;  %593 = vperm.xlu0 %17450, %v551_v19   ;;  %v15510_v18 = vsel %vm135_vm5, 1.0, %v20960_v16  ;;  %v101_v19 = vadd.s32 56, %v17841_v12 }
  0x1c   :  { %vm138_vm8 = vcmp.eq.s32.totalorder %v17846_v13, %v101_v19  ;;  %v124_v19 = vadd.s32 240, %v17841_v12 }
  0x1e   :  { %688 = vperm.xlu1 %17451, %v570_v20   ;;  %683 = vperm.xlu0 %17450, %v569_v21   ;;  %v102_v21 = vadd.s32 64, %v17841_v12 }
  0x20   :  { %vm139_vm9 = vcmp.eq.s32.totalorder %v17846_v13, %v102_v21  ;;  %v18098_v21 = vand.u32 127, %v93_v9 }
  0x22   :  { %608 = vperm.xlu1 %17451, %v554_v22   ;;  %603 = vperm.xlu0 %17450, %v553_v23   ;;  %v15511_v22 = vsel %vm136_vm6, 1.0, %v20960_v16  ;;  %v15512_v23 = vsel %vm137_vm7, 1.0, %v20960_v16  ;;  %20969 = vst [vmem:[#allocation2_spill] sm:$0xff] %v18098_v21 }
  0x26   :  { %698 = vperm.xlu1 %17451, %v572_v24   ;;  %693 = vperm.xlu0 %17450, %v571_v25   ;;  %v103_v24 = vadd.s32 72, %v17841_v12 }
  0x28   :  { %vm140_vm10 = vcmp.eq.s32.totalorder %v17846_v13, %v103_v24  ;;  %v125_v24 = vadd.s32 248, %v17841_v12 }
  0x2a   :  { %618 = vperm.xlu1 %17451, %v556_v26   ;;  %613 = vperm.xlu0 %17450, %v555_v27   ;;  %v104_v26 = vadd.s32 80, %v17841_v12  ;;  %v15513_v27 = vsel %vm138_vm8, 1.0, %v20960_v16 }
  0x2c   :  { %vm141_vm11 = vcmp.eq.s32.totalorder %v17846_v13, %v104_v26 }
  0x2e   :  { %708 = vperm.xlu1 %17451, %v574_v28   ;;  %703 = vperm.xlu0 %17450, %v573_v29   ;;  %v15514_v28 = vsel %vm139_vm9, 1.0, %v20960_v16  ;;  %v105_v29 = vadd.s32 88, %v17841_v12 }
  0x30   :  { %vm142_vm12 = vcmp.eq.s32.totalorder %v17846_v13, %v105_v29 }
  0x32   :  { %628 = vperm.xlu1 %17451, %v558_v30   ;;  %623 = vperm.xlu0 %17450, %v557_v31   ;;  %v106_v31 = vadd.s32 96, %v17841_v12 }
  0x34   :  { %vm143_vm13 = vcmp.eq.s32.totalorder %v17846_v13, %v106_v31  ;;  %v17721_v31 = vmov 1.0  }
  0x36   :  { %718 = vperm.xlu1 %17451, %v576_v32   ;;  %713 = vperm.xlu0 %17450, %v575_v33   ;;  %v15515_v32 = vsel %vm140_vm10, 1.0, %v20960_v16  ;;  %v15516_v33 = vsel %vm141_vm11, 1.0, %v20960_v16 }
  0x3a   :  { %638 = vperm.xlu1 %17451, %v560_v34   ;;  %633 = vperm.xlu0 %17450, %v559_v35   ;;  %v107_v34 = vadd.s32 104, %v17841_v12 }
  0x3c   :  { %vm144_vm14 = vcmp.eq.s32.totalorder %v17846_v13, %v107_v34 }
  0x3e   :  { %728 = vperm.xlu1 %17451, %v578_v36   ;;  %723 = vperm.xlu0 %17450, %v577_v37   ;;  %v108_v36 = vadd.s32 112, %v17841_v12  ;;  %v15517_v37 = vsel %vm142_vm12, 1.0, %v20960_v16  ;;  %vm157_vm12 = vcmp.eq.s32.totalorder %v17846_v13, %v120_v3 }
  0x3f   :  { %v15532_v15 = vsel %vm157_vm12, 1.0, %v20960_v16 }
  0x40   :  { %vm145_vm15 = vcmp.eq.s32.totalorder %v17846_v13, %v108_v36 }
  0x42   :  { %648 = vperm.xlu1 %17451, %v562_v38   ;;  %643 = vperm.xlu0 %17450, %v561_v39   ;;  %v15518_v38 = vsel %vm143_vm13, 1.0, %v20960_v16  ;;  %v109_v39 = vadd.s32 120, %v17841_v12  ;;  %vm158_vm13 = vcmp.eq.s32.totalorder %v17846_v13, %v121_v7 }
  0x44   :  { %vm146_vm0 = vcmp.eq.s32.totalorder %v17846_v13, %v109_v39 }
  0x46   :  { %738 = vperm.xlu1 %17451, %v580_v40   ;;  %733 = vperm.xlu0 %17450, %v579_v41   ;;  %v110_v41 = vadd.s32 128, %v17841_v12 }
  0x48   :  { %vm147_vm2 = vcmp.eq.s32.totalorder %v17846_v13, %v110_v41 }
  0x4a   :  { %658 = vperm.xlu1 %17451, %v564_v42   ;;  %653 = vperm.xlu0 %17450, %v563_v43   ;;  %v15519_v42 = vsel %vm144_vm14, 1.0, %v20960_v16  ;;  %v15520_v43 = vsel %vm145_vm15, 1.0, %v20960_v16 }
  0x4e   :  { %850 = vperm.xlu1 %17451, %v841_v44   ;;  %847 = vperm.xlu0 %17450, %v840_v45   ;;  %v111_v44 = vadd.s32 136, %v17841_v12 }
  0x50   :  { %vm148_vm3 = vcmp.eq.s32.totalorder %v17846_v13, %v111_v44 }
  0x52   :  { %856 = vperm.xlu1 %17451, %v843_v46   ;;  %853 = vperm.xlu0 %17450, %v842_v47   ;;  %v112_v46 = vadd.s32 144, %v17841_v12  ;;  %v15521_v47 = vsel %vm146_vm0, 1.0, %v20960_v16  ;;  %vm161_vm0 = vcmp.eq.s32.totalorder %v17846_v13, %v124_v19 }
  0x54   :  { %vm149_vm4 = vcmp.eq.s32.totalorder %v17846_v13, %v112_v46 }
  0x56   :  { %862 = vperm.xlu1 %17451, %v845_v48   ;;  %859 = vperm.xlu0 %17450, %v844_v49   ;;  %v15522_v48 = vsel %vm147_vm2, 1.0, %v20960_v16  ;;  %v113_v49 = vadd.s32 152, %v17841_v12  ;;  %vm162_vm2 = vcmp.eq.s32.totalorder %v17846_v13, %v125_v24  ;;  %v780_v24 = vld [vmem:[%s20949_s6 + $0x38] sm:$0xff] }
  0x58   :  { %vm150_vm5 = vcmp.eq.s32.totalorder %v17846_v13, %v113_v49 }
  0x81   :  { %v70_v50 = vpop.permute.xlu1 %69  ;;  %v60_v51 = vpop.permute.xlu0 %59 }
  0x82   :  { %v89_v55 = vmul.f32 %v70_v50, %v50_v52  ;;  %v87_v56 = vmul.f32 %v60_v51, %v50_v52  ;;  %v114_v51 = vadd.s32 160, %v17841_v12 }
  0x84   :  { %vm151_vm6 = vcmp.eq.s32.totalorder %v17846_v13, %v114_v51  ;;  %v773_v51 = vld [vmem:[%s20949_s6] sm:$0xff] }
  0x85   :  { %v75_v53 = vpop.permute.xlu1 %74  ;;  %v65_v54 = vpop.permute.xlu0 %64 }
  0x86   :  { %v90_v57 = vmul.f32 %v75_v53, %v50_v52  ;;  %v88_v58 = vmul.f32 %v65_v54, %v50_v52  ;;  %v15524_v53 = vsel %vm149_vm4, 1.0, %v20960_v16  ;;  %v115_v54 = vadd.s32 168, %v17841_v12 }
  0x88   :  { %v17241_v59 = vpack.c.bf16 %v88_v58, %v87_v56  ;;  %v17245_v62 = vpack.c.bf16 %v90_v57, %v89_v55  ;;  %v116_v56 = vadd.s32 176, %v17841_v12  ;;  %v15525_v57 = vsel %vm150_vm5, 1.0, %v20960_v16 }
  0x89   :  { %v85_v60 = vpop.permute.xlu1 %84  ;;  %v80_v61 = vpop.permute.xlu0 %79  ;;  %v15526_v58 = vsel %vm151_vm6, 1.0, %v20960_v16  ;;  %vm152_vm7 = vcmp.eq.s32.totalorder %v17846_v13, %v115_v54 }
  0x8a   :  { %v92_v63 = vmul.f32 %v85_v60, %v50_v52  ;;  %v91_v0 = vmul.f32 %v80_v61, %v50_v52  ;;  %17242 = vmatprep.subr.bf16.mxu0 %v17241_v59  ;;  %v15523_v52 = vsel %vm148_vm3, 1.0, %v20960_v16  ;;  %vm153_vm8 = vcmp.eq.s32.totalorder %v17846_v13, %v116_v56 }
  0x8b   :  { %17244 = vmatpush3.bf16.msra.mxu0 %v17241_v59  ;;  %v117_v59 = vadd.s32 184, %v17841_v12  ;;  %v118_v61 = vadd.s32 192, %v17841_v12 }
  0x8c   :  { %17246 = vmatprep.subr.bf16.mxu0 %v17245_v62  ;;  %v17249_v4 = vpack.c.bf16 %v92_v63, %v91_v0  ;;  %v15528_v63 = vsel %vm153_vm8, 1.0, %v20960_v16  ;;  %v119_v0 = vadd.s32 200, %v17841_v12 }
  0x8d   :  { %v17958_v2 = vpop.permute.xlu0 %663  ;;  %vm154_vm9 = vcmp.eq.s32.totalorder %v17846_v13, %v117_v59  ;;  %vm155_vm10 = vcmp.eq.s32.totalorder %v17846_v13, %v118_v61 }
  0x8e   :  { %v15530_v5 = vsel %vm155_vm10, 1.0, %v20960_v16  ;;  %vm156_vm11 = vcmp.eq.s32.totalorder %v17846_v13, %v119_v0 }
  0x8f   :  { %17248 = vmatpush3.bf16.msra.mxu0 %v17245_v62  ;;  %v15527_v62 = vsel %vm152_vm7, 1.0, %v20960_v16  ;;  %v15531_v11 = vsel %vm156_vm11, 1.0, %v20960_v16 }
  0x90   :  { %17250 = vmatprep.subr.bf16.mxu0 %v17249_v4 }
  0x91   :  { %v17963_v6 = vpop.permute.xlu0 %583 }
  0x93   :  { %17252 = vmatpush3.bf16.msra.mxu0 %v17249_v4  ;;  %v15529_v4 = vsel %vm154_vm9, 1.0, %v20960_v16 }
  0x94   :  { %16457 = vmatprep.subr.mxu0 %v20960_v16 }
  0x95   :  { %v17972_v14 = vpop.permute.xlu0 %673 }
  0x96   :  { %16383 = vmatmul.mubr.msk.f32.vlgmr.msra.gmra.mrb[0].mxu0 %vm227_vm1, %v15507_v8 }
  0x97   :  { %16385 = vmatprep.mubr.msk.f32.mxu0 %vm227_vm1, %v15508_v10  ;;  %v122_v10 = vadd.s32 224, %v17841_v12 }
  0x99   :  { %v17982_v20 = vpop.permute.xlu0 %593  ;;  %vm159_vm14 = vcmp.eq.s32.totalorder %v17846_v13, %v122_v10 }
  0x9a   :  { %16386 = vmatmul.mubr.msk.f32.gmra.mrb[2].mxu0 %vm227_vm1, %v15509_v17  ;;  %v123_v17 = vadd.s32 232, %v17841_v12 }
  0x9b   :  { %16388 = vmatprep.mubr.msk.f32.mxu0 %vm227_vm1, %v15510_v18 }
  0x9c   :  { %vm160_vm15 = vcmp.eq.s32.totalorder %v17846_v13, %v123_v17 }
  0x9d   :  { %v17992_v25 = vpop.permute.xlu0 %683  ;;  %v15535_v9 = vsel %vm160_vm15, 1.0, %v20960_v16  ;;  %vm1071_vm15 = vcmask 261120  }
  0x9e   :  { %16389 = vmatmul.mubr.msk.f32.gmra.mrb[4].mxu0 %vm227_vm1, %v15511_v22  ;;  %v15533_v22 = vsel %vm158_vm13, 1.0, %v20960_v16 }
  0x9f   :  { %16391 = vmatprep.mubr.msk.f32.mxu0 %vm227_vm1, %v15512_v23  ;;  %v15534_v23 = vsel %vm159_vm14, 1.0, %v20960_v16 }
  0xa1   :  { %v18002_v30 = vpop.permute.xlu0 %603 }
  0xa2   :  { %16392 = vmatmul.mubr.msk.f32.gmra.mrb[6].mxu0 %vm227_vm1, %v15513_v27  ;;  %v18110_v27 = vadd.s32 128, %v18098_v21 }
  0xa3   :  { %16394 = vmatprep.mubr.msk.f32.mxu0 %vm227_vm1, %v15514_v28  ;;  %v15536_v28 = vsel %vm161_vm0, 1.0, %v20960_v16  ;;  %vm17725_vm0 = vmmov 0  }
  0xa5   :  { %v18012_v35 = vpop.permute.xlu0 %693 }
  0xa6   :  { %16395 = vmatmul.mubr.msk.f32.gmra.mrb[8].mxu0 %vm227_vm1, %v15515_v32  ;;  %v15537_v32 = vsel %vm162_vm2, 1.0, %v20960_v16  ;;  %vm1229_vm2 = vcmask 64512  }
  0xa7   :  { %16397 = vmatprep.mubr.msk.f32.mxu0 %vm227_vm1, %v15516_v33  ;;  %v18125_v33 = vpop.permute.xlu1 %668 }
  0xa9   :  { %v18022_v40 = vpop.permute.xlu0 %613 }
  0xaa   :  { %16398 = vmatmul.mubr.msk.f32.gmra.mrb[10].mxu0 %vm227_vm1, %v15517_v37 }
  0xab   :  { %16400 = vmatprep.mubr.msk.f32.mxu0 %vm227_vm1, %v15518_v38  ;;  %v589_v34 = vpop.permute.xlu1 %588 }
  0xad   :  { %v18032_v45 = vpop.permute.xlu0 %703 }
  0xae   :  { %16401 = vmatmul.mubr.msk.f32.gmra.mrb[12].mxu0 %vm227_vm1, %v15519_v42 }
  0xaf   :  { %16403 = vmatprep.mubr.msk.f32.mxu0 %vm227_vm1, %v15520_v43  ;;  %v18127_v13 = vpop.permute.xlu1 %678 }
  0xb1   :  { %v18042_v50 = vpop.permute.xlu0 %623 }
  0xb2   :  { %16404 = vmatmul.mubr.msk.f32.gmra.mrb[14].mxu0 %vm227_vm1, %v15521_v47  ;;  %v774_v47 = vld [vmem:[%s20949_s6 + $0x8] sm:$0xff] }
  0xb3   :  { %16406 = vmatprep.mubr.msk.f32.mxu0 %vm227_vm1, %v15522_v48  ;;  %v599_v36 = vpop.permute.xlu1 %598 }
  0xb5   :  { %v18052_v55 = vpop.permute.xlu0 %713 }
  0xb6   :  { %16407 = vmatmul.mubr.msk.f32.gmra.mrb[16].mxu0 %vm227_vm1, %v15523_v52 }
  0xb7   :  { %16409 = vmatprep.mubr.msk.f32.mxu0 %vm227_vm1, %v15524_v53  ;;  %v18129_v37 = vpop.permute.xlu1 %688 }
  0xb9   :  { %v18062_v60 = vpop.permute.xlu0 %633 }
  0xba   :  { %16410 = vmatmul.mubr.msk.f32.gmra.mrb[18].mxu0 %vm227_vm1, %v15525_v57 }
  0xbb   :  { %16412 = vmatprep.mubr.msk.f32.mxu0 %vm227_vm1, %v15526_v58  ;;  %v609_v38 = vpop.permute.xlu1 %608  ;;  %v776_v58 = vld [vmem:[%s20949_s6 + $0x18] sm:$0xff] }
  0xbd   :  { %v18072_v1 = vpop.permute.xlu0 %723 }
  0xbe   :  { %16413 = vmatmul.mubr.msk.f32.gmra.mrb[20].mxu0 %vm227_vm1, %v15527_v62  ;;  %v775_v62 = vld [vmem:[%s20949_s6 + $0x10] sm:$0xff] }
  0xbf   :  { %16415 = vmatprep.mubr.msk.f32.mxu0 %vm227_vm1, %v15528_v63  ;;  %v18131_v39 = vpop.permute.xlu1 %698 }
  0xc1   :  { %v18082_v8 = vpop.permute.xlu0 %643 }
  0xc2   :  { %16416 = vmatmul.mubr.msk.f32.gmra.mrb[22].mxu0 %vm227_vm1, %v15529_v4 }
  0xc3   :  { %16418 = vmatprep.mubr.msk.f32.mxu0 %vm227_vm1, %v15530_v5  ;;  %v619_v41 = vpop.permute.xlu1 %618  ;;  %v778_v5 = vld [vmem:[%s20949_s6 + $0x28] sm:$0xff] }
  0xc5   :  { %v18092_v18 = vpop.permute.xlu0 %733 }
  0xc6   :  { %16419 = vmatmul.mubr.msk.f32.gmra.mrb[24].mxu0 %vm227_vm1, %v15531_v11  ;;  %v777_v11 = vld [vmem:[%s20949_s6 + $0x20] sm:$0xff] }
  0xc7   :  { %16421 = vmatprep.mubr.msk.f32.mxu0 %vm227_vm1, %v15532_v15  ;;  %v18133_v42 = vpop.permute.xlu1 %708 }
  0xc9   :  { %v18105_v26 = vpop.permute.xlu0 %653 }
  0xca   :  { %16422 = vmatmul.mubr.msk.f32.gmra.mrb[26].mxu0 %vm227_vm1, %v15533_v22 }
  0xcb   :  { %16424 = vmatprep.mubr.msk.f32.mxu0 %vm227_vm1, %v15534_v23  ;;  %v629_v43 = vpop.permute.xlu1 %628 }
  0xcd   :  { %v18116_v29 = vpop.permute.xlu0 %847 }
  0xce   :  { %16425 = vmatmul.mubr.msk.f32.gmra.mrb[28].mxu0 %vm227_vm1, %v15535_v9  ;;  %vm865_vm3 = vcmp.eq.s32.totalorder %v18116_v29, %v18110_v27  ;;  %vm864_vm4 = vcmp.eq.s32.totalorder %v18116_v29, %v18098_v21 }
  0xcf   :  { %15582 = vmatprep.mubr.msk.f32.mxu1 %vm865_vm3, %v17721_v31  ;;  %16427 = vmatprep.mubr.msk.f32.mxu0 %vm227_vm1, %v15536_v28  ;;  %v18135_v44 = vpop.permute.xlu1 %718  ;;  %vm5926_vm3 = vcmask 523264  }
  0xd2   :  { %16428 = vmatmul.mubr.msk.f32.gmra.mrb[30].mxu0 %vm227_vm1, %v15537_v32  ;;  %v779_v32 = vld [vmem:[%s20949_s6 + $0x30] sm:$0xff] }
  0xd3   :  { %v639_v54 = vpop.permute.xlu1 %638  ;;  %16459 = vmatprep.mubr.msk.f32.mxu0 %vm17725_vm0, %v20960_v16 }
  0xd7   :  { %v18167_v15 = vpop.permute.xlu1 %728 }
 0x169   :  { %v16384_v46 = vpop.f32.mrb[0].mxu0 }
 0x16a   :  { %v742_v48 = vmul.f32 %v16384_v46, %v589_v34  ;;  %v390_v49 = vpop.f32.mrb[1].mxu0 }
 0x16b   :  { %v741_v52 = vmul.f32 %v17963_v6, %v390_v49 }
 0x16c   :  { %v18144_v53 = vadd.f32 %v774_v47, %v742_v48 }
 0x16d   :  { %v18146_v56 = vadd.f32 %v773_v51, %v741_v52  ;;  %v16387_v57 = vpop.f32.mrb[2].mxu0  ;;  %v781_v51 = vld [vmem:[%s20949_s6 + $0x40] sm:$0xff] }
 0x16e   :  { %v744_v59 = vmul.f32 %v16387_v57, %v599_v36  ;;  %v400_v61 = vpop.f32.mrb[3].mxu0 }
 0x16f   :  { %v743_v63 = vmul.f32 %v17982_v20, %v400_v61  ;;  %v17255_v6 = vpack.c.bf16 %v18144_v53, %v18146_v56  ;;  %v784_v61 = vld [vmem:[%s20949_s6 + $0x58] sm:$0xff] }
 0x170   :  { %v18157_v0 = vadd.f32 %v776_v58, %v744_v59 }
 0x171   :  { %v18159_v3 = vadd.f32 %v775_v62, %v743_v63  ;;  %v16390_v4 = vpop.f32.mrb[4].mxu0  ;;  %v783_v63 = vld [vmem:[%s20949_s6 + $0x50] sm:$0xff] }
 0x172   :  { %v746_v7 = vmul.f32 %v16390_v4, %v609_v38  ;;  %v410_v10 = vpop.f32.mrb[5].mxu0  ;;  %v649_v38 = vpop.permute.xlu1 %648 }
 0x173   :  { %v745_v20 = vmul.f32 %v18002_v30, %v410_v10  ;;  %v17259_v17 = vpack.c.bf16 %v18157_v0, %v18159_v3 }
 0x174   :  { %v18172_v19 = vadd.f32 %v778_v5, %v746_v7 }
 0x175   :  { %v18174_v22 = vadd.f32 %v777_v11, %v745_v20  ;;  %v16393_v23 = vpop.f32.mrb[6].mxu0 }
 0x176   :  { %v748_v9 = vmul.f32 %v16393_v23, %v619_v41  ;;  %v420_v28 = vpop.f32.mrb[7].mxu0  ;;  %v782_v41 = vld [vmem:[%s20949_s6 + $0x48] sm:$0xff]  ;;  %v18208_v4 = vpop.permute.xlu1 %738 }
 0x177   :  { %v747_v30 = vmul.f32 %v18022_v40, %v420_v28  ;;  %v17263_v34 = vpack.c.bf16 %v18172_v19, %v18174_v22 }
 0x178   :  { %v18185_v36 = vadd.f32 %v780_v24, %v748_v9  ;;  %v785_v24 = vld [vmem:[%s20949_s6 + $0x60] sm:$0xff] }
 0x179   :  { %v18187_v46 = vadd.f32 %v779_v32, %v747_v30  ;;  %v16396_v47 = vpop.f32.mrb[8].mxu0 }
 0x17a   :  { %v750_v48 = vmul.f32 %v16396_v47, %v629_v43  ;;  %v430_v49 = vpop.f32.mrb[9].mxu0  ;;  %v659_v32 = vpop.permute.xlu1 %658 }
 0x17b   :  { %v749_v40 = vmul.f32 %v18042_v50, %v430_v49  ;;  %v17267_v52 = vpack.c.bf16 %v18185_v36, %v18187_v46  ;;  %v787_v49 = vld [vmem:[%s20949_s6 + $0x70] sm:$0xff] }
 0x17c   :  { %v18198_v57 = vadd.f32 %v782_v41, %v750_v48 }
 0x17d   :  { %v18200_v58 = vadd.f32 %v781_v51, %v749_v40  ;;  %v16399_v59 = vpop.f32.mrb[10].mxu0 }
 0x17e   :  { %v752_v43 = vmul.f32 %v16399_v59, %v639_v54  ;;  %v440_v62 = vpop.f32.mrb[11].mxu0  ;;  %v786_v54 = vld [vmem:[%s20949_s6 + $0x68] sm:$0xff] }
 0x17f   :  { %v751_v50 = vmul.f32 %v18062_v60, %v440_v62  ;;  %v17271_v5 = vpack.c.bf16 %v18198_v57, %v18200_v58 }
 0x180   :  { %v18213_v7 = vadd.f32 %v784_v61, %v752_v43  ;;  %v790_v43 = vld [vmem:[%s20949_s6 + $0x88] sm:$0xff] }
 0x181   :  { %v18215_v10 = vadd.f32 %v783_v63, %v751_v50  ;;  %v16402_v11 = vpop.f32.mrb[12].mxu0  ;;  %v789_v50 = vld [vmem:[%s20949_s6 + $0x80] sm:$0xff] }
 0x182   :  { %v754_v20 = vmul.f32 %v16402_v11, %v649_v38  ;;  %v450_v23 = vpop.f32.mrb[13].mxu0  ;;  %v788_v38 = vld [vmem:[%s20949_s6 + $0x78] sm:$0xff] }
 0x183   :  { %v753_v60 = vmul.f32 %v18082_v8, %v450_v23  ;;  %v17275_v9 = vpack.c.bf16 %v18213_v7, %v18215_v10  ;;  %v792_v23 = vld [vmem:[%s20949_s6 + $0x98] sm:$0xff] }
 0x184   :  { %v18226_v28 = vadd.f32 %v786_v54, %v754_v20 }
 0x185   :  { %v18228_v30 = vadd.f32 %v785_v24, %v753_v60  ;;  %v16405_v47 = vpop.f32.mrb[14].mxu0 }
 0x186   :  { %v756_v41 = vmul.f32 %v16405_v47, %v659_v32  ;;  %v460_v48 = vpop.f32.mrb[15].mxu0  ;;  %v791_v32 = vld [vmem:[%s20949_s6 + $0x90] sm:$0xff] }
 0x187   :  { %v755_v8 = vmul.f32 %v18105_v26, %v460_v48  ;;  %v17279_v51 = vpack.c.bf16 %v18226_v28, %v18228_v30 }
 0x188   :  { %v18239_v40 = vadd.f32 %v788_v38, %v756_v41 }
 0x189   :  { %v18241_v59 = vadd.f32 %v787_v49, %v755_v8  ;;  %v16408_v61 = vpop.f32.mrb[16].mxu0  ;;  %v794_v49 = vld [vmem:[%s20949_s6 + $0xa8] sm:$0xff] }
 0x18a   :  { %v758_v62 = vmul.f32 %v16408_v61, %v18125_v33  ;;  %v470_v63 = vpop.f32.mrb[17].mxu0 }
 0x18b   :  { %v757_v26 = vmul.f32 %v17958_v2, %v470_v63  ;;  %v17283_v11 = vpack.c.bf16 %v18239_v40, %v18241_v59  ;;  %v1049_v40 = vld [vmem:[%s20950_s9 + $0x18] sm:$0xff] }
 0x18c   :  { %v822_v54 = vadd.f32 %v790_v43, %v758_v62 }
 0x18d   :  { %v16411_v20 = vpop.f32.mrb[18].mxu0  ;;  %v821_v24 = vadd.f32 %v789_v50, %v757_v26  ;;  %v796_v26 = vld [vmem:[%s20949_s6 + $0xb8] sm:$0xff] }
 0x18e   :  { %v760_v60 = vmul.f32 %v16411_v20, %v18127_v13  ;;  %v480_v33 = vpop.f32.mrb[19].mxu0  ;;  %v793_v13 = vld [vmem:[%s20949_s6 + $0xa0] sm:$0xff]  ;;  %v795_v20 = vld [vmem:[%s20949_s6 + $0xb0] sm:$0xff] }
 0x18f   :  { %v759_v47 = vmul.f32 %v17972_v14, %v480_v33  ;;  %v17253_v2 = vpack.c.bf16 %v822_v54, %v821_v24  ;;  %v798_v24 = vld [vmem:[%s20949_s6 + $0xc8] sm:$0xff]  ;;  %v797_v33 = vld [vmem:[%s20949_s6 + $0xc0] sm:$0xff] }
 0x190   :  { %v824_v38 = vadd.f32 %v792_v23, %v760_v60 }
 0x191   :  { %v823_v41 = vadd.f32 %v791_v32, %v759_v47  ;;  %v16414_v48 = vpop.f32.mrb[20].mxu0  ;;  %17254 = vmatprep.subr.bf16.mxu1 %v17253_v2  ;;  %v800_v47 = vld [vmem:[%s20949_s6 + $0xd8] sm:$0xff] }
 0x192   :  { %v762_v8 = vmul.f32 %v16414_v48, %v18129_v37  ;;  %v490_v61 = vpop.f32.mrb[21].mxu0  ;;  %17256 = vmatpush3.bf16.msra.mxu1 %v17255_v6  ;;  %v802_v48 = vld [vmem:[%s20949_s6 + $0xe8] sm:$0xff] }
 0x193   :  { %v761_v14 = vmul.f32 %v17992_v25, %v490_v61  ;;  %v17257_v43 = vpack.c.bf16 %v824_v38, %v823_v41  ;;  %v799_v38 = vld [vmem:[%s20949_s6 + $0xd0] sm:$0xff] }
 0x194   :  { %v826_v62 = vadd.f32 %v794_v49, %v762_v8  ;;  %v801_v8 = vld [vmem:[%s20949_s6 + $0xe0] sm:$0xff] }
 0x195   :  { %v825_v63 = vadd.f32 %v793_v13, %v761_v14  ;;  %v16417_v50 = vpop.f32.mrb[22].mxu0  ;;  %17258 = vmatprep.subr.bf16.mxu1 %v17257_v43  ;;  %v804_v13 = vld [vmem:[%s20949_s6 + $0xf8] sm:$0xff]  ;;  %v803_v43 = vld [vmem:[%s20949_s6 + $0xf0] sm:$0xff] }
 0x196   :  { %v764_v37 = vmul.f32 %v16417_v50, %v18131_v39  ;;  %v500_v54 = vpop.f32.mrb[23].mxu0  ;;  %17260 = vmatpush3.bf16.msra.mxu1 %v17259_v17 }
 0x197   :  { %v763_v25 = vmul.f32 %v18012_v35, %v500_v54  ;;  %v17261_v53 = vpack.c.bf16 %v826_v62, %v825_v63 }
 0x198   :  { %v828_v56 = vadd.f32 %v796_v26, %v764_v37 }
 0x199   :  { %v827_v6 = vadd.f32 %v795_v20, %v763_v25  ;;  %v16420_v23 = vpop.f32.mrb[24].mxu0  ;;  %17262 = vmatprep.subr.bf16.mxu1 %v17261_v53 }
 0x19a   :  { %v766_v39 = vmul.f32 %v16420_v23, %v18133_v42  ;;  %v510_v60 = vpop.f32.mrb[25].mxu0  ;;  %17264 = vmatpush3.bf16.msra.mxu1 %v17263_v34 }
 0x19b   :  { %v765_v35 = vmul.f32 %v18032_v45, %v510_v60  ;;  %v17265_v0 = vpack.c.bf16 %v828_v56, %v827_v6 }
 0x19c   :  { %v830_v3 = vadd.f32 %v798_v24, %v766_v39 }
 0x19d   :  { %v829_v17 = vadd.f32 %v797_v33, %v765_v35  ;;  %v16423_v32 = vpop.f32.mrb[26].mxu0  ;;  %17266 = vmatprep.subr.bf16.mxu1 %v17265_v0  ;;  %v18394_v35 = vsub.s32 0, %v17841_v12  ;;  %v1066_v0 = vld [vmem:[%s20951_s13] sm:$0xff] }
 0x19e   :  { %v768_v42 = vmul.f32 %v16423_v32, %v18135_v44  ;;  %v520_v2 = vpop.f32.mrb[27].mxu0  ;;  %17268 = vmatpush3.bf16.msra.mxu1 %v17267_v52 }
 0x19f   :  { %v767_v45 = vmul.f32 %v18052_v55, %v520_v2  ;;  %v17269_v19 = vpack.c.bf16 %v830_v3, %v829_v17  ;;  %20971 = vst [vmem:[#allocation4_spill] sm:$0xff] %v18394_v35  ;;  %v1070_v3 = vrot.slane %v1066_v0, %v18394_v35 }
 0x1a0   :  { %v832_v22 = vadd.f32 %v800_v47, %v768_v42 }
 0x1a1   :  { %v831_v34 = vadd.f32 %v799_v38, %v767_v45  ;;  %v16426_v41 = vpop.f32.mrb[28].mxu0  ;;  %17270 = vmatprep.subr.bf16.mxu1 %v17269_v19 }
 0x1a2   :  { %v770_v44 = vmul.f32 %v16426_v41, %v18167_v15  ;;  %v530_v49 = vpop.f32.mrb[29].mxu0  ;;  %17272 = vmatpush3.bf16.msra.mxu1 %v17271_v5  ;;  %v1046_v5 = vld [vmem:[%s20950_s9] sm:$0xff] }
 0x1a3   :  { %v769_v55 = vmul.f32 %v18072_v1, %v530_v49  ;;  %v17273_v36 = vpack.c.bf16 %v832_v22, %v831_v34 }
 0x1a4   :  { %v834_v46 = vadd.f32 %v802_v48, %v770_v44 }
 0x1a5   :  { %v833_v52 = vadd.f32 %v801_v8, %v769_v55  ;;  %v16429_v61 = vpop.f32.mrb[30].mxu0  ;;  %17274 = vmatprep.subr.bf16.mxu1 %v17273_v36 }
 0x1a6   :  { %v772_v15 = vmul.f32 %v16429_v61, %v18208_v4  ;;  %v540_v14 = vpop.f32.mrb[31].mxu0  ;;  %17276 = vmatpush3.bf16.msra.mxu1 %v17275_v9  ;;  %v1047_v4 = vld [vmem:[%s20950_s9 + $0x8] sm:$0xff]  ;;  %v854_v9 = vpop.permute.xlu0 %853 }
 0x1a7   :  { %v771_v1 = vmul.f32 %v18092_v18, %v540_v14  ;;  %v17277_v57 = vpack.c.bf16 %v834_v46, %v833_v52  ;;  %v17285_v10 = vpack.c.bf16 %v1047_v4, %v1046_v5  ;;  %v851_v18 = vpop.permute.xlu1 %850  ;;  %vm869_vm7 = vcmp.eq.s32.totalorder %v854_v9, %v18110_v27 }
 0x1a8   :  { %v836_v58 = vadd.f32 %v804_v13, %v772_v15  ;;  %vm867_vm5 = vcmp.eq.s32.totalorder %v851_v18, %v18110_v27  ;;  %vm866_vm6 = vcmp.eq.s32.totalorder %v851_v18, %v18098_v21  ;;  %vm868_vm8 = vcmp.eq.s32.totalorder %v854_v9, %v18098_v21 }
 0x1a9   :  { %v835_v62 = vadd.f32 %v803_v43, %v771_v1  ;;  %17278 = vmatprep.subr.bf16.mxu1 %v17277_v57 }
 0x1aa   :  { %17280 = vmatpush3.bf16.msra.mxu1 %v17279_v51  ;;  %v860_v29 = vpop.permute.xlu0 %859  ;;  %v1048_v51 = vld [vmem:[%s20950_s9 + $0x10] sm:$0xff] }
 0x1ab   :  { %v17281_v7 = vpack.c.bf16 %v836_v58, %v835_v62  ;;  %v857_v28 = vpop.permute.xlu1 %856  ;;  %vm873_vm11 = vcmp.eq.s32.totalorder %v860_v29, %v18110_v27  ;;  %vm872_vm12 = vcmp.eq.s32.totalorder %v860_v29, %v18098_v21  ;;  %v17289_v59 = vpack.c.bf16 %v1049_v40, %v1048_v51 }
 0x1ac   :  { %vm871_vm9 = vcmp.eq.s32.totalorder %v857_v28, %v18110_v27  ;;  %vm870_vm10 = vcmp.eq.s32.totalorder %v857_v28, %v18098_v21 }
 0x1ad   :  { %17282 = vmatprep.subr.bf16.mxu1 %v17281_v7 }
 0x1ae   :  { %17284 = vmatpush3.bf16.msra.mxu1 %v17283_v11 }
 0x1af   :  { %17286 = vmatprep.subr.bf16.mxu1 %v17285_v10  ;;  %v863_v30 = vpop.permute.xlu1 %862 }
 0x1b0   :  { %vm875_vm13 = vcmp.eq.s32.totalorder %v863_v30, %v18110_v27  ;;  %vm874_vm14 = vcmp.eq.s32.totalorder %v863_v30, %v18098_v21 }
 0x1b1   :  { %15583 = vmatmul.mubr.msk.f32.vlgmr.msra.gmra.mrb[0].mxu1 %vm864_vm4, %v17721_v31 }
 0x1b2   :  { %15584 = vmatprep.mubr.msk.f32.mxu1 %vm867_vm5, %v17721_v31  ;;  %17288 = vmatpush3.bf16.msra.mxu1 %v17285_v10 }
 0x1b3   :  { %17290 = vmatprep.subr.bf16.mxu1 %v17289_v59 }
 0x1b5   :  { %15585 = vmatmul.mubr.msk.f32.gmra.mrb[2].mxu1 %vm866_vm6, %v17721_v31  ;;  %vm8126_vm6 = vcmask 18432  }
 0x1b6   :  { %15586 = vmatprep.mubr.msk.f32.mxu1 %vm869_vm7, %v17721_v31  ;;  %17292 = vmatpush3.bf16.msra.mxu1 %v17289_v59  ;;  %vm8305_vm7 = vcmask 23552  }
 0x1b7   :  { %16447 = vmatprep.subr.mxu1 %v20960_v16 }
 0x1b9   :  { %15587 = vmatmul.mubr.msk.f32.gmra.mrb[4].mxu1 %vm868_vm8, %v17721_v31  ;;  %vm10546_vm8 = vcmask 257024  }
 0x1ba   :  { %15588 = vmatprep.mubr.msk.f32.mxu1 %vm871_vm9, %v17721_v31  ;;  %vm15487_vm9 = vcmask 125952  }
 0x1bd   :  { %15589 = vmatmul.mubr.msk.f32.gmra.mrb[6].mxu1 %vm870_vm10, %v17721_v31  ;;  %vm15496_vm10 = vcmask 7168  }
 0x1be   :  { %15590 = vmatprep.mubr.msk.f32.mxu1 %vm873_vm11, %v17721_v31  ;;  %vm15498_vm11 = vcmask 1043456  }
 0x1c1   :  { %15591 = vmatmul.mubr.msk.f32.gmra.mrb[8].mxu1 %vm872_vm12, %v17721_v31 }
 0x1c2   :  { %15592 = vmatprep.mubr.msk.f32.mxu1 %vm875_vm13, %v17721_v31 }
 0x1c5   :  { %15593 = vmatmul.mubr.msk.f32.gmra.mrb[10].mxu1 %vm874_vm14, %v17721_v31 }
 0x284   :  { %v15985_v27 = vpop.f32.mrb[0].mxu1 }
 0x285   :  { %v15986_v11 = vpop.f32.mrb[1].mxu1 }
 0x286   :  { %v18369_v63 = vadd.f32 %v15986_v11, %v15985_v27 }
 0x288   :  { %v15988_v50 = vpop.f32.mrb[2].mxu1  ;;  %16438 = vmatprep.mubr.msk.f32.mxu1 %vm1071_vm15, %v18369_v63 }
 0x289   :  { %v15989_v31 = vpop.f32.mrb[3].mxu1 }
 0x28a   :  { %v18373_v26 = vadd.f32 %v15989_v31, %v15988_v50 }
 0x28c   :  { %v15991_v37 = vpop.f32.mrb[4].mxu1  ;;  %16439 = vmatmul.mubr.msk.f32.vlgmr.msra.gmra.mrb[12].mxu1 %vm1071_vm15, %v18373_v26 }
 0x28d   :  { %v15992_v54 = vpop.f32.mrb[5].mxu1 }
 0x28e   :  { %v18377_v20 = vadd.f32 %v15992_v54, %v15991_v37 }
 0x290   :  { %v15994_v25 = vpop.f32.mrb[6].mxu1  ;;  %16441 = vmatprep.mubr.msk.f32.mxu1 %vm1071_vm15, %v18377_v20 }
 0x291   :  { %v15995_v53 = vpop.f32.mrb[7].mxu1 }
 0x292   :  { %v18381_v56 = vadd.f32 %v15995_v53, %v15994_v25 }
 0x294   :  { %v15997_v6 = vpop.f32.mrb[8].mxu1  ;;  %16442 = vmatmul.mubr.msk.f32.gmra.mrb[14].mxu1 %vm1071_vm15, %v18381_v56 }
 0x295   :  { %v15998_v23 = vpop.f32.mrb[9].mxu1 }
 0x296   :  { %v18385_v24 = vadd.f32 %v15998_v23, %v15997_v6 }
 0x298   :  { %v16000_v39 = vpop.f32.mrb[10].mxu1  ;;  %16444 = vmatprep.mubr.msk.f32.mxu1 %vm1071_vm15, %v18385_v24 }
 0x299   :  { %v16001_v60 = vpop.f32.mrb[11].mxu1 }
 0x29a   :  { %v18389_v33 = vadd.f32 %v16001_v60, %v16000_v39 }
 0x29c   :  { %20970 = vst [vmem:[#allocation3_spill] sm:$0xff] %v18389_v33  ;;  %16445 = vmatmul.mubr.msk.f32.gmra.mrb[16].mxu1 %vm1071_vm15, %v18389_v33 }
 0x29d   :  { %16449 = vmatprep.mubr.msk.f32.mxu1 %vm17725_vm0, %v20960_v16 }
 0x35f   :  { %v16440_v17 = vpop.f32.mrb[12].mxu1 }
 0x360   :  { %v18400_v32 = vadd.f32 %v16440_v17, %v1070_v3  ;;  %v1156_v47 = vpop.f32.mrb[13].mxu1 }
 0x361   :  { %v18402_v42 = vadd.f32 %v1156_v47, %v1070_v3  ;;  %v17728_v47 = vmov 1966171168  }
 0x362   :  { %1193 = vrot.lane.b32.xlu1 %v18400_v32, %s17722_s2 }
 0x363   :  { %1191 = vrot.lane.b32.xlu0 %v18402_v42, %s17722_s2 }
 0x367   :  { %v16443_v2 = vpop.f32.mrb[14].mxu1 }
 0x368   :  { %v18408_v38 = vadd.f32 %v16443_v2, %v1070_v3  ;;  %v1166_v45 = vpop.f32.mrb[15].mxu1  ;;  %v995_v2 = vld [vmem:[%s20952_s3] sm:$0x3f] }
 0x369   :  { %v18410_v19 = vadd.f32 %v1166_v45, %v1070_v3 }
 0x36a   :  { %1197 = vrot.lane.b32.xlu1 %v18408_v38, %s17722_s2 }
 0x36b   :  { %1195 = vrot.lane.b32.xlu0 %v18410_v19, %s17722_s2 }
 0x36f   :  { %v16446_v22 = vpop.f32.mrb[16].mxu1 }
 0x370   :  { %v18416_v34 = vadd.f32 %v16446_v22, %v1070_v3  ;;  %v1176_v41 = vpop.f32.mrb[17].mxu1 }
 0x371   :  { %v18418_v48 = vadd.f32 %v1176_v41, %v1070_v3 }
 0x372   :  { %1201 = vrot.lane.b32.xlu1 %v18416_v34, %s17722_s2 }
 0x373   :  { %1199 = vrot.lane.b32.xlu0 %v18418_v48, %s17722_s2 }
 0x376   :  { %1205 = vrot.lane.b32.xlu1 %v18400_v32, %s17723_s23 }
 0x377   :  { %1203 = vrot.lane.b32.xlu0 %v18402_v42, %s17723_s23 }
 0x37a   :  { %1209 = vrot.lane.b32.xlu1 %v18408_v38, %s17723_s23 }
 0x37b   :  { %1207 = vrot.lane.b32.xlu0 %v18410_v19, %s17723_s23 }
 0x37e   :  { %1213 = vrot.lane.b32.xlu1 %v18416_v34, %s17723_s23 }
 0x37f   :  { %1211 = vrot.lane.b32.xlu0 %v18418_v48, %s17723_s23 }
 0x382   :  { %1217 = vrot.lane.b32.xlu1 %v18400_v32, %s17724_s24 }
 0x383   :  { %1215 = vrot.lane.b32.xlu0 %v18402_v42, %s17724_s24 }
 0x386   :  { %1221 = vrot.lane.b32.xlu1 %v18408_v38, %s17724_s24 }
 0x387   :  { %1219 = vrot.lane.b32.xlu0 %v18410_v19, %s17724_s24 }
 0x38a   :  { %1225 = vrot.lane.b32.xlu1 %v18416_v34, %s17724_s24 }
 0x38b   :  { %1223 = vrot.lane.b32.xlu0 %v18418_v48, %s17724_s24 }
 0x38e   :  { %1304 = vrot.lane.b32.xlu1 %v18400_v32, %s17726_s1 }
 0x38f   :  { %1227 = vrot.lane.b32.xlu0 %v18402_v42, %s17726_s1 }
 0x392   :  { %1456 = vrot.lane.b32.xlu1 %v18408_v38, %s17726_s1 }
 0x393   :  { %1380 = vrot.lane.b32.xlu0 %v18410_v19, %s17726_s1 }
 0x396   :  { %1608 = vrot.lane.b32.xlu1 %v18416_v34, %s17726_s1 }
 0x397   :  { %1532 = vrot.lane.b32.xlu0 %v18418_v48, %s17726_s1 }
 0x3d4   :  { %v18464_v44 = vpop.permute.xlu1 %1193 }
 0x3d5   :  { %1760 = vrot.lane.b32.xlu1 %v18464_v44, %s17726_s1  ;;  %v18468_v49 = vpop.permute.xlu0 %1191 }
 0x3d6   :  { %1684 = vrot.lane.b32.xlu0 %v18468_v49, %s17726_s1 }
 0x3dc   :  { %v18472_v8 = vpop.permute.xlu1 %1197 }
 0x3dd   :  { %1912 = vrot.lane.b32.xlu1 %v18472_v8, %s17726_s1  ;;  %v18476_v55 = vpop.permute.xlu0 %1195 }
 0x3de   :  { %1836 = vrot.lane.b32.xlu0 %v18476_v55, %s17726_s1 }
 0x3e4   :  { %v18480_v36 = vpop.permute.xlu1 %1201 }
 0x3e5   :  { %2064 = vrot.lane.b32.xlu1 %v18480_v36, %s17726_s1  ;;  %v18484_v46 = vpop.permute.xlu0 %1199 }
 0x3e6   :  { %1988 = vrot.lane.b32.xlu0 %v18484_v46, %s17726_s1 }
 0x3e8   :  { %v18488_v52 = vpop.permute.xlu1 %1205 }
 0x3e9   :  { %2216 = vrot.lane.b32.xlu1 %v18488_v52, %s17726_s1  ;;  %v18492_v61 = vpop.permute.xlu0 %1203 }
 0x3ea   :  { %2140 = vrot.lane.b32.xlu0 %v18492_v61, %s17726_s1 }
 0x3ec   :  { %v18496_v13 = vpop.permute.xlu1 %1209 }
 0x3ed   :  { %2368 = vrot.lane.b32.xlu1 %v18496_v13, %s17726_s1  ;;  %v18500_v15 = vpop.permute.xlu0 %1207 }
 0x3ee   :  { %2292 = vrot.lane.b32.xlu0 %v18500_v15, %s17726_s1 }
 0x3f0   :  { %v18504_v14 = vpop.permute.xlu1 %1213 }
 0x3f1   :  { %2520 = vrot.lane.b32.xlu1 %v18504_v14, %s17726_s1  ;;  %v18508_v43 = vpop.permute.xlu0 %1211 }
 0x3f2   :  { %2444 = vrot.lane.b32.xlu0 %v18508_v43, %s17726_s1 }
 0x3f4   :  { %v18512_v1 = vpop.permute.xlu1 %1217 }
 0x3f5   :  { %2672 = vrot.lane.b32.xlu1 %v18512_v1, %s17726_s1  ;;  %v18516_v57 = vpop.permute.xlu0 %1215 }
 0x3f6   :  { %2596 = vrot.lane.b32.xlu0 %v18516_v57, %s17726_s1 }
 0x3f8   :  { %v18520_v58 = vpop.permute.xlu1 %1221 }
 0x3f9   :  { %2824 = vrot.lane.b32.xlu1 %v18520_v58, %s17726_s1  ;;  %v18524_v5 = vpop.permute.xlu0 %1219 }
 0x3fa   :  { %2748 = vrot.lane.b32.xlu0 %v18524_v5, %s17726_s1 }
 0x3fc   :  { %v18528_v4 = vpop.permute.xlu1 %1225 }
 0x3fd   :  { %2976 = vrot.lane.b32.xlu1 %v18528_v4, %s17726_s1  ;;  %v18532_v62 = vpop.permute.xlu0 %1223 }
 0x3fe   :  { %2900 = vrot.lane.b32.xlu0 %v18532_v62, %s17726_s1 }
 0x400   :  { %v1305_v10 = vpop.permute.xlu1 %1304 }
 0x401   :  { %3394 = vrot.lane.b32.xlu1 %v18402_v42, %s17727_s25  ;;  %v1228_v7 = vpop.permute.xlu0 %1227 }
 0x402   :  { %3470 = vrot.lane.b32.xlu0 %v18400_v32, %s17727_s25  ;;  %16448 = vmatpush3.xpose.msk.msra.mxu1 %vm1229_vm2, %v1228_v7 }
 0x403   :  { %16452 = vmatprep.subr.mxu1 %v20960_v16 }
 0x404   :  { %v1457_v9 = vpop.permute.xlu1 %1456 }
 0x405   :  { %3546 = vrot.lane.b32.xlu1 %v18410_v19, %s17727_s25  ;;  %16450 = vmatmul.mubr.msk.f32.vlgmr.msra.gmra.mrb[18].mxu1 %vm1229_vm2, %v18402_v42  ;;  %v1381_v18 = vpop.permute.xlu0 %1380  ;;  %v1001_v42 = vunpack.c.l.s4 %v17728_v47 }
 0x406   :  { %3622 = vrot.lane.b32.xlu0 %v18408_v38, %s17727_s25  ;;  %16453 = vmatpush3.xpose.msk.msra.mxu1 %vm1229_vm2, %v1305_v10 }
 0x407   :  { %16458 = vmatpush3.xpose.msk.msra.mxu0 %vm1229_vm2, %v1381_v18  ;;  %16454 = vmatprep.mubr.msk.f32.mxu1 %vm17725_vm0, %v20960_v16  ;;  %v1002_v45 = vunpack.c.0.s8 %v1001_v42 }
 0x408   :  { %16462 = vmatprep.subr.mxu1 %v20960_v16  ;;  %16467 = vmatprep.subr.mxu0 %v20960_v16  ;;  %v1609_v29 = vpop.permute.xlu1 %1608 }
 0x409   :  { %3698 = vrot.lane.b32.xlu1 %v18418_v48, %s17727_s25  ;;  %16455 = vmatmul.mubr.msk.f32.vlgmr.msra.gmra.mrb[20].mxu1 %vm1229_vm2, %v18400_v32  ;;  %v1533_v28 = vpop.permute.xlu0 %1532  ;;  %v18726_v22 = vsub.s32 %v1002_v45, %v17841_v12 }
 0x40a   :  { %16460 = vmatmul.mubr.msk.f32.vlgmr.msra.gmra.mrb[32].mxu0 %vm1229_vm2, %v18410_v19  ;;  %3774 = vrot.lane.b32.xlu0 %v18416_v34, %s17727_s25 }
 0x40b   :  { %16463 = vmatpush3.xpose.msk.msra.mxu1 %vm1229_vm2, %v1457_v9  ;;  %16468 = vmatpush3.xpose.msk.msra.mxu0 %vm1229_vm2, %v1533_v28  ;;  %20972 = vst [vmem:[#allocation5_spill] sm:$0xff] %v18726_v22 }
 0x40c   :  { %16464 = vmatprep.mubr.msk.f32.mxu1 %vm17725_vm0, %v20960_v16  ;;  %16469 = vmatprep.mubr.msk.f32.mxu0 %vm17725_vm0, %v20960_v16 }
 0x40d   :  { %3850 = vrot.lane.b32.xlu1 %v18468_v49, %s17727_s25  ;;  %16472 = vmatprep.subr.mxu1 %v20960_v16 }
 0x40e   :  { %16465 = vmatmul.mubr.msk.f32.vlgmr.msra.gmra.mrb[22].mxu1 %vm1229_vm2, %v18408_v38  ;;  %16470 = vmatmul.mubr.msk.f32.vlgmr.msra.gmra.mrb[34].mxu0 %vm1229_vm2, %v18418_v48  ;;  %v15594_v38 = vadd.f32 -1.0, %v995_v2 }
 0x40f   :  { %3926 = vrot.lane.b32.xlu0 %v18464_v44, %s17727_s25  ;;  %16473 = vmatpush3.xpose.msk.msra.mxu1 %vm1229_vm2, %v1609_v29 }
 0x410   :  { %16474 = vmatprep.mubr.msk.f32.mxu1 %vm17725_vm0, %v20960_v16  ;;  %16482 = vmatprep.subr.mxu1 %v20960_v16  ;;  %v997_v19 = vmul.f32 1e+30, %v15594_v38 }
 0x411   :  { %4002 = vrot.lane.b32.xlu1 %v18476_v55, %s17727_s25  ;;  %16477 = vmatprep.subr.mxu0 %v20960_v16 }
 0x412   :  { %16475 = vmatmul.mubr.msk.f32.vlgmr.msra.gmra.mrb[24].mxu1 %vm1229_vm2, %v18416_v34  ;;  %16479 = vmatprep.mubr.msk.f32.mxu0 %vm17725_vm0, %v20960_v16  ;;  %v1006_v34 = vrot.slane %v997_v19, %v18726_v22 }
 0x413   :  { %4078 = vrot.lane.b32.xlu0 %v18472_v8, %s17727_s25  ;;  %16484 = vmatprep.mubr.msk.f32.mxu1 %vm17725_vm0, %v20960_v16 }
 0x414   :  { %v1022_v41 = vrot.slane %v1006_v34, %v18726_v22  ;;  %v1014_v48 = vcombine.high %v1006_v34, %v1006_v34 }
 0x415   :  { %4306 = vrot.lane.b32.xlu1 %v18492_v61, %s17727_s25 }
 0x417   :  { %4230 = vrot.lane.b32.xlu0 %v18480_v36, %s17727_s25 }
 0x419   :  { %4382 = vrot.lane.b32.xlu1 %v18488_v52, %s17727_s25 }
 0x41b   :  { %4458 = vrot.lane.b32.xlu0 %v18500_v15, %s17727_s25 }
 0x41d   :  { %4534 = vrot.lane.b32.xlu1 %v18496_v13, %s17727_s25 }
 0x41f   :  { %4762 = vrot.lane.b32.xlu0 %v18516_v57, %s17727_s25 }
 0x421   :  { %4686 = vrot.lane.b32.xlu1 %v18504_v14, %s17727_s25 }
 0x423   :  { %4610 = vrot.lane.b32.xlu0 %v18508_v43, %s17727_s25 }
 0x425   :  { %4838 = vrot.lane.b32.xlu1 %v18512_v1, %s17727_s25 }
 0x429   :  { %4154 = vrot.lane.b32.xlu1 %v18484_v46, %s17727_s25 }
 0x447   :  { %v1761_v30 = vpop.permute.xlu1 %1760 }
 0x448   :  { %16483 = vmatpush3.xpose.msk.msra.mxu1 %vm1229_vm2, %v1761_v30  ;;  %v1685_v51 = vpop.permute.xlu0 %1684 }
 0x449   :  { %16478 = vmatpush3.xpose.msk.msra.mxu0 %vm1229_vm2, %v1685_v51  ;;  %16492 = vmatprep.subr.mxu1 %v20960_v16 }
 0x44a   :  { %16487 = vmatprep.subr.mxu0 %v20960_v16 }
 0x44b   :  { %16485 = vmatmul.mubr.msk.f32.vlgmr.msra.gmra.mrb[26].mxu1 %vm1229_vm2, %v18464_v44  ;;  %v999_v44 = vcombine.high %v997_v19, %v997_v19 }
 0x44c   :  { %16480 = vmatmul.mubr.msk.f32.vlgmr.msra.gmra.mrb[36].mxu0 %vm1229_vm2, %v18468_v49  ;;  %16494 = vmatprep.mubr.msk.f32.mxu1 %vm17725_vm0, %v20960_v16  ;;  %v18731_v49 = vrot.slane %v1022_v41, %v18394_v35 }
 0x44d   :  { %16489 = vmatprep.mubr.msk.f32.mxu0 %vm17725_vm0, %v20960_v16 }
 0x44f   :  { %v1913_v40 = vpop.permute.xlu1 %1912 }
 0x450   :  { %16493 = vmatpush3.xpose.msk.msra.mxu1 %vm1229_vm2, %v1913_v40  ;;  %v1837_v59 = vpop.permute.xlu0 %1836 }
 0x451   :  { %16488 = vmatpush3.xpose.msk.msra.mxu0 %vm1229_vm2, %v1837_v59  ;;  %16502 = vmatprep.subr.mxu1 %v20960_v16 }
 0x452   :  { %16497 = vmatprep.subr.mxu0 %v20960_v16 }
 0x453   :  { %16495 = vmatmul.mubr.msk.f32.vlgmr.msra.gmra.mrb[28].mxu1 %vm1229_vm2, %v18472_v8  ;;  %v1036_v8 = vrot.slane %v1014_v48, %v18726_v22 }
 0x454   :  { %16490 = vmatmul.mubr.msk.f32.vlgmr.msra.gmra.mrb[38].mxu0 %vm1229_vm2, %v18476_v55  ;;  %16504 = vmatprep.mubr.msk.f32.mxu1 %vm17725_vm0, %v20960_v16 }
 0x455   :  { %16499 = vmatprep.mubr.msk.f32.mxu0 %vm17725_vm0, %v20960_v16 }
 0x457   :  { %v2065_v27 = vpop.permute.xlu1 %2064 }
 0x458   :  { %16503 = vmatpush3.xpose.msk.msra.mxu1 %vm1229_vm2, %v2065_v27  ;;  %v1989_v11 = vpop.permute.xlu0 %1988 }
 0x459   :  { %16498 = vmatpush3.xpose.msk.msra.mxu0 %vm1229_vm2, %v1989_v11  ;;  %16512 = vmatprep.subr.mxu1 %v20960_v16 }
 0x45a   :  { %16507 = vmatprep.subr.mxu0 %v20960_v16 }
 0x45b   :  { %v2217_v50 = vpop.permute.xlu1 %2216  ;;  %16505 = vmatmul.mubr.msk.f32.vlgmr.msra.gmra.mrb[30].mxu1 %vm1229_vm2, %v18480_v36  ;;  %v1044_v36 = vcombine.high %v1022_v41, %v1022_v41 }
 0x45c   :  { %16500 = vmatmul.mubr.msk.f32.vlgmr.msra.gmra.mrb[40].mxu0 %vm1229_vm2, %v18484_v46  ;;  %16513 = vmatpush3.xpose.msk.msra.mxu1 %vm1229_vm2, %v2217_v50  ;;  %v2141_v31 = vpop.permute.xlu0 %2140  ;;  %v1013_v46 = vrot.slane %v999_v44, %v18726_v22 }
 0x45d   :  { %16508 = vmatpush3.xpose.msk.msra.mxu0 %vm1229_vm2, %v2141_v31  ;;  %16514 = vmatprep.mubr.msk.f32.mxu1 %vm17725_vm0, %v20960_v16 }
 0x45e   :  { %16509 = vmatprep.mubr.msk.f32.mxu0 %vm17725_vm0, %v20960_v16  ;;  %16522 = vmatprep.subr.mxu1 %v20960_v16  ;;  %v1015_v7 = vcombine.high %v1013_v46, %v1013_v46 }
 0x45f   :  { %v2369_v37 = vpop.permute.xlu1 %2368  ;;  %16515 = vmatmul.mubr.msk.f32.vlgmr.msra.gmra.mrb[32].mxu1 %vm1229_vm2, %v18488_v52  ;;  %16517 = vmatprep.subr.mxu0 %v20960_v16 }
 0x460   :  { %16510 = vmatmul.mubr.msk.f32.vlgmr.msra.gmra.mrb[42].mxu0 %vm1229_vm2, %v18492_v61  ;;  %16523 = vmatpush3.xpose.msk.msra.mxu1 %vm1229_vm2, %v2369_v37  ;;  %v2293_v54 = vpop.permute.xlu0 %2292  ;;  %v1043_v11 = vrot.slane %v1015_v7, %v18726_v22 }
 0x461   :  { %16518 = vmatpush3.xpose.msk.msra.mxu0 %vm1229_vm2, %v2293_v54  ;;  %16524 = vmatprep.mubr.msk.f32.mxu1 %vm17725_vm0, %v20960_v16 }
 0x462   :  { %16519 = vmatprep.mubr.msk.f32.mxu0 %vm17725_vm0, %v20960_v16  ;;  %16532 = vmatprep.subr.mxu1 %v20960_v16 }
 0x463   :  { %v2521_v25 = vpop.permute.xlu1 %2520  ;;  %16525 = vmatmul.mubr.msk.f32.vlgmr.msra.gmra.mrb[34].mxu1 %vm1229_vm2, %v18496_v13  ;;  %16527 = vmatprep.subr.mxu0 %v20960_v16 }
 0x464   :  { %16520 = vmatmul.mubr.msk.f32.vlgmr.msra.gmra.mrb[44].mxu0 %vm1229_vm2, %v18500_v15  ;;  %16533 = vmatpush3.xpose.msk.msra.mxu1 %vm1229_vm2, %v2521_v25  ;;  %v2445_v53 = vpop.permute.xlu0 %2444  ;;  %v18739_v15 = vrot.slane %v1036_v8, %v18394_v35 }
 0x465   :  { %16528 = vmatpush3.xpose.msk.msra.mxu0 %vm1229_vm2, %v2445_v53  ;;  %16534 = vmatprep.mubr.msk.f32.mxu1 %vm17725_vm0, %v20960_v16 }
 0x466   :  { %16529 = vmatprep.mubr.msk.f32.mxu0 %vm17725_vm0, %v20960_v16  ;;  %16542 = vmatprep.subr.mxu1 %v20960_v16 }
 0x467   :  { %v2673_v6 = vpop.permute.xlu1 %2672  ;;  %16535 = vmatmul.mubr.msk.f32.vlgmr.msra.gmra.mrb[36].mxu1 %vm1229_vm2, %v18504_v14  ;;  %16537 = vmatprep.subr.mxu0 %v20960_v16 }
 0x468   :  { %16530 = vmatmul.mubr.msk.f32.vlgmr.msra.gmra.mrb[46].mxu0 %vm1229_vm2, %v18508_v43  ;;  %16543 = vmatpush3.xpose.msk.msra.mxu1 %vm1229_vm2, %v2673_v6  ;;  %v2597_v23 = vpop.permute.xlu0 %2596  ;;  %v18742_v43 = vrot.slane %v1044_v36, %v18394_v35 }
 0x469   :  { %16538 = vmatpush3.xpose.msk.msra.mxu0 %vm1229_vm2, %v2597_v23  ;;  %16544 = vmatprep.mubr.msk.f32.mxu1 %vm17725_vm0, %v20960_v16 }
 0x46a   :  { %16539 = vmatprep.mubr.msk.f32.mxu0 %vm17725_vm0, %v20960_v16  ;;  %16552 = vmatprep.subr.mxu1 %v20960_v16 }
 0x46b   :  { %v2825_v39 = vpop.permute.xlu1 %2824  ;;  %16545 = vmatmul.mubr.msk.f32.vlgmr.msra.gmra.mrb[38].mxu1 %vm1229_vm2, %v18512_v1  ;;  %16547 = vmatprep.subr.mxu0 %v20960_v16  ;;  %v1045_v1 = vcombine.high %v1036_v8, %v1036_v8 }
 0x46c   :  { %16540 = vmatmul.mubr.msk.f32.vlgmr.msra.gmra.mrb[48].mxu0 %vm1229_vm2, %v18516_v57  ;;  %16553 = vmatpush3.xpose.msk.msra.mxu1 %vm1229_vm2, %v2825_v39  ;;  %v2749_v60 = vpop.permute.xlu0 %2748  ;;  %v1029_v57 = vrot.slane %v1013_v46, %v18726_v22 }
 0x46d   :  { %16548 = vmatpush3.xpose.msk.msra.mxu0 %vm1229_vm2, %v2749_v60  ;;  %16554 = vmatprep.mubr.msk.f32.mxu1 %vm17725_vm0, %v20960_v16  ;;  %v18754_v59 = vrot.slane %v1045_v1, %v18394_v35 }
 0x46e   :  { %16549 = vmatprep.mubr.msk.f32.mxu0 %vm17725_vm0, %v20960_v16  ;;  %16562 = vmatprep.subr.mxu1 %v20960_v16  ;;  %v18757_v27 = vrot.slane %v1029_v57, %v18394_v35 }
 0x46f   :  { %v2977_v0 = vpop.permute.xlu1 %2976  ;;  %16555 = vmatmul.mubr.msk.f32.vlgmr.msra.gmra.mrb[40].mxu1 %vm1229_vm2, %v18520_v58  ;;  %16557 = vmatprep.subr.mxu0 %v20960_v16 }
 0x470   :  { %16550 = vmatmul.mubr.msk.f32.vlgmr.msra.gmra.mrb[50].mxu0 %vm1229_vm2, %v18524_v5  ;;  %16563 = vmatpush3.xpose.msk.msra.mxu1 %vm1229_vm2, %v2977_v0  ;;  %v2901_v3 = vpop.permute.xlu0 %2900  ;;  %v18771_v0 = vrot.slane %v1043_v11, %v18394_v35 }
 0x471   :  { %16558 = vmatpush3.xpose.msk.msra.mxu0 %vm1229_vm2, %v2901_v3  ;;  %16564 = vmatprep.mubr.msk.f32.mxu1 %vm17725_vm0, %v20960_v16 }
 0x472   :  { %16559 = vmatprep.mubr.msk.f32.mxu0 %vm17725_vm0, %v20960_v16  ;;  %16567 = vmatprep.subr.mxu0 %v20960_v16 }
 0x473   :  { %v3395_v17 = vpop.permute.xlu1 %3394  ;;  %16565 = vmatmul.mubr.msk.f32.vlgmr.msra.gmra.mrb[42].mxu1 %vm1229_vm2, %v18528_v4  ;;  %16572 = vmatprep.subr.mxu1 %v20960_v16 }
 0x474   :  { %16560 = vmatmul.mubr.msk.f32.vlgmr.msra.gmra.mrb[52].mxu0 %vm1229_vm2, %v18532_v62  ;;  %v3471_v32 = vpop.permute.xlu0 %3470  ;;  %16574 = vmatprep.mubr.msk.f32.mxu1 %vm17725_vm0, %v20960_v16 }
 0x475   :  { %16568 = vmatpush3.msra.mxu0 %v3395_v17  ;;  %16573 = vmatpush3.msra.mxu1 %v3471_v32 }
 0x476   :  { %16582 = vmatprep.subr.mxu1 %v20960_v16  ;;  %16569 = vmatprep.mubr.msk.f32.mxu0 %vm17725_vm0, %v20960_v16 }
 0x477   :  { %16577 = vmatprep.subr.mxu0 %v20960_v16 }
 0x4d8   :  { %v1300_v55 = vpop.f32.mrb[18].mxu1 }
 0x4d9   :  { %v3052_v52 = vmul.f32 0.35355338, %v1300_v55  ;;  %v16451_v61 = vpop.f32.mrb[19].mxu1 }
 0x4db   :  { %v18736_v13 = vadd.f32 %v18731_v49, %v3052_v52 }
 0x4dc   :  { %v1376_v14 = vpop.f32.mrb[20].mxu1 }
 0x4dd   :  { %v3053_v10 = vmul.f32 0.35355338, %v1376_v14  ;;  %v1452_v18 = vpop.f32.mrb[32].mxu0  ;;  %v16456_v9 = vpop.f32.mrb[21].mxu1  ;;  %v3130_v28 = vsel %vm1229_vm2, %v18736_v13, -inf }
 0x4de   :  { %v3054_v29 = vmul.f32 0.35355338, %v1452_v18  ;;  %v16461_v30 = vpop.f32.mrb[33].mxu0  ;;  %3131 = vmax.xlane.f32.xlu0 %v3130_v28 }
 0x4df   :  { %v18748_v51 = vadd.f32 %v18739_v15, %v3053_v10 }
 0x4e0   :  { %v18751_v40 = vadd.f32 %v18742_v43, %v3054_v29 }
 0x4e1   :  { %v1528_v50 = vpop.f32.mrb[22].mxu1  ;;  %v1604_v31 = vpop.f32.mrb[34].mxu0  ;;  %v3133_v37 = vsel %vm1229_vm2, %v18748_v51, -inf }
 0x4e2   :  { %v3055_v54 = vmul.f32 0.35355338, %v1528_v50  ;;  %v3056_v25 = vmul.f32 0.35355338, %v1604_v31  ;;  %v16466_v53 = vpop.f32.mrb[23].mxu1  ;;  %v16471_v6 = vpop.f32.mrb[35].mxu0  ;;  %3134 = vmax.xlane.f32.xlu1 %v3133_v37 }
 0x4e3   :  { %v3136_v23 = vsel %vm1229_vm2, %v18751_v40, -inf }
 0x4e4   :  { %v18765_v39 = vadd.f32 %v18754_v59, %v3055_v54  ;;  %v18768_v60 = vadd.f32 %v18757_v27, %v3056_v25  ;;  %3137 = vmax.xlane.f32.xlu0 %v3136_v23 }
 0x4e5   :  { %v1680_v3 = vpop.f32.mrb[24].mxu1 }
 0x4e6   :  { %v3057_v17 = vmul.f32 0.35355338, %v1680_v3  ;;  %v16476_v32 = vpop.f32.mrb[25].mxu1  ;;  %v3139_v47 = vsel %vm1229_vm2, %v18765_v39, -inf  ;;  %v3142_v42 = vsel %vm1229_vm2, %v18768_v60, -inf }
 0x4e7   :  { %3143 = vmax.xlane.f32.xlu1 %v3142_v42  ;;  %v18810_v32 = vpop.permute.xlu1 %3546 }
 0x4e8   :  { %v18778_v2 = vadd.f32 %v18771_v0, %v3057_v17  ;;  %3140 = vmax.xlane.f32.xlu0 %v3139_v47 }
 0x4ea   :  { %v3145_v38 = vsel %vm1229_vm2, %v18778_v2, -inf }
 0x4ec   :  { %3146 = vmax.xlane.f32.xlu0 %v3145_v38 }
 0x51e   :  { %v1832_v45 = vpop.f32.mrb[26].mxu1 }
 0x51f   :  { %v3059_v19 = vmul.f32 0.35355338, %v1832_v45  ;;  %v1756_v34 = vpop.f32.mrb[36].mxu0  ;;  %v16486_v41 = vpop.f32.mrb[27].mxu1 }
 0x520   :  { %v3058_v48 = vmul.f32 0.35355338, %v1756_v34  ;;  %v16481_v44 = vpop.f32.mrb[37].mxu0 }
 0x521   :  { %v18783_v8 = vadd.f32 %v18739_v15, %v3059_v19 }
 0x522   :  { %v18786_v55 = vadd.f32 %v18731_v49, %v3058_v48 }
 0x523   :  { %v3151_v36 = vsel %vm1229_vm2, %v18783_v8, -inf }
 0x524   :  { %3152 = vmax.xlane.f32.xlu0 %v3151_v36  ;;  %v3148_v46 = vsel %vm1229_vm2, %v18786_v55, -inf }
 0x525   :  { %3149 = vmax.xlane.f32.xlu1 %v3148_v46 }
 0x526   :  { %v1984_v52 = vpop.f32.mrb[28].mxu1 }
 0x527   :  { %v3061_v61 = vmul.f32 0.35355338, %v1984_v52  ;;  %v1908_v14 = vpop.f32.mrb[38].mxu0  ;;  %v16496_v1 = vpop.f32.mrb[29].mxu1 }
 0x528   :  { %v3060_v57 = vmul.f32 0.35355338, %v1908_v14  ;;  %v16491_v7 = vpop.f32.mrb[39].mxu0  ;;  %v18827_v1 = vpop.permute.xlu1 %3698 }
 0x529   :  { %v18793_v10 = vadd.f32 %v18754_v59, %v3061_v61 }
 0x52a   :  { %v18796_v18 = vadd.f32 %v18742_v43, %v3060_v57 }
 0x52b   :  { %v3157_v9 = vsel %vm1229_vm2, %v18793_v10, -inf }
 0x52c   :  { %3158 = vmax.xlane.f32.xlu0 %v3157_v9  ;;  %v3154_v28 = vsel %vm1229_vm2, %v18796_v18, -inf }
 0x52d   :  { %3155 = vmax.xlane.f32.xlu1 %v3154_v28 }
 0x52e   :  { %v2136_v29 = vpop.f32.mrb[30].mxu1 }
 0x52f   :  { %v3063_v30 = vmul.f32 0.35355338, %v2136_v29  ;;  %v2060_v11 = vpop.f32.mrb[40].mxu0  ;;  %v16506_v50 = vpop.f32.mrb[31].mxu1 }
 0x530   :  { %v3062_v31 = vmul.f32 0.35355338, %v2060_v11  ;;  %v16501_v37 = vpop.f32.mrb[41].mxu0  ;;  %v18834_v11 = vpop.permute.xlu0 %3622 }
 0x531   :  { %v18803_v54 = vadd.f32 %v18771_v0, %v3063_v30 }
 0x532   :  { %v18806_v25 = vadd.f32 %v18757_v27, %v3062_v31  ;;  %v2288_v53 = vpop.f32.mrb[32].mxu1 }
 0x533   :  { %v3065_v6 = vmul.f32 0.35355338, %v2288_v53  ;;  %v2212_v23 = vpop.f32.mrb[42].mxu0  ;;  %v16516_v3 = vpop.f32.mrb[33].mxu1  ;;  %v3163_v17 = vsel %vm1229_vm2, %v18803_v54, -inf }
 0x534   :  { %v3064_v47 = vmul.f32 0.35355338, %v2212_v23  ;;  %3164 = vmax.xlane.f32.xlu0 %v3163_v17  ;;  %v16511_v42 = vpop.f32.mrb[43].mxu0  ;;  %v3160_v38 = vsel %vm1229_vm2, %v18806_v25, -inf }
 0x535   :  { %v18815_v45 = vadd.f32 %v18739_v15, %v3065_v6  ;;  %3161 = vmax.xlane.f32.xlu1 %v3160_v38  ;;  %v18846_v38 = vpop.permute.xlu1 %3850 }
 0x536   :  { %v18818_v19 = vadd.f32 %v18731_v49, %v3064_v47  ;;  %v2440_v34 = vpop.f32.mrb[34].mxu1 }
 0x537   :  { %v3067_v41 = vmul.f32 0.35355338, %v2440_v34  ;;  %v2364_v48 = vpop.f32.mrb[44].mxu0  ;;  %v16526_v44 = vpop.f32.mrb[35].mxu1  ;;  %v3169_v36 = vsel %vm1229_vm2, %v18815_v45, -inf }
 0x538   :  { %v3066_v46 = vmul.f32 0.35355338, %v2364_v48  ;;  %3170 = vmax.xlane.f32.xlu0 %v3169_v36  ;;  %v16521_v52 = vpop.f32.mrb[45].mxu0  ;;  %v3166_v61 = vsel %vm1229_vm2, %v18818_v19, -inf  ;;  %v18853_v36 = vpop.permute.xlu0 %3774 }
 0x539   :  { %v18825_v14 = vadd.f32 %v18754_v59, %v3067_v41  ;;  %3167 = vmax.xlane.f32.xlu1 %v3166_v61 }
 0x53a   :  { %v18830_v57 = vadd.f32 %v18742_v43, %v3066_v46  ;;  %v2592_v7 = vpop.f32.mrb[36].mxu1 }
 0x53b   :  { %v3069_v9 = vmul.f32 0.35355338, %v2592_v7  ;;  %v2516_v28 = vpop.f32.mrb[46].mxu0  ;;  %v16536_v29 = vpop.f32.mrb[37].mxu1  ;;  %v3175_v30 = vsel %vm1229_vm2, %v18825_v14, -inf }
 0x53c   :  { %v3068_v50 = vmul.f32 0.35355338, %v2516_v28  ;;  %3176 = vmax.xlane.f32.xlu0 %v3175_v30  ;;  %v16531_v31 = vpop.f32.mrb[47].mxu0  ;;  %v3172_v37 = vsel %vm1229_vm2, %v18830_v57, -inf }
 0x53d   :  { %v18839_v53 = vadd.f32 %v18771_v0, %v3069_v9  ;;  %3173 = vmax.xlane.f32.xlu1 %v3172_v37  ;;  %v18865_v31 = vpop.permute.xlu1 %4002 }
 0x53e   :  { %v18842_v6 = vadd.f32 %v18757_v27, %v3068_v50  ;;  %v2744_v23 = vpop.f32.mrb[38].mxu1 }
 0x53f   :  { %v3071_v3 = vmul.f32 0.35355338, %v2744_v23  ;;  %v2668_v17 = vpop.f32.mrb[48].mxu0  ;;  %v16546_v47 = vpop.f32.mrb[39].mxu1  ;;  %v3181_v42 = vsel %vm1229_vm2, %v18839_v53, -inf }
 0x540   :  { %v3070_v34 = vmul.f32 0.35355338, %v2668_v17  ;;  %3182 = vmax.xlane.f32.xlu0 %v3181_v42  ;;  %v16541_v41 = vpop.f32.mrb[49].mxu0  ;;  %v3178_v48 = vsel %vm1229_vm2, %v18842_v6, -inf }
 0x541   :  { %v18851_v44 = vadd.f32 %v18739_v15, %v3071_v3  ;;  %3179 = vmax.xlane.f32.xlu1 %v3178_v48  ;;  %v18874_v41 = vpop.permute.xlu0 %3926 }
 0x542   :  { %v18856_v46 = vadd.f32 %v18731_v49, %v3070_v34  ;;  %v2896_v52 = vpop.f32.mrb[40].mxu1 }
 0x543   :  { %v3073_v61 = vmul.f32 0.35355338, %v2896_v52  ;;  %v2820_v7 = vpop.f32.mrb[50].mxu0  ;;  %v16556_v9 = vpop.f32.mrb[41].mxu1  ;;  %v3187_v28 = vsel %vm1229_vm2, %v18851_v44, -inf }
 0x544   :  { %v3072_v29 = vmul.f32 0.35355338, %v2820_v7  ;;  %3188 = vmax.xlane.f32.xlu0 %v3187_v28  ;;  %v16551_v30 = vpop.f32.mrb[51].mxu0  ;;  %v3184_v15 = vsel %vm1229_vm2, %v18856_v46, -inf  ;;  %v18886_v7 = vpop.permute.xlu1 %4306 }
 0x545   :  { %v18863_v50 = vadd.f32 %v18754_v59, %v3073_v61  ;;  %3185 = vmax.xlane.f32.xlu1 %v3184_v15  ;;  %v18888_v9 = vpop.permute.xlu0 %4078 }
 0x546   :  { %v18868_v49 = vadd.f32 %v18742_v43, %v3072_v29  ;;  %v3048_v37 = vpop.f32.mrb[42].mxu1 }
 0x547   :  { %v3075_v23 = vmul.f32 0.35355338, %v3048_v37  ;;  %v2972_v3 = vpop.f32.mrb[52].mxu0  ;;  %v16566_v17 = vpop.f32.mrb[43].mxu1  ;;  %v3193_v47 = vsel %vm1229_vm2, %v18863_v50, -inf }
 0x548   :  { %v3074_v42 = vmul.f32 0.35355338, %v2972_v3  ;;  %3194 = vmax.xlane.f32.xlu0 %v3193_v47  ;;  %v16561_v34 = vpop.f32.mrb[53].mxu0  ;;  %v3190_v59 = vsel %vm1229_vm2, %v18868_v49, -inf  ;;  %v18890_v28 = vpop.permute.xlu1 %4382 }
 0x549   :  { %v18877_v48 = vadd.f32 %v18771_v0, %v3075_v23  ;;  %3191 = vmax.xlane.f32.xlu1 %v3190_v59  ;;  %v18892_v0 = vpop.permute.xlu0 %4230 }
 0x54a   :  { %v18880_v43 = vadd.f32 %v18757_v27, %v3074_v42 }
 0x54b   :  { %v3199_v52 = vsel %vm1229_vm2, %v18877_v48, -inf }
 0x54c   :  { %3200 = vmax.xlane.f32.xlu0 %v3199_v52  ;;  %v3196_v61 = vsel %vm1229_vm2, %v18880_v43, -inf  ;;  %v18894_v29 = vpop.permute.xlu1 %4534 }
 0x54d   :  { %3197 = vmax.xlane.f32.xlu1 %v3196_v61  ;;  %v18896_v27 = vpop.permute.xlu0 %4458 }
 0x550   :  { %v18900_v30 = vpop.permute.xlu1 %4686 }
 0x551   :  { %v18902_v15 = vpop.permute.xlu0 %4762 }
 0x554   :  { %v18906_v37 = vpop.permute.xlu1 %4838 }
 0x555   :  { %v18908_v23 = vpop.permute.xlu0 %4610 }
 0x558   :  { %v18910_v3 = vpop.permute.xlu1 %4154 }
 0x55e   :  { %4990 = vrot.lane.b32.xlu1 %v18520_v58, %s17727_s25 }
 0x562   :  { %4914 = vrot.lane.b32.xlu0 %v18524_v5, %s17727_s25 }
 0x56b   :  { %v3132_v17 = vpop.xlane.xlu0 %3131 }
 0x56c   :  { %v3202_v47 = vsub.f32 %v18736_v13, %v3132_v17 }
 0x56e   :  { %v3226_v42 = vmul.f32 1.442695, %v3202_v47 }
 0x56f   :  { %v3135_v34 = vpop.xlane.xlu1 %3134 }
 0x570   :  { %v3203_v58 = vsub.f32 %v18748_v51, %v3135_v34  ;;  %17452 = vpow2.f32 %v3226_v42 }
 0x571   :  { %v3138_v59 = vpop.xlane.xlu0 %3137 }
 0x572   :  { %v3228_v52 = vmul.f32 1.442695, %v3203_v58  ;;  %v3204_v61 = vsub.f32 %v18751_v40, %v3138_v59 }
 0x574   :  { %17454 = vpow2.f32 %v3228_v52  ;;  %v3230_v5 = vmul.f32 1.442695, %v3204_v61  ;;  %v3144_v16 = vpop.xlane.xlu1 %3143 }
 0x575   :  { %v3206_v22 = vsub.f32 %v18768_v60, %v3144_v16  ;;  %v3141_v35 = vpop.xlane.xlu0 %3140 }
 0x576   :  { %v3205_v21 = vsub.f32 %v18765_v39, %v3141_v35  ;;  %17456 = vpow2.f32 %v3230_v5 }
 0x577   :  { %v3234_v33 = vmul.f32 1.442695, %v3206_v22 }
 0x578   :  { %v3232_v13 = vmul.f32 1.442695, %v3205_v21 }
 0x579   :  { %v3147_v17 = vpop.xlane.xlu0 %3146 }
 0x57a   :  { %17458 = vpow2.f32 %v3232_v13  ;;  %v3207_v51 = vsub.f32 %v18778_v2, %v3147_v17  ;;  %v18918_v34 = vpop.eup %17452 }
 0x57b   :  { %17460 = vpow2.f32 %v3234_v33  ;;  %v3274_v35 = vsel %vm1229_vm2, %v18918_v34, 0.0 }
 0x57c   :  { %v3236_v47 = vmul.f32 1.442695, %v3207_v51 }
 0x57e   :  { %v18920_v40 = vpop.eup %17454  ;;  %17462 = vpow2.f32 %v3236_v47 }
 0x57f   :  { %v3277_v16 = vsel %vm1229_vm2, %v18920_v40, 0.0 }
 0x580   :  { %v18926_v22 = vpop.eup %17456 }
 0x581   :  { %3278 = vadd.xlane.f32.xlu0 %v3277_v16  ;;  %v3280_v39 = vsel %vm1229_vm2, %v18926_v22, 0.0 }
 0x582   :  { %3275 = vadd.xlane.f32.xlu1 %v3274_v35 }
 0x584   :  { %v18928_v21 = vpop.eup %17458 }
 0x585   :  { %v3283_v33 = vsel %vm1229_vm2, %v18928_v21, 0.0  ;;  %v18934_v60 = vpop.eup %17460 }
 0x586   :  { %3284 = vadd.xlane.f32.xlu0 %v3283_v33  ;;  %3281 = vadd.xlane.f32.xlu1 %v3280_v39  ;;  %v3286_v58 = vsel %vm1229_vm2, %v18934_v60, 0.0 }
 0x588   :  { %v18936_v2 = vpop.eup %17462 }
 0x589   :  { %v3289_v42 = vsel %vm1229_vm2, %v18936_v2, 0.0 }
 0x58a   :  { %3290 = vadd.xlane.f32.xlu0 %v3289_v42  ;;  %3287 = vadd.xlane.f32.xlu1 %v3286_v58 }
 0x5b1   :  { %v3153_v59 = vpop.xlane.xlu0 %3152 }
 0x5b2   :  { %v3209_v52 = vsub.f32 %v18783_v8, %v3153_v59  ;;  %v3150_v61 = vpop.xlane.xlu1 %3149 }
 0x5b3   :  { %v3208_v5 = vsub.f32 %v18786_v55, %v3150_v61 }
 0x5b4   :  { %v3240_v13 = vmul.f32 1.442695, %v3209_v52 }
 0x5b5   :  { %v3238_v17 = vmul.f32 1.442695, %v3208_v5 }
 0x5b6   :  { %17464 = vpow2.f32 %v3240_v13 }
 0x5b7   :  { %17466 = vpow2.f32 %v3238_v17 }
 0x5b9   :  { %v3159_v51 = vpop.xlane.xlu0 %3158 }
 0x5ba   :  { %v3211_v47 = vsub.f32 %v18793_v10, %v3159_v51  ;;  %v3156_v16 = vpop.xlane.xlu1 %3155 }
 0x5bb   :  { %v3210_v35 = vsub.f32 %v18796_v18, %v3156_v16 }
 0x5bc   :  { %v3244_v33 = vmul.f32 1.442695, %v3211_v47 }
 0x5bd   :  { %v3242_v39 = vmul.f32 1.442695, %v3210_v35 }
 0x5be   :  { %17468 = vpow2.f32 %v3244_v33 }
 0x5bf   :  { %17470 = vpow2.f32 %v3242_v39 }
 0x5c0   :  { %v18946_v42 = vpop.eup %17464 }
 0x5c1   :  { %v18948_v8 = vpop.eup %17466  ;;  %v3165_v58 = vpop.xlane.xlu0 %3164  ;;  %v3295_v55 = vsel %vm1229_vm2, %v18946_v42, 0.0 }
 0x5c2   :  { %v3213_v59 = vsub.f32 %v18803_v54, %v3165_v58  ;;  %v3162_v52 = vpop.xlane.xlu1 %3161  ;;  %3296 = vadd.xlane.f32.xlu0 %v3295_v55  ;;  %v3292_v10 = vsel %vm1229_vm2, %v18948_v8, 0.0 }
 0x5c3   :  { %v3212_v18 = vsub.f32 %v18806_v25, %v3162_v52  ;;  %3293 = vadd.xlane.f32.xlu1 %v3292_v10 }
 0x5c4   :  { %v3248_v61 = vmul.f32 1.442695, %v3213_v59 }
 0x5c5   :  { %v3246_v5 = vmul.f32 1.442695, %v3212_v18  ;;  %v3171_v13 = vpop.xlane.xlu0 %3170 }
 0x5c6   :  { %17472 = vpow2.f32 %v3248_v61  ;;  %v3215_v17 = vsub.f32 %v18815_v45, %v3171_v13  ;;  %v3168_v51 = vpop.xlane.xlu1 %3167 }
 0x5c7   :  { %17474 = vpow2.f32 %v3246_v5  ;;  %v3214_v47 = vsub.f32 %v18818_v19, %v3168_v51 }
 0x5c8   :  { %v18958_v16 = vpop.eup %17468  ;;  %v3252_v54 = vmul.f32 1.442695, %v3215_v17 }
 0x5c9   :  { %v18960_v35 = vpop.eup %17470  ;;  %v3250_v33 = vmul.f32 1.442695, %v3214_v47  ;;  %v3177_v39 = vpop.xlane.xlu0 %3176  ;;  %v3301_v25 = vsel %vm1229_vm2, %v18958_v16, 0.0 }
 0x5ca   :  { %17476 = vpow2.f32 %v3252_v54  ;;  %v3217_v58 = vsub.f32 %v18825_v14, %v3177_v39  ;;  %v3174_v55 = vpop.xlane.xlu1 %3173  ;;  %3302 = vadd.xlane.f32.xlu0 %v3301_v25  ;;  %v3298_v45 = vsel %vm1229_vm2, %v18960_v35, 0.0 }
 0x5cb   :  { %17478 = vpow2.f32 %v3250_v33  ;;  %v3216_v19 = vsub.f32 %v18830_v57, %v3174_v55  ;;  %3299 = vadd.xlane.f32.xlu1 %v3298_v45 }
 0x5cc   :  { %v3256_v59 = vmul.f32 1.442695, %v3217_v58 }
 0x5cd   :  { %v3254_v52 = vmul.f32 1.442695, %v3216_v19  ;;  %v3183_v10 = vpop.xlane.xlu0 %3182 }
 0x5ce   :  { %17480 = vpow2.f32 %v3256_v59  ;;  %v3219_v18 = vsub.f32 %v18839_v53, %v3183_v10  ;;  %v3180_v61 = vpop.xlane.xlu1 %3179 }
 0x5cf   :  { %17482 = vpow2.f32 %v3254_v52  ;;  %v3218_v5 = vsub.f32 %v18842_v6, %v3180_v61 }
 0x5d0   :  { %v18970_v14 = vpop.eup %17472  ;;  %v3260_v13 = vmul.f32 1.442695, %v3219_v18 }
 0x5d1   :  { %v18972_v17 = vpop.eup %17474  ;;  %v3258_v51 = vmul.f32 1.442695, %v3218_v5  ;;  %v3189_v47 = vpop.xlane.xlu0 %3188  ;;  %v3307_v57 = vsel %vm1229_vm2, %v18970_v14, 0.0 }
 0x5d2   :  { %17484 = vpow2.f32 %v3260_v13  ;;  %v3221_v54 = vsub.f32 %v18851_v44, %v3189_v47  ;;  %v3186_v33 = vpop.xlane.xlu1 %3185  ;;  %3308 = vadd.xlane.f32.xlu0 %v3307_v57  ;;  %v3304_v53 = vsel %vm1229_vm2, %v18972_v17, 0.0 }
 0x5d3   :  { %17486 = vpow2.f32 %v3258_v51  ;;  %v3220_v6 = vsub.f32 %v18856_v46, %v3186_v33  ;;  %3305 = vadd.xlane.f32.xlu1 %v3304_v53 }
 0x5d4   :  { %v18980_v39 = vpop.eup %17476  ;;  %v3264_v25 = vmul.f32 1.442695, %v3221_v54 }
 0x5d5   :  { %v18982_v58 = vpop.eup %17478  ;;  %v3262_v55 = vmul.f32 1.442695, %v3220_v6  ;;  %v3195_v45 = vpop.xlane.xlu0 %3194  ;;  %v3313_v19 = vsel %vm1229_vm2, %v18980_v39, 0.0 }
 0x5d6   :  { %17488 = vpow2.f32 %v3264_v25  ;;  %v3223_v44 = vsub.f32 %v18863_v50, %v3195_v45  ;;  %v3192_v59 = vpop.xlane.xlu1 %3191  ;;  %3314 = vadd.xlane.f32.xlu0 %v3313_v19  ;;  %v3310_v52 = vsel %vm1229_vm2, %v18982_v58, 0.0 }
 0x5d7   :  { %17490 = vpow2.f32 %v3262_v55  ;;  %v3222_v46 = vsub.f32 %v18868_v49, %v3192_v59  ;;  %3311 = vadd.xlane.f32.xlu1 %v3310_v52 }
 0x5d8   :  { %v18990_v10 = vpop.eup %17480  ;;  %v3268_v18 = vmul.f32 1.442695, %v3223_v44 }
 0x5d9   :  { %v18992_v61 = vpop.eup %17482  ;;  %v3266_v5 = vmul.f32 1.442695, %v3222_v46  ;;  %v3201_v13 = vpop.xlane.xlu0 %3200  ;;  %v3319_v51 = vsel %vm1229_vm2, %v18990_v10, 0.0 }
 0x5da   :  { %17492 = vpow2.f32 %v3268_v18  ;;  %v3225_v50 = vsub.f32 %v18877_v48, %v3201_v13  ;;  %v3198_v47 = vpop.xlane.xlu1 %3197  ;;  %3320 = vadd.xlane.f32.xlu0 %v3319_v51  ;;  %v3316_v57 = vsel %vm1229_vm2, %v18992_v61, 0.0 }
 0x5db   :  { %17494 = vpow2.f32 %v3266_v5  ;;  %v3224_v49 = vsub.f32 %v18880_v43, %v3198_v47  ;;  %3317 = vadd.xlane.f32.xlu1 %v3316_v57 }
 0x5dc   :  { %v19000_v54 = vpop.eup %17484  ;;  %v3272_v33 = vmul.f32 1.442695, %v3225_v50 }
 0x5dd   :  { %v19002_v53 = vpop.eup %17486  ;;  %v3270_v6 = vmul.f32 1.442695, %v3224_v49  ;;  %v3325_v25 = vsel %vm1229_vm2, %v19000_v54, 0.0  ;;  %v19036_v50 = vpop.permute.xlu0 %4914 }
 0x5de   :  { %17496 = vpow2.f32 %v3272_v33  ;;  %3326 = vadd.xlane.f32.xlu0 %v3325_v25  ;;  %v3322_v48 = vsel %vm1229_vm2, %v19002_v53, 0.0  ;;  %v19038_v47 = vpop.permute.xlu1 %4990 }
 0x5df   :  { %17498 = vpow2.f32 %v3270_v6  ;;  %3323 = vadd.xlane.f32.xlu1 %v3322_v48 }
 0x5e0   :  { %v19008_v55 = vpop.eup %17488 }
 0x5e1   :  { %v19010_v43 = vpop.eup %17490  ;;  %v3331_v45 = vsel %vm1229_vm2, %v19008_v55, 0.0 }
 0x5e2   :  { %3332 = vadd.xlane.f32.xlu0 %v3331_v45  ;;  %v3328_v19 = vsel %vm1229_vm2, %v19010_v43, 0.0 }
 0x5e3   :  { %3329 = vadd.xlane.f32.xlu1 %v3328_v19 }
 0x5e4   :  { %v19016_v44 = vpop.eup %17492 }
 0x5e5   :  { %v19018_v59 = vpop.eup %17494  ;;  %v3337_v52 = vsel %vm1229_vm2, %v19016_v44, 0.0 }
 0x5e6   :  { %3338 = vadd.xlane.f32.xlu0 %v3337_v52  ;;  %v3334_v46 = vsel %vm1229_vm2, %v19018_v59, 0.0 }
 0x5e7   :  { %3335 = vadd.xlane.f32.xlu1 %v3334_v46  ;;  %v20973_v46 = vmov 0.0  }
 0x5e8   :  { %v19024_v18 = vpop.eup %17496 }
 0x5e9   :  { %v19026_v5 = vpop.eup %17498  ;;  %v3343_v13 = vsel %vm1229_vm2, %v19024_v18, 0.0 }
 0x5ea   :  { %3344 = vadd.xlane.f32.xlu0 %v3343_v13  ;;  %v3340_v51 = vsel %vm1229_vm2, %v19026_v5, 0.0 }
 0x5eb   :  { %3341 = vadd.xlane.f32.xlu1 %v3340_v51 }
 0x5fc   :  { %5142 = vrot.lane.b32.xlu1 %v18528_v4, %s17727_s25 }
 0x600   :  { %5066 = vrot.lane.b32.xlu0 %v18532_v62, %s17727_s25 }
 0x60e   :  { %v3279_v57 = vpop.xlane.xlu0 %3278 }
 0x60f   :  { %17500 = vrcp.f32 %v3279_v57  ;;  %v3276_v49 = vpop.xlane.xlu1 %3275 }
 0x610   :  { %17502 = vrcp.f32 %v3276_v49 }
 0x613   :  { %v3285_v33 = vpop.xlane.xlu0 %3284  ;;  %v3282_v6 = vpop.xlane.xlu1 %3281 }
 0x614   :  { %17504 = vrcp.f32 %v3285_v33 }
 0x615   :  { %17506 = vrcp.f32 %v3282_v6 }
 0x617   :  { %v3291_v25 = vpop.xlane.xlu0 %3290  ;;  %v3288_v48 = vpop.xlane.xlu1 %3287 }
 0x618   :  { %17508 = vrcp.f32 %v3291_v25 }
 0x619   :  { %v17501_v45 = vpop.eup %17500  ;;  %17510 = vrcp.f32 %v3288_v48 }
 0x61a   :  { %v17503_v4 = vpop.eup %17502  ;;  %v3371_v62 = vmul.f32 %v17501_v45, %v18920_v40 }
 0x61b   :  { %v3370_v19 = vmul.f32 %v17503_v4, %v18918_v34 }
 0x61c   :  { %16575 = vmatmul.mubr.msk.f32.vlgmr.msra.gmra.mrb[44].mxu1 %vm1229_vm2, %v3371_v62 }
 0x61d   :  { %16583 = vmatpush3.msra.mxu1 %v18834_v11  ;;  %16570 = vmatmul.mubr.msk.f32.vlgmr.msra.gmra.mrb[54].mxu0 %vm1229_vm2, %v3370_v19 }
 0x61e   :  { %v17505_v52 = vpop.eup %17504  ;;  %16578 = vmatpush3.msra.mxu0 %v18810_v32  ;;  %16584 = vmatprep.mubr.msk.f32.mxu1 %vm17725_vm0, %v20973_v46 }
 0x61f   :  { %v17507_v13 = vpop.eup %17506  ;;  %16592 = vmatprep.subr.mxu1 %v20973_v46  ;;  %16579 = vmatprep.mubr.msk.f32.mxu0 %vm17725_vm0, %v20973_v46  ;;  %v3373_v34 = vmul.f32 %v17505_v52, %v18928_v21 }
 0x620   :  { %16587 = vmatprep.subr.mxu0 %v20973_v46  ;;  %v3372_v11 = vmul.f32 %v17507_v13, %v18926_v22 }
 0x621   :  { %16585 = vmatmul.mubr.msk.f32.vlgmr.msra.gmra.mrb[46].mxu1 %vm1229_vm2, %v3373_v34 }
 0x622   :  { %v17509_v40 = vpop.eup %17508  ;;  %16593 = vmatpush3.msra.mxu1 %v18853_v36  ;;  %16580 = vmatmul.mubr.msk.f32.vlgmr.msra.gmra.mrb[56].mxu0 %vm1229_vm2, %v3372_v11 }
 0x623   :  { %v17511_v32 = vpop.eup %17510  ;;  %16588 = vmatpush3.msra.mxu0 %v18827_v1  ;;  %16594 = vmatprep.mubr.msk.f32.mxu1 %vm17725_vm0, %v20973_v46  ;;  %v3375_v51 = vmul.f32 %v17509_v40, %v18936_v2 }
 0x624   :  { %16602 = vmatprep.subr.mxu1 %v20973_v46  ;;  %16589 = vmatprep.mubr.msk.f32.mxu0 %vm17725_vm0, %v20973_v46  ;;  %v3374_v22 = vmul.f32 %v17511_v32, %v18934_v60 }
 0x625   :  { %16595 = vmatmul.mubr.msk.f32.vlgmr.msra.gmra.mrb[48].mxu1 %vm1229_vm2, %v3375_v51  ;;  %16597 = vmatprep.subr.mxu0 %v20973_v46 }
 0x626   :  { %16603 = vmatpush3.msra.mxu1 %v18874_v41  ;;  %16590 = vmatmul.mubr.msk.f32.vlgmr.msra.gmra.mrb[58].mxu0 %vm1229_vm2, %v3374_v22 }
 0x627   :  { %16598 = vmatpush3.msra.mxu0 %v18846_v38  ;;  %16604 = vmatprep.mubr.msk.f32.mxu1 %vm17725_vm0, %v20973_v46 }
 0x628   :  { %16612 = vmatprep.subr.mxu1 %v20973_v46  ;;  %16599 = vmatprep.mubr.msk.f32.mxu0 %vm17725_vm0, %v20973_v46 }
 0x629   :  { %16607 = vmatprep.subr.mxu0 %v20973_v46 }
 0x64f   :  { %v3297_v1 = vpop.xlane.xlu0 %3296 }
 0x650   :  { %17512 = vrcp.f32 %v3297_v1  ;;  %v3294_v36 = vpop.xlane.xlu1 %3293 }
 0x651   :  { %17514 = vrcp.f32 %v3294_v36 }
 0x657   :  { %v3303_v21 = vpop.xlane.xlu0 %3302 }
 0x658   :  { %17516 = vrcp.f32 %v3303_v21  ;;  %v3300_v41 = vpop.xlane.xlu1 %3299  ;;  %v1051_v21 = vld [vmem:[%s20953_s10 + $0x8] sm:$0xff] }
 0x659   :  { %17518 = vrcp.f32 %v3300_v41 }
 0x65a   :  { %v17513_v60 = vpop.eup %17512 }
 0x65b   :  { %v17515_v38 = vpop.eup %17514  ;;  %v3377_v2 = vmul.f32 %v17513_v60, %v18946_v42 }
 0x65c   :  { %v3376_v57 = vmul.f32 %v17515_v38, %v18948_v8 }
 0x65d   :  { %16605 = vmatmul.mubr.msk.f32.vlgmr.msra.gmra.mrb[50].mxu1 %vm1229_vm2, %v3377_v2 }
 0x65e   :  { %16613 = vmatpush3.msra.mxu1 %v18888_v9  ;;  %16600 = vmatmul.mubr.msk.f32.vlgmr.msra.gmra.mrb[60].mxu0 %vm1229_vm2, %v3376_v57 }
 0x65f   :  { %16608 = vmatpush3.msra.mxu0 %v18865_v31  ;;  %v3309_v49 = vpop.xlane.xlu0 %3308  ;;  %16614 = vmatprep.mubr.msk.f32.mxu1 %vm17725_vm0, %v20973_v46 }
 0x660   :  { %17520 = vrcp.f32 %v3309_v49  ;;  %v3306_v33 = vpop.xlane.xlu1 %3305  ;;  %16622 = vmatprep.subr.mxu1 %v20973_v46  ;;  %16609 = vmatprep.mubr.msk.f32.mxu0 %vm17725_vm0, %v20973_v46 }
 0x661   :  { %17522 = vrcp.f32 %v3306_v33  ;;  %16617 = vmatprep.subr.mxu0 %v20973_v46 }
 0x662   :  { %v17517_v42 = vpop.eup %17516 }
 0x663   :  { %v17519_v9 = vpop.eup %17518  ;;  %v3315_v8 = vpop.xlane.xlu0 %3314  ;;  %v3379_v6 = vmul.f32 %v17517_v42, %v18958_v16 }
 0x664   :  { %17524 = vrcp.f32 %v3315_v8  ;;  %v3312_v31 = vpop.xlane.xlu1 %3311  ;;  %v3378_v25 = vmul.f32 %v17519_v9, %v18960_v35 }
 0x665   :  { %17526 = vrcp.f32 %v3312_v31  ;;  %16615 = vmatmul.mubr.msk.f32.vlgmr.msra.gmra.mrb[52].mxu1 %vm1229_vm2, %v3379_v6 }
 0x666   :  { %16623 = vmatpush3.msra.mxu1 %v18892_v0  ;;  %16610 = vmatmul.mubr.msk.f32.vlgmr.msra.gmra.mrb[62].mxu0 %vm1229_vm2, %v3378_v25 }
 0x667   :  { %16618 = vmatpush3.msra.mxu0 %v18910_v3  ;;  %v3321_v48 = vpop.xlane.xlu0 %3320  ;;  %16624 = vmatprep.mubr.msk.f32.mxu1 %vm17725_vm0, %v20973_v46 }
 0x668   :  { %17528 = vrcp.f32 %v3321_v48  ;;  %v3318_v45 = vpop.xlane.xlu1 %3317  ;;  %16632 = vmatprep.subr.mxu1 %v20973_v46  ;;  %16619 = vmatprep.mubr.msk.f32.mxu0 %vm17725_vm0, %v20973_v46 }
 0x669   :  { %17530 = vrcp.f32 %v3318_v45  ;;  %16627 = vmatprep.subr.mxu0 %v20973_v46 }
 0x66a   :  { %v17521_v16 = vpop.eup %17520 }
 0x66b   :  { %v17523_v0 = vpop.eup %17522  ;;  %v3327_v35 = vpop.xlane.xlu0 %3326  ;;  %v3381_v4 = vmul.f32 %v17521_v16, %v18970_v14  ;;  %v1053_v16 = vld [vmem:[%s20953_s10 + $0x18] sm:$0xff] }
 0x66c   :  { %17532 = vrcp.f32 %v3327_v35  ;;  %v3324_v3 = vpop.xlane.xlu1 %3323  ;;  %v3380_v62 = vmul.f32 %v17523_v0, %v18972_v17 }
 0x66d   :  { %17534 = vrcp.f32 %v3324_v3  ;;  %16625 = vmatmul.mubr.msk.f32.vlgmr.msra.gmra.mrb[54].mxu1 %vm1229_vm2, %v3381_v4 }
 0x66e   :  { %v17525_v19 = vpop.eup %17524  ;;  %16633 = vmatpush3.msra.mxu1 %v18890_v28  ;;  %16620 = vmatmul.mubr.msk.f32.vlgmr.msra.gmra.mrb[64].mxu0 %vm1229_vm2, %v3380_v62 }
 0x66f   :  { %v17527_v52 = vpop.eup %17526  ;;  %16628 = vmatpush3.msra.mxu0 %v18886_v7  ;;  %v3333_v13 = vpop.xlane.xlu0 %3332  ;;  %16634 = vmatprep.mubr.msk.f32.mxu1 %vm17725_vm0, %v20973_v46  ;;  %v3383_v14 = vmul.f32 %v17525_v19, %v18980_v39 }
 0x670   :  { %17536 = vrcp.f32 %v3333_v13  ;;  %v3330_v34 = vpop.xlane.xlu1 %3329  ;;  %16642 = vmatprep.subr.mxu1 %v20973_v46  ;;  %16629 = vmatprep.mubr.msk.f32.mxu0 %vm17725_vm0, %v20973_v46  ;;  %v3382_v28 = vmul.f32 %v17527_v52, %v18982_v58 }
 0x671   :  { %17538 = vrcp.f32 %v3330_v34  ;;  %16635 = vmatmul.mubr.msk.f32.vlgmr.msra.gmra.mrb[56].mxu1 %vm1229_vm2, %v3383_v14  ;;  %16637 = vmatprep.subr.mxu0 %v20973_v46 }
 0x672   :  { %v17529_v7 = vpop.eup %17528  ;;  %16643 = vmatpush3.msra.mxu1 %v18894_v29  ;;  %16630 = vmatmul.mubr.msk.f32.vlgmr.msra.gmra.mrb[66].mxu0 %vm1229_vm2, %v3382_v28 }
 0x673   :  { %v17531_v17 = vpop.eup %17530  ;;  %16638 = vmatpush3.msra.mxu0 %v18896_v27  ;;  %v3339_v39 = vpop.xlane.xlu0 %3338  ;;  %16644 = vmatprep.mubr.msk.f32.mxu1 %vm17725_vm0, %v20973_v46  ;;  %v3385_v11 = vmul.f32 %v17529_v7, %v18990_v10 }
 0x674   :  { %17540 = vrcp.f32 %v3339_v39  ;;  %v3336_v58 = vpop.xlane.xlu1 %3335  ;;  %16652 = vmatprep.subr.mxu1 %v20973_v46  ;;  %16639 = vmatprep.mubr.msk.f32.mxu0 %vm17725_vm0, %v20973_v46  ;;  %v3384_v29 = vmul.f32 %v17531_v17, %v18992_v61 }
 0x675   :  { %17542 = vrcp.f32 %v3336_v58  ;;  %16645 = vmatmul.mubr.msk.f32.vlgmr.msra.gmra.mrb[58].mxu1 %vm1229_vm2, %v3385_v11  ;;  %16647 = vmatprep.subr.mxu0 %v20973_v46 }
 0x676   :  { %v17533_v27 = vpop.eup %17532  ;;  %16653 = vmatpush3.msra.mxu1 %v18900_v30  ;;  %16640 = vmatmul.mubr.msk.f32.vlgmr.msra.gmra.mrb[68].mxu0 %vm1229_vm2, %v3384_v29 }
 0x677   :  { %v17535_v10 = vpop.eup %17534  ;;  %16648 = vmatpush3.msra.mxu0 %v18908_v23  ;;  %v3345_v40 = vpop.xlane.xlu0 %3344  ;;  %16654 = vmatprep.mubr.msk.f32.mxu1 %vm17725_vm0, %v20973_v46  ;;  %v3387_v32 = vmul.f32 %v17533_v27, %v19000_v54 }
 0x678   :  { %17544 = vrcp.f32 %v3345_v40  ;;  %v3342_v61 = vpop.xlane.xlu1 %3341  ;;  %16662 = vmatprep.subr.mxu1 %v20973_v46  ;;  %16649 = vmatprep.mubr.msk.f32.mxu0 %vm17725_vm0, %v20973_v46  ;;  %v3386_v30 = vmul.f32 %v17535_v10, %v19002_v53 }
 0x679   :  { %17546 = vrcp.f32 %v3342_v61  ;;  %16655 = vmatmul.mubr.msk.f32.vlgmr.msra.gmra.mrb[60].mxu1 %vm1229_vm2, %v3387_v32  ;;  %16657 = vmatprep.subr.mxu0 %v20973_v46 }
 0x67a   :  { %v17537_v23 = vpop.eup %17536  ;;  %16663 = vmatpush3.msra.mxu1 %v18906_v37  ;;  %16650 = vmatmul.mubr.msk.f32.vlgmr.msra.gmra.mrb[70].mxu0 %vm1229_vm2, %v3386_v30 }
 0x67b   :  { %v17539_v54 = vpop.eup %17538  ;;  %16658 = vmatpush3.msra.mxu0 %v18902_v15  ;;  %16664 = vmatprep.mubr.msk.f32.mxu1 %vm17725_vm0, %v20973_v46  ;;  %v3389_v51 = vmul.f32 %v17537_v23, %v19008_v55  ;;  %v5067_v1 = vpop.permute.xlu0 %5066 }
 0x67c   :  { %16672 = vmatprep.subr.mxu1 %v20973_v46  ;;  %16659 = vmatprep.mubr.msk.f32.mxu0 %vm17725_vm0, %v20973_v46  ;;  %v3388_v53 = vmul.f32 %v17539_v54, %v19010_v43  ;;  %v5143_v22 = vpop.permute.xlu1 %5142 }
 0x67d   :  { %16665 = vmatmul.mubr.msk.f32.vlgmr.msra.gmra.mrb[62].mxu1 %vm1229_vm2, %v3389_v51  ;;  %16667 = vmatprep.subr.mxu0 %v20973_v46 }
 0x67e   :  { %v17541_v37 = vpop.eup %17540  ;;  %16673 = vmatpush3.msra.mxu1 %v19038_v47  ;;  %16660 = vmatmul.mubr.msk.f32.vlgmr.msra.gmra.mrb[72].mxu0 %vm1229_vm2, %v3388_v53 }
 0x67f   :  { %v17543_v15 = vpop.eup %17542  ;;  %16668 = vmatpush3.msra.mxu0 %v19036_v50  ;;  %16674 = vmatprep.mubr.msk.f32.mxu1 %vm17725_vm0, %v20973_v46  ;;  %v3391_v55 = vmul.f32 %v17541_v37, %v19016_v44  ;;  %v1050_v50 = vld [vmem:[%s20953_s10] sm:$0xff] }
 0x680   :  { %16682 = vmatprep.subr.mxu1 %v20973_v46  ;;  %16669 = vmatprep.mubr.msk.f32.mxu0 %vm17725_vm0, %v20973_v46  ;;  %v3390_v43 = vmul.f32 %v17543_v15, %v19018_v59 }
 0x681   :  { %16675 = vmatmul.mubr.msk.f32.vlgmr.msra.gmra.mrb[64].mxu1 %vm1229_vm2, %v3391_v55  ;;  %16677 = vmatprep.subr.mxu0 %v20973_v46 }
 0x682   :  { %v17545_v47 = vpop.eup %17544  ;;  %16683 = vmatpush3.msra.mxu1 %v5143_v22  ;;  %16670 = vmatmul.mubr.msk.f32.vlgmr.msra.gmra.mrb[74].mxu0 %vm1229_vm2, %v3390_v43 }
 0x683   :  { %v17547_v44 = vpop.eup %17546  ;;  %16678 = vmatpush3.msra.mxu0 %v5067_v1  ;;  %16684 = vmatprep.mubr.msk.f32.mxu1 %vm17725_vm0, %v20973_v46  ;;  %v3393_v59 = vmul.f32 %v17545_v47, %v19024_v18  ;;  %v19217_v47 = vld [vmem:[%s20951_s13] sm:$0xff] }
 0x684   :  { %16679 = vmatprep.mubr.msk.f32.mxu0 %vm17725_vm0, %v20973_v46  ;;  %v3392_v36 = vmul.f32 %v17547_v44, %v19026_v5  ;;  %16687 = vmatprep.subr.mxu0 %v1050_v50  ;;  %v1052_v5 = vld [vmem:[%s20953_s10 + $0x10] sm:$0xff] }
 0x685   :  { %16685 = vmatmul.mubr.msk.f32.vlgmr.msra.gmra.mrb[66].mxu1 %vm1229_vm2, %v3393_v59 }
 0x686   :  { %16680 = vmatmul.mubr.msk.f32.vlgmr.msra.gmra.mrb[76].mxu0 %vm1229_vm2, %v3392_v36 }
 0x687   :  { %16688 = vmatpush3.msra.mxu0 %v1050_v50  ;;  %v19212_v50 = vsub.s32 1, %v17841_v12 }
 0x688   :  { %16698 = vmatprep.subr.mxu0 %v1051_v21 }
 0x689   :  { %v5334_v1 = vrot.slane %v19217_v47, %v19212_v50 }
 0x6ef   :  { %v3542_v41 = vpop.f32.mrb[44].mxu1 }
 0x6f0   :  { %v3466_v60 = vpop.f32.mrb[54].mxu0  ;;  %v16576_v38 = vpop.f32.mrb[45].mxu1 }
 0x6f1   :  { %v16571_v18 = vpop.f32.mrb[55].mxu0  ;;  %16689 = vmatprep.mubr.msk.f32.mxu0 %vm1229_vm2, %v3466_v60 }
 0x6f2   :  { %16690 = vmatmul.mubr.msk.f32.vlgmr.msra.gmra.mrb[78].mxu0 %vm1229_vm2, %v3542_v41 }
 0x6f3   :  { %16699 = vmatpush3.msra.mxu0 %v1051_v21 }
 0x6f4   :  { %v3694_v2 = vpop.f32.mrb[46].mxu1  ;;  %16709 = vmatprep.subr.mxu0 %v1052_v5 }
 0x6f5   :  { %v3618_v57 = vpop.f32.mrb[56].mxu0  ;;  %v16586_v49 = vpop.f32.mrb[47].mxu1 }
 0x6f6   :  { %v16581_v33 = vpop.f32.mrb[57].mxu0  ;;  %16692 = vmatprep.mubr.msk.f32.mxu0 %vm1229_vm2, %v3618_v57 }
 0x6f7   :  { %16693 = vmatmul.mubr.msk.f32.gmra.mrb[80].mxu0 %vm1229_vm2, %v3694_v2 }
 0x6f8   :  { %v3846_v42 = vpop.f32.mrb[48].mxu1 }
 0x6f9   :  { %v3770_v9 = vpop.f32.mrb[58].mxu0  ;;  %v16596_v8 = vpop.f32.mrb[49].mxu1 }
 0x6fa   :  { %v16591_v6 = vpop.f32.mrb[59].mxu0  ;;  %16695 = vmatprep.mubr.msk.f32.mxu0 %vm1229_vm2, %v3770_v9 }
 0x6fb   :  { %16696 = vmatmul.mubr.msk.f32.gmra.mrb[82].mxu0 %vm1229_vm2, %v3846_v42 }
 0x730   :  { %v3998_v31 = vpop.f32.mrb[50].mxu1 }
 0x731   :  { %v3922_v25 = vpop.f32.mrb[60].mxu0  ;;  %v16606_v48 = vpop.f32.mrb[51].mxu1 }
 0x732   :  { %v16601_v45 = vpop.f32.mrb[61].mxu0  ;;  %16700 = vmatprep.mubr.msk.f32.mxu0 %vm1229_vm2, %v3922_v25  ;;  %v20974_v25 = vld [vmem:[#allocation3_spill] sm:$0xff] }
 0x733   :  { %16701 = vmatmul.mubr.msk.f32.vlgmr.msra.gmra.mrb[78].mxu0 %vm1229_vm2, %v3998_v31 }
 0x734   :  { %16710 = vmatpush3.msra.mxu0 %v1052_v5 }
 0x735   :  { %16720 = vmatprep.subr.mxu0 %v1053_v16 }
 0x738   :  { %v4150_v0 = vpop.f32.mrb[52].mxu1 }
 0x739   :  { %v4074_v35 = vpop.f32.mrb[62].mxu0  ;;  %v16616_v4 = vpop.f32.mrb[53].mxu1 }
 0x73a   :  { %v16611_v3 = vpop.f32.mrb[63].mxu0  ;;  %16703 = vmatprep.mubr.msk.f32.mxu0 %vm1229_vm2, %v4074_v35 }
 0x73b   :  { %16704 = vmatmul.mubr.msk.f32.gmra.mrb[80].mxu0 %vm1229_vm2, %v4150_v0 }
 0x740   :  { %v4302_v62 = vpop.f32.mrb[54].mxu1 }
 0x741   :  { %v4226_v19 = vpop.f32.mrb[64].mxu0  ;;  %v16626_v52 = vpop.f32.mrb[55].mxu1 }
 0x742   :  { %v16621_v13 = vpop.f32.mrb[65].mxu0  ;;  %16706 = vmatprep.mubr.msk.f32.mxu0 %vm1229_vm2, %v4226_v19 }
 0x743   :  { %16707 = vmatmul.mubr.msk.f32.gmra.mrb[82].mxu0 %vm1229_vm2, %v4302_v62 }
 0x744   :  { %v4454_v14 = vpop.f32.mrb[56].mxu1 }
 0x745   :  { %v4378_v34 = vpop.f32.mrb[66].mxu0  ;;  %v16636_v28 = vpop.f32.mrb[57].mxu1 }
 0x746   :  { %v16631_v7 = vpop.f32.mrb[67].mxu0  ;;  %16711 = vmatprep.mubr.msk.f32.mxu0 %vm1229_vm2, %v4378_v34 }
 0x747   :  { %16712 = vmatmul.mubr.msk.f32.vlgmr.msra.gmra.mrb[78].mxu0 %vm1229_vm2, %v4454_v14 }
 0x748   :  { %v4606_v17 = vpop.f32.mrb[58].mxu1  ;;  %16721 = vmatpush3.msra.mxu0 %v1053_v16 }
 0x749   :  { %v4530_v39 = vpop.f32.mrb[68].mxu0  ;;  %v16646_v11 = vpop.f32.mrb[59].mxu1  ;;  %16804 = vmatprep.subr.mxu0 %v20973_v46 }
 0x74a   :  { %v16641_v58 = vpop.f32.mrb[69].mxu0  ;;  %16714 = vmatprep.mubr.msk.f32.mxu0 %vm1229_vm2, %v4530_v39 }
 0x74b   :  { %16715 = vmatmul.mubr.msk.f32.gmra.mrb[80].mxu0 %vm1229_vm2, %v4606_v17 }
 0x74c   :  { %v4758_v29 = vpop.f32.mrb[60].mxu1 }
 0x74d   :  { %v4682_v27 = vpop.f32.mrb[70].mxu0  ;;  %v16656_v10 = vpop.f32.mrb[61].mxu1 }
 0x74e   :  { %v16651_v40 = vpop.f32.mrb[71].mxu0  ;;  %16717 = vmatprep.mubr.msk.f32.mxu0 %vm1229_vm2, %v4682_v27 }
 0x74f   :  { %16718 = vmatmul.mubr.msk.f32.gmra.mrb[82].mxu0 %vm1229_vm2, %v4758_v29 }
 0x750   :  { %v4910_v32 = vpop.f32.mrb[62].mxu1 }
 0x751   :  { %v4834_v61 = vpop.f32.mrb[72].mxu0  ;;  %v16666_v30 = vpop.f32.mrb[63].mxu1 }
 0x752   :  { %v16661_v23 = vpop.f32.mrb[73].mxu0  ;;  %16722 = vmatprep.mubr.msk.f32.mxu0 %vm1229_vm2, %v4834_v61 }
 0x753   :  { %16723 = vmatmul.mubr.msk.f32.vlgmr.msra.gmra.mrb[78].mxu0 %vm1229_vm2, %v4910_v32 }
 0x754   :  { %v5062_v54 = vpop.f32.mrb[64].mxu1 }
 0x755   :  { %v4986_v51 = vpop.f32.mrb[74].mxu0  ;;  %v16676_v53 = vpop.f32.mrb[65].mxu1 }
 0x756   :  { %v16671_v37 = vpop.f32.mrb[75].mxu0  ;;  %16725 = vmatprep.mubr.msk.f32.mxu0 %vm1229_vm2, %v4986_v51 }
 0x757   :  { %16726 = vmatmul.mubr.msk.f32.gmra.mrb[80].mxu0 %vm1229_vm2, %v5062_v54 }
 0x758   :  { %v5214_v15 = vpop.f32.mrb[66].mxu1 }
 0x759   :  { %v5138_v55 = vpop.f32.mrb[76].mxu0  ;;  %v16686_v43 = vpop.f32.mrb[67].mxu1 }
 0x75a   :  { %v16681_v22 = vpop.f32.mrb[77].mxu0  ;;  %16728 = vmatprep.mubr.msk.f32.mxu0 %vm1229_vm2, %v5138_v55  ;;  %v1055_v55 = vld [vmem:[%s20954_s11 + $0x8] sm:$0xff] }
 0x75b   :  { %16729 = vmatmul.mubr.msk.f32.gmra.mrb[82].mxu0 %vm1229_vm2, %v5214_v15  ;;  %v1054_v15 = vld [vmem:[%s20954_s11] sm:$0xff]  ;;  %v1056_v22 = vld [vmem:[%s20954_s11 + $0x10] sm:$0xff] }
 0x75c   :  { %16806 = vmatprep.mubr.msk.f32.mxu0 %vm17725_vm0, %v20973_v46  ;;  %v17293_v43 = vpack.c.bf16 %v1055_v55, %v1054_v15 }
 0x75e   :  { %17294 = vmatprep.subr.bf16.mxu1 %v17293_v43 }
 0x75f   :  { %17296 = vmatpush3.bf16.msra.mxu1 %v17293_v43  ;;  %v1064_v43 = vld [vmem:[%s20955_s12 + $0x30] sm:$0xff] }
 0x826   :  { %v16724_v44 = vpop.f32.mrb[78].mxu0 }
 0x827   :  { %v17399_v59 = vadd.f32 %v16724_v44, %v5334_v1  ;;  %v5663_v36 = vpop.f32.mrb[79].mxu0 }
 0x828   :  { %v17400_v21 = vadd.f32 %v5663_v36, %v5334_v1  ;;  %v1059_v36 = vld [vmem:[%s20955_s12 + $0x8] sm:$0xff] }
 0x829   :  { %v5699_v41 = vadd.f32 %v17399_v59, %v18373_v26  ;;  %v1058_v59 = vld [vmem:[%s20955_s12] sm:$0xff] }
 0x82a   :  { %v5698_v60 = vadd.f32 %v17400_v21, %v18369_v63  ;;  %v16727_v38 = vpop.f32.mrb[80].mxu0  ;;  %v17301_v21 = vpack.c.bf16 %v1059_v36, %v1058_v59 }
 0x82b   :  { %v5673_v18 = vpop.f32.mrb[81].mxu0  ;;  %v5707_v5 = vsel %vm1071_vm15, %v5699_v41, 0.0  ;;  %v17401_v2 = vadd.f32 %v16727_v38, %v5334_v1 }
 0x82c   :  { %v17402_v57 = vadd.f32 %v5673_v18, %v5334_v1  ;;  %5708 = vadd.xlane.f32.xlu1 %v5707_v5  ;;  %v5704_v49 = vsel %vm1071_vm15, %v5698_v60, 0.0 }
 0x82d   :  { %5705 = vadd.xlane.f32.xlu0 %v5704_v49  ;;  %v5701_v8 = vadd.f32 %v17401_v2, %v18381_v56 }
 0x82e   :  { %v5700_v33 = vadd.f32 %v17402_v57, %v18377_v20  ;;  %v16730_v42 = vpop.f32.mrb[82].mxu0 }
 0x82f   :  { %v5683_v9 = vpop.f32.mrb[83].mxu0  ;;  %v17403_v6 = vadd.f32 %v16730_v42, %v5334_v1  ;;  %v5713_v45 = vsel %vm1071_vm15, %v5701_v8, 0.0 }
 0x830   :  { %v17404_v26 = vadd.f32 %v5683_v9, %v5334_v1  ;;  %v5710_v63 = vsel %vm1071_vm15, %v5700_v33, 0.0  ;;  %v1057_v1 = vld [vmem:[%s20954_s11 + $0x18] sm:$0xff] }
 0x831   :  { %5711 = vadd.xlane.f32.xlu0 %v5710_v63  ;;  %v5703_v48 = vadd.f32 %v17403_v6, %v20974_v25  ;;  %v17297_v44 = vpack.c.bf16 %v1057_v1, %v1056_v22  ;;  %v19331_v1 = vsub.s32 4, %v17841_v12 }
 0x832   :  { %v5702_v31 = vadd.f32 %v17404_v26, %v18385_v24  ;;  %v19282_v26 = vsub.s32 2, %v17841_v12 }
 0x833   :  { %v5719_v20 = vsel %vm1071_vm15, %v5703_v48, 0.0  ;;  %17298 = vmatprep.subr.bf16.mxu1 %v17297_v44 }
 0x834   :  { %v5716_v16 = vsel %vm1071_vm15, %v5702_v31, 0.0  ;;  %17300 = vmatpush3.bf16.msra.mxu1 %v17297_v44  ;;  %v5806_v44 = vrot.slane %v19217_v47, %v19331_v1 }
 0x835   :  { %5714 = vadd.xlane.f32.xlu0 %v5713_v45  ;;  %5717 = vadd.xlane.f32.xlu1 %v5716_v16  ;;  %v5786_v16 = vrot.slane %v19217_v47, %v19282_v26 }
 0x836   :  { %17302 = vmatprep.subr.bf16.mxu1 %v17301_v21 }
 0x839   :  { %5720 = vadd.xlane.f32.xlu0 %v5719_v20 }
 0x8b9   :  { %v5709_v0 = vpop.xlane.xlu1 %5708 }
 0x8ba   :  { %v5724_v56 = vmul.f32 0.03125, %v5709_v0  ;;  %v5706_v35 = vpop.xlane.xlu0 %5705 }
 0x8bb   :  { %v5723_v4 = vmul.f32 0.03125, %v5706_v35 }
 0x8bc   :  { %v19233_v3 = vsub.f32 %v5699_v41, %v5724_v56 }
 0x8bd   :  { %v19235_v62 = vsub.f32 %v5698_v60, %v5723_v4 }
 0x8be   :  { %v5712_v24 = vpop.xlane.xlu0 %5711  ;;  %v5736_v19 = vmul.f32 %v19233_v3, %v19233_v3 }
 0x8bf   :  { %v5725_v52 = vmul.f32 0.03125, %v5712_v24  ;;  %v5735_v13 = vmul.f32 %v19235_v62, %v19235_v62 }
 0x8c0   :  { %v5744_v14 = vsel %vm1071_vm15, %v5736_v19, 0.0 }
 0x8c1   :  { %v19242_v34 = vsub.f32 %v5700_v33, %v5725_v52  ;;  %5745 = vadd.xlane.f32.xlu0 %v5744_v14  ;;  %v5741_v28 = vsel %vm1071_vm15, %v5735_v13, 0.0  ;;  %v1060_v13 = vld [vmem:[%s20955_s12 + $0x10] sm:$0xff]  ;;  %v1061_v14 = vld [vmem:[%s20955_s12 + $0x18] sm:$0xff] }
 0x8c2   :  { %v5715_v7 = vpop.xlane.xlu0 %5714  ;;  %5742 = vadd.xlane.f32.xlu1 %v5741_v28  ;;  %v5718_v17 = vpop.xlane.xlu1 %5717 }
 0x8c3   :  { %v5726_v39 = vmul.f32 0.03125, %v5715_v7  ;;  %v5727_v11 = vmul.f32 0.03125, %v5718_v17  ;;  %v5737_v58 = vmul.f32 %v19242_v34, %v19242_v34  ;;  %v17305_v17 = vpack.c.bf16 %v1061_v14, %v1060_v13 }
 0x8c5   :  { %v19247_v29 = vsub.f32 %v5701_v8, %v5726_v39  ;;  %v19249_v27 = vsub.f32 %v5702_v31, %v5727_v11  ;;  %v5747_v10 = vsel %vm1071_vm15, %v5737_v58, 0.0  ;;  %v1062_v11 = vld [vmem:[%s20955_s12 + $0x20] sm:$0xff]  ;;  %v1063_v58 = vld [vmem:[%s20955_s12 + $0x28] sm:$0xff] }
 0x8c6   :  { %v5721_v40 = vpop.xlane.xlu0 %5720  ;;  %5748 = vadd.xlane.f32.xlu1 %v5747_v10 }
 0x8c7   :  { %v5728_v32 = vmul.f32 0.03125, %v5721_v40  ;;  %v5738_v61 = vmul.f32 %v19247_v29, %v19247_v29  ;;  %v5739_v30 = vmul.f32 %v19249_v27, %v19249_v27 }
 0x8c9   :  { %v19256_v23 = vsub.f32 %v5703_v48, %v5728_v32  ;;  %v5750_v54 = vsel %vm1071_vm15, %v5738_v61, 0.0  ;;  %v5753_v51 = vsel %vm1071_vm15, %v5739_v30, 0.0  ;;  %v19285_v48 = vsub.s32 3, %v17841_v12 }
 0x8ca   :  { %5751 = vadd.xlane.f32.xlu0 %v5750_v54  ;;  %5754 = vadd.xlane.f32.xlu1 %v5753_v51  ;;  %v17309_v30 = vpack.c.bf16 %v1063_v58, %v1062_v11 }
 0x8cb   :  { %v5740_v53 = vmul.f32 %v19256_v23, %v19256_v23  ;;  %v5796_v24 = vrot.slane %v19217_v47, %v19285_v48 }
 0x8cd   :  { %v5756_v37 = vsel %vm1071_vm15, %v5740_v53, 0.0 }
 0x8ce   :  { %5757 = vadd.xlane.f32.xlu0 %v5756_v37 }
 0x94e   :  { %v5746_v41 = vpop.xlane.xlu0 %5745 }
 0x94f   :  { %v5760_v60 = vmul.f32 0.03125, %v5746_v41  ;;  %v5743_v38 = vpop.xlane.xlu1 %5742 }
 0x950   :  { %v5759_v18 = vmul.f32 0.03125, %v5743_v38 }
 0x951   :  { %v5766_v5 = vadd.f32 1e-05, %v5760_v60 }
 0x952   :  { %v5765_v2 = vadd.f32 1e-05, %v5759_v18 }
 0x953   :  { %17548 = vrsqrt.f32 %v5766_v5  ;;  %v5749_v57 = vpop.xlane.xlu1 %5748 }
 0x954   :  { %17550 = vrsqrt.f32 %v5765_v2  ;;  %v5761_v49 = vmul.f32 0.03125, %v5749_v57 }
 0x956   :  { %v5767_v33 = vadd.f32 1e-05, %v5761_v49 }
 0x957   :  { %v5752_v42 = vpop.xlane.xlu0 %5751  ;;  %v5755_v9 = vpop.xlane.xlu1 %5754 }
 0x958   :  { %17552 = vrsqrt.f32 %v5767_v33  ;;  %v5762_v8 = vmul.f32 0.03125, %v5752_v42  ;;  %v5763_v6 = vmul.f32 0.03125, %v5755_v9 }
 0x95a   :  { %v5768_v63 = vadd.f32 1e-05, %v5762_v8  ;;  %v5769_v31 = vadd.f32 1e-05, %v5763_v6 }
 0x95b   :  { %v5758_v25 = vpop.xlane.xlu0 %5757 }
 0x95c   :  { %17554 = vrsqrt.f32 %v5768_v63  ;;  %v5764_v45 = vmul.f32 0.03125, %v5758_v25  ;;  %v19342_v25 = vsub.s32 5, %v17841_v12 }
 0x95d   :  { %v17549_v20 = vpop.eup %17548  ;;  %17556 = vrsqrt.f32 %v5769_v31 }
 0x95e   :  { %v17551_v0 = vpop.eup %17550  ;;  %v5778_v56 = vmul.f32 %v17549_v20, %v19233_v3  ;;  %v5770_v35 = vadd.f32 1e-05, %v5764_v45  ;;  %v6049_v45 = vrot.slane %v19217_v47, %v19342_v25 }
 0x95f   :  { %v5777_v4 = vmul.f32 %v17551_v0, %v19235_v62 }
 0x960   :  { %17558 = vrsqrt.f32 %v5770_v35  ;;  %v5788_v19 = vmul.f32 %v5786_v16, %v5778_v56 }
 0x961   :  { %v5787_v52 = vmul.f32 %v5786_v16, %v5777_v4 }
 0x962   :  { %v17553_v28 = vpop.eup %17552  ;;  %v19302_v62 = vadd.f32 %v5796_v24, %v5788_v19 }
 0x963   :  { %v19299_v7 = vadd.f32 %v5796_v24, %v5787_v52  ;;  %v5779_v3 = vmul.f32 %v17553_v28, %v19242_v34 }
 0x965   :  { %16739 = vmatprep.mubr.msk.f32.mxu1 %vm1071_vm15, %v19299_v7  ;;  %v5789_v39 = vmul.f32 %v5786_v16, %v5779_v3 }
 0x966   :  { %v17555_v10 = vpop.eup %17554  ;;  %16740 = vmatmul.mubr.msk.f32.vlgmr.msra.gmra.mrb[68].mxu1 %vm1071_vm15, %v19302_v62 }
 0x967   :  { %v17557_v34 = vpop.eup %17556  ;;  %v19314_v40 = vadd.f32 %v5796_v24, %v5789_v39  ;;  %v5780_v32 = vmul.f32 %v17555_v10, %v19247_v29  ;;  %17304 = vmatpush3.bf16.msra.mxu1 %v17301_v21 }
 0x968   :  { %v5781_v61 = vmul.f32 %v17557_v34, %v19249_v27  ;;  %17306 = vmatprep.subr.bf16.mxu1 %v17305_v17 }
 0x969   :  { %16742 = vmatprep.mubr.msk.f32.mxu1 %vm1071_vm15, %v19314_v40  ;;  %v5790_v54 = vmul.f32 %v5786_v16, %v5780_v32 }
 0x96a   :  { %v17559_v51 = vpop.eup %17558  ;;  %v5791_v53 = vmul.f32 %v5786_v16, %v5781_v61 }
 0x96b   :  { %v5800_v37 = vadd.f32 %v5796_v24, %v5790_v54  ;;  %v5782_v15 = vmul.f32 %v17559_v51, %v19256_v23  ;;  %17308 = vmatpush3.bf16.msra.mxu1 %v17305_v17  ;;  %v1065_v23 = vld [vmem:[%s20955_s12 + $0x38] sm:$0xff] }
 0x96c   :  { %v5801_v55 = vadd.f32 %v5796_v24, %v5791_v53  ;;  %17310 = vmatprep.subr.bf16.mxu1 %v17309_v30  ;;  %v17313_v22 = vpack.c.bf16 %v1065_v23, %v1064_v43 }
 0x96d   :  { %16743 = vmatmul.mubr.msk.f32.gmra.mrb[70].mxu1 %vm1071_vm15, %v5800_v37  ;;  %v5792_v29 = vmul.f32 %v5786_v16, %v5782_v15 }
 0x96e   :  { %16745 = vmatprep.mubr.msk.f32.mxu1 %vm1071_vm15, %v5801_v55 }
 0x96f   :  { %v5802_v27 = vadd.f32 %v5796_v24, %v5792_v29  ;;  %17312 = vmatpush3.bf16.msra.mxu1 %v17309_v30 }
 0x970   :  { %17314 = vmatprep.subr.bf16.mxu1 %v17313_v22 }
 0x971   :  { %16746 = vmatmul.mubr.msk.f32.gmra.mrb[72].mxu1 %vm1071_vm15, %v5802_v27 }
 0x973   :  { %17316 = vmatpush3.bf16.msra.mxu1 %v17313_v22 }
 0xa39   :  { %v16741_v59 = vpop.f32.mrb[68].mxu1 }
 0xa3a   :  { %v5897_v36 = vadd.f32 %v16741_v59, %v5806_v44  ;;  %v5891_v21 = vpop.f32.mrb[69].mxu1 }
 0xa3b   :  { %v5892_v41 = vadd.f32 %v5891_v21, %v5806_v44 }
 0xa3c   :  { %v5921_v38 = vmax.f32 %v5897_v36, 0.0 }
 0xa3d   :  { %v5920_v60 = vmax.f32 %v5892_v41, 0.0 }
 0xa3f   :  { %16764 = vmatprep.mubr.msk.f32.mxu1 %vm5926_vm3, %v5920_v60 }
 0xa40   :  { %v16744_v18 = vpop.f32.mrb[70].mxu1  ;;  %16765 = vmatmul.mubr.msk.f32.vlgmr.msra.gmra.mrb[74].mxu1 %vm5926_vm3, %v5921_v38 }
 0xa41   :  { %v5907_v5 = vadd.f32 %v16744_v18, %v5806_v44  ;;  %v5901_v2 = vpop.f32.mrb[71].mxu1 }
 0xa42   :  { %v5902_v57 = vadd.f32 %v5901_v2, %v5806_v44 }
 0xa43   :  { %v5923_v42 = vmax.f32 %v5907_v5, 0.0 }
 0xa44   :  { %v5922_v49 = vmax.f32 %v5902_v57, 0.0  ;;  %v16747_v33 = vpop.f32.mrb[72].mxu1 }
 0xa45   :  { %v5917_v9 = vadd.f32 %v16747_v33, %v5806_v44  ;;  %v5911_v8 = vpop.f32.mrb[73].mxu1 }
 0xa46   :  { %v5912_v6 = vadd.f32 %v5911_v8, %v5806_v44  ;;  %16767 = vmatprep.mubr.msk.f32.mxu1 %vm5926_vm3, %v5922_v49 }
 0xa47   :  { %16768 = vmatmul.mubr.msk.f32.gmra.mrb[76].mxu1 %vm5926_vm3, %v5923_v42  ;;  %v5925_v31 = vmax.f32 %v5917_v9, 0.0 }
 0xa48   :  { %v5924_v63 = vmax.f32 %v5912_v6, 0.0 }
 0xa4a   :  { %16770 = vmatprep.mubr.msk.f32.mxu1 %vm5926_vm3, %v5924_v63 }
 0xa4b   :  { %16771 = vmatmul.mubr.msk.f32.gmra.mrb[78].mxu1 %vm5926_vm3, %v5925_v31  ;;  %v6154_v31 = vld [vmem:[%s20956_s4] sm:$0xff] }
 0xb13   :  { %v16766_v16 = vpop.f32.mrb[74].mxu1 }
 0xb14   :  { %v6041_v20 = vadd.f32 %v16766_v16, %v19302_v62  ;;  %v6011_v0 = vpop.f32.mrb[75].mxu1  ;;  %v6169_v16 = vld [vmem:[%s20957_s5] sm:$0xff] }
 0xb15   :  { %v6040_v56 = vadd.f32 %v6011_v0, %v19299_v7 }
 0xb16   :  { %v6051_v35 = vadd.f32 %v6049_v45, %v6041_v20  ;;  %v6170_v20 = vld [vmem:[%s20957_s5 + $0x8] sm:$0xf] }
 0xb17   :  { %v6050_v4 = vadd.f32 %v6049_v45, %v6040_v56 }
 0xb18   :  { %v6059_v24 = vsel %vm1071_vm15, %v6051_v35, 0.0 }
 0xb19   :  { %6060 = vadd.xlane.f32.xlu0 %v6059_v24  ;;  %v6056_v19 = vsel %vm1071_vm15, %v6050_v4, 0.0 }
 0xb1a   :  { %6057 = vadd.xlane.f32.xlu1 %v6056_v19  ;;  %v16769_v52 = vpop.f32.mrb[76].mxu1 }
 0xb1b   :  { %v6043_v13 = vadd.f32 %v16769_v52, %v5800_v37  ;;  %v6021_v14 = vpop.f32.mrb[77].mxu1 }
 0xb1c   :  { %v6042_v28 = vadd.f32 %v6021_v14, %v19314_v40 }
 0xb1d   :  { %v6053_v3 = vadd.f32 %v6049_v45, %v6043_v13 }
 0xb1e   :  { %v6052_v17 = vadd.f32 %v6049_v45, %v6042_v28  ;;  %v16772_v39 = vpop.f32.mrb[78].mxu1 }
 0xb1f   :  { %v6045_v62 = vadd.f32 %v16772_v39, %v5802_v27  ;;  %v6031_v11 = vpop.f32.mrb[79].mxu1  ;;  %v6065_v7 = vsel %vm1071_vm15, %v6053_v3, 0.0 }
 0xb20   :  { %v6044_v58 = vadd.f32 %v6031_v11, %v5801_v55  ;;  %6066 = vadd.xlane.f32.xlu0 %v6065_v7  ;;  %v6062_v10 = vsel %vm1071_vm15, %v6052_v17, 0.0 }
 0xb21   :  { %v6055_v34 = vadd.f32 %v6049_v45, %v6045_v62  ;;  %6063 = vadd.xlane.f32.xlu1 %v6062_v10 }
 0xb22   :  { %v6054_v32 = vadd.f32 %v6049_v45, %v6044_v58  ;;  %v6155_v45 = vld [vmem:[%s20956_s4 + $0x8] sm:$0xf]  ;;  %v19401_v58 = vsub.s32 7, %v17841_v12 }
 0xb23   :  { %v6071_v61 = vsel %vm1071_vm15, %v6055_v34, 0.0 }
 0xb24   :  { %6072 = vadd.xlane.f32.xlu0 %v6071_v61  ;;  %v6068_v30 = vsel %vm1071_vm15, %v6054_v32, 0.0 }
 0xb25   :  { %6069 = vadd.xlane.f32.xlu1 %v6068_v30 }
 0xba6   :  { %v6061_v40 = vpop.xlane.xlu0 %6060 }
 0xba7   :  { %v6075_v54 = vmul.f32 0.03125, %v6061_v40  ;;  %v6058_v51 = vpop.xlane.xlu1 %6057 }
 0xba8   :  { %v6074_v53 = vmul.f32 0.03125, %v6058_v51 }
 0xba9   :  { %v19355_v37 = vsub.f32 %v6051_v35, %v6075_v54 }
 0xbaa   :  { %v19357_v15 = vsub.f32 %v6050_v4, %v6074_v53  ;;  %v6147_v53 = vrot.slane %v19217_v47, %v19401_v58 }
 0xbab   :  { %v6087_v55 = vmul.f32 %v19355_v37, %v19355_v37 }
 0xbac   :  { %v6086_v29 = vmul.f32 %v19357_v15, %v19357_v15 }
 0xbad   :  { %v6067_v27 = vpop.xlane.xlu0 %6066  ;;  %v6095_v43 = vsel %vm1071_vm15, %v6087_v55, 0.0  ;;  %v20975_v55 = vld [vmem:[#allocation2_spill] sm:$0xff] }
 0xbae   :  { %v6077_v23 = vmul.f32 0.03125, %v6067_v27  ;;  %v6064_v22 = vpop.xlane.xlu1 %6063  ;;  %6096 = vadd.xlane.f32.xlu0 %v6095_v43  ;;  %v6092_v44 = vsel %vm1071_vm15, %v6086_v29, 0.0 }
 0xbaf   :  { %v6076_v59 = vmul.f32 0.03125, %v6064_v22  ;;  %6093 = vadd.xlane.f32.xlu1 %v6092_v44 }
 0xbb0   :  { %v19365_v36 = vsub.f32 %v6053_v3, %v6077_v23 }
 0xbb1   :  { %v19367_v21 = vsub.f32 %v6052_v17, %v6076_v59  ;;  %v6073_v41 = vpop.xlane.xlu0 %6072  ;;  %v19398_v17 = vsub.s32 6, %v17841_v12 }
 0xbb2   :  { %v6079_v60 = vmul.f32 0.03125, %v6073_v41  ;;  %v6070_v38 = vpop.xlane.xlu1 %6069  ;;  %v6089_v18 = vmul.f32 %v19365_v36, %v19365_v36 }
 0xbb3   :  { %v6078_v5 = vmul.f32 0.03125, %v6070_v38  ;;  %v6088_v2 = vmul.f32 %v19367_v21, %v19367_v21 }
 0xbb4   :  { %v19373_v57 = vsub.f32 %v6055_v34, %v6079_v60  ;;  %v6101_v49 = vsel %vm1071_vm15, %v6089_v18, 0.0 }
 0xbb5   :  { %v19376_v33 = vsub.f32 %v6054_v32, %v6078_v5  ;;  %6102 = vadd.xlane.f32.xlu0 %v6101_v49  ;;  %v6098_v42 = vsel %vm1071_vm15, %v6088_v2, 0.0  ;;  %v6137_v32 = vrot.slane %v19217_v47, %v19398_v17 }
 0xbb6   :  { %6099 = vadd.xlane.f32.xlu1 %v6098_v42  ;;  %v6091_v9 = vmul.f32 %v19373_v57, %v19373_v57 }
 0xbb7   :  { %v6090_v8 = vmul.f32 %v19376_v33, %v19376_v33 }
 0xbb8   :  { %v6107_v6 = vsel %vm1071_vm15, %v6091_v9, 0.0 }
 0xbb9   :  { %6108 = vadd.xlane.f32.xlu0 %v6107_v6  ;;  %v6104_v63 = vsel %vm1071_vm15, %v6090_v8, 0.0 }
 0xbba   :  { %6105 = vadd.xlane.f32.xlu1 %v6104_v63 }
 0xbcb   :  { %6157 = vperm.xlu1 %17451, %v6154_v31  }
 0xbcf   :  { %6160 = vperm.xlu0 %17450, %v6155_v45   ;;  %6173 = vperm.xlu1 %17451, %v6169_v16  }
 0xbd3   :  { %6178 = vperm.xlu1 %17451, %v6170_v20   ;;  %v15716_v20 = vld [vmem:[%s20950_s9 + $0x30] sm:$0xff] }
 0xc3b   :  { %v6097_v0 = vpop.xlane.xlu0 %6096 }
 0xc3c   :  { %v6111_v56 = vmul.f32 0.03125, %v6097_v0  ;;  %v6094_v35 = vpop.xlane.xlu1 %6093  ;;  %v15717_v0 = vld [vmem:[%s20950_s9 + $0x38] sm:$0xff] }
 0xc3d   :  { %v6110_v4 = vmul.f32 0.03125, %v6094_v35 }
 0xc3e   :  { %v6117_v24 = vadd.f32 1e-05, %v6111_v56  ;;  %v17333_v56 = vpack.c.bf16 %v15717_v0, %v15716_v20 }
 0xc3f   :  { %v6116_v19 = vadd.f32 1e-05, %v6110_v4  ;;  %v15711_v4 = vld [vmem:[%s20948_s8 + $0x8] ss:$0 sm:$0xff] }
 0xc40   :  { %17560 = vrsqrt.f32 %v6117_v24 }
 0xc41   :  { %17562 = vrsqrt.f32 %v6116_v19 }
 0xc42   :  { %v6103_v52 = vpop.xlane.xlu0 %6102 }
 0xc43   :  { %v6113_v13 = vmul.f32 0.03125, %v6103_v52  ;;  %v6100_v14 = vpop.xlane.xlu1 %6099 }
 0xc44   :  { %v6112_v28 = vmul.f32 0.03125, %v6100_v14 }
 0xc45   :  { %v6119_v3 = vadd.f32 1e-05, %v6113_v13 }
 0xc46   :  { %v6118_v39 = vadd.f32 1e-05, %v6112_v28  ;;  %v6109_v62 = vpop.xlane.xlu0 %6108 }
 0xc47   :  { %17564 = vrsqrt.f32 %v6119_v3  ;;  %v6115_v11 = vmul.f32 0.03125, %v6109_v62  ;;  %v6106_v7 = vpop.xlane.xlu1 %6105  ;;  %v20976_v62 = vld [vmem:[#allocation4_spill] sm:$0xff] }
 0xc48   :  { %17566 = vrsqrt.f32 %v6118_v39  ;;  %v6114_v10 = vmul.f32 0.03125, %v6106_v7  ;;  %v15734_v39 = vld [vmem:[%s20951_s13 + $0x8] sm:$0xff] }
 0xc49   :  { %v6121_v34 = vadd.f32 1e-05, %v6115_v11  ;;  %v6297_v11 = vrot.slane %v15734_v39, %v20976_v62 }
 0xc4a   :  { %v17561_v61 = vpop.eup %17560  ;;  %v6120_v30 = vadd.f32 1e-05, %v6114_v10 }
 0xc4b   :  { %v17563_v40 = vpop.eup %17562  ;;  %17568 = vrsqrt.f32 %v6121_v34  ;;  %v6158_v54 = vpop.permute.xlu1 %6157  ;;  %v6129_v51 = vmul.f32 %v17561_v61, %v19355_v37  ;;  %v20977_v61 = vld [vmem:[#allocation5_spill] sm:$0xff] }
 0xc4c   :  { %17570 = vrsqrt.f32 %v6120_v30  ;;  %vm6162_vm4 = vcmp.eq.s32.totalorder %v6158_v54, %v20975_v55  ;;  %v6128_v12 = vmul.f32 %v17563_v40, %v19357_v15 }
 0xc4d   :  { %v15709_v29 = vsel %vm6162_vm4, 1.0, %v20973_v46  ;;  %v6139_v27 = vmul.f32 %v6137_v32, %v6129_v51 }
 0xc4e   :  { %16785 = vmatprep.mubr.msk.f32.mxu1 %vm227_vm1, %v15709_v29  ;;  %v6138_v43 = vmul.f32 %v6137_v32, %v6128_v12  ;;  %v6161_v45 = vpop.permute.xlu0 %6160 }
 0xc4f   :  { %v6149_v23 = vadd.f32 %v6147_v53, %v6139_v27  ;;  %vm6163_vm5 = vcmp.eq.s32.totalorder %v6161_v45, %v20975_v55  ;;  %v6174_v35 = vpop.permute.xlu1 %6173 }
 0xc50   :  { %v6148_v22 = vadd.f32 %v6147_v53, %v6138_v43  ;;  %v6185_v19 = vmul.f32 %v15711_v4, %v6174_v35 }
 0xc51   :  { %v17565_v44 = vpop.eup %17564 }
 0xc52   :  { %v17567_v59 = vpop.eup %17566  ;;  %v17317_v41 = vpack.c.bf16 %v6149_v23, %v6148_v22  ;;  %v6131_v37 = vmul.f32 %v17565_v44, %v19365_v36  ;;  %v15714_v36 = vld [vmem:[%s20950_s9 + $0x20] sm:$0xff] }
 0xc53   :  { %v6130_v47 = vmul.f32 %v17567_v59, %v19367_v21  ;;  %v15715_v21 = vld [vmem:[%s20950_s9 + $0x28] sm:$0xff]  ;;  %v6179_v24 = vpop.permute.xlu1 %6178 }
 0xc54   :  { %17318 = vmatprep.subr.bf16.mxu1 %v17317_v41  ;;  %v6141_v60 = vmul.f32 %v6137_v32, %v6131_v37  ;;  %v17329_v16 = vpack.c.bf16 %v15715_v21, %v15714_v36  ;;  %v6186_v13 = vmul.f32 %v15711_v4, %v6179_v24 }
 0xc55   :  { %v17569_v38 = vpop.eup %17568  ;;  %17320 = vmatpush3.bf16.msra.mxu1 %v17317_v41  ;;  %v6140_v15 = vmul.f32 %v6137_v32, %v6130_v47 }
 0xc56   :  { %v17571_v18 = vpop.eup %17570  ;;  %v6151_v5 = vadd.f32 %v6147_v53, %v6141_v60  ;;  %v6133_v2 = vmul.f32 %v17569_v38, %v19373_v57 }
 0xc57   :  { %v6150_v49 = vadd.f32 %v6147_v53, %v6140_v15  ;;  %v6132_v42 = vmul.f32 %v17571_v18, %v19376_v33  ;;  %v15710_v33 = vsel %vm6163_vm5, 1.0, %v20973_v46 }
 0xc58   :  { %v6143_v9 = vmul.f32 %v6137_v32, %v6133_v2 }
 0xc59   :  { %v17321_v8 = vpack.c.bf16 %v6151_v5, %v6150_v49  ;;  %v6142_v6 = vmul.f32 %v6137_v32, %v6132_v42 }
 0xc5a   :  { %v6153_v63 = vadd.f32 %v6147_v53, %v6143_v9 }
 0xc5b   :  { %17322 = vmatprep.subr.bf16.mxu1 %v17321_v8  ;;  %v6152_v31 = vadd.f32 %v6147_v53, %v6142_v6 }
 0xc5c   :  { %17324 = vmatpush3.bf16.msra.mxu1 %v17321_v8 }
 0xc5d   :  { %v17325_v57 = vpack.c.bf16 %v6153_v63, %v6152_v31 }
 0xc5f   :  { %17326 = vmatprep.subr.bf16.mxu1 %v17325_v57 }
 0xc60   :  { %17328 = vmatpush3.bf16.msra.mxu1 %v17325_v57 }
 0xc61   :  { %17330 = vmatprep.subr.bf16.mxu1 %v17329_v16 }
 0xc63   :  { %16786 = vmatmul.mubr.msk.f32.vlgmr.msra.gmra.mrb[80].mxu1 %vm227_vm1, %v15710_v33  ;;  %vm8309_vm1 = vcmask 1042432  }
 0xc64   :  { %17332 = vmatpush3.bf16.msra.mxu1 %v17329_v16 }
 0xc65   :  { %17334 = vmatprep.subr.bf16.mxu1 %v17333_v56 }
 0xc68   :  { %17336 = vmatpush3.bf16.msra.mxu1 %v17333_v56 }
 0xc69   :  { %16799 = vmatprep.subr.mxu1 %v20973_v46 }
 0xd36   :  { %v16787_v52 = vpop.f32.mrb[80].mxu1 }
 0xd37   :  { %v6259_v14 = vpop.f32.mrb[81].mxu1  ;;  %v19437_v3 = vadd.f32 %v16787_v52, %v6186_v13 }
 0xd38   :  { %v19435_v28 = vadd.f32 %v6259_v14, %v6185_v19 }
 0xd3a   :  { %16796 = vmatprep.mubr.msk.f32.mxu1 %vm1071_vm15, %v19435_v28 }
 0xd3b   :  { %16797 = vmatmul.mubr.msk.f32.vlgmr.msra.gmra.mrb[82].mxu1 %vm1071_vm15, %v19437_v3 }
 0xd3c   :  { %16801 = vmatprep.mubr.msk.f32.mxu1 %vm17725_vm0, %v20973_v46 }
 0xe0e   :  { %v16798_v7 = vpop.f32.mrb[82].mxu1 }
 0xe0f   :  { %v6376_v10 = vadd.f32 %v16798_v7, %v6297_v11  ;;  %v6370_v34 = vpop.f32.mrb[83].mxu1 }
 0xe10   :  { %v6371_v32 = vadd.f32 %v6370_v34, %v6297_v11 }
 0xe11   :  { %v6436_v30 = vrot.slane %v6376_v10, %v20977_v61 }
 0xe12   :  { %v6381_v40 = vcombine.high %v6371_v32, %v6371_v32  ;;  %v6388_v54 = vrot.slane %v6371_v32, %v20977_v61 }
 0xe13   :  { %v6444_v51 = vrot.slane %v6436_v30, %v20977_v61  ;;  %v6437_v23 = vcombine.high %v6436_v30, %v6436_v30 }
 0xe14   :  { %v6395_v53 = vrot.slane %v6381_v40, %v20977_v61  ;;  %v6396_v55 = vcombine.high %v6388_v54, %v6388_v54  ;;  %v6404_v12 = vrot.slane %v6388_v54, %v20977_v61 }
 0xe15   :  { %6470 = vrot.lane.b32.xlu0 %v6444_v51, %s17722_s2  ;;  %v6451_v60 = vrot.slane %v6437_v23, %v20977_v61  ;;  %v6738_v18 = vrot.slane %v6444_v51, %v20977_v61  ;;  %v6452_v5 = vcombine.high %v6444_v51, %v6444_v51 }
 0xe16   :  { %v6397_v29 = vcombine.high %v6395_v53, %v6395_v53  ;;  %v6418_v27 = vrot.slane %v6396_v55, %v20977_v61  ;;  %6478 = vrot.lane.b32.xlu1 %v6404_v12, %s17723_s23  ;;  %v6426_v43 = vcombine.high %v6404_v12, %v6404_v12  ;;  %v6411_v59 = vrot.slane %v6395_v53, %v20977_v61 }
 0xe17   :  { %v6453_v49 = vcombine.high %v6451_v60, %v6451_v60  ;;  %v6823_v36 = vcombine.low %v6451_v60, %v6452_v5 }
 0xe18   :  { %v6425_v22 = vrot.slane %v6397_v29, %v20977_v61  ;;  %v6526_v44 = vcombine.low %v6404_v12, %v6418_v27  ;;  %v6540_v37 = vrot.slane %v6426_v43, %v20977_v61  ;;  %v6428_v42 = vcombine.high %v6418_v27, %v6418_v27 }
 0xe19   :  { %6494 = vrot.lane.b32.xlu0 %v6444_v51, %s17723_s23  ;;  %v6427_v9 = vcombine.high %v6411_v59, %v6411_v59  ;;  %v6830_v45 = vrot.slane %v6823_v36, %v20977_v61  ;;  %v6837_v57 = vrot.slane %v6453_v49, %v20977_v61 }
 0xe1a   :  { %6502 = vrot.lane.b32.xlu1 %v6404_v12, %s17724_s24  ;;  %v6533_v41 = vrot.slane %v6526_v44, %v20977_v61  ;;  %v15741_v47 = vcombine.high %v6411_v59, %v6425_v22  ;;  %v6429_v8 = vcombine.high %v6425_v22, %v6425_v22  ;;  %v6625_v6 = vcombine.low %v6428_v42, %v6411_v59 }
 0xe1b   :  { %v6639_v21 = vrot.slane %v6425_v22, %v20977_v61  ;;  %v6838_v20 = vcombine.low %v6830_v45, %v6837_v57 }
 0xe1c   :  { %v6541_v38 = vcombine.low %v6533_v41, %v6540_v37  ;;  %v6731_v15 = vrot.slane %v15741_v47, %v20977_v61  ;;  %v6632_v63 = vrot.slane %v6625_v6, %v20977_v61 }
 0xe1d   :  { %6454 = vrot.lane.b32.xlu0 %v6404_v12, %s17722_s2  ;;  %v19516_v56 = vrot.slane %v6838_v20, %v20977_v61 }
 0xe1e   :  { %6472 = vrot.lane.b32.xlu1 %v6451_v60, %s17722_s2  ;;  %v6739_v2 = vcombine.low %v6731_v15, %v6738_v18  ;;  %v6640_v31 = vcombine.low %v6632_v63, %v6639_v21  ;;  %v19503_v16 = vrot.slane %v6541_v38, %v20977_v61 }
 0xe20   :  { %v19506_v33 = vrot.slane %v6640_v31, %v20977_v61  ;;  %v19513_v0 = vrot.slane %v6739_v2, %v20977_v61 }
 0xe21   :  { %6474 = vrot.lane.b32.xlu0 %v6452_v5, %s17722_s2 }
 0xe22   :  { %6496 = vrot.lane.b32.xlu1 %v6451_v60, %s17723_s23 }
 0xe25   :  { %6498 = vrot.lane.b32.xlu0 %v6452_v5, %s17723_s23 }
 0xe26   :  { %6456 = vrot.lane.b32.xlu1 %v6418_v27, %s17722_s2 }
 0xe29   :  { %6458 = vrot.lane.b32.xlu0 %v6426_v43, %s17722_s2 }
 0xe2a   :  { %6476 = vrot.lane.b32.xlu1 %v6453_v49, %s17722_s2 }
 0xe2d   :  { %6462 = vrot.lane.b32.xlu0 %v6411_v59, %s17722_s2 }
 0xe2e   :  { %6500 = vrot.lane.b32.xlu1 %v6453_v49, %s17723_s23 }
 0xe31   :  { %6480 = vrot.lane.b32.xlu0 %v6418_v27, %s17723_s23 }
 0xe32   :  { %6460 = vrot.lane.b32.xlu1 %v6428_v42, %s17722_s2 }
 0xe35   :  { %6482 = vrot.lane.b32.xlu0 %v6426_v43, %s17723_s23 }
 0xe36   :  { %6466 = vrot.lane.b32.xlu1 %v6427_v9, %s17722_s2 }
 0xe39   :  { %6486 = vrot.lane.b32.xlu0 %v6411_v59, %s17723_s23 }
 0xe3a   :  { %6464 = vrot.lane.b32.xlu1 %v6425_v22, %s17722_s2 }
 0xe3d   :  { %6504 = vrot.lane.b32.xlu0 %v6418_v27, %s17724_s24 }
 0xe3e   :  { %6484 = vrot.lane.b32.xlu1 %v6428_v42, %s17723_s23 }
 0xe41   :  { %6506 = vrot.lane.b32.xlu0 %v6426_v43, %s17724_s24 }
 0xe42   :  { %6490 = vrot.lane.b32.xlu1 %v6427_v9, %s17723_s23 }
 0xe45   :  { %6468 = vrot.lane.b32.xlu0 %v6429_v8, %s17722_s2 }
 0xe46   :  { %6488 = vrot.lane.b32.xlu1 %v6425_v22, %s17723_s23 }
 0xe49   :  { %6510 = vrot.lane.b32.xlu0 %v6411_v59, %s17724_s24 }
 0xe4a   :  { %6508 = vrot.lane.b32.xlu1 %v6428_v42, %s17724_s24 }
 0xe4d   :  { %6492 = vrot.lane.b32.xlu0 %v6429_v8, %s17723_s23 }
 0xe4e   :  { %6514 = vrot.lane.b32.xlu1 %v6427_v9, %s17724_s24 }
 0xe51   :  { %6518 = vrot.lane.b32.xlu0 %v6444_v51, %s17724_s24 }
 0xe52   :  { %6512 = vrot.lane.b32.xlu1 %v6425_v22, %s17724_s24 }
 0xe55   :  { %6516 = vrot.lane.b32.xlu0 %v6429_v8, %s17724_s24 }
 0xe56   :  { %6520 = vrot.lane.b32.xlu1 %v6451_v60, %s17724_s24 }
 0xe59   :  { %6522 = vrot.lane.b32.xlu0 %v6452_v5, %s17724_s24 }
 0xe5a   :  { %6524 = vrot.lane.b32.xlu1 %v6453_v49, %s17724_s24 }
 0xe5d   :  { %6549 = vrot.lane.b32.xlu0 %v19503_v16, %s17726_s1 }
 0xe5e   :  { %6648 = vrot.lane.b32.xlu1 %v19506_v33, %s17726_s1 }
 0xe61   :  { %6747 = vrot.lane.b32.xlu0 %v19513_v0, %s17726_s1 }
 0xe62   :  { %6846 = vrot.lane.b32.xlu1 %v19516_v56, %s17726_s1 }
 0xe87   :  { %v6471_v35 = vpop.permute.xlu0 %6470 }
 0xe88   :  { %v6479_v4 = vpop.permute.xlu1 %6478 }
 0xe8b   :  { %v19522_v24 = vpop.permute.xlu0 %6494 }
 0xe8c   :  { %v19524_v19 = vpop.permute.xlu1 %6502 }
 0xe8f   :  { %v6455_v52 = vpop.permute.xlu0 %6454 }
 0xe90   :  { %v6473_v13 = vpop.permute.xlu1 %6472 }
 0xe93   :  { %v6475_v14 = vpop.permute.xlu0 %6474 }
 0xe94   :  { %v6497_v39 = vpop.permute.xlu1 %6496  ;;  %v7219_v22 = vcombine.low %v6473_v13, %v6475_v14 }
 0xe96   :  { %v7226_v60 = vrot.slane %v7219_v22, %v20977_v61 }
 0xe97   :  { %v6499_v11 = vpop.permute.xlu0 %6498 }
 0xe98   :  { %v6457_v7 = vpop.permute.xlu1 %6456  ;;  %v7615_v6 = vcombine.low %v6497_v39, %v6499_v11 }
 0xe99   :  { %v6922_v10 = vcombine.low %v6455_v52, %v6457_v7  ;;  %v7134_v52 = vrot.slane %v6471_v35, %v20977_v61 }
 0xe9a   :  { %v7622_v39 = vrot.slane %v7615_v6, %v20977_v61 }
 0xe9b   :  { %v6929_v34 = vrot.slane %v6922_v10, %v20977_v61  ;;  %v6459_v32 = vpop.permute.xlu0 %6458 }
 0xe9c   :  { %v6936_v30 = vrot.slane %v6459_v32, %v20977_v61  ;;  %v6477_v40 = vpop.permute.xlu1 %6476 }
 0xe9d   :  { %v7233_v41 = vrot.slane %v6477_v40, %v20977_v61 }
 0xe9e   :  { %v6937_v54 = vcombine.low %v6929_v34, %v6936_v30 }
 0xe9f   :  { %v6463_v51 = vpop.permute.xlu0 %6462  ;;  %v7234_v5 = vcombine.low %v7226_v60, %v7233_v41 }
 0xea0   :  { %v19529_v53 = vrot.slane %v6937_v54, %v20977_v61  ;;  %v6501_v55 = vpop.permute.xlu1 %6500 }
 0xea1   :  { %v19543_v9 = vrot.slane %v7234_v5, %v20977_v61  ;;  %v7629_v45 = vrot.slane %v6501_v55, %v20977_v61 }
 0xea2   :  { %6945 = vrot.lane.b32.xlu0 %v19529_v53, %s17726_s1 }
 0xea3   :  { %v6481_v12 = vpop.permute.xlu0 %6480  ;;  %v7630_v32 = vcombine.low %v7622_v39, %v7629_v45 }
 0xea4   :  { %v6461_v29 = vpop.permute.xlu1 %6460  ;;  %v7318_v36 = vcombine.low %v6479_v4, %v6481_v12 }
 0xea5   :  { %v7021_v23 = vcombine.low %v6461_v29, %v6463_v51  ;;  %v19567_v29 = vrot.slane %v7630_v32, %v20977_v61 }
 0xea6   :  { %v7325_v4 = vrot.slane %v7318_v36, %v20977_v61 }
 0xea7   :  { %v6483_v27 = vpop.permute.xlu0 %6482  ;;  %v7028_v37 = vrot.slane %v7021_v23, %v20977_v61 }
 0xea8   :  { %v6467_v43 = vpop.permute.xlu1 %6466  ;;  %v7332_v13 = vrot.slane %v6483_v27, %v20977_v61 }
 0xeaa   :  { %v7333_v40 = vcombine.low %v7325_v4, %v7332_v13 }
 0xeab   :  { %v6487_v44 = vpop.permute.xlu0 %6486 }
 0xeac   :  { %v6465_v59 = vpop.permute.xlu1 %6464  ;;  %v19572_v23 = vrot.slane %v7333_v40, %v20977_v61 }
 0xead   :  { %v7035_v47 = vrot.slane %v6465_v59, %v20977_v61 }
 0xeaf   :  { %v7036_v38 = vcombine.low %v7028_v37, %v7035_v47  ;;  %v6505_v15 = vpop.permute.xlu0 %6504 }
 0xeb0   :  { %v6485_v18 = vpop.permute.xlu1 %6484  ;;  %v7714_v51 = vcombine.low %v19524_v19, %v6505_v15 }
 0xeb1   :  { %v19538_v2 = vrot.slane %v7036_v38, %v20977_v61  ;;  %v7417_v8 = vcombine.low %v6485_v18, %v6487_v44 }
 0xeb2   :  { %v7721_v59 = vrot.slane %v7714_v51, %v20977_v61 }
 0xeb3   :  { %v6507_v49 = vpop.permute.xlu0 %6506  ;;  %7044 = vrot.lane.b32.xlu1 %v19538_v2, %s17726_s1  ;;  %v7424_v57 = vrot.slane %v7417_v8, %v20977_v61 }
 0xeb4   :  { %v6491_v42 = vpop.permute.xlu1 %6490  ;;  %v7728_v22 = vrot.slane %v6507_v49, %v20977_v61 }
 0xeb6   :  { %v7729_v60 = vcombine.low %v7721_v59, %v7728_v22 }
 0xeb7   :  { %7242 = vrot.lane.b32.xlu1 %v19543_v9, %s17726_s1  ;;  %v6469_v63 = vpop.permute.xlu0 %6468 }
 0xeb8   :  { %v7120_v21 = vcombine.low %v6467_v43, %v6469_v63  ;;  %v6489_v31 = vpop.permute.xlu1 %6488  ;;  %v7530_v43 = vrot.slane %v19522_v24, %v20977_v61  ;;  %v19592_v8 = vrot.slane %v7729_v60, %v20977_v61 }
 0xeb9   :  { %v7431_v20 = vrot.slane %v6489_v31, %v20977_v61 }
 0xeba   :  { %v7127_v14 = vrot.slane %v7120_v21, %v20977_v61 }
 0xebb   :  { %v7432_v11 = vcombine.low %v7424_v57, %v7431_v20  ;;  %v6511_v7 = vpop.permute.xlu0 %6510 }
 0xebc   :  { %v7135_v10 = vcombine.low %v7127_v14, %v7134_v52  ;;  %v6509_v34 = vpop.permute.xlu1 %6508 }
 0xebd   :  { %v19556_v30 = vrot.slane %v7432_v11, %v20977_v61  ;;  %v7813_v27 = vcombine.low %v6509_v34, %v6511_v7 }
 0xebe   :  { %v19559_v54 = vrot.slane %v7135_v10, %v20977_v61 }
 0xebf   :  { %7440 = vrot.lane.b32.xlu1 %v19556_v30, %s17726_s1  ;;  %v6493_v35 = vpop.permute.xlu0 %6492  ;;  %v7820_v24 = vrot.slane %v7813_v27, %v20977_v61 }
 0xec0   :  { %v7516_v55 = vcombine.low %v6491_v42, %v6493_v35  ;;  %v6515_v12 = vpop.permute.xlu1 %6514  ;;  %7143 = vrot.lane.b32.xlu0 %v19559_v54, %s17726_s1 }
 0xec2   :  { %v7523_v44 = vrot.slane %v7516_v55, %v20977_v61 }
 0xec3   :  { %7638 = vrot.lane.b32.xlu1 %v19567_v29, %s17726_s1  ;;  %v6519_v19 = vpop.permute.xlu0 %6518 }
 0xec4   :  { %v7531_v41 = vcombine.low %v7523_v44, %v7530_v43  ;;  %v6513_v37 = vpop.permute.xlu1 %6512  ;;  %7341 = vrot.lane.b32.xlu0 %v19572_v23, %s17726_s1  ;;  %v7926_v6 = vrot.slane %v6519_v19, %v20977_v61 }
 0xec5   :  { %v7827_v47 = vrot.slane %v6513_v37, %v20977_v61 }
 0xec6   :  { %v19584_v38 = vrot.slane %v7531_v41, %v20977_v61 }
 0xec7   :  { %v7828_v15 = vcombine.low %v7820_v24, %v7827_v47  ;;  %v6517_v18 = vpop.permute.xlu0 %6516 }
 0xec8   :  { %v7912_v5 = vcombine.low %v6515_v12, %v6517_v18  ;;  %v6521_v49 = vpop.permute.xlu1 %6520  ;;  %7539 = vrot.lane.b32.xlu0 %v19584_v38, %s17726_s1 }
 0xec9   :  { %v19589_v42 = vrot.slane %v7828_v15, %v20977_v61 }
 0xeca   :  { %v7919_v63 = vrot.slane %v7912_v5, %v20977_v61 }
 0xecb   :  { %7836 = vrot.lane.b32.xlu1 %v19589_v42, %s17726_s1  ;;  %v6523_v36 = vpop.permute.xlu0 %6522 }
 0xecc   :  { %v7927_v21 = vcombine.low %v7919_v63, %v7926_v6  ;;  %v8011_v31 = vcombine.low %v6521_v49, %v6523_v36  ;;  %v6525_v45 = vpop.permute.xlu1 %6524  ;;  %7737 = vrot.lane.b32.xlu0 %v19592_v8, %s17726_s1 }
 0xecd   :  { %v8025_v57 = vrot.slane %v6525_v45, %v20977_v61 }
 0xece   :  { %v8018_v20 = vrot.slane %v8011_v31, %v20977_v61  ;;  %v19603_v52 = vrot.slane %v7927_v21, %v20977_v61 }
 0xecf   :  { %v6550_v13 = vpop.permute.xlu0 %6549 }
 0xed0   :  { %v8026_v14 = vcombine.low %v8018_v20, %v8025_v57  ;;  %v6649_v39 = vpop.permute.xlu1 %6648  ;;  %7935 = vrot.lane.b32.xlu0 %v19603_v52, %s17726_s1  ;;  %16800 = vmatpush3.xpose.msk.msra.mxu1 %vm1229_vm2, %v6550_v13 }
 0xed1   :  { %16805 = vmatpush3.xpose.msk.msra.mxu0 %vm1229_vm2, %v6649_v39  ;;  %16809 = vmatprep.subr.mxu1 %v20973_v46 }
 0xed2   :  { %v19611_v11 = vrot.slane %v8026_v14, %v20977_v61  ;;  %16814 = vmatprep.subr.mxu0 %v20973_v46 }
 0xed3   :  { %16802 = vmatmul.mubr.msk.f32.vlgmr.msra.gmra.mrb[84].mxu1 %vm1229_vm2, %v19503_v16  ;;  %v6748_v7 = vpop.permute.xlu0 %6747 }
 0xed4   :  { %16807 = vmatmul.mubr.msk.f32.vlgmr.msra.gmra.mrb[84].mxu0 %vm1229_vm2, %v19506_v33  ;;  %v6847_v4 = vpop.permute.xlu1 %6846  ;;  %8303 = vrot.lane.b32.xlu0 %v19503_v16, %s17727_s25 }
 0xed5   :  { %8034 = vrot.lane.b32.xlu1 %v19611_v11, %s17726_s1  ;;  %16810 = vmatpush3.xpose.msk.msra.mxu1 %vm1229_vm2, %v6748_v7 }
 0xed6   :  { %16815 = vmatpush3.xpose.msk.msra.mxu0 %vm1229_vm2, %v6847_v4  ;;  %16811 = vmatprep.mubr.msk.f32.mxu1 %vm17725_vm0, %v20973_v46 }
 0xed7   :  { %16816 = vmatprep.mubr.msk.f32.mxu0 %vm17725_vm0, %v20973_v46  ;;  %16819 = vmatprep.subr.mxu1 %v20973_v46 }
 0xed8   :  { %16812 = vmatmul.mubr.msk.f32.vlgmr.msra.gmra.mrb[86].mxu1 %vm1229_vm2, %v19513_v0  ;;  %16824 = vmatprep.subr.mxu0 %v20973_v46 }
 0xed9   :  { %16817 = vmatmul.mubr.msk.f32.vlgmr.msra.gmra.mrb[86].mxu0 %vm1229_vm2, %v19516_v56  ;;  %8382 = vrot.lane.b32.xlu1 %v19506_v33, %s17727_s25 }
 0xeda   :  { %16821 = vmatprep.mubr.msk.f32.mxu1 %vm17725_vm0, %v20973_v46  ;;  %16826 = vmatprep.mubr.msk.f32.mxu0 %vm17725_vm0, %v20973_v46 }
 0xf14   :  { %v6946_v16 = vpop.permute.xlu0 %6945 }
 0xf15   :  { %16820 = vmatpush3.xpose.msk.msra.mxu1 %vm1229_vm2, %v6946_v16 }
 0xf16   :  { %16829 = vmatprep.subr.mxu1 %v20973_v46 }
 0xf18   :  { %16822 = vmatmul.mubr.msk.f32.vlgmr.msra.gmra.mrb[88].mxu1 %vm1229_vm2, %v19529_v53 }
 0xf19   :  { %16831 = vmatprep.mubr.msk.f32.mxu1 %vm17725_vm0, %v20973_v46 }
 0xf25   :  { %v7045_v10 = vpop.permute.xlu1 %7044 }
 0xf26   :  { %16825 = vmatpush3.xpose.msk.msra.mxu0 %vm1229_vm2, %v7045_v10 }
 0xf27   :  { %16834 = vmatprep.subr.mxu0 %v20973_v46 }
 0xf29   :  { %16827 = vmatmul.mubr.msk.f32.vlgmr.msra.gmra.mrb[88].mxu0 %vm1229_vm2, %v19538_v2  ;;  %v7243_v33 = vpop.permute.xlu1 %7242 }
 0xf2a   :  { %16835 = vmatpush3.xpose.msk.msra.mxu0 %vm1229_vm2, %v7243_v33  ;;  %16836 = vmatprep.mubr.msk.f32.mxu0 %vm17725_vm0, %v20973_v46 }
 0xf2b   :  { %16844 = vmatprep.subr.mxu0 %v20973_v46 }
 0xf2d   :  { %16837 = vmatmul.mubr.msk.f32.vlgmr.msra.gmra.mrb[90].mxu0 %vm1229_vm2, %v19543_v9 }
 0xf2e   :  { %16846 = vmatprep.mubr.msk.f32.mxu0 %vm17725_vm0, %v20973_v46 }
 0xf31   :  { %v7441_v34 = vpop.permute.xlu1 %7440 }
 0xf32   :  { %16845 = vmatpush3.xpose.msk.msra.mxu0 %vm1229_vm2, %v7441_v34  ;;  %v7144_v32 = vpop.permute.xlu0 %7143 }
 0xf33   :  { %16830 = vmatpush3.xpose.msk.msra.mxu1 %vm1229_vm2, %v7144_v32  ;;  %16854 = vmatprep.subr.mxu0 %v20973_v46 }
 0xf34   :  { %16839 = vmatprep.subr.mxu1 %v20973_v46 }
 0xf35   :  { %16847 = vmatmul.mubr.msk.f32.vlgmr.msra.gmra.mrb[92].mxu0 %vm1229_vm2, %v19556_v30  ;;  %v7639_v40 = vpop.permute.xlu1 %7638 }
 0xf36   :  { %16832 = vmatmul.mubr.msk.f32.vlgmr.msra.gmra.mrb[90].mxu1 %vm1229_vm2, %v19559_v54  ;;  %16855 = vmatpush3.xpose.msk.msra.mxu0 %vm1229_vm2, %v7639_v40  ;;  %v7342_v35 = vpop.permute.xlu0 %7341 }
 0xf37   :  { %16840 = vmatpush3.xpose.msk.msra.mxu1 %vm1229_vm2, %v7342_v35  ;;  %16856 = vmatprep.mubr.msk.f32.mxu0 %vm17725_vm0, %v20973_v46 }
 0xf38   :  { %16841 = vmatprep.mubr.msk.f32.mxu1 %vm17725_vm0, %v20973_v46  ;;  %16849 = vmatprep.subr.mxu1 %v20973_v46 }
 0xf39   :  { %16857 = vmatmul.mubr.msk.f32.vlgmr.msra.gmra.mrb[94].mxu0 %vm1229_vm2, %v19567_v29  ;;  %16864 = vmatprep.subr.mxu0 %v20973_v46 }
 0xf3a   :  { %16842 = vmatmul.mubr.msk.f32.vlgmr.msra.gmra.mrb[92].mxu1 %vm1229_vm2, %v19572_v23  ;;  %v7540_v51 = vpop.permute.xlu0 %7539  ;;  %16866 = vmatprep.mubr.msk.f32.mxu0 %vm17725_vm0, %v20973_v46 }
 0xf3b   :  { %16850 = vmatpush3.xpose.msk.msra.mxu1 %vm1229_vm2, %v7540_v51  ;;  %16851 = vmatprep.mubr.msk.f32.mxu1 %vm17725_vm0, %v20973_v46 }
 0xf3c   :  { %16859 = vmatprep.subr.mxu1 %v20973_v46 }
 0xf3d   :  { %v7837_v55 = vpop.permute.xlu1 %7836 }
 0xf3e   :  { %16852 = vmatmul.mubr.msk.f32.vlgmr.msra.gmra.mrb[94].mxu1 %vm1229_vm2, %v19584_v38  ;;  %16865 = vmatpush3.xpose.msk.msra.mxu0 %vm1229_vm2, %v7837_v55  ;;  %v7738_v12 = vpop.permute.xlu0 %7737 }
 0xf3f   :  { %16860 = vmatpush3.xpose.msk.msra.mxu1 %vm1229_vm2, %v7738_v12  ;;  %16861 = vmatprep.mubr.msk.f32.mxu1 %vm17725_vm0, %v20973_v46 }
 0xf40   :  { %16869 = vmatprep.subr.mxu1 %v20973_v46  ;;  %16874 = vmatprep.subr.mxu0 %v20973_v46 }
 0xf41   :  { %16867 = vmatmul.mubr.msk.f32.vlgmr.msra.gmra.mrb[96].mxu0 %vm1229_vm2, %v19589_v42 }
 0xf42   :  { %16862 = vmatmul.mubr.msk.f32.vlgmr.msra.gmra.mrb[96].mxu1 %vm1229_vm2, %v19592_v8  ;;  %v7936_v27 = vpop.permute.xlu0 %7935  ;;  %16876 = vmatprep.mubr.msk.f32.mxu0 %vm17725_vm0, %v20973_v46 }
 0xf43   :  { %16870 = vmatpush3.xpose.msk.msra.mxu1 %vm1229_vm2, %v7936_v27  ;;  %16871 = vmatprep.mubr.msk.f32.mxu1 %vm17725_vm0, %v20973_v46 }
 0xf44   :  { %16879 = vmatprep.subr.mxu1 %v20973_v46 }
 0xf46   :  { %16872 = vmatmul.mubr.msk.f32.vlgmr.msra.gmra.mrb[98].mxu1 %vm1229_vm2, %v19603_v52  ;;  %v8304_v43 = vpop.permute.xlu0 %8303 }
 0xf47   :  { %v8035_v22 = vpop.permute.xlu1 %8034  ;;  %16880 = vmatpush3.msk.msra.mxu1 %vm8309_vm1, %v8304_v43  ;;  %16881 = vmatprep.mubr.msk.f32.mxu1 %vm17725_vm0, %v20973_v46 }
 0xf48   :  { %16875 = vmatpush3.xpose.msk.msra.mxu0 %vm1229_vm2, %v8035_v22  ;;  %16889 = vmatprep.subr.mxu1 %v20973_v46 }
 0xf49   :  { %16884 = vmatprep.subr.mxu0 %v20973_v46 }
 0xf4b   :  { %16877 = vmatmul.mubr.msk.f32.vlgmr.msra.gmra.mrb[98].mxu0 %vm1229_vm2, %v19611_v11  ;;  %v8383_v44 = vpop.permute.xlu1 %8382 }
 0xf4c   :  { %16885 = vmatpush3.msk.msra.mxu0 %vm8309_vm1, %v8383_v44  ;;  %16886 = vmatprep.mubr.msk.f32.mxu0 %vm17725_vm0, %v20973_v46 }
 0xf4d   :  { %16894 = vmatprep.subr.mxu0 %v20973_v46 }
 0xfa6   :  { %v6621_v19 = vpop.f32.mrb[84].mxu1 }
 0xfa7   :  { %v19716_v59 = vmul.f32 0.35355338, %v6621_v19  ;;  %v16803_v41 = vpop.f32.mrb[85].mxu1  ;;  %v6720_v37 = vpop.f32.mrb[84].mxu0 }
 0xfa8   :  { %v19718_v24 = vmul.f32 0.35355338, %v6720_v37  ;;  %v16808_v47 = vpop.f32.mrb[85].mxu0 }
 0xfa9   :  { %v8127_v60 = vsel %vm8126_vm6, %v19716_v59, -inf }
 0xfaa   :  { %8128 = vmax.xlane.f32.xlu0 %v8127_v60  ;;  %v8130_v15 = vsel %vm8126_vm6, %v19718_v24, -inf }
 0xfab   :  { %v6819_v18 = vpop.f32.mrb[86].mxu1  ;;  %8131 = vmax.xlane.f32.xlu1 %v8130_v15 }
 0xfac   :  { %v19724_v5 = vmul.f32 0.35355338, %v6819_v18  ;;  %v6918_v49 = vpop.f32.mrb[86].mxu0  ;;  %v16813_v6 = vpop.f32.mrb[87].mxu1 }
 0xfad   :  { %v16818_v63 = vpop.f32.mrb[87].mxu0  ;;  %v19726_v36 = vmul.f32 0.35355338, %v6918_v49 }
 0xfae   :  { %v8133_v21 = vsel %vm8126_vm6, %v19724_v5, -inf }
 0xfaf   :  { %8134 = vmax.xlane.f32.xlu0 %v8133_v21  ;;  %v8136_v31 = vsel %vm8126_vm6, %v19726_v36, -inf }
 0xfb3   :  { %8137 = vmax.xlane.f32.xlu0 %v8136_v31 }
 0xfeb   :  { %v7017_v45 = vpop.f32.mrb[88].mxu1 }
 0xfec   :  { %v19732_v57 = vmul.f32 0.35355338, %v7017_v45  ;;  %v16823_v20 = vpop.f32.mrb[89].mxu1 }
 0xfee   :  { %v8139_v13 = vsel %vm8126_vm6, %v19732_v57, -inf }
 0xfef   :  { %8140 = vmax.xlane.f32.xlu1 %v8139_v13 }
 0xffc   :  { %v7116_v14 = vpop.f32.mrb[88].mxu0 }
 0xffd   :  { %v19736_v39 = vmul.f32 0.35355338, %v7116_v14  ;;  %v16828_v7 = vpop.f32.mrb[89].mxu0 }
 0xfff   :  { %v8142_v4 = vsel %vm8126_vm6, %v19736_v39, -inf }
0x1000   :  { %v7314_v16 = vpop.f32.mrb[90].mxu0  ;;  %8143 = vmax.xlane.f32.xlu0 %v8142_v4 }
0x1001   :  { %v19740_v10 = vmul.f32 0.35355338, %v7314_v16  ;;  %v16838_v33 = vpop.f32.mrb[91].mxu0 }
0x1003   :  { %v8148_v34 = vsel %vm8126_vm6, %v19740_v10, -inf }
0x1004   :  { %8149 = vmax.xlane.f32.xlu0 %v8148_v34 }
0x1008   :  { %v7512_v32 = vpop.f32.mrb[92].mxu0 }
0x1009   :  { %v19744_v40 = vmul.f32 0.35355338, %v7512_v32  ;;  %v7215_v35 = vpop.f32.mrb[90].mxu1  ;;  %v16848_v51 = vpop.f32.mrb[93].mxu0 }
0x100a   :  { %v19746_v55 = vmul.f32 0.35355338, %v7215_v35  ;;  %v16833_v12 = vpop.f32.mrb[91].mxu1 }
0x100b   :  { %v8154_v27 = vsel %vm8126_vm6, %v19744_v40, -inf }
0x100c   :  { %v7710_v43 = vpop.f32.mrb[94].mxu0  ;;  %8155 = vmax.xlane.f32.xlu0 %v8154_v27  ;;  %v8145_v22 = vsel %vm8126_vm6, %v19746_v55, -inf }
0x100d   :  { %v19752_v44 = vmul.f32 0.35355338, %v7710_v43  ;;  %v16858_v19 = vpop.f32.mrb[95].mxu0  ;;  %8146 = vmax.xlane.f32.xlu1 %v8145_v22  ;;  %v7413_v41 = vpop.f32.mrb[92].mxu1 }
0x100e   :  { %v19754_v37 = vmul.f32 0.35355338, %v7413_v41  ;;  %v16843_v47 = vpop.f32.mrb[93].mxu1 }
0x100f   :  { %v8160_v60 = vsel %vm8126_vm6, %v19752_v44, -inf }
0x1010   :  { %8161 = vmax.xlane.f32.xlu0 %v8160_v60  ;;  %v8151_v15 = vsel %vm8126_vm6, %v19754_v37, -inf }
0x1011   :  { %8152 = vmax.xlane.f32.xlu1 %v8151_v15  ;;  %v7611_v18 = vpop.f32.mrb[94].mxu1 }
0x1012   :  { %v19760_v49 = vmul.f32 0.35355338, %v7611_v18  ;;  %v16853_v6 = vpop.f32.mrb[95].mxu1 }
0x1014   :  { %v7908_v63 = vpop.f32.mrb[96].mxu0  ;;  %v8157_v21 = vsel %vm8126_vm6, %v19760_v49, -inf }
0x1015   :  { %v19764_v31 = vmul.f32 0.35355338, %v7908_v63  ;;  %v16868_v45 = vpop.f32.mrb[97].mxu0  ;;  %8158 = vmax.xlane.f32.xlu1 %v8157_v21  ;;  %v7809_v20 = vpop.f32.mrb[96].mxu1 }
0x1016   :  { %v19766_v13 = vmul.f32 0.35355338, %v7809_v20  ;;  %v16863_v14 = vpop.f32.mrb[97].mxu1 }
0x1017   :  { %v8166_v7 = vsel %vm8126_vm6, %v19764_v31, -inf }
0x1018   :  { %8167 = vmax.xlane.f32.xlu0 %v8166_v7  ;;  %v8163_v4 = vsel %vm8126_vm6, %v19766_v13, -inf }
0x1019   :  { %8164 = vmax.xlane.f32.xlu1 %v8163_v4  ;;  %v8007_v16 = vpop.f32.mrb[98].mxu1 }
0x101a   :  { %v19772_v33 = vmul.f32 0.35355338, %v8007_v16  ;;  %v16873_v34 = vpop.f32.mrb[99].mxu1 }
0x101c   :  { %v8169_v32 = vsel %vm8126_vm6, %v19772_v33, -inf }
0x101d   :  { %8170 = vmax.xlane.f32.xlu1 %v8169_v32 }
0x101e   :  { %v8106_v35 = vpop.f32.mrb[98].mxu0 }
0x101f   :  { %v19776_v51 = vmul.f32 0.35355338, %v8106_v35  ;;  %v16878_v12 = vpop.f32.mrb[99].mxu0 }
0x1021   :  { %v8172_v27 = vsel %vm8126_vm6, %v19776_v51, -inf }
0x1022   :  { %8173 = vmax.xlane.f32.xlu0 %v8172_v27 }
0x102e   :  { %8536 = vrot.lane.b32.xlu1 %v19516_v56, %s17727_s25 }
0x1032   :  { %8613 = vrot.lane.b32.xlu1 %v19529_v53, %s17727_s25 }
0x1036   :  { %8690 = vrot.lane.b32.xlu1 %v19538_v2, %s17727_s25 }
0x1037   :  { %v8129_v43 = vpop.xlane.xlu0 %8128 }
0x1038   :  { %8459 = vrot.lane.b32.xlu0 %v19513_v0, %s17727_s25  ;;  %v8132_v19 = vpop.xlane.xlu1 %8131 }
0x1039   :  { %v8176_v56 = vsub.f32 %v19718_v24, %v8132_v19 }
0x103a   :  { %8767 = vrot.lane.b32.xlu1 %v19559_v54, %s17727_s25 }
0x103b   :  { %v8193_v53 = vmul.f32 1.442695, %v8176_v56 }
0x103c   :  { %v8135_v22 = vpop.xlane.xlu0 %8134 }
0x103d   :  { %17572 = vpow2.f32 %v8193_v53  ;;  %v8177_v47 = vsub.f32 %v19724_v5, %v8135_v22 }
0x103e   :  { %8844 = vrot.lane.b32.xlu1 %v19543_v9, %s17727_s25 }
0x1040   :  { %v8138_v41 = vpop.xlane.xlu0 %8137 }
0x1041   :  { %v8178_v2 = vsub.f32 %v19726_v36, %v8138_v41 }
0x1042   :  { %8921 = vrot.lane.b32.xlu1 %v19572_v23, %s17727_s25  ;;  %v8175_v23 = vsub.f32 %v19716_v59, %v8129_v43 }
0x1043   :  { %v8197_v0 = vmul.f32 1.442695, %v8178_v2 }
0x1045   :  { %17574 = vpow2.f32 %v8197_v0 }
0x1046   :  { %8998 = vrot.lane.b32.xlu1 %v19556_v30, %s17727_s25  ;;  %v8191_v30 = vmul.f32 1.442695, %v8175_v23 }
0x1047   :  { %v19800_v54 = vpop.eup %17572 }
0x1048   :  { %v8226_v9 = vsel %vm8126_vm6, %v19800_v54, 0.0  ;;  %17576 = vpow2.f32 %v8191_v30 }
0x104a   :  { %9075 = vrot.lane.b32.xlu1 %v19584_v38, %s17727_s25  ;;  %v8195_v38 = vmul.f32 1.442695, %v8177_v47 }
0x104c   :  { %17578 = vpow2.f32 %v8195_v38 }
0x104f   :  { %v19804_v24 = vpop.eup %17574 }
0x1050   :  { %v8232_v36 = vsel %vm8126_vm6, %v19804_v24, 0.0 }
0x1052   :  { %v19810_v60 = vpop.eup %17576 }
0x1053   :  { %v8223_v15 = vsel %vm8126_vm6, %v19810_v60, 0.0 }
0x1056   :  { %v19814_v18 = vpop.eup %17578 }
0x1057   :  { %8227 = vadd.xlane.f32.xlu0 %v8226_v9  ;;  %v8229_v59 = vsel %vm8126_vm6, %v19814_v18, 0.0 }
0x105b   :  { %8233 = vadd.xlane.f32.xlu0 %v8232_v36 }
0x106e   :  { %8224 = vadd.xlane.f32.xlu1 %v8223_v15 }
0x1072   :  { %8230 = vadd.xlane.f32.xlu1 %v8229_v59 }
0x107c   :  { %v8141_v6 = vpop.xlane.xlu1 %8140 }
0x107d   :  { %v8179_v63 = vsub.f32 %v19732_v57, %v8141_v6 }
0x107f   :  { %v8199_v21 = vmul.f32 1.442695, %v8179_v63 }
0x1081   :  { %17580 = vpow2.f32 %v8199_v21 }
0x108b   :  { %v19819_v5 = vpop.eup %17580 }
0x108c   :  { %v8235_v45 = vsel %vm8126_vm6, %v19819_v5, 0.0 }
0x108d   :  { %8236 = vadd.xlane.f32.xlu1 %v8235_v45  ;;  %v8144_v20 = vpop.xlane.xlu0 %8143 }
0x108e   :  { %v8180_v14 = vsub.f32 %v19736_v39, %v8144_v20 }
0x1090   :  { %v8201_v7 = vmul.f32 1.442695, %v8180_v14 }
0x1091   :  { %v8150_v4 = vpop.xlane.xlu0 %8149 }
0x1092   :  { %17582 = vpow2.f32 %v8201_v7  ;;  %v8182_v16 = vsub.f32 %v19740_v10, %v8150_v4 }
0x1094   :  { %v8205_v34 = vmul.f32 1.442695, %v8182_v16 }
0x1096   :  { %17584 = vpow2.f32 %v8205_v34 }
0x1099   :  { %v8156_v32 = vpop.xlane.xlu0 %8155 }
0x109a   :  { %v8184_v57 = vsub.f32 %v19744_v40, %v8156_v32  ;;  %v8147_v35 = vpop.xlane.xlu1 %8146 }
0x109b   :  { %v8181_v12 = vsub.f32 %v19746_v55, %v8147_v35 }
0x109c   :  { %v19827_v27 = vpop.eup %17582  ;;  %v8209_v43 = vmul.f32 1.442695, %v8184_v57 }
0x109d   :  { %v8203_v22 = vmul.f32 1.442695, %v8181_v12  ;;  %v8162_v19 = vpop.xlane.xlu0 %8161  ;;  %v8238_v39 = vsel %vm8126_vm6, %v19827_v27, 0.0 }
0x109e   :  { %17586 = vpow2.f32 %v8209_v43  ;;  %v8186_v56 = vsub.f32 %v19752_v44, %v8162_v19  ;;  %v8153_v10 = vpop.xlane.xlu1 %8152  ;;  %8239 = vadd.xlane.f32.xlu0 %v8238_v39 }
0x109f   :  { %17588 = vpow2.f32 %v8203_v22  ;;  %v8183_v41 = vsub.f32 %v19754_v37, %v8153_v10 }
0x10a0   :  { %v19833_v40 = vpop.eup %17584  ;;  %v8213_v53 = vmul.f32 1.442695, %v8186_v56 }
0x10a1   :  { %v8207_v55 = vmul.f32 1.442695, %v8183_v41  ;;  %v8244_v2 = vsel %vm8126_vm6, %v19833_v40, 0.0 }
0x10a2   :  { %17590 = vpow2.f32 %v8213_v53  ;;  %v8159_v0 = vpop.xlane.xlu1 %8158  ;;  %8245 = vadd.xlane.f32.xlu0 %v8244_v2 }
0x10a3   :  { %17592 = vpow2.f32 %v8207_v55  ;;  %v8185_v9 = vsub.f32 %v19760_v49, %v8159_v0 }
0x10a5   :  { %v8211_v23 = vmul.f32 1.442695, %v8185_v9  ;;  %v8168_v44 = vpop.xlane.xlu0 %8167 }
0x10a6   :  { %v8188_v36 = vsub.f32 %v19764_v31, %v8168_v44  ;;  %v8165_v30 = vpop.xlane.xlu1 %8164 }
0x10a7   :  { %17594 = vpow2.f32 %v8211_v23  ;;  %v8187_v37 = vsub.f32 %v19766_v13, %v8165_v30 }
0x10a8   :  { %v19840_v47 = vpop.eup %17586  ;;  %v8217_v15 = vmul.f32 1.442695, %v8188_v36 }
0x10a9   :  { %v19842_v38 = vpop.eup %17588  ;;  %v8215_v59 = vmul.f32 1.442695, %v8187_v37  ;;  %v8250_v6 = vsel %vm8126_vm6, %v19840_v47, 0.0 }
0x10aa   :  { %v8171_v63 = vpop.xlane.xlu1 %8170  ;;  %8251 = vadd.xlane.f32.xlu0 %v8250_v6  ;;  %v8241_v49 = vsel %vm8126_vm6, %v19842_v38, 0.0 }
0x10ab   :  { %17596 = vpow2.f32 %v8215_v59  ;;  %v8189_v31 = vsub.f32 %v19772_v33, %v8171_v63  ;;  %8242 = vadd.xlane.f32.xlu1 %v8241_v49 }
0x10ac   :  { %v19849_v21 = vpop.eup %17590  ;;  %17598 = vpow2.f32 %v8217_v15 }
0x10ad   :  { %v19851_v13 = vpop.eup %17592  ;;  %v8219_v45 = vmul.f32 1.442695, %v8189_v31  ;;  %v8256_v20 = vsel %vm8126_vm6, %v19849_v21, 0.0 }
0x10ae   :  { %8257 = vadd.xlane.f32.xlu0 %v8256_v20  ;;  %v8247_v14 = vsel %vm8126_vm6, %v19851_v13, 0.0  ;;  %v8537_v39 = vpop.permute.xlu1 %8536 }
0x10af   :  { %v8174_v7 = vpop.xlane.xlu0 %8173  ;;  %8248 = vadd.xlane.f32.xlu1 %v8247_v14  ;;  %17600 = vpow2.f32 %v8219_v45 }
0x10b0   :  { %v8190_v4 = vsub.f32 %v19776_v51, %v8174_v7 }
0x10b1   :  { %v19858_v16 = vpop.eup %17594 }
0x10b2   :  { %v8221_v33 = vmul.f32 1.442695, %v8190_v4  ;;  %v8253_v34 = vsel %vm8126_vm6, %v19858_v16, 0.0  ;;  %v8614_v56 = vpop.permute.xlu1 %8613 }
0x10b3   :  { %8254 = vadd.xlane.f32.xlu1 %v8253_v34  ;;  %v8460_v53 = vpop.permute.xlu0 %8459 }
0x10b4   :  { %17602 = vpow2.f32 %v8221_v33 }
0x10b5   :  { %v19862_v32 = vpop.eup %17596 }
0x10b6   :  { %v8259_v57 = vsel %vm8126_vm6, %v19862_v32, 0.0  ;;  %v19866_v35 = vpop.eup %17598  ;;  %v8691_v10 = vpop.permute.xlu1 %8690 }
0x10b7   :  { %8260 = vadd.xlane.f32.xlu1 %v8259_v57  ;;  %v8262_v51 = vsel %vm8126_vm6, %v19866_v35, 0.0 }
0x10b9   :  { %v19870_v12 = vpop.eup %17600 }
0x10ba   :  { %v8265_v22 = vsel %vm8126_vm6, %v19870_v12, 0.0  ;;  %v8768_v41 = vpop.permute.xlu1 %8767 }
0x10bb   :  { %8263 = vadd.xlane.f32.xlu1 %v8262_v51 }
0x10be   :  { %v19872_v43 = vpop.eup %17602  ;;  %v8845_v2 = vpop.permute.xlu1 %8844 }
0x10bf   :  { %8266 = vadd.xlane.f32.xlu1 %v8265_v22  ;;  %v8268_v19 = vsel %vm8126_vm6, %v19872_v43, 0.0 }
0x10c0   :  { %8269 = vadd.xlane.f32.xlu0 %v8268_v19 }
0x10c2   :  { %v19888_v0 = vpop.permute.xlu1 %8921 }
0x10c6   :  { %v8999_v9 = vpop.permute.xlu1 %8998 }
0x10ca   :  { %v19898_v23 = vpop.permute.xlu1 %9075 }
0x10d0   :  { %9229 = vrot.lane.b32.xlu1 %v19592_v8, %s17727_s25 }
0x10d4   :  { %9306 = vrot.lane.b32.xlu1 %v19589_v42, %s17727_s25 }
0x10d6   :  { %9152 = vrot.lane.b32.xlu0 %v19567_v29, %s17727_s25 }
0x10d8   :  { %9383 = vrot.lane.b32.xlu1 %v19603_v52, %s17727_s25 }
0x10dc   :  { %9460 = vrot.lane.b32.xlu1 %v19611_v11, %s17727_s25 }
0x10e4   :  { %v8228_v55 = vpop.xlane.xlu0 %8227 }
0x10e5   :  { %17604 = vrcp.f32 %v8228_v55 }
0x10e8   :  { %v8234_v8 = vpop.xlane.xlu0 %8233 }
0x10e9   :  { %17606 = vrcp.f32 %v8234_v8 }
0x10ef   :  { %v17605_v42 = vpop.eup %17604 }
0x10f0   :  { %v8288_v29 = vmul.f32 %v17605_v42, %v19800_v54 }
0x10f2   :  { %16887 = vmatmul.mubr.msk.f32.vlgmr.msra.gmra.mrb[100].mxu0 %vm8305_vm7, %v8288_v29 }
0x10f3   :  { %v17607_v52 = vpop.eup %17606  ;;  %16895 = vmatpush3.msk.msra.mxu0 %vm8309_vm1, %v8537_v39  ;;  %16896 = vmatprep.mubr.msk.f32.mxu0 %vm17725_vm0, %v20973_v46 }
0x10f4   :  { %16904 = vmatprep.subr.mxu0 %v20973_v46  ;;  %v8290_v11 = vmul.f32 %v17607_v52, %v19804_v24  ;;  %v15718_v52 = vld [vmem:[%s20953_s10 + $0x20] sm:$0xff] }
0x10f6   :  { %16897 = vmatmul.mubr.msk.f32.vlgmr.msra.gmra.mrb[102].mxu0 %vm8305_vm7, %v8290_v11 }
0x10f7   :  { %16905 = vmatpush3.msk.msra.mxu0 %vm8309_vm1, %v8691_v10  ;;  %16906 = vmatprep.mubr.msk.f32.mxu0 %vm17725_vm0, %v20973_v46 }
0x10f8   :  { %16914 = vmatprep.subr.mxu0 %v20973_v46 }
0x10fb   :  { %v8225_v54 = vpop.xlane.xlu1 %8224 }
0x10fc   :  { %17608 = vrcp.f32 %v8225_v54 }
0x10ff   :  { %v8231_v44 = vpop.xlane.xlu1 %8230 }
0x1100   :  { %17610 = vrcp.f32 %v8231_v44 }
0x1106   :  { %v17609_v36 = vpop.eup %17608 }
0x1107   :  { %v8287_v30 = vmul.f32 %v17609_v36, %v19810_v60 }
0x1109   :  { %16882 = vmatmul.mubr.msk.f32.vlgmr.msra.gmra.mrb[100].mxu1 %vm8305_vm7, %v8287_v30 }
0x110a   :  { %v17611_v24 = vpop.eup %17610  ;;  %16890 = vmatpush3.msk.msra.mxu1 %vm8309_vm1, %v8460_v53  ;;  %16891 = vmatprep.mubr.msk.f32.mxu1 %vm17725_vm0, %v20973_v46 }
0x110b   :  { %16899 = vmatprep.subr.mxu1 %v20973_v46  ;;  %v8289_v37 = vmul.f32 %v17611_v24, %v19814_v18 }
0x110d   :  { %16892 = vmatmul.mubr.msk.f32.vlgmr.msra.gmra.mrb[102].mxu1 %vm8305_vm7, %v8289_v37 }
0x110e   :  { %16900 = vmatpush3.msk.msra.mxu1 %vm8309_vm1, %v8614_v56  ;;  %16901 = vmatprep.mubr.msk.f32.mxu1 %vm17725_vm0, %v20973_v46 }
0x110f   :  { %16909 = vmatprep.subr.mxu1 %v20973_v46 }
0x111a   :  { %v8237_v60 = vpop.xlane.xlu1 %8236 }
0x111b   :  { %17612 = vrcp.f32 %v8237_v60 }
0x1125   :  { %v17613_v15 = vpop.eup %17612 }
0x1126   :  { %v8291_v59 = vmul.f32 %v17613_v15, %v19819_v5 }
0x1128   :  { %16902 = vmatmul.mubr.msk.f32.vlgmr.msra.gmra.mrb[104].mxu1 %vm8305_vm7, %v8291_v59 }
0x1129   :  { %16910 = vmatpush3.msk.msra.mxu1 %vm8309_vm1, %v8768_v41  ;;  %16911 = vmatprep.mubr.msk.f32.mxu1 %vm17725_vm0, %v20973_v46 }
0x112a   :  { %16919 = vmatprep.subr.mxu1 %v20973_v46 }
0x112b   :  { %v8240_v18 = vpop.xlane.xlu0 %8239 }
0x112c   :  { %17614 = vrcp.f32 %v8240_v18 }
0x112f   :  { %v8246_v6 = vpop.xlane.xlu0 %8245 }
0x1130   :  { %17616 = vrcp.f32 %v8246_v6 }
0x1136   :  { %v17615_v63 = vpop.eup %17614 }
0x1137   :  { %v8252_v49 = vpop.xlane.xlu0 %8251  ;;  %v8292_v31 = vmul.f32 %v17615_v63, %v19827_v27 }
0x1138   :  { %17618 = vrcp.f32 %v8252_v49  ;;  %v8243_v45 = vpop.xlane.xlu1 %8242 }
0x1139   :  { %17620 = vrcp.f32 %v8243_v45  ;;  %16907 = vmatmul.mubr.msk.f32.vlgmr.msra.gmra.mrb[104].mxu0 %vm8305_vm7, %v8292_v31 }
0x113a   :  { %v17617_v5 = vpop.eup %17616  ;;  %16915 = vmatpush3.msk.msra.mxu0 %vm8309_vm1, %v8845_v2  ;;  %16916 = vmatprep.mubr.msk.f32.mxu0 %vm17725_vm0, %v20973_v46 }
0x113b   :  { %16924 = vmatprep.subr.mxu0 %v20973_v46  ;;  %v8294_v20 = vmul.f32 %v17617_v5, %v19833_v40  ;;  %v8258_v7 = vpop.xlane.xlu0 %8257 }
0x113c   :  { %v8249_v14 = vpop.xlane.xlu1 %8248 }
0x113d   :  { %17622 = vrcp.f32 %v8249_v14  ;;  %16917 = vmatmul.mubr.msk.f32.vlgmr.msra.gmra.mrb[106].mxu0 %vm8305_vm7, %v8294_v20 }
0x113e   :  { %16925 = vmatpush3.msk.msra.mxu0 %vm8309_vm1, %v8999_v9  ;;  %16926 = vmatprep.mubr.msk.f32.mxu0 %vm17725_vm0, %v20973_v46 }
0x113f   :  { %16934 = vmatprep.subr.mxu0 %v20973_v46 }
0x1140   :  { %v8255_v27 = vpop.xlane.xlu1 %8254 }
0x1141   :  { %17624 = vrcp.f32 %v8255_v27 }
0x1142   :  { %v17619_v4 = vpop.eup %17618  ;;  %17626 = vrcp.f32 %v8258_v7 }
0x1143   :  { %v17621_v33 = vpop.eup %17620  ;;  %v8296_v34 = vmul.f32 %v17619_v4, %v19840_v47 }
0x1144   :  { %v8261_v40 = vpop.xlane.xlu1 %8260  ;;  %v8293_v57 = vmul.f32 %v17621_v33, %v19842_v38 }
0x1145   :  { %17628 = vrcp.f32 %v8261_v40  ;;  %16927 = vmatmul.mubr.msk.f32.vlgmr.msra.gmra.mrb[108].mxu0 %vm8305_vm7, %v8296_v34 }
0x1146   :  { %16912 = vmatmul.mubr.msk.f32.vlgmr.msra.gmra.mrb[106].mxu1 %vm8305_vm7, %v8293_v57  ;;  %16936 = vmatprep.mubr.msk.f32.mxu0 %vm17725_vm0, %v20973_v46 }
0x1147   :  { %v17623_v51 = vpop.eup %17622  ;;  %16920 = vmatpush3.msk.msra.mxu1 %vm8309_vm1, %v19888_v0  ;;  %16921 = vmatprep.mubr.msk.f32.mxu1 %vm17725_vm0, %v20973_v46 }
0x1148   :  { %v8264_v47 = vpop.xlane.xlu1 %8263  ;;  %16929 = vmatprep.subr.mxu1 %v20973_v46  ;;  %v8295_v38 = vmul.f32 %v17623_v51, %v19851_v13 }
0x1149   :  { %17630 = vrcp.f32 %v8264_v47 }
0x114a   :  { %16922 = vmatmul.mubr.msk.f32.vlgmr.msra.gmra.mrb[108].mxu1 %vm8305_vm7, %v8295_v38 }
0x114b   :  { %v17625_v22 = vpop.eup %17624  ;;  %16930 = vmatpush3.msk.msra.mxu1 %vm8309_vm1, %v19898_v23  ;;  %16931 = vmatprep.mubr.msk.f32.mxu1 %vm17725_vm0, %v20973_v46 }
0x114c   :  { %v8267_v19 = vpop.xlane.xlu1 %8266  ;;  %v8297_v39 = vmul.f32 %v17625_v22, %v19858_v16  ;;  %16939 = vmatprep.subr.mxu1 %v20973_v46  ;;  %v17627_v10 = vpop.eup %17626 }
0x114d   :  { %17632 = vrcp.f32 %v8267_v19  ;;  %v8270_v56 = vpop.xlane.xlu0 %8269  ;;  %v8298_v16 = vmul.f32 %v17627_v10, %v19849_v21 }
0x114e   :  { %16932 = vmatmul.mubr.msk.f32.vlgmr.msra.gmra.mrb[110].mxu1 %vm8305_vm7, %v8297_v39  ;;  %17634 = vrcp.f32 %v8270_v56 }
0x114f   :  { %v17629_v13 = vpop.eup %17628  ;;  %16941 = vmatprep.mubr.msk.f32.mxu1 %vm17725_vm0, %v20973_v46 }
0x1150   :  { %v9230_v41 = vpop.permute.xlu1 %9229  ;;  %v8299_v53 = vmul.f32 %v17629_v13, %v19862_v32 }
0x1151   :  { %v9153_v55 = vpop.permute.xlu0 %9152  ;;  %16940 = vmatpush3.msk.msra.mxu1 %vm8309_vm1, %v9230_v41 }
0x1152   :  { %16935 = vmatpush3.msk.msra.mxu0 %vm8309_vm1, %v9153_v55  ;;  %16942 = vmatmul.mubr.msk.f32.vlgmr.msra.gmra.mrb[112].mxu1 %vm8305_vm7, %v8299_v53 }
0x1153   :  { %v17631_v2 = vpop.eup %17630  ;;  %16937 = vmatmul.mubr.msk.f32.vlgmr.msra.gmra.mrb[110].mxu0 %vm8305_vm7, %v8298_v16  ;;  %16944 = vmatprep.subr.mxu0 %v20973_v46 }
0x1154   :  { %v9307_v8 = vpop.permute.xlu1 %9306  ;;  %16946 = vmatprep.mubr.msk.f32.mxu0 %vm17725_vm0, %v20973_v46  ;;  %v8300_v32 = vmul.f32 %v17631_v2, %v19866_v35  ;;  %16949 = vmatprep.subr.mxu1 %v20973_v46 }
0x1155   :  { %16945 = vmatpush3.msk.msra.mxu0 %vm8309_vm1, %v9307_v8  ;;  %16951 = vmatprep.mubr.msk.f32.mxu1 %vm17725_vm0, %v20973_v46 }
0x1156   :  { %16954 = vmatprep.subr.mxu0 %v20973_v46 }
0x1157   :  { %v17633_v21 = vpop.eup %17632  ;;  %16947 = vmatmul.mubr.msk.f32.vlgmr.msra.gmra.mrb[112].mxu0 %vm8305_vm7, %v8300_v32 }
0x1158   :  { %v9384_v0 = vpop.permute.xlu1 %9383  ;;  %v8301_v42 = vmul.f32 %v17633_v21, %v19870_v12  ;;  %16956 = vmatprep.mubr.msk.f32.mxu0 %vm17725_vm0, %v20973_v46  ;;  %v17635_v29 = vpop.eup %17634  ;;  %v15719_v12 = vld [vmem:[%s20953_s10 + $0x28] sm:$0xff] }
0x1159   :  { %16950 = vmatpush3.msk.msra.mxu1 %vm8309_vm1, %v9384_v0  ;;  %v8302_v9 = vmul.f32 %v17635_v29, %v19872_v43  ;;  %v20011_v29 = vld [vmem:[%s20953_s10 + $0x30] sm:$0xff] }
0x115a   :  { %16952 = vmatmul.mubr.msk.f32.vlgmr.msra.gmra.mrb[114].mxu1 %vm8305_vm7, %v8301_v42  ;;  %16959 = vmatprep.subr.mxu1 %v15718_v52 }
0x115b   :  { %16960 = vmatpush3.msra.mxu1 %v15718_v52 }
0x115c   :  { %v9461_v35 = vpop.permute.xlu1 %9460  ;;  %16964 = vmatprep.subr.mxu1 %v15719_v12 }
0x115d   :  { %16955 = vmatpush3.msk.msra.mxu0 %vm8309_vm1, %v9461_v35 }
0x115e   :  { %16957 = vmatmul.mubr.msk.f32.vlgmr.msra.gmra.mrb[114].mxu0 %vm8305_vm7, %v8302_v9 }
0x11c5   :  { %v8455_v11 = vpop.f32.mrb[100].mxu0 }
0x11c6   :  { %v16888_v23 = vpop.f32.mrb[101].mxu0  ;;  %v9570_v43 = vrot.slane %v8455_v11, %v20977_v61 }
0x11c8   :  { %v9571_v30 = vcombine.high %v9570_v43, %v9570_v43  ;;  %v9578_v24 = vrot.slane %v9570_v43, %v20977_v61 }
0x11c9   :  { %v8609_v54 = vpop.f32.mrb[102].mxu0 }
0x11ca   :  { %v16898_v44 = vpop.f32.mrb[103].mxu0  ;;  %v9616_v36 = vrot.slane %v8609_v54, %v20977_v61  ;;  %v9585_v49 = vrot.slane %v9571_v30, %v20977_v61  ;;  %v9586_v31 = vcombine.high %v9578_v24, %v9578_v24 }
0x11cc   :  { %v9617_v37 = vcombine.high %v9616_v36, %v9616_v36  ;;  %v9624_v60 = vrot.slane %v9616_v36, %v20977_v61  ;;  %v9635_v51 = vcombine.low %v9585_v49, %v9586_v31 }
0x11ce   :  { %v9631_v45 = vrot.slane %v9617_v37, %v20977_v61  ;;  %v9632_v5 = vcombine.high %v9624_v60, %v9624_v60  ;;  %v9657_v41 = vrot.slane %v9635_v51, %v20977_v61 }
0x11d0   :  { %v9683_v47 = vcombine.low %v9631_v45, %v9632_v5 }
0x11d2   :  { %v9697_v53 = vrot.slane %v9683_v47, %v20977_v61 }
0x11dc   :  { %v8378_v15 = vpop.f32.mrb[100].mxu1 }
0x11dd   :  { %v9547_v59 = vrot.slane %v8378_v15, %v20977_v61  ;;  %v16883_v18 = vpop.f32.mrb[101].mxu1 }
0x11df   :  { %v9548_v6 = vcombine.high %v9547_v59, %v9547_v59  ;;  %v9555_v63 = vrot.slane %v9547_v59, %v20977_v61 }
0x11e0   :  { %v8532_v20 = vpop.f32.mrb[102].mxu1 }
0x11e1   :  { %v9562_v14 = vrot.slane %v9548_v6, %v20977_v61  ;;  %v9563_v27 = vcombine.high %v9555_v63, %v9555_v63  ;;  %v9593_v7 = vrot.slane %v8532_v20, %v20977_v61  ;;  %v16893_v4 = vpop.f32.mrb[103].mxu1 }
0x11e3   :  { %v9633_v33 = vcombine.low %v9555_v63, %v9562_v14  ;;  %v9634_v34 = vcombine.low %v9563_v27, %v9578_v24  ;;  %v9594_v40 = vcombine.high %v9593_v7, %v9593_v7  ;;  %v9601_v57 = vrot.slane %v9593_v7, %v20977_v61 }
0x11e5   :  { %v9643_v38 = vrot.slane %v9633_v33, %v20977_v61  ;;  %v9650_v22 = vrot.slane %v9634_v34, %v20977_v61  ;;  %v9608_v19 = vrot.slane %v9594_v40, %v20977_v61  ;;  %v9609_v39 = vcombine.high %v9601_v57, %v9601_v57 }
0x11e7   :  { %v9665_v56 = vcombine.low %v9643_v38, %v9650_v22  ;;  %v9636_v10 = vcombine.low %v9601_v57, %v9608_v19  ;;  %v9682_v13 = vcombine.low %v9609_v39, %v9624_v60 }
0x11e9   :  { %v9664_v55 = vrot.slane %v9636_v10, %v20977_v61  ;;  %v9690_v16 = vrot.slane %v9682_v13, %v20977_v61  ;;  %v9673_v32 = vrot.slane %v9665_v56, %v20977_v61 }
0x11eb   :  { %v9666_v2 = vcombine.low %v9657_v41, %v9664_v55  ;;  %v9698_v8 = vcombine.low %v9690_v16, %v9697_v53 }
0x11ed   :  { %v9680_v21 = vrot.slane %v9666_v2, %v20977_v61  ;;  %v9705_v42 = vrot.slane %v9698_v8, %v20977_v61 }
0x11ef   :  { %v9681_v0 = vcombine.low %v9673_v32, %v9680_v21 }
0x11f1   :  { %16961 = vmatprep.mubr.msk.f32.mxu1 %vm1229_vm2, %v9681_v0 }
0x11f2   :  { %16962 = vmatmul.mubr.msk.f32.vlgmr.msra.gmra.mrb[116].mxu1 %vm1229_vm2, %v9705_v42 }
0x11f3   :  { %16965 = vmatpush3.msra.mxu1 %v15719_v12 }
0x11f4   :  { %16969 = vmatprep.subr.mxu1 %v20011_v29 }
0x11fb   :  { %v8686_v35 = vpop.f32.mrb[104].mxu1 }
0x11fc   :  { %v16903_v9 = vpop.f32.mrb[105].mxu1  ;;  %v9801_v52 = vrot.slane %v8686_v35, %v20977_v61 }
0x11fe   :  { %v9802_v11 = vcombine.high %v9801_v52, %v9801_v52  ;;  %v9809_v23 = vrot.slane %v9801_v52, %v20977_v61 }
0x1200   :  { %v9816_v54 = vrot.slane %v9802_v11, %v20977_v61  ;;  %v9817_v30 = vcombine.high %v9809_v23, %v9809_v23 }
0x1202   :  { %v9887_v24 = vcombine.low %v9809_v23, %v9816_v54 }
0x1204   :  { %v9897_v18 = vrot.slane %v9887_v24, %v20977_v61 }
0x120c   :  { %v8763_v44 = vpop.f32.mrb[104].mxu0 }
0x120d   :  { %v9824_v43 = vrot.slane %v8763_v44, %v20977_v61  ;;  %v16908_v36 = vpop.f32.mrb[105].mxu0 }
0x120f   :  { %v9832_v37 = vrot.slane %v9824_v43, %v20977_v61  ;;  %v9825_v63 = vcombine.high %v9824_v43, %v9824_v43 }
0x1210   :  { %v8917_v12 = vpop.f32.mrb[106].mxu0 }
0x1211   :  { %v9888_v60 = vcombine.low %v9817_v30, %v9832_v37  ;;  %v9870_v15 = vrot.slane %v8917_v12, %v20977_v61  ;;  %v16918_v59 = vpop.f32.mrb[107].mxu0  ;;  %v9839_v5 = vrot.slane %v9825_v63, %v20977_v61  ;;  %v9840_v14 = vcombine.high %v9832_v37, %v9832_v37 }
0x1213   :  { %v9904_v6 = vrot.slane %v9888_v60, %v20977_v61  ;;  %v9871_v31 = vcombine.high %v9870_v15, %v9870_v15  ;;  %v9878_v45 = vrot.slane %v9870_v15, %v20977_v61  ;;  %v9889_v38 = vcombine.low %v9839_v5, %v9840_v14 }
0x1215   :  { %v9919_v49 = vcombine.low %v9897_v18, %v9904_v6  ;;  %v9885_v27 = vrot.slane %v9871_v31, %v20977_v61  ;;  %v9886_v7 = vcombine.high %v9878_v45, %v9878_v45  ;;  %v9911_v32 = vrot.slane %v9889_v38, %v20977_v61 }
0x1217   :  { %v9937_v22 = vcombine.low %v9885_v27, %v9886_v7  ;;  %v9927_v59 = vrot.slane %v9919_v49, %v20977_v61 }
0x1218   :  { %v9071_v20 = vpop.f32.mrb[108].mxu0 }
0x1219   :  { %v10074_v4 = vrot.slane %v9071_v20, %v20977_v61  ;;  %v8840_v33 = vpop.f32.mrb[106].mxu1  ;;  %v16928_v34 = vpop.f32.mrb[109].mxu0  ;;  %v9951_v21 = vrot.slane %v9937_v22, %v20977_v61 }
0x121a   :  { %v9847_v40 = vrot.slane %v8840_v33, %v20977_v61  ;;  %v16913_v57 = vpop.f32.mrb[107].mxu1 }
0x121b   :  { %v10075_v19 = vcombine.high %v10074_v4, %v10074_v4  ;;  %v10082_v39 = vrot.slane %v10074_v4, %v20977_v61 }
0x121c   :  { %v9848_v51 = vcombine.high %v9847_v40, %v9847_v40  ;;  %v9855_v47 = vrot.slane %v9847_v40, %v20977_v61 }
0x121d   :  { %v8994_v56 = vpop.f32.mrb[108].mxu1  ;;  %v10089_v0 = vrot.slane %v10075_v19, %v20977_v61  ;;  %v10090_v42 = vcombine.high %v10082_v39, %v10082_v39 }
0x121e   :  { %v9862_v10 = vrot.slane %v9848_v51, %v20977_v61  ;;  %v9863_v13 = vcombine.high %v9855_v47, %v9855_v47  ;;  %v10051_v41 = vrot.slane %v8994_v56, %v20977_v61  ;;  %v16923_v53 = vpop.f32.mrb[109].mxu1 }
0x121f   :  { %v10139_v37 = vcombine.low %v10089_v0, %v10090_v42 }
0x1220   :  { %v9890_v55 = vcombine.low %v9855_v47, %v9862_v10  ;;  %v9936_v16 = vcombine.low %v9863_v13, %v9878_v45  ;;  %v10052_v2 = vcombine.high %v10051_v41, %v10051_v41  ;;  %v10059_v8 = vrot.slane %v10051_v41, %v20977_v61 }
0x1221   :  { %v9148_v35 = vpop.f32.mrb[110].mxu1  ;;  %v10161_v47 = vrot.slane %v10139_v37, %v20977_v61 }
0x1222   :  { %v9918_v9 = vrot.slane %v9890_v55, %v20977_v61  ;;  %v9944_v52 = vrot.slane %v9936_v16, %v20977_v61  ;;  %v10066_v11 = vrot.slane %v10052_v2, %v20977_v61  ;;  %v10067_v23 = vcombine.high %v10059_v8, %v10059_v8  ;;  %v16933_v54 = vpop.f32.mrb[111].mxu1 }
0x1223   :  { %v10097_v44 = vrot.slane %v9148_v35, %v20977_v61 }
0x1224   :  { %v9920_v43 = vcombine.low %v9911_v32, %v9918_v9  ;;  %v9952_v36 = vcombine.low %v9944_v52, %v9951_v21  ;;  %v10137_v30 = vcombine.low %v10059_v8, %v10066_v11  ;;  %v10138_v24 = vcombine.low %v10067_v23, %v10082_v39  ;;  %v15721_v39 = vld [vmem:[%s20953_s10 + $0x38] sm:$0xff] }
0x1225   :  { %v10098_v12 = vcombine.high %v10097_v44, %v10097_v44  ;;  %v10105_v60 = vrot.slane %v10097_v44, %v20977_v61  ;;  %v9302_v15 = vpop.f32.mrb[112].mxu1 }
0x1226   :  { %v10147_v18 = vrot.slane %v10137_v30, %v20977_v61  ;;  %v10154_v6 = vrot.slane %v10138_v24, %v20977_v61  ;;  %v9225_v63 = vpop.f32.mrb[110].mxu0  ;;  %v10301_v31 = vrot.slane %v9302_v15, %v20977_v61  ;;  %v16943_v45 = vpop.f32.mrb[113].mxu1  ;;  %v9934_v5 = vrot.slane %v9920_v43, %v20977_v61 }
0x1227   :  { %v10112_v20 = vrot.slane %v10098_v12, %v20977_v61  ;;  %v10120_v14 = vrot.slane %v9225_v63, %v20977_v61  ;;  %v16938_v27 = vpop.f32.mrb[111].mxu0  ;;  %v10113_v4 = vcombine.high %v10105_v60, %v10105_v60  ;;  %v9959_v51 = vrot.slane %v9952_v36, %v20977_v61 }
0x1228   :  { %v10169_v7 = vcombine.low %v10147_v18, %v10154_v6  ;;  %v10302_v33 = vcombine.high %v10301_v31, %v10301_v31  ;;  %v9935_v34 = vcombine.low %v9927_v59, %v9934_v5  ;;  %v10309_v38 = vrot.slane %v10301_v31, %v20977_v61 }
0x1229   :  { %v10140_v49 = vcombine.low %v10105_v60, %v10112_v20  ;;  %v10121_v40 = vcombine.high %v10120_v14, %v10120_v14  ;;  %v10128_v57 = vrot.slane %v10120_v14, %v20977_v61 }
0x122a   :  { %v10316_v22 = vrot.slane %v10302_v33, %v20977_v61  ;;  %v9379_v19 = vpop.f32.mrb[112].mxu0  ;;  %16966 = vmatprep.mubr.msk.f32.mxu1 %vm1229_vm2, %v9935_v34  ;;  %v10317_v21 = vcombine.high %v10309_v38, %v10309_v38  ;;  %v10177_v23 = vrot.slane %v10169_v7, %v20977_v61 }
0x122b   :  { %v10168_v56 = vrot.slane %v10140_v49, %v20977_v61  ;;  %v10135_v10 = vrot.slane %v10121_v40, %v20977_v61  ;;  %v10136_v13 = vcombine.high %v10128_v57, %v10128_v57  ;;  %v10186_v41 = vcombine.low %v10113_v4, %v10128_v57  ;;  %v16948_v53 = vpop.f32.mrb[113].mxu0  ;;  %16967 = vmatmul.mubr.msk.f32.vlgmr.msra.gmra.mrb[116].mxu1 %vm1229_vm2, %v9959_v51 }
0x122c   :  { %v10324_v55 = vrot.slane %v9379_v19, %v20977_v61  ;;  %16970 = vmatpush3.msra.mxu1 %v20011_v29  ;;  %v10387_v8 = vcombine.low %v10309_v38, %v10316_v22 }
0x122d   :  { %v10170_v16 = vcombine.low %v10161_v47, %v10168_v56  ;;  %v10187_v2 = vcombine.low %v10135_v10, %v10136_v13  ;;  %v9456_v32 = vpop.f32.mrb[114].mxu1  ;;  %16974 = vmatprep.subr.mxu1 %v15721_v39  ;;  %v10194_v52 = vrot.slane %v10186_v41, %v20977_v61 }
0x122e   :  { %v10325_v0 = vcombine.high %v10324_v55, %v10324_v55  ;;  %v10332_v42 = vrot.slane %v10324_v55, %v20977_v61  ;;  %v10347_v35 = vrot.slane %v9456_v32, %v20977_v61  ;;  %v16953_v9 = vpop.f32.mrb[115].mxu1  ;;  %v10397_v24 = vrot.slane %v10387_v8, %v20977_v61 }
0x122f   :  { %v10201_v11 = vrot.slane %v10187_v2, %v20977_v61  ;;  %v10184_v29 = vrot.slane %v10170_v16, %v20977_v61 }
0x1230   :  { %v10339_v54 = vrot.slane %v10325_v0, %v20977_v61  ;;  %v10340_v44 = vcombine.high %v10332_v42, %v10332_v42  ;;  %v10388_v43 = vcombine.low %v10317_v21, %v10332_v42  ;;  %v10348_v36 = vcombine.high %v10347_v35, %v10347_v35 }
0x1231   :  { %v10202_v30 = vcombine.low %v10194_v52, %v10201_v11  ;;  %v10355_v37 = vrot.slane %v10347_v35, %v20977_v61  ;;  %v9533_v12 = vpop.f32.mrb[114].mxu0  ;;  %v10185_v60 = vcombine.low %v10177_v23, %v10184_v29 }
0x1232   :  { %v10389_v15 = vcombine.low %v10339_v54, %v10340_v44  ;;  %v10404_v59 = vrot.slane %v10388_v43, %v20977_v61  ;;  %v10362_v18 = vrot.slane %v10348_v36, %v20977_v61  ;;  %v10370_v6 = vrot.slane %v9533_v12, %v20977_v61  ;;  %v16958_v63 = vpop.f32.mrb[115].mxu0  ;;  %v15723_v44 = vld [vmem:[%s20954_s11 + $0x28] sm:$0xff]  ;;  %v15724_v36 = vld [vmem:[%s20954_s11 + $0x30] sm:$0xff] }
0x1233   :  { %v10209_v31 = vrot.slane %v10202_v30, %v20977_v61  ;;  %16971 = vmatprep.mubr.msk.f32.mxu1 %vm1229_vm2, %v10185_v60  ;;  %v10363_v14 = vcombine.high %v10355_v37, %v10355_v37  ;;  %v15725_v30 = vld [vmem:[%s20954_s11 + $0x38] sm:$0xff]  ;;  %v15727_v12 = vld [vmem:[%s20955_s12 + $0x48] sm:$0xff] }
0x1234   :  { %v10419_v45 = vcombine.low %v10397_v24, %v10404_v59  ;;  %v10390_v5 = vcombine.low %v10355_v37, %v10362_v18  ;;  %v10371_v20 = vcombine.high %v10370_v6, %v10370_v6  ;;  %v10378_v27 = vrot.slane %v10370_v6, %v20977_v61  ;;  %v15726_v37 = vld [vmem:[%s20955_s12 + $0x40] sm:$0xff] }
0x1235   :  { %16972 = vmatmul.mubr.msk.f32.vlgmr.msra.gmra.mrb[116].mxu1 %vm1229_vm2, %v10209_v31  ;;  %v10411_v7 = vrot.slane %v10389_v15, %v20977_v61  ;;  %v17341_v24 = vpack.c.bf16 %v15725_v30, %v15724_v36  ;;  %v17345_v60 = vpack.c.bf16 %v15727_v12, %v15726_v37  ;;  %v15814_v12 = vld [vmem:[%s20950_s9 + $0x40] sm:$0xff] }
0x1236   :  { %v10418_v4 = vrot.slane %v10390_v5, %v20977_v61  ;;  %v10385_v33 = vrot.slane %v10371_v20, %v20977_v61  ;;  %16975 = vmatpush3.msra.mxu1 %v15721_v39  ;;  %v10386_v34 = vcombine.high %v10378_v27, %v10378_v27  ;;  %v10436_v49 = vcombine.low %v10363_v14, %v10378_v27  ;;  %v20091_v39 = vld [vmem:[%s20951_s13 + $0x8] sm:$0xff] }
0x1237   :  { %v10427_v51 = vrot.slane %v10419_v45, %v20977_v61  ;;  %v9788_v13 = vrot.slane %v20091_v39, %v19212_v50  ;;  %v10573_v45 = vrot.slane %v20091_v39, %v19282_v26 }
0x1238   :  { %v10420_v40 = vcombine.low %v10411_v7, %v10418_v4  ;;  %v10437_v57 = vcombine.low %v10385_v33, %v10386_v34  ;;  %v10444_v38 = vrot.slane %v10436_v49, %v20977_v61  ;;  %v10579_v7 = vrot.slane %v20091_v39, %v19285_v48  ;;  %v15728_v34 = vld [vmem:[%s20955_s12 + $0x50] sm:$0xff]  ;;  %v15729_v49 = vld [vmem:[%s20955_s12 + $0x58] sm:$0xff] }
0x123a   :  { %v10434_v47 = vrot.slane %v10420_v40, %v20977_v61  ;;  %v10451_v22 = vrot.slane %v10437_v57, %v20977_v61 }
0x123c   :  { %v10435_v19 = vcombine.low %v10427_v51, %v10434_v47  ;;  %v10452_v56 = vcombine.low %v10444_v38, %v10451_v22  ;;  %v17349_v51 = vpack.c.bf16 %v15729_v49, %v15728_v34  ;;  %v15730_v47 = vld [vmem:[%s20955_s12 + $0x60] sm:$0xff]  ;;  %v15731_v38 = vld [vmem:[%s20955_s12 + $0x68] sm:$0xff]  ;;  %v10793_v49 = vrot.slane %v20091_v39, %v19401_v58 }
0x123d   :  { %v17353_v22 = vpack.c.bf16 %v15731_v38, %v15730_v47  ;;  %v15834_v38 = vld [vmem:[%s20951_s13 + $0x10] sm:$0xff] }
0x123e   :  { %16976 = vmatprep.mubr.msk.f32.mxu1 %vm1229_vm2, %v10435_v19  ;;  %v10459_v10 = vrot.slane %v10452_v56, %v20977_v61  ;;  %v15732_v19 = vld [vmem:[%s20955_s12 + $0x70] sm:$0xff]  ;;  %v15733_v56 = vld [vmem:[%s20955_s12 + $0x78] sm:$0xff] }
0x1240   :  { %16977 = vmatmul.mubr.msk.f32.vlgmr.msra.gmra.mrb[116].mxu1 %vm1229_vm2, %v10459_v10  ;;  %v17357_v10 = vpack.c.bf16 %v15733_v56, %v15732_v19 }
0x1313   :  { %v16978_v41 = vpop.f32.mrb[116].mxu1 }
0x1314   :  { %v17405_v53 = vadd.f32 %v16978_v41, %v9788_v13  ;;  %v10530_v55 = vpop.f32.mrb[117].mxu1 }
0x1315   :  { %v17406_v16 = vadd.f32 %v10530_v55, %v9788_v13  ;;  %v10585_v13 = vrot.slane %v20091_v39, %v19331_v1 }
0x1316   :  { %v10542_v2 = vadd.f32 %v17405_v53, %v19437_v3 }
0x1317   :  { %v10541_v8 = vadd.f32 %v17406_v16, %v19435_v28  ;;  %v15722_v28 = vld [vmem:[%s20954_s11 + $0x20] sm:$0xff] }
0x1318   :  { %v10547_v32 = vsel %vm10546_vm8, %v10542_v2, 0.0  ;;  %v17337_v43 = vpack.c.bf16 %v15723_v44, %v15722_v28 }
0x1319   :  { %10548 = vadd.xlane.f32.xlu0 %v10547_v32  ;;  %v10543_v21 = vsel %vm1071_vm15, %v10541_v8, 0.0  ;;  %v10755_v32 = vrot.slane %v20091_v39, %v19342_v25 }
0x131a   :  { %10544 = vadd.xlane.f32.xlu1 %v10543_v21  ;;  %17338 = vmatprep.subr.bf16.mxu0 %v17337_v43 }
0x131b   :  { %17340 = vmatpush3.bf16.msra.mxu0 %v17337_v43 }
0x131c   :  { %17342 = vmatprep.subr.bf16.mxu0 %v17341_v24 }
0x131f   :  { %17344 = vmatpush3.bf16.msra.mxu0 %v17341_v24 }
0x1320   :  { %17346 = vmatprep.subr.bf16.mxu0 %v17345_v60 }
0x13a6   :  { %v10549_v0 = vpop.xlane.xlu0 %10548 }
0x13a7   :  { %v10551_v42 = vmul.f32 0.03125, %v10549_v0  ;;  %v10545_v35 = vpop.xlane.xlu1 %10544 }
0x13a8   :  { %v10550_v9 = vmul.f32 0.03125, %v10545_v35 }
0x13a9   :  { %v10553_v52 = vsub.f32 %v10542_v2, %v10551_v42 }
0x13aa   :  { %v10552_v11 = vsub.f32 %v10541_v8, %v10550_v9 }
0x13ab   :  { %v10555_v23 = vmul.f32 %v10553_v52, %v10553_v52 }
0x13ac   :  { %v10554_v29 = vmul.f32 %v10552_v11, %v10552_v11 }
0x13ad   :  { %v10559_v54 = vsel %vm10546_vm8, %v10555_v23, 0.0 }
0x13ae   :  { %10560 = vadd.xlane.f32.xlu1 %v10559_v54  ;;  %v10556_v3 = vsel %vm1071_vm15, %v10554_v29, 0.0 }
0x13af   :  { %10557 = vadd.xlane.f32.xlu0 %v10556_v3 }
0x143b   :  { %v10561_v15 = vpop.xlane.xlu1 %10560 }
0x143c   :  { %v10563_v59 = vmul.f32 0.03125, %v10561_v15  ;;  %v10558_v18 = vpop.xlane.xlu0 %10557 }
0x143d   :  { %v10562_v6 = vmul.f32 0.03125, %v10558_v18  ;;  %v15817_v18 = vld [vmem:[%s20950_s9 + $0x58] sm:$0xff] }
0x143e   :  { %v10565_v63 = vadd.f32 1e-05, %v10563_v59  ;;  %v15816_v59 = vld [vmem:[%s20950_s9 + $0x50] sm:$0xff] }
0x143f   :  { %v10564_v31 = vadd.f32 1e-05, %v10562_v6  ;;  %v17365_v6 = vpack.c.bf16 %v15817_v18, %v15816_v59 }
0x1440   :  { %17636 = vrsqrt.f32 %v10565_v63 }
0x1441   :  { %17638 = vrsqrt.f32 %v10564_v31 }
0x144a   :  { %v17637_v5 = vpop.eup %17636 }
0x144b   :  { %v17639_v20 = vpop.eup %17638  ;;  %v10569_v14 = vmul.f32 %v17637_v5, %v10553_v52 }
0x144c   :  { %v10568_v27 = vmul.f32 %v17639_v20, %v10552_v11 }
0x144d   :  { %v10575_v4 = vmul.f32 %v10573_v45, %v10569_v14 }
0x144e   :  { %v10574_v33 = vmul.f32 %v10573_v45, %v10568_v27  ;;  %v10787_v27 = vrot.slane %v20091_v39, %v19398_v17  ;;  %v10825_v39 = vrot.slane %v15834_v38, %v20976_v62 }
0x144f   :  { %v10581_v57 = vadd.f32 %v10579_v7, %v10575_v4 }
0x1450   :  { %v10580_v40 = vadd.f32 %v10579_v7, %v10574_v33 }
0x1452   :  { %16987 = vmatprep.mubr.msk.f32.mxu0 %vm1071_vm15, %v10580_v40 }
0x1453   :  { %16988 = vmatmul.mubr.msk.f32.vlgmr.msra.gmra.mrb[116].mxu0 %vm1071_vm15, %v10581_v57 }
0x1454   :  { %17348 = vmatpush3.bf16.msra.mxu0 %v17345_v60  ;;  %v15815_v60 = vld [vmem:[%s20950_s9 + $0x48] sm:$0xff] }
0x1455   :  { %17350 = vmatprep.subr.bf16.mxu0 %v17349_v51  ;;  %v17361_v15 = vpack.c.bf16 %v15815_v60, %v15814_v12 }
0x1457   :  { %17362 = vmatprep.subr.bf16.mxu1 %v17361_v15 }
0x1458   :  { %17352 = vmatpush3.bf16.msra.mxu0 %v17349_v51  ;;  %17364 = vmatpush3.bf16.msra.mxu1 %v17361_v15 }
0x1459   :  { %17354 = vmatprep.subr.bf16.mxu0 %v17353_v22  ;;  %17366 = vmatprep.subr.bf16.mxu1 %v17365_v6 }
0x145c   :  { %17356 = vmatpush3.bf16.msra.mxu0 %v17353_v22  ;;  %17368 = vmatpush3.bf16.msra.mxu1 %v17365_v6 }
0x145d   :  { %17358 = vmatprep.subr.bf16.mxu0 %v17357_v10  ;;  %17020 = vmatprep.subr.mxu1 %v20973_v46 }
0x1460   :  { %17360 = vmatpush3.bf16.msra.mxu0 %v17357_v10 }
0x1461   :  { %17025 = vmatprep.subr.mxu0 %v20973_v46 }
0x1526   :  { %v16989_v41 = vpop.f32.mrb[116].mxu0 }
0x1527   :  { %v10664_v53 = vadd.f32 %v16989_v41, %v10585_v13  ;;  %v10658_v55 = vpop.f32.mrb[117].mxu0 }
0x1528   :  { %v10659_v16 = vadd.f32 %v10658_v55, %v10585_v13 }
0x1529   :  { %v10668_v8 = vmax.f32 %v10664_v53, 0.0 }
0x152a   :  { %v10667_v2 = vmax.f32 %v10659_v16, 0.0 }
0x152c   :  { %17006 = vmatprep.mubr.msk.f32.mxu0 %vm5926_vm3, %v10667_v2 }
0x152d   :  { %17007 = vmatmul.mubr.msk.f32.vlgmr.msra.gmra.mrb[118].mxu0 %vm5926_vm3, %v10668_v8 }
0x152e   :  { %17027 = vmatprep.mubr.msk.f32.mxu0 %vm17725_vm0, %v20973_v46 }
0x1600   :  { %v17008_v21 = vpop.f32.mrb[118].mxu0 }
0x1601   :  { %v10751_v0 = vadd.f32 %v17008_v21, %v10581_v57  ;;  %v10741_v42 = vpop.f32.mrb[119].mxu0 }
0x1602   :  { %v10750_v35 = vadd.f32 %v10741_v42, %v10580_v40 }
0x1603   :  { %v10757_v9 = vadd.f32 %v10755_v32, %v10751_v0 }
0x1604   :  { %v10756_v52 = vadd.f32 %v10755_v32, %v10750_v35 }
0x1605   :  { %v10761_v11 = vsel %vm10546_vm8, %v10757_v9, 0.0 }
0x1606   :  { %10762 = vadd.xlane.f32.xlu1 %v10761_v11  ;;  %v10758_v23 = vsel %vm1071_vm15, %v10756_v52, 0.0 }
0x1607   :  { %10759 = vadd.xlane.f32.xlu0 %v10758_v23 }
0x1693   :  { %v10763_v29 = vpop.xlane.xlu1 %10762 }
0x1694   :  { %v10765_v54 = vmul.f32 0.03125, %v10763_v29  ;;  %v10760_v3 = vpop.xlane.xlu0 %10759 }
0x1695   :  { %v10764_v28 = vmul.f32 0.03125, %v10760_v3 }
0x1696   :  { %v10767_v44 = vsub.f32 %v10757_v9, %v10765_v54 }
0x1697   :  { %v10766_v43 = vsub.f32 %v10756_v52, %v10764_v28 }
0x1698   :  { %v10769_v36 = vmul.f32 %v10767_v44, %v10767_v44 }
0x1699   :  { %v10768_v30 = vmul.f32 %v10766_v43, %v10766_v43 }
0x169a   :  { %v10773_v24 = vsel %vm10546_vm8, %v10769_v36, 0.0 }
0x169b   :  { %10774 = vadd.xlane.f32.xlu1 %v10773_v24  ;;  %v10770_v37 = vsel %vm1071_vm15, %v10768_v30, 0.0 }
0x169c   :  { %10771 = vadd.xlane.f32.xlu0 %v10770_v37 }
0x1728   :  { %v10775_v63 = vpop.xlane.xlu1 %10774 }
0x1729   :  { %v10777_v31 = vmul.f32 0.03125, %v10775_v63  ;;  %v10772_v45 = vpop.xlane.xlu0 %10771 }
0x172a   :  { %v10776_v5 = vmul.f32 0.03125, %v10772_v45 }
0x172b   :  { %v10779_v20 = vadd.f32 1e-05, %v10777_v31 }
0x172c   :  { %v10778_v14 = vadd.f32 1e-05, %v10776_v5 }
0x172d   :  { %17640 = vrsqrt.f32 %v10779_v20 }
0x172e   :  { %17642 = vrsqrt.f32 %v10778_v14 }
0x1737   :  { %v17641_v7 = vpop.eup %17640 }
0x1738   :  { %v17643_v4 = vpop.eup %17642  ;;  %v10783_v33 = vmul.f32 %v17641_v7, %v10767_v44 }
0x1739   :  { %v10782_v34 = vmul.f32 %v17643_v4, %v10766_v43 }
0x173a   :  { %v10789_v40 = vmul.f32 %v10787_v27, %v10783_v33 }
0x173b   :  { %v10788_v57 = vmul.f32 %v10787_v27, %v10782_v34 }
0x173c   :  { %v20175_v47 = vadd.f32 %v10793_v49, %v10789_v40 }
0x173d   :  { %v20173_v51 = vadd.f32 %v10793_v49, %v10788_v57 }
0x173f   :  { %17017 = vmatprep.mubr.msk.f32.mxu1 %vm1071_vm15, %v20173_v51 }
0x1740   :  { %17018 = vmatmul.mubr.msk.f32.vlgmr.msra.gmra.mrb[118].mxu1 %vm1071_vm15, %v20175_v47 }
0x1741   :  { %17022 = vmatprep.mubr.msk.f32.mxu1 %vm17725_vm0, %v20973_v46 }
0x1813   :  { %v17019_v22 = vpop.f32.mrb[118].mxu1 }
0x1814   :  { %v10904_v19 = vadd.f32 %v17019_v22, %v10825_v39  ;;  %v10898_v56 = vpop.f32.mrb[119].mxu1 }
0x1815   :  { %v10899_v10 = vadd.f32 %v10898_v56, %v10825_v39 }
0x1816   :  { %v10964_v13 = vrot.slane %v10904_v19, %v20977_v61 }
0x1817   :  { %v10909_v41 = vcombine.high %v10899_v10, %v10899_v10  ;;  %v10916_v53 = vrot.slane %v10899_v10, %v20977_v61 }
0x1818   :  { %v10965_v55 = vcombine.high %v10964_v13, %v10964_v13  ;;  %v10972_v16 = vrot.slane %v10964_v13, %v20977_v61 }
0x1819   :  { %v10923_v2 = vrot.slane %v10909_v41, %v20977_v61  ;;  %v10932_v8 = vrot.slane %v10916_v53, %v20977_v61  ;;  %v10924_v43 = vcombine.high %v10916_v53, %v10916_v53 }
0x181a   :  { %v10979_v32 = vrot.slane %v10965_v55, %v20977_v61  ;;  %10998 = vrot.lane.b32.xlu0 %v10972_v16, %s17722_s2  ;;  %v10980_v21 = vcombine.high %v10972_v16, %v10972_v16  ;;  %v11266_v28 = vrot.slane %v10972_v16, %v20977_v61 }
0x181b   :  { %v10925_v0 = vcombine.high %v10923_v2, %v10923_v2  ;;  %11006 = vrot.lane.b32.xlu1 %v10932_v8, %s17723_s23  ;;  %v10939_v9 = vrot.slane %v10923_v2, %v20977_v61  ;;  %v10946_v36 = vrot.slane %v10924_v43, %v20977_v61  ;;  %v10954_v30 = vcombine.high %v10932_v8, %v10932_v8 }
0x181c   :  { %v10981_v42 = vcombine.high %v10979_v32, %v10979_v32  ;;  %v11351_v35 = vcombine.low %v10979_v32, %v10980_v21 }
0x181d   :  { %v10953_v52 = vrot.slane %v10925_v0, %v20977_v61  ;;  %v10956_v24 = vcombine.high %v10946_v36, %v10946_v36  ;;  %v10955_v37 = vcombine.high %v10939_v9, %v10939_v9  ;;  %v11054_v60 = vcombine.low %v10932_v8, %v10946_v36 }
0x181e   :  { %11022 = vrot.lane.b32.xlu0 %v10972_v16, %s17723_s23  ;;  %v11358_v11 = vrot.slane %v11351_v35, %v20977_v61  ;;  %v11365_v23 = vrot.slane %v10981_v42, %v20977_v61  ;;  %v11068_v59 = vrot.slane %v10954_v30, %v20977_v61 }
0x181f   :  { %11030 = vrot.lane.b32.xlu1 %v10932_v8, %s17724_s24  ;;  %v15841_v29 = vcombine.high %v10939_v9, %v10953_v52  ;;  %v10957_v12 = vcombine.high %v10953_v52, %v10953_v52  ;;  %v11061_v15 = vrot.slane %v11054_v60, %v20977_v61  ;;  %v11153_v6 = vcombine.low %v10956_v24, %v10939_v9 }
0x1820   :  { %v11366_v54 = vcombine.low %v11358_v11, %v11365_v23  ;;  %v11167_v45 = vrot.slane %v10953_v52, %v20977_v61 }
0x1821   :  { %v11259_v3 = vrot.slane %v15841_v29, %v20977_v61  ;;  %v11069_v18 = vcombine.low %v11061_v15, %v11068_v59  ;;  %v11160_v31 = vrot.slane %v11153_v6, %v20977_v61 }
0x1822   :  { %10982 = vrot.lane.b32.xlu0 %v10932_v8, %s17722_s2  ;;  %v20256_v27 = vrot.slane %v11366_v54, %v20977_v61 }
0x1823   :  { %11000 = vrot.lane.b32.xlu1 %v10979_v32, %s17722_s2  ;;  %v11267_v44 = vcombine.low %v11259_v3, %v11266_v28  ;;  %v20237_v63 = vrot.slane %v11069_v18, %v20977_v61  ;;  %v11168_v20 = vcombine.low %v11160_v31, %v11167_v45 }
0x1825   :  { %v20245_v5 = vrot.slane %v11267_v44, %v20977_v61  ;;  %v20251_v14 = vrot.slane %v11168_v20, %v20977_v61 }
0x1826   :  { %11002 = vrot.lane.b32.xlu0 %v10980_v21, %s17722_s2 }
0x1827   :  { %11024 = vrot.lane.b32.xlu1 %v10979_v32, %s17723_s23 }
0x182a   :  { %11026 = vrot.lane.b32.xlu0 %v10980_v21, %s17723_s23 }
0x182b   :  { %10984 = vrot.lane.b32.xlu1 %v10946_v36, %s17722_s2 }
0x182e   :  { %10990 = vrot.lane.b32.xlu0 %v10939_v9, %s17722_s2 }
0x182f   :  { %10986 = vrot.lane.b32.xlu1 %v10954_v30, %s17722_s2 }
0x1832   :  { %11008 = vrot.lane.b32.xlu0 %v10946_v36, %s17723_s23 }
0x1833   :  { %11004 = vrot.lane.b32.xlu1 %v10981_v42, %s17722_s2 }
0x1836   :  { %11010 = vrot.lane.b32.xlu0 %v10954_v30, %s17723_s23 }
0x1837   :  { %11028 = vrot.lane.b32.xlu1 %v10981_v42, %s17723_s23 }
0x183a   :  { %11014 = vrot.lane.b32.xlu0 %v10939_v9, %s17723_s23 }
0x183b   :  { %10988 = vrot.lane.b32.xlu1 %v10956_v24, %s17722_s2 }
0x183e   :  { %11032 = vrot.lane.b32.xlu0 %v10946_v36, %s17724_s24 }
0x183f   :  { %10994 = vrot.lane.b32.xlu1 %v10955_v37, %s17722_s2 }
0x1842   :  { %11034 = vrot.lane.b32.xlu0 %v10954_v30, %s17724_s24 }
0x1843   :  { %10992 = vrot.lane.b32.xlu1 %v10953_v52, %s17722_s2 }
0x1846   :  { %10996 = vrot.lane.b32.xlu0 %v10957_v12, %s17722_s2 }
0x1847   :  { %11012 = vrot.lane.b32.xlu1 %v10956_v24, %s17723_s23 }
0x184a   :  { %11038 = vrot.lane.b32.xlu0 %v10939_v9, %s17724_s24 }
0x184b   :  { %11018 = vrot.lane.b32.xlu1 %v10955_v37, %s17723_s23 }
0x184e   :  { %11020 = vrot.lane.b32.xlu0 %v10957_v12, %s17723_s23 }
0x184f   :  { %11016 = vrot.lane.b32.xlu1 %v10953_v52, %s17723_s23 }
0x1852   :  { %11046 = vrot.lane.b32.xlu0 %v10972_v16, %s17724_s24 }
0x1853   :  { %11036 = vrot.lane.b32.xlu1 %v10956_v24, %s17724_s24 }
0x1856   :  { %11044 = vrot.lane.b32.xlu0 %v10957_v12, %s17724_s24 }
0x1857   :  { %11042 = vrot.lane.b32.xlu1 %v10955_v37, %s17724_s24 }
0x185a   :  { %11050 = vrot.lane.b32.xlu0 %v10980_v21, %s17724_s24 }
0x185b   :  { %11040 = vrot.lane.b32.xlu1 %v10953_v52, %s17724_s24 }
0x185e   :  { %11077 = vrot.lane.b32.xlu0 %v20237_v63, %s17726_s1 }
0x185f   :  { %11048 = vrot.lane.b32.xlu1 %v10979_v32, %s17724_s24 }
0x1862   :  { %11275 = vrot.lane.b32.xlu0 %v20245_v5, %s17726_s1 }
0x1863   :  { %11052 = vrot.lane.b32.xlu1 %v10981_v42, %s17724_s24 }
0x1867   :  { %11176 = vrot.lane.b32.xlu1 %v20251_v14, %s17726_s1 }
0x186b   :  { %11374 = vrot.lane.b32.xlu1 %v20256_v27, %s17726_s1 }
0x188c   :  { %v10999_v7 = vpop.permute.xlu0 %10998 }
0x188d   :  { %v11007_v4 = vpop.permute.xlu1 %11006  ;;  %v11662_v60 = vrot.slane %v10999_v7, %v20977_v61 }
0x1890   :  { %v20260_v33 = vpop.permute.xlu0 %11022 }
0x1891   :  { %v20262_v34 = vpop.permute.xlu1 %11030 }
0x1894   :  { %v10983_v49 = vpop.permute.xlu0 %10982 }
0x1895   :  { %v11001_v40 = vpop.permute.xlu1 %11000 }
0x1898   :  { %v11003_v57 = vpop.permute.xlu0 %11002 }
0x1899   :  { %v11025_v38 = vpop.permute.xlu1 %11024  ;;  %v11747_v52 = vcombine.low %v11001_v40, %v11003_v57 }
0x189b   :  { %v11754_v28 = vrot.slane %v11747_v52, %v20977_v61 }
0x189c   :  { %v11027_v39 = vpop.permute.xlu0 %11026 }
0x189d   :  { %v10985_v22 = vpop.permute.xlu1 %10984  ;;  %v12143_v7 = vcombine.low %v11025_v38, %v11027_v39  ;;  %v12058_v38 = vrot.slane %v20260_v33, %v20977_v61 }
0x189e   :  { %v11450_v19 = vcombine.low %v10983_v49, %v10985_v22 }
0x18a0   :  { %v10991_v56 = vpop.permute.xlu0 %10990  ;;  %v11457_v13 = vrot.slane %v11450_v19, %v20977_v61 }
0x18a1   :  { %v10987_v10 = vpop.permute.xlu1 %10986 }
0x18a2   :  { %v11464_v41 = vrot.slane %v10987_v10, %v20977_v61 }
0x18a4   :  { %v11465_v53 = vcombine.low %v11457_v13, %v11464_v41  ;;  %v11009_v55 = vpop.permute.xlu0 %11008 }
0x18a5   :  { %v11005_v16 = vpop.permute.xlu1 %11004  ;;  %v11846_v36 = vcombine.low %v11007_v4, %v11009_v55  ;;  %v12150_v55 = vrot.slane %v12143_v7, %v20977_v61 }
0x18a6   :  { %v20267_v2 = vrot.slane %v11465_v53, %v20977_v61  ;;  %v11761_v29 = vrot.slane %v11005_v16, %v20977_v61 }
0x18a7   :  { %v11853_v6 = vrot.slane %v11846_v36, %v20977_v61 }
0x18a8   :  { %v11011_v8 = vpop.permute.xlu0 %11010  ;;  %11473 = vrot.lane.b32.xlu0 %v20267_v2, %s17726_s1  ;;  %v11762_v37 = vcombine.low %v11754_v28, %v11761_v29 }
0x18a9   :  { %v11029_v32 = vpop.permute.xlu1 %11028  ;;  %v11860_v15 = vrot.slane %v11011_v8, %v20977_v61 }
0x18aa   :  { %v20285_v20 = vrot.slane %v11762_v37, %v20977_v61  ;;  %v12157_v10 = vrot.slane %v11029_v32, %v20977_v61 }
0x18ab   :  { %v11861_v49 = vcombine.low %v11853_v6, %v11860_v15 }
0x18ac   :  { %v11015_v21 = vpop.permute.xlu0 %11014 }
0x18ad   :  { %v10989_v0 = vpop.permute.xlu1 %10988  ;;  %v20301_v39 = vrot.slane %v11861_v49, %v20977_v61 }
0x18ae   :  { %v11549_v9 = vcombine.low %v10989_v0, %v10991_v56 }
0x18b0   :  { %v11033_v42 = vpop.permute.xlu0 %11032  ;;  %v11556_v54 = vrot.slane %v11549_v9, %v20977_v61 }
0x18b1   :  { %v10995_v35 = vpop.permute.xlu1 %10994  ;;  %v12242_v22 = vcombine.low %v20262_v34, %v11033_v42  ;;  %v12158_v42 = vcombine.low %v12150_v55, %v12157_v10 }
0x18b3   :  { %v12249_v32 = vrot.slane %v12242_v22, %v20977_v61 }
0x18b4   :  { %v11035_v11 = vpop.permute.xlu0 %11034 }
0x18b5   :  { %v10993_v23 = vpop.permute.xlu1 %10992  ;;  %v12256_v53 = vrot.slane %v11035_v11, %v20977_v61 }
0x18b6   :  { %v11563_v3 = vrot.slane %v10993_v23, %v20977_v61  ;;  %v20320_v23 = vrot.slane %v12158_v42, %v20977_v61 }
0x18b8   :  { %v11564_v44 = vcombine.low %v11556_v54, %v11563_v3  ;;  %v10997_v43 = vpop.permute.xlu0 %10996 }
0x18b9   :  { %v11648_v30 = vcombine.low %v10995_v35, %v10997_v43  ;;  %v11013_v24 = vpop.permute.xlu1 %11012  ;;  %v12257_v35 = vcombine.low %v12249_v32, %v12256_v53 }
0x18ba   :  { %v20276_v12 = vrot.slane %v11564_v44, %v20977_v61  ;;  %v11945_v4 = vcombine.low %v11013_v24, %v11015_v21 }
0x18bb   :  { %v11655_v59 = vrot.slane %v11648_v30, %v20977_v61  ;;  %v20323_v3 = vrot.slane %v12257_v35, %v20977_v61 }
0x18bc   :  { %11572 = vrot.lane.b32.xlu1 %v20276_v12, %s17726_s1  ;;  %v11039_v18 = vpop.permute.xlu0 %11038  ;;  %v11952_v13 = vrot.slane %v11945_v4, %v20977_v61 }
0x18bd   :  { %v11663_v31 = vcombine.low %v11655_v59, %v11662_v60  ;;  %v11019_v45 = vpop.permute.xlu1 %11018 }
0x18bf   :  { %v20288_v40 = vrot.slane %v11663_v31, %v20977_v61 }
0x18c0   :  { %11770 = vrot.lane.b32.xlu1 %v20285_v20, %s17726_s1  ;;  %v11021_v57 = vpop.permute.xlu0 %11020 }
0x18c1   :  { %v12044_v19 = vcombine.low %v11019_v45, %v11021_v57  ;;  %v11017_v56 = vpop.permute.xlu1 %11016  ;;  %11671 = vrot.lane.b32.xlu0 %v20288_v40, %s17726_s1 }
0x18c2   :  { %v11959_v41 = vrot.slane %v11017_v56, %v20977_v61 }
0x18c3   :  { %v12051_v34 = vrot.slane %v12044_v19, %v20977_v61 }
0x18c4   :  { %v11960_v16 = vcombine.low %v11952_v13, %v11959_v41  ;;  %v11047_v8 = vpop.permute.xlu0 %11046 }
0x18c5   :  { %v12059_v21 = vcombine.low %v12051_v34, %v12058_v38  ;;  %v11037_v0 = vpop.permute.xlu1 %11036  ;;  %11869 = vrot.lane.b32.xlu0 %v20301_v39, %s17726_s1  ;;  %v12454_v28 = vrot.slane %v11047_v8, %v20977_v61 }
0x18c6   :  { %v20310_v33 = vrot.slane %v11960_v16, %v20977_v61  ;;  %v12341_v29 = vcombine.low %v11037_v0, %v11039_v18 }
0x18c7   :  { %v20313_v9 = vrot.slane %v12059_v21, %v20977_v61 }
0x18c8   :  { %11968 = vrot.lane.b32.xlu1 %v20310_v33, %s17726_s1  ;;  %v11045_v52 = vpop.permute.xlu0 %11044  ;;  %v12348_v30 = vrot.slane %v12341_v29, %v20977_v61 }
0x18c9   :  { %v11043_v11 = vpop.permute.xlu1 %11042  ;;  %12067 = vrot.lane.b32.xlu0 %v20313_v9, %s17726_s1 }
0x18ca   :  { %v12440_v54 = vcombine.low %v11043_v11, %v11045_v52 }
0x18cc   :  { %v12447_v44 = vrot.slane %v12440_v54, %v20977_v61  ;;  %12166 = vrot.lane.b32.xlu1 %v20320_v23, %s17726_s1  ;;  %v11051_v43 = vpop.permute.xlu0 %11050 }
0x18cd   :  { %v11041_v36 = vpop.permute.xlu1 %11040  ;;  %12265 = vrot.lane.b32.xlu0 %v20323_v3, %s17726_s1 }
0x18ce   :  { %v12455_v24 = vcombine.low %v12447_v44, %v12454_v28  ;;  %v12355_v37 = vrot.slane %v11041_v36, %v20977_v61 }
0x18d0   :  { %v20334_v60 = vrot.slane %v12455_v24, %v20977_v61  ;;  %v12356_v15 = vcombine.low %v12348_v30, %v12355_v37  ;;  %v11078_v59 = vpop.permute.xlu0 %11077 }
0x18d1   :  { %v11049_v18 = vpop.permute.xlu1 %11048  ;;  %17021 = vmatpush3.xpose.msk.msra.mxu1 %vm1229_vm2, %v11078_v59 }
0x18d2   :  { %v20338_v6 = vrot.slane %v12356_v15, %v20977_v61  ;;  %v12539_v31 = vcombine.low %v11049_v18, %v11051_v43  ;;  %12463 = vrot.lane.b32.xlu0 %v20334_v60, %s17726_s1  ;;  %17030 = vmatprep.subr.mxu1 %v20973_v46 }
0x18d4   :  { %12364 = vrot.lane.b32.xlu1 %v20338_v6, %s17726_s1  ;;  %17023 = vmatmul.mubr.msk.f32.vlgmr.msra.gmra.mrb[120].mxu1 %vm1229_vm2, %v20237_v63  ;;  %v11276_v45 = vpop.permute.xlu0 %11275  ;;  %v12546_v49 = vrot.slane %v12539_v31, %v20977_v61 }
0x18d5   :  { %v11053_v4 = vpop.permute.xlu1 %11052  ;;  %17031 = vmatpush3.xpose.msk.msra.mxu1 %vm1229_vm2, %v11276_v45  ;;  %17032 = vmatprep.mubr.msk.f32.mxu1 %vm17725_vm0, %v20973_v46 }
0x18d6   :  { %v12553_v7 = vrot.slane %v11053_v4, %v20977_v61  ;;  %17040 = vmatprep.subr.mxu1 %v20973_v46 }
0x18d8   :  { %v12554_v57 = vcombine.low %v12546_v49, %v12553_v7  ;;  %17033 = vmatmul.mubr.msk.f32.vlgmr.msra.gmra.mrb[122].mxu1 %vm1229_vm2, %v20245_v5 }
0x18d9   :  { %v11177_v22 = vpop.permute.xlu1 %11176  ;;  %17042 = vmatprep.mubr.msk.f32.mxu1 %vm17725_vm0, %v20973_v46 }
0x18da   :  { %v20358_v19 = vrot.slane %v12554_v57, %v20977_v61  ;;  %17026 = vmatpush3.xpose.msk.msra.mxu0 %vm1229_vm2, %v11177_v22 }
0x18db   :  { %17035 = vmatprep.subr.mxu0 %v20973_v46 }
0x18dc   :  { %12562 = vrot.lane.b32.xlu1 %v20358_v19, %s17726_s1 }
0x18dd   :  { %17028 = vmatmul.mubr.msk.f32.vlgmr.msra.gmra.mrb[120].mxu0 %vm1229_vm2, %v20251_v14  ;;  %v11375_v56 = vpop.permute.xlu1 %11374 }
0x18de   :  { %17036 = vmatpush3.xpose.msk.msra.mxu0 %vm1229_vm2, %v11375_v56  ;;  %17037 = vmatprep.mubr.msk.f32.mxu0 %vm17725_vm0, %v20973_v46 }
0x18df   :  { %17045 = vmatprep.subr.mxu0 %v20973_v46 }
0x18e1   :  { %17038 = vmatmul.mubr.msk.f32.vlgmr.msra.gmra.mrb[122].mxu0 %vm1229_vm2, %v20256_v27 }
0x18e2   :  { %17047 = vmatprep.mubr.msk.f32.mxu0 %vm17725_vm0, %v20973_v46 }
0x191a   :  { %v11474_v10 = vpop.permute.xlu0 %11473 }
0x191b   :  { %17041 = vmatpush3.xpose.msk.msra.mxu1 %vm1229_vm2, %v11474_v10 }
0x191c   :  { %17050 = vmatprep.subr.mxu1 %v20973_v46 }
0x191e   :  { %17043 = vmatmul.mubr.msk.f32.vlgmr.msra.gmra.mrb[124].mxu1 %vm1229_vm2, %v20267_v2 }
0x191f   :  { %17052 = vmatprep.mubr.msk.f32.mxu1 %vm17725_vm0, %v20973_v46 }
0x192e   :  { %v11573_v13 = vpop.permute.xlu1 %11572 }
0x192f   :  { %17046 = vmatpush3.xpose.msk.msra.mxu0 %vm1229_vm2, %v11573_v13 }
0x1930   :  { %17055 = vmatprep.subr.mxu0 %v20973_v46 }
0x1932   :  { %17048 = vmatmul.mubr.msk.f32.vlgmr.msra.gmra.mrb[124].mxu0 %vm1229_vm2, %v20276_v12  ;;  %v11771_v41 = vpop.permute.xlu1 %11770 }
0x1933   :  { %17056 = vmatpush3.xpose.msk.msra.mxu0 %vm1229_vm2, %v11771_v41  ;;  %v11672_v38 = vpop.permute.xlu0 %11671  ;;  %17057 = vmatprep.mubr.msk.f32.mxu0 %vm17725_vm0, %v20973_v46 }
0x1934   :  { %17051 = vmatpush3.xpose.msk.msra.mxu1 %vm1229_vm2, %v11672_v38  ;;  %17065 = vmatprep.subr.mxu0 %v20973_v46 }
0x1935   :  { %17060 = vmatprep.subr.mxu1 %v20973_v46 }
0x1936   :  { %17058 = vmatmul.mubr.msk.f32.vlgmr.msra.gmra.mrb[126].mxu0 %vm1229_vm2, %v20285_v20 }
0x1937   :  { %17053 = vmatmul.mubr.msk.f32.vlgmr.msra.gmra.mrb[126].mxu1 %vm1229_vm2, %v20288_v40  ;;  %v11870_v53 = vpop.permute.xlu0 %11869  ;;  %17067 = vmatprep.mubr.msk.f32.mxu0 %vm17725_vm0, %v20973_v46 }
0x1938   :  { %17061 = vmatpush3.xpose.msk.msra.mxu1 %vm1229_vm2, %v11870_v53  ;;  %17062 = vmatprep.mubr.msk.f32.mxu1 %vm17725_vm0, %v20973_v46 }
0x1939   :  { %17070 = vmatprep.subr.mxu1 %v20973_v46 }
0x193a   :  { %v11969_v34 = vpop.permute.xlu1 %11968 }
0x193b   :  { %17063 = vmatmul.mubr.msk.f32.vlgmr.msra.gmra.mrb[128].mxu1 %vm1229_vm2, %v20301_v39  ;;  %17066 = vmatpush3.xpose.msk.msra.mxu0 %vm1229_vm2, %v11969_v34  ;;  %v12068_v55 = vpop.permute.xlu0 %12067 }
0x193c   :  { %17071 = vmatpush3.xpose.msk.msra.mxu1 %vm1229_vm2, %v12068_v55  ;;  %17075 = vmatprep.subr.mxu0 %v20973_v46 }
0x193d   :  { %17072 = vmatprep.mubr.msk.f32.mxu1 %vm17725_vm0, %v20973_v46  ;;  %17080 = vmatprep.subr.mxu1 %v20973_v46 }
0x193e   :  { %17068 = vmatmul.mubr.msk.f32.vlgmr.msra.gmra.mrb[128].mxu0 %vm1229_vm2, %v20310_v33  ;;  %v12167_v16 = vpop.permute.xlu1 %12166 }
0x193f   :  { %17073 = vmatmul.mubr.msk.f32.vlgmr.msra.gmra.mrb[130].mxu1 %vm1229_vm2, %v20313_v9  ;;  %17076 = vmatpush3.xpose.msk.msra.mxu0 %vm1229_vm2, %v12167_v16  ;;  %v12266_v8 = vpop.permute.xlu0 %12265 }
0x1940   :  { %17081 = vmatpush3.xpose.msk.msra.mxu1 %vm1229_vm2, %v12266_v8  ;;  %17077 = vmatprep.mubr.msk.f32.mxu0 %vm17725_vm0, %v20973_v46 }
0x1941   :  { %17082 = vmatprep.mubr.msk.f32.mxu1 %vm17725_vm0, %v20973_v46  ;;  %17090 = vmatprep.subr.mxu1 %v20973_v46 }
0x1942   :  { %17078 = vmatmul.mubr.msk.f32.vlgmr.msra.gmra.mrb[130].mxu0 %vm1229_vm2, %v20320_v23  ;;  %17085 = vmatprep.subr.mxu0 %v20973_v46 }
0x1943   :  { %17083 = vmatmul.mubr.msk.f32.vlgmr.msra.gmra.mrb[132].mxu1 %vm1229_vm2, %v20323_v3  ;;  %17087 = vmatprep.mubr.msk.f32.mxu0 %vm17725_vm0, %v20973_v46 }
0x1944   :  { %v12464_v32 = vpop.permute.xlu0 %12463  ;;  %17092 = vmatprep.mubr.msk.f32.mxu1 %vm17725_vm0, %v20973_v46 }
0x1945   :  { %17091 = vmatpush3.xpose.msk.msra.mxu1 %vm1229_vm2, %v12464_v32 }
0x1946   :  { %v12365_v21 = vpop.permute.xlu1 %12364  ;;  %17100 = vmatprep.subr.mxu1 %v20973_v46 }
0x1947   :  { %17086 = vmatpush3.xpose.msk.msra.mxu0 %vm1229_vm2, %v12365_v21 }
0x1948   :  { %17093 = vmatmul.mubr.msk.f32.vlgmr.msra.gmra.mrb[134].mxu1 %vm1229_vm2, %v20334_v60  ;;  %17095 = vmatprep.subr.mxu0 %v20973_v46 }
0x1949   :  { %17102 = vmatprep.mubr.msk.f32.mxu1 %vm17725_vm0, %v20973_v46 }
0x194a   :  { %17088 = vmatmul.mubr.msk.f32.vlgmr.msra.gmra.mrb[132].mxu0 %vm1229_vm2, %v20338_v6 }
0x194b   :  { %17097 = vmatprep.mubr.msk.f32.mxu0 %vm17725_vm0, %v20973_v46 }
0x194e   :  { %v12563_v0 = vpop.permute.xlu1 %12562 }
0x194f   :  { %17096 = vmatpush3.xpose.msk.msra.mxu0 %vm1229_vm2, %v12563_v0 }
0x1950   :  { %17105 = vmatprep.subr.mxu0 %v20973_v46 }
0x1952   :  { %17098 = vmatmul.mubr.msk.f32.vlgmr.msra.gmra.mrb[134].mxu0 %vm1229_vm2, %v20358_v19 }
0x1953   :  { %17107 = vmatprep.mubr.msk.f32.mxu0 %vm17725_vm0, %v20973_v46 }
0x19a7   :  { %v11149_v42 = vpop.f32.mrb[120].mxu1 }
0x19a8   :  { %v20446_v35 = vmul.f32 0.35355338, %v11149_v42  ;;  %v17024_v52 = vpop.f32.mrb[121].mxu1 }
0x19aa   :  { %v12654_v11 = vsel %vm8126_vm6, %v20446_v35, -inf }
0x19ab   :  { %12655 = vmax.xlane.f32.xlu0 %v12654_v11  ;;  %v11347_v29 = vpop.f32.mrb[122].mxu1 }
0x19ac   :  { %v17034_v54 = vpop.f32.mrb[123].mxu1  ;;  %v20458_v37 = vmul.f32 0.35355338, %v11347_v29 }
0x19ae   :  { %v12660_v59 = vsel %vm8126_vm6, %v20458_v37, -inf }
0x19b0   :  { %v11248_v28 = vpop.f32.mrb[120].mxu0 }
0x19b1   :  { %v20450_v44 = vmul.f32 0.35355338, %v11248_v28  ;;  %v17029_v43 = vpop.f32.mrb[121].mxu0 }
0x19b3   :  { %v12657_v36 = vsel %vm8126_vm6, %v20450_v44, -inf }
0x19b4   :  { %v11446_v30 = vpop.f32.mrb[122].mxu0  ;;  %12658 = vmax.xlane.f32.xlu1 %v12657_v36 }
0x19b5   :  { %v17039_v24 = vpop.f32.mrb[123].mxu0  ;;  %v20460_v15 = vmul.f32 0.35355338, %v11446_v30 }
0x19b7   :  { %v12663_v18 = vsel %vm8126_vm6, %v20460_v15, -inf }
0x19c1   :  { %12907 = vrot.lane.b32.xlu0 %v20251_v14, %s17727_s25 }
0x19c5   :  { %12830 = vrot.lane.b32.xlu1 %v20237_v63, %s17727_s25 }
0x19e0   :  { %12661 = vmax.xlane.f32.xlu0 %v12660_v59 }
0x19e4   :  { %12664 = vmax.xlane.f32.xlu0 %v12663_v18 }
0x19f1   :  { %v11545_v31 = vpop.f32.mrb[124].mxu1 }
0x19f2   :  { %v20466_v45 = vmul.f32 0.35355338, %v11545_v31  ;;  %v17044_v4 = vpop.f32.mrb[125].mxu1 }
0x19f4   :  { %v12666_v14 = vsel %vm8126_vm6, %v20466_v45, -inf }
0x19f5   :  { %12667 = vmax.xlane.f32.xlu0 %v12666_v14 }
0x1a05   :  { %v11644_v63 = vpop.f32.mrb[124].mxu0 }
0x1a06   :  { %v20470_v49 = vmul.f32 0.35355338, %v11644_v63  ;;  %v17049_v7 = vpop.f32.mrb[125].mxu0 }
0x1a08   :  { %v12669_v57 = vsel %vm8126_vm6, %v20470_v49, -inf }
0x1a09   :  { %v11842_v22 = vpop.f32.mrb[126].mxu0  ;;  %12670 = vmax.xlane.f32.xlu1 %v12669_v57 }
0x1a0a   :  { %v20474_v56 = vmul.f32 0.35355338, %v11842_v22  ;;  %v11743_v10 = vpop.f32.mrb[126].mxu1  ;;  %v17059_v13 = vpop.f32.mrb[127].mxu0 }
0x1a0b   :  { %v20476_v41 = vmul.f32 0.35355338, %v11743_v10  ;;  %v17054_v38 = vpop.f32.mrb[127].mxu1 }
0x1a0c   :  { %v12675_v53 = vsel %vm8126_vm6, %v20474_v56, -inf }
0x1a0d   :  { %12676 = vmax.xlane.f32.xlu1 %v12675_v53  ;;  %v12672_v34 = vsel %vm8126_vm6, %v20476_v41, -inf }
0x1a0e   :  { %12673 = vmax.xlane.f32.xlu0 %v12672_v34  ;;  %v11941_v55 = vpop.f32.mrb[128].mxu1 }
0x1a0f   :  { %v20482_v16 = vmul.f32 0.35355338, %v11941_v55  ;;  %v17064_v8 = vpop.f32.mrb[129].mxu1 }
0x1a11   :  { %v12040_v32 = vpop.f32.mrb[128].mxu0  ;;  %v12678_v21 = vsel %vm8126_vm6, %v20482_v16, -inf }
0x1a12   :  { %v20486_v0 = vmul.f32 0.35355338, %v12040_v32  ;;  %v17069_v42 = vpop.f32.mrb[129].mxu0  ;;  %12679 = vmax.xlane.f32.xlu0 %v12678_v21  ;;  %v12139_v52 = vpop.f32.mrb[130].mxu1 }
0x1a13   :  { %v20488_v11 = vmul.f32 0.35355338, %v12139_v52  ;;  %v17074_v29 = vpop.f32.mrb[131].mxu1 }
0x1a14   :  { %v12681_v54 = vsel %vm8126_vm6, %v20486_v0, -inf }
0x1a15   :  { %v12238_v28 = vpop.f32.mrb[130].mxu0  ;;  %12682 = vmax.xlane.f32.xlu1 %v12681_v54  ;;  %v12684_v43 = vsel %vm8126_vm6, %v20488_v11, -inf }
0x1a16   :  { %v20494_v36 = vmul.f32 0.35355338, %v12238_v28  ;;  %v17079_v30 = vpop.f32.mrb[131].mxu0  ;;  %12685 = vmax.xlane.f32.xlu0 %v12684_v43  ;;  %v12337_v24 = vpop.f32.mrb[132].mxu1 }
0x1a17   :  { %v20496_v59 = vmul.f32 0.35355338, %v12337_v24  ;;  %v17084_v18 = vpop.f32.mrb[133].mxu1 }
0x1a18   :  { %v12687_v31 = vsel %vm8126_vm6, %v20494_v36, -inf }
0x1a19   :  { %12688 = vmax.xlane.f32.xlu1 %v12687_v31  ;;  %v12690_v4 = vsel %vm8126_vm6, %v20496_v59, -inf }
0x1a1a   :  { %12691 = vmax.xlane.f32.xlu0 %v12690_v4 }
0x1a1b   :  { %v12535_v14 = vpop.f32.mrb[134].mxu1 }
0x1a1c   :  { %v20502_v63 = vmul.f32 0.35355338, %v12535_v14  ;;  %v17094_v7 = vpop.f32.mrb[135].mxu1 }
0x1a1d   :  { %v12436_v57 = vpop.f32.mrb[132].mxu0 }
0x1a1e   :  { %v20504_v22 = vmul.f32 0.35355338, %v12436_v57  ;;  %v17089_v10 = vpop.f32.mrb[133].mxu0  ;;  %v12696_v13 = vsel %vm8126_vm6, %v20502_v63, -inf }
0x1a1f   :  { %12697 = vmax.xlane.f32.xlu0 %v12696_v13 }
0x1a20   :  { %v12693_v38 = vsel %vm8126_vm6, %v20504_v22, -inf }
0x1a21   :  { %12694 = vmax.xlane.f32.xlu1 %v12693_v38 }
0x1a25   :  { %v12634_v53 = vpop.f32.mrb[134].mxu0 }
0x1a26   :  { %v20510_v34 = vmul.f32 0.35355338, %v12634_v53  ;;  %v17099_v55 = vpop.f32.mrb[135].mxu0 }
0x1a28   :  { %v12699_v8 = vsel %vm8126_vm6, %v20510_v34, -inf }
0x1a29   :  { %12700 = vmax.xlane.f32.xlu1 %v12699_v8 }
0x1a35   :  { %13061 = vrot.lane.b32.xlu0 %v20256_v27, %s17727_s25 }
0x1a38   :  { %v12656_v32 = vpop.xlane.xlu0 %12655 }
0x1a39   :  { %13138 = vrot.lane.b32.xlu0 %v20267_v2, %s17727_s25 }
0x1a3a   :  { %12984 = vrot.lane.b32.xlu1 %v20245_v5, %s17727_s25 }
0x1a3c   :  { %v12908_v21 = vpop.permute.xlu0 %12907 }
0x1a3d   :  { %13215 = vrot.lane.b32.xlu0 %v20276_v12, %s17727_s25  ;;  %17106 = vmatpush3.msk.msra.mxu0 %vm8309_vm1, %v12908_v21 }
0x1a3e   :  { %13523 = vrot.lane.b32.xlu1 %v20310_v33, %s17727_s25  ;;  %17115 = vmatprep.subr.mxu0 %v20973_v46 }
0x1a41   :  { %v12659_v42 = vpop.xlane.xlu1 %12658  ;;  %13292 = vrot.lane.b32.xlu0 %v20288_v40, %s17727_s25  ;;  %v12702_v40 = vsub.f32 %v20446_v35, %v12656_v32 }
0x1a42   :  { %v12703_v5 = vsub.f32 %v20450_v44, %v12659_v42 }
0x1a44   :  { %v12720_v2 = vmul.f32 1.442695, %v12703_v5 }
0x1a45   :  { %v12831_v27 = vpop.permute.xlu1 %12830  ;;  %13369 = vrot.lane.b32.xlu0 %v20285_v20, %s17727_s25 }
0x1a46   :  { %17101 = vmatpush3.msk.msra.mxu1 %vm8309_vm1, %v12831_v27  ;;  %17644 = vpow2.f32 %v12720_v2 }
0x1a47   :  { %17110 = vmatprep.subr.mxu1 %v20973_v46 }
0x1a49   :  { %13446 = vrot.lane.b32.xlu0 %v20301_v39, %s17727_s25  ;;  %v12718_v39 = vmul.f32 1.442695, %v12702_v40 }
0x1a4b   :  { %17646 = vpow2.f32 %v12718_v39 }
0x1a4d   :  { %13600 = vrot.lane.b32.xlu0 %v20313_v9, %s17727_s25 }
0x1a50   :  { %v20543_v12 = vpop.eup %17644 }
0x1a51   :  { %13677 = vrot.lane.b32.xlu0 %v20320_v23, %s17727_s25  ;;  %v12753_v20 = vsel %vm8126_vm6, %v20543_v12, 0.0 }
0x1a55   :  { %13754 = vrot.lane.b32.xlu0 %v20323_v3, %s17727_s25  ;;  %v20550_v52 = vpop.eup %17646 }
0x1a56   :  { %v12750_v29 = vsel %vm8126_vm6, %v20550_v52, 0.0 }
0x1a59   :  { %13831 = vrot.lane.b32.xlu0 %v20338_v6, %s17727_s25 }
0x1a62   :  { %12754 = vadd.xlane.f32.xlu1 %v12753_v20 }
0x1a6d   :  { %v12662_v33 = vpop.xlane.xlu0 %12661 }
0x1a6e   :  { %v12704_v9 = vsub.f32 %v20458_v37, %v12662_v33 }
0x1a70   :  { %v12722_v23 = vmul.f32 1.442695, %v12704_v9 }
0x1a71   :  { %v12665_v44 = vpop.xlane.xlu0 %12664 }
0x1a72   :  { %17648 = vpow2.f32 %v12722_v23  ;;  %v12705_v3 = vsub.f32 %v20460_v15, %v12665_v44 }
0x1a74   :  { %v12724_v6 = vmul.f32 1.442695, %v12705_v3 }
0x1a76   :  { %17650 = vpow2.f32 %v12724_v6 }
0x1a78   :  { %12751 = vadd.xlane.f32.xlu0 %v12750_v29 }
0x1a7c   :  { %v20554_v35 = vpop.eup %17648 }
0x1a7d   :  { %v12756_v54 = vsel %vm8126_vm6, %v20554_v35, 0.0 }
0x1a7e   :  { %12757 = vadd.xlane.f32.xlu0 %v12756_v54 }
0x1a80   :  { %v20558_v37 = vpop.eup %17650 }
0x1a81   :  { %v12759_v28 = vsel %vm8126_vm6, %v20558_v37, 0.0 }
0x1a82   :  { %12760 = vadd.xlane.f32.xlu1 %v12759_v28  ;;  %v12668_v15 = vpop.xlane.xlu0 %12667 }
0x1a83   :  { %v12706_v43 = vsub.f32 %v20466_v45, %v12668_v15 }
0x1a85   :  { %v12726_v30 = vmul.f32 1.442695, %v12706_v43 }
0x1a87   :  { %17652 = vpow2.f32 %v12726_v30 }
0x1a91   :  { %v20563_v24 = vpop.eup %17652 }
0x1a92   :  { %v12762_v18 = vsel %vm8126_vm6, %v20563_v24, 0.0 }
0x1a93   :  { %12763 = vadd.xlane.f32.xlu0 %v12762_v18 }
0x1a96   :  { %v12671_v31 = vpop.xlane.xlu1 %12670 }
0x1a97   :  { %v12707_v4 = vsub.f32 %v20470_v49, %v12671_v31 }
0x1a99   :  { %v12728_v14 = vmul.f32 1.442695, %v12707_v4 }
0x1a9a   :  { %v12677_v7 = vpop.xlane.xlu1 %12676 }
0x1a9b   :  { %17654 = vpow2.f32 %v12728_v14  ;;  %v12709_v57 = vsub.f32 %v20474_v56, %v12677_v7  ;;  %v12674_v10 = vpop.xlane.xlu0 %12673 }
0x1a9c   :  { %v12708_v13 = vsub.f32 %v20476_v41, %v12674_v10 }
0x1a9d   :  { %v12732_v45 = vmul.f32 1.442695, %v12709_v57 }
0x1a9e   :  { %v12730_v38 = vmul.f32 1.442695, %v12708_v13 }
0x1a9f   :  { %17656 = vpow2.f32 %v12732_v45  ;;  %v12680_v53 = vpop.xlane.xlu0 %12679 }
0x1aa0   :  { %17658 = vpow2.f32 %v12730_v38  ;;  %v12710_v55 = vsub.f32 %v20482_v16, %v12680_v53 }
0x1aa2   :  { %v12734_v8 = vmul.f32 1.442695, %v12710_v55  ;;  %v12683_v32 = vpop.xlane.xlu1 %12682 }
0x1aa3   :  { %v12711_v21 = vsub.f32 %v20486_v0, %v12683_v32  ;;  %v12686_v49 = vpop.xlane.xlu0 %12685 }
0x1aa4   :  { %17660 = vpow2.f32 %v12734_v8  ;;  %v12712_v42 = vsub.f32 %v20488_v11, %v12686_v49 }
0x1aa5   :  { %v20573_v27 = vpop.eup %17654  ;;  %v12736_v56 = vmul.f32 1.442695, %v12711_v21 }
0x1aa6   :  { %v12738_v5 = vmul.f32 1.442695, %v12712_v42  ;;  %v12689_v41 = vpop.xlane.xlu1 %12688  ;;  %v12765_v2 = vsel %vm8126_vm6, %v20573_v27, 0.0 }
0x1aa7   :  { %17662 = vpow2.f32 %v12736_v56  ;;  %v12713_v20 = vsub.f32 %v20494_v36, %v12689_v41  ;;  %12766 = vadd.xlane.f32.xlu1 %v12765_v2  ;;  %v12692_v16 = vpop.xlane.xlu0 %12691 }
0x1aa8   :  { %17664 = vpow2.f32 %v12738_v5  ;;  %v12714_v0 = vsub.f32 %v20496_v59, %v12692_v16 }
0x1aa9   :  { %v20579_v40 = vpop.eup %17656  ;;  %v12740_v39 = vmul.f32 1.442695, %v12713_v20 }
0x1aaa   :  { %v20581_v11 = vpop.eup %17658  ;;  %v12742_v33 = vmul.f32 1.442695, %v12714_v0  ;;  %v12771_v9 = vsel %vm8126_vm6, %v20579_v40, 0.0 }
0x1aab   :  { %17666 = vpow2.f32 %v12740_v39  ;;  %12772 = vadd.xlane.f32.xlu1 %v12771_v9  ;;  %v12768_v23 = vsel %vm8126_vm6, %v20581_v11, 0.0 }
0x1aac   :  { %17668 = vpow2.f32 %v12742_v33  ;;  %12769 = vadd.xlane.f32.xlu0 %v12768_v23  ;;  %v12698_v36 = vpop.xlane.xlu0 %12697 }
0x1aad   :  { %v12716_v44 = vsub.f32 %v20502_v63, %v12698_v36 }
0x1aae   :  { %v20588_v59 = vpop.eup %17660  ;;  %v12695_v3 = vpop.xlane.xlu1 %12694 }
0x1aaf   :  { %v12715_v6 = vsub.f32 %v20504_v22, %v12695_v3  ;;  %v12774_v29 = vsel %vm8126_vm6, %v20588_v59, 0.0  ;;  %v12746_v28 = vmul.f32 1.442695, %v12716_v44 }
0x1ab0   :  { %12775 = vadd.xlane.f32.xlu0 %v12774_v29  ;;  %v13062_v55 = vpop.permute.xlu0 %13061 }
0x1ab1   :  { %v20593_v54 = vpop.eup %17662  ;;  %v12744_v15 = vmul.f32 1.442695, %v12715_v6 }
0x1ab2   :  { %v20595_v43 = vpop.eup %17664  ;;  %v12777_v30 = vsel %vm8126_vm6, %v20593_v54, 0.0 }
0x1ab3   :  { %17670 = vpow2.f32 %v12744_v15  ;;  %12778 = vadd.xlane.f32.xlu1 %v12777_v30  ;;  %v12780_v63 = vsel %vm8126_vm6, %v20595_v43, 0.0 }
0x1ab4   :  { %12781 = vadd.xlane.f32.xlu0 %v12780_v63  ;;  %17672 = vpow2.f32 %v12746_v28  ;;  %v13139_v8 = vpop.permute.xlu0 %13138 }
0x1ab5   :  { %v20601_v22 = vpop.eup %17666 }
0x1ab6   :  { %v20603_v18 = vpop.eup %17668  ;;  %v12701_v31 = vpop.xlane.xlu1 %12700  ;;  %v12783_v4 = vsel %vm8126_vm6, %v20601_v22, 0.0 }
0x1ab7   :  { %v12717_v14 = vsub.f32 %v20510_v34, %v12701_v31  ;;  %12784 = vadd.xlane.f32.xlu1 %v12783_v4  ;;  %v12786_v7 = vsel %vm8126_vm6, %v20603_v18, 0.0 }
0x1ab8   :  { %12787 = vadd.xlane.f32.xlu0 %v12786_v7  ;;  %v13216_v32 = vpop.permute.xlu0 %13215 }
0x1ab9   :  { %v12748_v57 = vmul.f32 1.442695, %v12717_v14 }
0x1aba   :  { %v12985_v42 = vpop.permute.xlu1 %12984 }
0x1abb   :  { %17674 = vpow2.f32 %v12748_v57 }
0x1abc   :  { %v13293_v21 = vpop.permute.xlu0 %13292 }
0x1abd   :  { %v20610_v10 = vpop.eup %17670 }
0x1abe   :  { %v12789_v13 = vsel %vm8126_vm6, %v20610_v10, 0.0  ;;  %v20614_v45 = vpop.eup %17672  ;;  %v20630_v5 = vpop.permute.xlu1 %13523 }
0x1abf   :  { %12790 = vadd.xlane.f32.xlu0 %v12789_v13  ;;  %v12792_v38 = vsel %vm8126_vm6, %v20614_v45, 0.0 }
0x1ac0   :  { %v20626_v49 = vpop.permute.xlu0 %13369 }
0x1ac3   :  { %12793 = vadd.xlane.f32.xlu0 %v12792_v38 }
0x1ac4   :  { %v20628_v56 = vpop.permute.xlu0 %13446 }
0x1ac5   :  { %v20618_v34 = vpop.eup %17674 }
0x1ac6   :  { %v12795_v53 = vsel %vm8126_vm6, %v20618_v34, 0.0 }
0x1ac7   :  { %12796 = vadd.xlane.f32.xlu1 %v12795_v53 }
0x1ac8   :  { %v20632_v41 = vpop.permute.xlu0 %13600 }
0x1acc   :  { %v20634_v20 = vpop.permute.xlu0 %13677 }
0x1ad0   :  { %v20636_v0 = vpop.permute.xlu0 %13754 }
0x1ad8   :  { %13985 = vrot.lane.b32.xlu1 %v20358_v19, %s17727_s25 }
0x1ad9   :  { %13908 = vrot.lane.b32.xlu0 %v20334_v60, %s17727_s25  ;;  %v20644_v60 = vpop.permute.xlu0 %13831 }
0x1aef   :  { %v12755_v2 = vpop.xlane.xlu1 %12754 }
0x1af0   :  { %17676 = vrcp.f32 %v12755_v2 }
0x1afa   :  { %v17677_v16 = vpop.eup %17676 }
0x1afb   :  { %v12815_v19 = vmul.f32 %v17677_v16, %v20543_v12 }
0x1afd   :  { %17108 = vmatmul.mubr.msk.f32.vlgmr.msra.gmra.mrb[136].mxu0 %vm8305_vm7, %v12815_v19  ;;  %v15819_v19 = vld [vmem:[%s20953_s10 + $0x48] sm:$0xff] }
0x1afe   :  { %17116 = vmatpush3.msk.msra.mxu0 %vm8309_vm1, %v13062_v55  ;;  %17117 = vmatprep.mubr.msk.f32.mxu0 %vm17725_vm0, %v20973_v46 }
0x1aff   :  { %17125 = vmatprep.subr.mxu0 %v20973_v46 }
0x1b05   :  { %v12752_v39 = vpop.xlane.xlu0 %12751 }
0x1b06   :  { %17678 = vrcp.f32 %v12752_v39 }
0x1b0b   :  { %v12758_v33 = vpop.xlane.xlu0 %12757 }
0x1b0c   :  { %17680 = vrcp.f32 %v12758_v33 }
0x1b0f   :  { %v12761_v9 = vpop.xlane.xlu1 %12760 }
0x1b10   :  { %v17679_v23 = vpop.eup %17678  ;;  %17682 = vrcp.f32 %v12761_v9 }
0x1b11   :  { %v12814_v12 = vmul.f32 %v17679_v23, %v20550_v52 }
0x1b13   :  { %17103 = vmatmul.mubr.msk.f32.vlgmr.msra.gmra.mrb[136].mxu1 %vm8305_vm7, %v12814_v12 }
0x1b14   :  { %17111 = vmatpush3.msk.msra.mxu1 %vm8309_vm1, %v12985_v42  ;;  %17112 = vmatprep.mubr.msk.f32.mxu1 %vm17725_vm0, %v20973_v46 }
0x1b15   :  { %17120 = vmatprep.subr.mxu1 %v20973_v46 }
0x1b16   :  { %v17681_v36 = vpop.eup %17680 }
0x1b17   :  { %v12816_v44 = vmul.f32 %v17681_v36, %v20554_v35 }
0x1b19   :  { %17113 = vmatmul.mubr.msk.f32.vlgmr.msra.gmra.mrb[138].mxu1 %vm8305_vm7, %v12816_v44 }
0x1b1a   :  { %v17683_v3 = vpop.eup %17682  ;;  %17121 = vmatpush3.msk.msra.mxu1 %vm8309_vm1, %v13139_v8  ;;  %17122 = vmatprep.mubr.msk.f32.mxu1 %vm17725_vm0, %v20973_v46 }
0x1b1b   :  { %v12817_v52 = vmul.f32 %v17683_v3, %v20558_v37  ;;  %17130 = vmatprep.subr.mxu1 %v20973_v46 }
0x1b1d   :  { %17118 = vmatmul.mubr.msk.f32.vlgmr.msra.gmra.mrb[138].mxu0 %vm8305_vm7, %v12817_v52 }
0x1b1e   :  { %17126 = vmatpush3.msk.msra.mxu0 %vm8309_vm1, %v13216_v32  ;;  %17127 = vmatprep.mubr.msk.f32.mxu0 %vm17725_vm0, %v20973_v46 }
0x1b1f   :  { %17135 = vmatprep.subr.mxu0 %v20973_v46 }
0x1b20   :  { %v12764_v35 = vpop.xlane.xlu0 %12763 }
0x1b21   :  { %17684 = vrcp.f32 %v12764_v35 }
0x1b2b   :  { %v17685_v6 = vpop.eup %17684 }
0x1b2c   :  { %v12818_v29 = vmul.f32 %v17685_v6, %v20563_v24 }
0x1b2e   :  { %17123 = vmatmul.mubr.msk.f32.vlgmr.msra.gmra.mrb[140].mxu1 %vm8305_vm7, %v12818_v29 }
0x1b2f   :  { %17131 = vmatpush3.msk.msra.mxu1 %vm8309_vm1, %v13293_v21  ;;  %17132 = vmatprep.mubr.msk.f32.mxu1 %vm17725_vm0, %v20973_v46 }
0x1b30   :  { %17140 = vmatprep.subr.mxu1 %v20973_v46 }
0x1b34   :  { %v12767_v37 = vpop.xlane.xlu1 %12766 }
0x1b35   :  { %17686 = vrcp.f32 %v12767_v37 }
0x1b38   :  { %v12773_v28 = vpop.xlane.xlu1 %12772 }
0x1b39   :  { %17688 = vrcp.f32 %v12773_v28  ;;  %v12770_v15 = vpop.xlane.xlu0 %12769 }
0x1b3a   :  { %17690 = vrcp.f32 %v12770_v15 }
0x1b3d   :  { %v12776_v30 = vpop.xlane.xlu0 %12775 }
0x1b3e   :  { %17692 = vrcp.f32 %v12776_v30 }
0x1b3f   :  { %v17687_v63 = vpop.eup %17686 }
0x1b40   :  { %v12819_v24 = vmul.f32 %v17687_v63, %v20573_v27  ;;  %v12779_v31 = vpop.xlane.xlu1 %12778 }
0x1b41   :  { %17694 = vrcp.f32 %v12779_v31  ;;  %v12782_v4 = vpop.xlane.xlu0 %12781 }
0x1b42   :  { %17696 = vrcp.f32 %v12782_v4  ;;  %17128 = vmatmul.mubr.msk.f32.vlgmr.msra.gmra.mrb[140].mxu0 %vm8305_vm7, %v12819_v24 }
0x1b43   :  { %v17689_v14 = vpop.eup %17688  ;;  %17136 = vmatpush3.msk.msra.mxu0 %vm8309_vm1, %v20626_v49  ;;  %17137 = vmatprep.mubr.msk.f32.mxu0 %vm17725_vm0, %v20973_v46 }
0x1b44   :  { %v17691_v7 = vpop.eup %17690  ;;  %v12821_v57 = vmul.f32 %v17689_v14, %v20579_v40  ;;  %v12785_v13 = vpop.xlane.xlu1 %12784  ;;  %17145 = vmatprep.subr.mxu0 %v20973_v46 }
0x1b45   :  { %v12820_v27 = vmul.f32 %v17691_v7, %v20581_v11  ;;  %17698 = vrcp.f32 %v12785_v13  ;;  %v12788_v38 = vpop.xlane.xlu0 %12787 }
0x1b46   :  { %17700 = vrcp.f32 %v12788_v38  ;;  %17138 = vmatmul.mubr.msk.f32.vlgmr.msra.gmra.mrb[142].mxu0 %vm8305_vm7, %v12821_v57 }
0x1b47   :  { %17146 = vmatpush3.msk.msra.mxu0 %vm8309_vm1, %v20630_v5  ;;  %17133 = vmatmul.mubr.msk.f32.vlgmr.msra.gmra.mrb[142].mxu1 %vm8305_vm7, %v12820_v27 }
0x1b48   :  { %v17693_v53 = vpop.eup %17692  ;;  %17141 = vmatpush3.msk.msra.mxu1 %vm8309_vm1, %v20628_v56  ;;  %17142 = vmatprep.mubr.msk.f32.mxu1 %vm17725_vm0, %v20973_v46 }
0x1b49   :  { %v12822_v40 = vmul.f32 %v17693_v53, %v20588_v59  ;;  %17150 = vmatprep.subr.mxu1 %v20973_v46  ;;  %17147 = vmatprep.mubr.msk.f32.mxu0 %vm17725_vm0, %v20973_v46 }
0x1b4a   :  { %17155 = vmatprep.subr.mxu0 %v20973_v46 }
0x1b4b   :  { %v17695_v11 = vpop.eup %17694  ;;  %17143 = vmatmul.mubr.msk.f32.vlgmr.msra.gmra.mrb[144].mxu1 %vm8305_vm7, %v12822_v40 }
0x1b4c   :  { %v17697_v55 = vpop.eup %17696  ;;  %v12823_v8 = vmul.f32 %v17695_v11, %v20593_v54  ;;  %17151 = vmatpush3.msk.msra.mxu1 %vm8309_vm1, %v20632_v41  ;;  %v12791_v32 = vpop.xlane.xlu0 %12790  ;;  %17152 = vmatprep.mubr.msk.f32.mxu1 %vm17725_vm0, %v20973_v46 }
0x1b4d   :  { %v12824_v59 = vmul.f32 %v17697_v55, %v20595_v43  ;;  %17702 = vrcp.f32 %v12791_v32  ;;  %17160 = vmatprep.subr.mxu1 %v20973_v46 }
0x1b4e   :  { %17148 = vmatmul.mubr.msk.f32.vlgmr.msra.gmra.mrb[144].mxu0 %vm8305_vm7, %v12823_v8 }
0x1b4f   :  { %v17699_v21 = vpop.eup %17698  ;;  %17156 = vmatpush3.msk.msra.mxu0 %vm8309_vm1, %v20634_v20  ;;  %17153 = vmatmul.mubr.msk.f32.vlgmr.msra.gmra.mrb[146].mxu1 %vm8305_vm7, %v12824_v59 }
0x1b50   :  { %v17701_v54 = vpop.eup %17700  ;;  %v12825_v49 = vmul.f32 %v17699_v21, %v20601_v22  ;;  %17161 = vmatpush3.msk.msra.mxu1 %vm8309_vm1, %v20636_v0  ;;  %v12794_v42 = vpop.xlane.xlu0 %12793  ;;  %17157 = vmatprep.mubr.msk.f32.mxu0 %vm17725_vm0, %v20973_v46 }
0x1b51   :  { %v12826_v43 = vmul.f32 %v17701_v54, %v20603_v18  ;;  %17704 = vrcp.f32 %v12794_v42  ;;  %17165 = vmatprep.subr.mxu0 %v20973_v46  ;;  %17162 = vmatprep.mubr.msk.f32.mxu1 %vm17725_vm0, %v20973_v46 }
0x1b52   :  { %17158 = vmatmul.mubr.msk.f32.vlgmr.msra.gmra.mrb[146].mxu0 %vm8305_vm7, %v12825_v49  ;;  %17170 = vmatprep.subr.mxu1 %v20973_v46 }
0x1b53   :  { %17166 = vmatpush3.msk.msra.mxu0 %vm8309_vm1, %v20644_v60  ;;  %17163 = vmatmul.mubr.msk.f32.vlgmr.msra.gmra.mrb[148].mxu1 %vm8305_vm7, %v12826_v43 }
0x1b54   :  { %v12797_v22 = vpop.xlane.xlu1 %12796  ;;  %v13909_v56 = vpop.permute.xlu0 %13908  ;;  %17167 = vmatprep.mubr.msk.f32.mxu0 %vm17725_vm0, %v20973_v46  ;;  %17175 = vmatprep.subr.mxu0 %v20973_v46 }
0x1b55   :  { %17706 = vrcp.f32 %v12797_v22  ;;  %17171 = vmatpush3.msk.msra.mxu1 %vm8309_vm1, %v13909_v56  ;;  %17172 = vmatprep.mubr.msk.f32.mxu1 %vm17725_vm0, %v20973_v46 }
0x1b57   :  { %v17703_v18 = vpop.eup %17702 }
0x1b58   :  { %v12827_v5 = vmul.f32 %v17703_v18, %v20610_v10  ;;  %v13986_v41 = vpop.permute.xlu1 %13985  ;;  %v15818_v10 = vld [vmem:[%s20953_s10 + $0x40] sm:$0xff] }
0x1b59   :  { %17180 = vmatprep.subr.mxu1 %v15818_v10 }
0x1b5a   :  { %17168 = vmatmul.mubr.msk.f32.vlgmr.msra.gmra.mrb[148].mxu0 %vm8305_vm7, %v12827_v5 }
0x1b5b   :  { %v17705_v2 = vpop.eup %17704  ;;  %17176 = vmatpush3.msk.msra.mxu0 %vm8309_vm1, %v13986_v41  ;;  %17177 = vmatprep.mubr.msk.f32.mxu0 %vm17725_vm0, %v20973_v46 }
0x1b5c   :  { %v12828_v20 = vmul.f32 %v17705_v2, %v20614_v45 }
0x1b5e   :  { %17173 = vmatmul.mubr.msk.f32.vlgmr.msra.gmra.mrb[150].mxu1 %vm8305_vm7, %v12828_v20  ;;  %v20764_v20 = vld [vmem:[%s20953_s10 + $0x50] sm:$0xff] }
0x1b5f   :  { %v17707_v16 = vpop.eup %17706  ;;  %17181 = vmatpush3.msra.mxu1 %v15818_v10 }
0x1b60   :  { %v12829_v0 = vmul.f32 %v17707_v16, %v20618_v34  ;;  %17185 = vmatprep.subr.mxu1 %v15819_v19 }
0x1b62   :  { %17178 = vmatmul.mubr.msk.f32.vlgmr.msra.gmra.mrb[150].mxu0 %vm8305_vm7, %v12829_v0 }
0x1bd0   :  { %v12980_v60 = vpop.f32.mrb[136].mxu0 }
0x1bd1   :  { %v17109_v45 = vpop.f32.mrb[137].mxu0  ;;  %v14095_v39 = vrot.slane %v12980_v60, %v20977_v61 }
0x1bd3   :  { %v14096_v23 = vcombine.high %v14095_v39, %v14095_v39  ;;  %v14103_v12 = vrot.slane %v14095_v39, %v20977_v61 }
0x1bd5   :  { %v14110_v35 = vrot.slane %v14096_v23, %v20977_v61  ;;  %v14111_v6 = vcombine.high %v14103_v12, %v14103_v12 }
0x1bd7   :  { %v14160_v14 = vcombine.low %v14110_v35, %v14111_v6 }
0x1bd9   :  { %v14182_v8 = vrot.slane %v14160_v14, %v20977_v61 }
0x1be6   :  { %v12903_v33 = vpop.f32.mrb[136].mxu1 }
0x1be7   :  { %v14072_v34 = vrot.slane %v12903_v33, %v20977_v61  ;;  %v17104_v9 = vpop.f32.mrb[137].mxu1 }
0x1be9   :  { %v14073_v36 = vcombine.high %v14072_v34, %v14072_v34  ;;  %v14080_v44 = vrot.slane %v14072_v34, %v20977_v61 }
0x1beb   :  { %v14087_v3 = vrot.slane %v14073_v36, %v20977_v61  ;;  %v14088_v52 = vcombine.high %v14080_v44, %v14080_v44 }
0x1bec   :  { %v13057_v29 = vpop.f32.mrb[138].mxu1 }
0x1bed   :  { %v14158_v37 = vcombine.low %v14080_v44, %v14087_v3  ;;  %v14159_v28 = vcombine.low %v14088_v52, %v14103_v12  ;;  %v14118_v15 = vrot.slane %v13057_v29, %v20977_v61  ;;  %v17114_v30 = vpop.f32.mrb[139].mxu1 }
0x1bef   :  { %v14168_v63 = vrot.slane %v14158_v37, %v20977_v61  ;;  %v14175_v24 = vrot.slane %v14159_v28, %v20977_v61  ;;  %v14119_v31 = vcombine.high %v14118_v15, %v14118_v15  ;;  %v14126_v4 = vrot.slane %v14118_v15, %v20977_v61 }
0x1bf0   :  { %v13134_v7 = vpop.f32.mrb[138].mxu0 }
0x1bf1   :  { %v14190_v57 = vcombine.low %v14168_v63, %v14175_v24  ;;  %v14133_v13 = vrot.slane %v14119_v31, %v20977_v61  ;;  %v14141_v27 = vrot.slane %v13134_v7, %v20977_v61  ;;  %v17119_v38 = vpop.f32.mrb[139].mxu0  ;;  %v14134_v53 = vcombine.high %v14126_v4, %v14126_v4 }
0x1bf3   :  { %v14161_v40 = vcombine.low %v14126_v4, %v14133_v13  ;;  %v14142_v11 = vcombine.high %v14141_v27, %v14141_v27  ;;  %v14149_v55 = vrot.slane %v14141_v27, %v20977_v61  ;;  %v14198_v56 = vrot.slane %v14190_v57, %v20977_v61 }
0x1bf5   :  { %v14189_v32 = vrot.slane %v14161_v40, %v20977_v61  ;;  %v14156_v59 = vrot.slane %v14142_v11, %v20977_v61  ;;  %v14157_v21 = vcombine.high %v14149_v55, %v14149_v55  ;;  %v14207_v54 = vcombine.low %v14134_v53, %v14149_v55 }
0x1bf7   :  { %v14191_v49 = vcombine.low %v14182_v8, %v14189_v32  ;;  %v14208_v42 = vcombine.low %v14156_v59, %v14157_v21  ;;  %v14215_v43 = vrot.slane %v14207_v54, %v20977_v61 }
0x1bf9   :  { %v14222_v22 = vrot.slane %v14208_v42, %v20977_v61  ;;  %v14205_v18 = vrot.slane %v14191_v49, %v20977_v61 }
0x1bfb   :  { %v14223_v5 = vcombine.low %v14215_v43, %v14222_v22  ;;  %v14206_v41 = vcombine.low %v14198_v56, %v14205_v18 }
0x1bfd   :  { %v14230_v2 = vrot.slane %v14223_v5, %v20977_v61  ;;  %17182 = vmatprep.mubr.msk.f32.mxu1 %vm1229_vm2, %v14206_v41 }
0x1bff   :  { %17183 = vmatmul.mubr.msk.f32.vlgmr.msra.gmra.mrb[152].mxu1 %vm1229_vm2, %v14230_v2 }
0x1c00   :  { %17186 = vmatpush3.msra.mxu1 %v15819_v19 }
0x1c01   :  { %v13211_v16 = vpop.f32.mrb[140].mxu1  ;;  %17190 = vmatprep.subr.mxu1 %v20764_v20 }
0x1c02   :  { %v17124_v0 = vpop.f32.mrb[141].mxu1  ;;  %v14326_v10 = vrot.slane %v13211_v16, %v20977_v61 }
0x1c04   :  { %v14327_v60 = vcombine.high %v14326_v10, %v14326_v10  ;;  %v14334_v45 = vrot.slane %v14326_v10, %v20977_v61 }
0x1c06   :  { %v14341_v39 = vrot.slane %v14327_v60, %v20977_v61  ;;  %v14342_v23 = vcombine.high %v14334_v45, %v14334_v45 }
0x1c08   :  { %v14412_v12 = vcombine.low %v14334_v45, %v14341_v39 }
0x1c0a   :  { %v14422_v30 = vrot.slane %v14412_v12, %v20977_v61 }
0x1c15   :  { %v13288_v33 = vpop.f32.mrb[140].mxu0 }
0x1c16   :  { %v14349_v34 = vrot.slane %v13288_v33, %v20977_v61  ;;  %v17129_v9 = vpop.f32.mrb[141].mxu0 }
0x1c18   :  { %v14350_v36 = vcombine.high %v14349_v34, %v14349_v34  ;;  %v14357_v19 = vrot.slane %v14349_v34, %v20977_v61 }
0x1c19   :  { %v13442_v44 = vpop.f32.mrb[142].mxu0 }
0x1c1a   :  { %v14364_v3 = vrot.slane %v14350_v36, %v20977_v61  ;;  %v14365_v52 = vcombine.high %v14357_v19, %v14357_v19  ;;  %v14413_v35 = vcombine.low %v14342_v23, %v14357_v19  ;;  %v14395_v6 = vrot.slane %v13442_v44, %v20977_v61  ;;  %v13365_v29 = vpop.f32.mrb[142].mxu1  ;;  %v17139_v37 = vpop.f32.mrb[143].mxu0 }
0x1c1b   :  { %v14372_v28 = vrot.slane %v13365_v29, %v20977_v61  ;;  %v17134_v15 = vpop.f32.mrb[143].mxu1 }
0x1c1c   :  { %v14429_v63 = vrot.slane %v14413_v35, %v20977_v61  ;;  %v14396_v24 = vcombine.high %v14395_v6, %v14395_v6  ;;  %v14403_v31 = vrot.slane %v14395_v6, %v20977_v61  ;;  %v14414_v7 = vcombine.low %v14364_v3, %v14365_v52 }
0x1c1d   :  { %v14373_v4 = vcombine.high %v14372_v28, %v14372_v28  ;;  %v14380_v14 = vrot.slane %v14372_v28, %v20977_v61 }
0x1c1e   :  { %v14444_v57 = vcombine.low %v14422_v30, %v14429_v63  ;;  %v14410_v13 = vrot.slane %v14396_v24, %v20977_v61  ;;  %v14411_v27 = vcombine.high %v14403_v31, %v14403_v31  ;;  %v13519_v38 = vpop.f32.mrb[144].mxu1  ;;  %v14436_v42 = vrot.slane %v14414_v7, %v20977_v61 }
0x1c1f   :  { %v14387_v53 = vrot.slane %v14373_v4, %v20977_v61  ;;  %v14388_v40 = vcombine.high %v14380_v14, %v14380_v14  ;;  %v14576_v11 = vrot.slane %v13519_v38, %v20977_v61  ;;  %v17144_v55 = vpop.f32.mrb[145].mxu1 }
0x1c20   :  { %v14462_v8 = vcombine.low %v14410_v13, %v14411_v27  ;;  %v14452_v38 = vrot.slane %v14444_v57, %v20977_v61 }
0x1c21   :  { %v14415_v32 = vcombine.low %v14380_v14, %v14387_v53  ;;  %v14461_v59 = vcombine.low %v14388_v40, %v14403_v31  ;;  %v14577_v21 = vcombine.high %v14576_v11, %v14576_v11  ;;  %v14584_v54 = vrot.slane %v14576_v11, %v20977_v61  ;;  %v13596_v49 = vpop.f32.mrb[144].mxu0 }
0x1c22   :  { %v14476_v43 = vrot.slane %v14462_v8, %v20977_v61  ;;  %v14599_v22 = vrot.slane %v13596_v49, %v20977_v61  ;;  %v17149_v56 = vpop.f32.mrb[145].mxu0  ;;  %v13673_v18 = vpop.f32.mrb[146].mxu1 }
0x1c23   :  { %v14443_v5 = vrot.slane %v14415_v32, %v20977_v61  ;;  %v14469_v41 = vrot.slane %v14461_v59, %v20977_v61  ;;  %v14591_v2 = vrot.slane %v14577_v21, %v20977_v61  ;;  %v14592_v16 = vcombine.high %v14584_v54, %v14584_v54  ;;  %v17154_v0 = vpop.f32.mrb[147].mxu1 }
0x1c24   :  { %v14600_v10 = vcombine.high %v14599_v22, %v14599_v22  ;;  %v14607_v60 = vrot.slane %v14599_v22, %v20977_v61  ;;  %v14622_v45 = vrot.slane %v13673_v18, %v20977_v61  ;;  %v15821_v22 = vld [vmem:[%s20953_s10 + $0x58] sm:$0xff] }
0x1c25   :  { %v14445_v39 = vcombine.low %v14436_v42, %v14443_v5  ;;  %v14477_v33 = vcombine.low %v14469_v41, %v14476_v43  ;;  %v14662_v34 = vcombine.low %v14584_v54, %v14591_v2  ;;  %v13750_v9 = vpop.f32.mrb[146].mxu0 }
0x1c26   :  { %v14614_v23 = vrot.slane %v14600_v10, %v20977_v61  ;;  %v14615_v12 = vcombine.high %v14607_v60, %v14607_v60  ;;  %v14663_v36 = vcombine.low %v14592_v16, %v14607_v60  ;;  %v14623_v19 = vcombine.high %v14622_v45, %v14622_v45  ;;  %v17159_v44 = vpop.f32.mrb[147].mxu0  ;;  %v13827_v3 = vpop.f32.mrb[148].mxu1 }
0x1c27   :  { %v14672_v52 = vrot.slane %v14662_v34, %v20977_v61  ;;  %v14630_v35 = vrot.slane %v14622_v45, %v20977_v61  ;;  %v14645_v6 = vrot.slane %v13750_v9, %v20977_v61  ;;  %v14826_v29 = vrot.slane %v13827_v3, %v20977_v61  ;;  %v17164_v37 = vpop.f32.mrb[149].mxu1 }
0x1c28   :  { %v14664_v28 = vcombine.low %v14614_v23, %v14615_v12  ;;  %v14679_v15 = vrot.slane %v14663_v36, %v20977_v61  ;;  %v14637_v30 = vrot.slane %v14623_v19, %v20977_v61  ;;  %v14459_v63 = vrot.slane %v14445_v39, %v20977_v61 }
0x1c29   :  { %v14638_v24 = vcombine.high %v14630_v35, %v14630_v35  ;;  %v14646_v31 = vcombine.high %v14645_v6, %v14645_v6  ;;  %v14653_v4 = vrot.slane %v14645_v6, %v20977_v61  ;;  %v14827_v14 = vcombine.high %v14826_v29, %v14826_v29 }
0x1c2a   :  { %v14686_v7 = vrot.slane %v14664_v28, %v20977_v61  ;;  %v14694_v13 = vcombine.low %v14672_v52, %v14679_v15  ;;  %v14665_v27 = vcombine.low %v14630_v35, %v14637_v30  ;;  %v14834_v55 = vrot.slane %v14826_v29, %v20977_v61 }
0x1c2b   :  { %v14660_v53 = vrot.slane %v14646_v31, %v20977_v61  ;;  %v14661_v40 = vcombine.high %v14653_v4, %v14653_v4  ;;  %v14711_v11 = vcombine.low %v14638_v24, %v14653_v4  ;;  %v14841_v32 = vrot.slane %v14827_v14, %v20977_v61 }
0x1c2c   :  { %v14693_v8 = vrot.slane %v14665_v27, %v20977_v61  ;;  %v14460_v59 = vcombine.low %v14452_v38, %v14459_v63  ;;  %v14484_v54 = vrot.slane %v14477_v33, %v20977_v61  ;;  %v14842_v5 = vcombine.high %v14834_v55, %v14834_v55 }
0x1c2d   :  { %v14712_v21 = vcombine.low %v14660_v53, %v14661_v40  ;;  %v13904_v49 = vpop.f32.mrb[148].mxu0  ;;  %v14719_v56 = vrot.slane %v14711_v11, %v20977_v61  ;;  %v14912_v41 = vcombine.low %v14834_v55, %v14841_v32  ;;  %v14702_v45 = vrot.slane %v14694_v13, %v20977_v61 }
0x1c2e   :  { %v14695_v42 = vcombine.low %v14686_v7, %v14693_v8  ;;  %17187 = vmatprep.mubr.msk.f32.mxu1 %vm1229_vm2, %v14460_v59  ;;  %v14849_v57 = vrot.slane %v13904_v49, %v20977_v61  ;;  %v17169_v43 = vpop.f32.mrb[149].mxu0 }
0x1c2f   :  { %v14726_v18 = vrot.slane %v14712_v21, %v20977_v61  ;;  %17188 = vmatmul.mubr.msk.f32.vlgmr.msra.gmra.mrb[152].mxu1 %vm1229_vm2, %v14484_v54  ;;  %v14922_v19 = vrot.slane %v14912_v41, %v20977_v61  ;;  %v20846_v21 = vld [vmem:[%s20951_s13 + $0x10] sm:$0xff] }
0x1c30   :  { %v14850_v2 = vcombine.high %v14849_v57, %v14849_v57  ;;  %v14857_v16 = vrot.slane %v14849_v57, %v20977_v61  ;;  %17191 = vmatpush3.msra.mxu1 %v20764_v20  ;;  %v14709_v0 = vrot.slane %v14695_v42, %v20977_v61  ;;  %v14313_v54 = vrot.slane %v20846_v21, %v19212_v50 }
0x1c31   :  { %v14727_v10 = vcombine.low %v14719_v56, %v14726_v18  ;;  %v13981_v60 = vpop.f32.mrb[150].mxu1  ;;  %17195 = vmatprep.subr.mxu1 %v15821_v22 }
0x1c32   :  { %v14864_v39 = vrot.slane %v14850_v2, %v20977_v61  ;;  %v14865_v33 = vcombine.high %v14857_v16, %v14857_v16  ;;  %v14913_v34 = vcombine.low %v14842_v5, %v14857_v16  ;;  %v14872_v9 = vrot.slane %v13981_v60, %v20977_v61  ;;  %v17174_v23 = vpop.f32.mrb[151].mxu1 }
0x1c33   :  { %v14734_v12 = vrot.slane %v14727_v10, %v20977_v61  ;;  %v14710_v36 = vcombine.low %v14702_v45, %v14709_v0  ;;  %v15825_v23 = vld [vmem:[%s20954_s11 + $0x58] sm:$0xff] }
0x1c34   :  { %v14929_v20 = vrot.slane %v14913_v34, %v20977_v61  ;;  %v14873_v44 = vcombine.high %v14872_v9, %v14872_v9  ;;  %v14880_v3 = vrot.slane %v14872_v9, %v20977_v61  ;;  %v14914_v35 = vcombine.low %v14864_v39, %v14865_v33  ;;  %v15823_v33 = vld [vmem:[%s20954_s11 + $0x48] sm:$0xff]  ;;  %v15824_v9 = vld [vmem:[%s20954_s11 + $0x50] sm:$0xff] }
0x1c35   :  { %17192 = vmatprep.mubr.msk.f32.mxu1 %vm1229_vm2, %v14710_v36  ;;  %v14058_v52 = vpop.f32.mrb[150].mxu0  ;;  %v15826_v36 = vld [vmem:[%s20955_s12 + $0x80] sm:$0xff] }
0x1c36   :  { %v14944_v6 = vcombine.low %v14922_v19, %v14929_v20  ;;  %v14887_v29 = vrot.slane %v14873_v44, %v20977_v61  ;;  %v17179_v37 = vpop.f32.mrb[151].mxu0  ;;  %v14895_v28 = vrot.slane %v14058_v52, %v20977_v61  ;;  %v14888_v30 = vcombine.high %v14880_v3, %v14880_v3  ;;  %v15827_v19 = vld [vmem:[%s20955_s12 + $0x88] sm:$0xff] }
0x1c37   :  { %17193 = vmatmul.mubr.msk.f32.vlgmr.msra.gmra.mrb[152].mxu1 %vm1229_vm2, %v14734_v12  ;;  %v14936_v31 = vrot.slane %v14914_v35, %v20977_v61  ;;  %v17373_v12 = vpack.c.bf16 %v15825_v23, %v15824_v9  ;;  %v17377_v20 = vpack.c.bf16 %v15827_v19, %v15826_v36  ;;  %v15097_v37 = vrot.slane %v20846_v21, %v19282_v26  ;;  %v15376_v23 = vld [vmem:[%s20958_s14] sm:$0xff]  ;;  %v15378_v36 = vld [vmem:[%s20958_s14 + $0x10] sm:$0xff] }
0x1c38   :  { %v14915_v15 = vcombine.low %v14880_v3, %v14887_v29  ;;  %17196 = vmatpush3.msra.mxu1 %v15821_v22  ;;  %v14896_v63 = vcombine.high %v14895_v28, %v14895_v28  ;;  %v14903_v24 = vrot.slane %v14895_v28, %v20977_v61  ;;  %v14952_v53 = vrot.slane %v14944_v6, %v20977_v61 }
0x1c39   :  { %v17729_v9 = vmov 0.0|0.0  }
0x1c3a   :  { %v14943_v4 = vrot.slane %v14915_v15, %v20977_v61  ;;  %v14910_v14 = vrot.slane %v14896_v63, %v20977_v61  ;;  %v14911_v7 = vcombine.high %v14903_v24, %v14903_v24  ;;  %v14961_v13 = vcombine.low %v14888_v30, %v14903_v24  ;;  %17393 = vmatprep.subr.bf16.mxu1 %v17729_v9 }
0x1c3b   :  { %v15103_v30 = vrot.slane %v20846_v21, %v19285_v48  ;;  %v15830_v48 = vld [vmem:[%s20955_s12 + $0xa0] sm:$0xff] }
0x1c3c   :  { %v14945_v27 = vcombine.low %v14936_v31, %v14943_v4  ;;  %v14962_v38 = vcombine.low %v14910_v14, %v14911_v7  ;;  %v14969_v11 = vrot.slane %v14961_v13, %v20977_v61  ;;  %v15828_v14 = vld [vmem:[%s20955_s12 + $0x90] sm:$0xff]  ;;  %v15829_v7 = vld [vmem:[%s20955_s12 + $0x98] sm:$0xff] }
0x1c3e   :  { %v14959_v40 = vrot.slane %v14945_v27, %v20977_v61  ;;  %v14976_v55 = vrot.slane %v14962_v38, %v20977_v61  ;;  %v17381_v38 = vpack.c.bf16 %v15829_v7, %v15828_v14 }
0x1c40   :  { %v14960_v8 = vcombine.low %v14952_v53, %v14959_v40  ;;  %v14977_v32 = vcombine.low %v14969_v11, %v14976_v55  ;;  %v15831_v53 = vld [vmem:[%s20955_s12 + $0xa8] sm:$0xff]  ;;  %v15832_v11 = vld [vmem:[%s20955_s12 + $0xb0] sm:$0xff]  ;;  %v15833_v55 = vld [vmem:[%s20955_s12 + $0xb8] sm:$0xff] }
0x1c41   :  { %v17385_v40 = vpack.c.bf16 %v15831_v53, %v15830_v48 }
0x1c42   :  { %17197 = vmatprep.mubr.msk.f32.mxu1 %vm1229_vm2, %v14960_v8  ;;  %v14984_v59 = vrot.slane %v14977_v32, %v20977_v61  ;;  %v17389_v8 = vpack.c.bf16 %v15833_v55, %v15832_v11  ;;  %v15109_v32 = vrot.slane %v20846_v21, %v19331_v1 }
0x1c44   :  { %17198 = vmatmul.mubr.msk.f32.vlgmr.msra.gmra.mrb[152].mxu1 %vm1229_vm2, %v14984_v59 }
0x1c45   :  { %17238 = vmatprep.mubr.msk.f32.mxu1 %vm17725_vm0, %v20973_v46 }
0x1d17   :  { %v17199_v49 = vpop.f32.mrb[152].mxu1 }
0x1d18   :  { %v17407_v42 = vadd.f32 %v17199_v49, %v14313_v54  ;;  %v15055_v57 = vpop.f32.mrb[153].mxu1 }
0x1d19   :  { %v17408_v43 = vadd.f32 %v15055_v57, %v14313_v54 }
0x1d1a   :  { %v15067_v22 = vadd.f32 %v17407_v42, %v20175_v47 }
0x1d1b   :  { %v15066_v56 = vadd.f32 %v17408_v43, %v20173_v51  ;;  %v15822_v51 = vld [vmem:[%s20954_s11 + $0x40] sm:$0xff] }
0x1d1c   :  { %v15071_v18 = vsel %vm10546_vm8, %v15067_v22, 0.0  ;;  %v17369_v34 = vpack.c.bf16 %v15823_v33, %v15822_v51 }
0x1d1d   :  { %15072 = vadd.xlane.f32.xlu1 %v15071_v18  ;;  %v15068_v46 = vsel %vm1071_vm15, %v15066_v56, 0.0 }
0x1d1e   :  { %15069 = vadd.xlane.f32.xlu0 %v15068_v46  ;;  %17370 = vmatprep.subr.bf16.mxu0 %v17369_v34 }
0x1d1f   :  { %17372 = vmatpush3.bf16.msra.mxu0 %v17369_v34 }
0x1d20   :  { %17374 = vmatprep.subr.bf16.mxu0 %v17373_v12 }
0x1d23   :  { %17376 = vmatpush3.bf16.msra.mxu0 %v17373_v12  ;;  %v15377_v12 = vld [vmem:[%s20958_s14 + $0x8] sm:$0xff] }
0x1d24   :  { %17378 = vmatprep.subr.bf16.mxu0 %v17377_v20  ;;  %v17394_v19 = vpack.c.bf16 %v15377_v12, %v15376_v23 }
0x1d26   :  { %17395 = vmatpush3.bf16.msra.mxu1 %v17394_v19 }
0x1d27   :  { %17396 = vmatprep.subr.bf16.mxu1 %v17729_v9 }
0x1daa   :  { %v15073_v5 = vpop.xlane.xlu1 %15072 }
0x1dab   :  { %v15075_v41 = vmul.f32 0.03125, %v15073_v5  ;;  %v15070_v2 = vpop.xlane.xlu0 %15069 }
0x1dac   :  { %v15074_v16 = vmul.f32 0.03125, %v15070_v2 }
0x1dad   :  { %v15077_v0 = vsub.f32 %v15067_v22, %v15075_v41  ;;  %v15279_v22 = vrot.slane %v20846_v21, %v19342_v25 }
0x1dae   :  { %v15076_v10 = vsub.f32 %v15066_v56, %v15074_v16 }
0x1daf   :  { %v15079_v39 = vmul.f32 %v15077_v0, %v15077_v0 }
0x1db0   :  { %v15078_v60 = vmul.f32 %v15076_v10, %v15076_v10 }
0x1db1   :  { %v15083_v47 = vsel %vm10546_vm8, %v15079_v39, 0.0 }
0x1db2   :  { %v15080_v45 = vsel %vm1071_vm15, %v15078_v60, 0.0 }
0x1db3   :  { %15081 = vadd.xlane.f32.xlu0 %v15080_v45 }
0x1db7   :  { %15084 = vadd.xlane.f32.xlu0 %v15083_v47 }
0x1e40   :  { %v15082_v44 = vpop.xlane.xlu0 %15081 }
0x1e41   :  { %v15086_v3 = vmul.f32 0.03125, %v15082_v44 }
0x1e43   :  { %v15088_v52 = vadd.f32 1e-05, %v15086_v3 }
0x1e44   :  { %v15085_v35 = vpop.xlane.xlu0 %15084 }
0x1e45   :  { %17708 = vrsqrt.f32 %v15088_v52  ;;  %v15087_v6 = vmul.f32 0.03125, %v15085_v35 }
0x1e47   :  { %v15089_v29 = vadd.f32 1e-05, %v15087_v6 }
0x1e49   :  { %17710 = vrsqrt.f32 %v15089_v29 }
0x1e4f   :  { %v17709_v28 = vpop.eup %17708 }
0x1e50   :  { %v15092_v15 = vmul.f32 %v17709_v28, %v15076_v10  ;;  %v15311_v28 = vrot.slane %v20846_v21, %v19398_v17 }
0x1e52   :  { %v15098_v63 = vmul.f32 %v15097_v37, %v15092_v15 }
0x1e53   :  { %v17711_v24 = vpop.eup %17710 }
0x1e54   :  { %v15093_v31 = vmul.f32 %v17711_v24, %v15077_v0  ;;  %v15104_v4 = vadd.f32 %v15103_v30, %v15098_v63  ;;  %v15317_v63 = vrot.slane %v20846_v21, %v19401_v58 }
0x1e56   :  { %v15099_v13 = vmul.f32 %v15097_v37, %v15093_v31  ;;  %17208 = vmatprep.mubr.msk.f32.mxu0 %vm1071_vm15, %v15104_v4 }
0x1e58   :  { %v15105_v27 = vadd.f32 %v15103_v30, %v15099_v13 }
0x1e5a   :  { %17209 = vmatmul.mubr.msk.f32.vlgmr.msra.gmra.mrb[152].mxu0 %vm1071_vm15, %v15105_v27 }
0x1e5b   :  { %17380 = vmatpush3.bf16.msra.mxu0 %v17377_v20  ;;  %v15379_v20 = vld [vmem:[%s20958_s14 + $0x18] sm:$0xff] }
0x1e5c   :  { %17382 = vmatprep.subr.bf16.mxu0 %v17381_v38  ;;  %v17397_v44 = vpack.c.bf16 %v15379_v20, %v15378_v36 }
0x1e5e   :  { %17398 = vmatpush3.bf16.msra.mxu1 %v17397_v44 }
0x1e5f   :  { %17384 = vmatpush3.bf16.msra.mxu0 %v17381_v38 }
0x1e60   :  { %17386 = vmatprep.subr.bf16.mxu0 %v17385_v40 }
0x1e63   :  { %17388 = vmatpush3.bf16.msra.mxu0 %v17385_v40 }
0x1e64   :  { %17390 = vmatprep.subr.bf16.mxu0 %v17389_v8 }
0x1e67   :  { %17392 = vmatpush3.bf16.msra.mxu0 %v17389_v8 }
0x1f2d   :  { %v17210_v59 = vpop.f32.mrb[152].mxu0 }
0x1f2e   :  { %v15188_v54 = vadd.f32 %v17210_v59, %v15109_v32  ;;  %v15182_v49 = vpop.f32.mrb[153].mxu0 }
0x1f2f   :  { %v15183_v42 = vadd.f32 %v15182_v49, %v15109_v32 }
0x1f30   :  { %v15192_v43 = vmax.f32 %v15188_v54, 0.0 }
0x1f31   :  { %v15191_v57 = vmax.f32 %v15183_v42, 0.0 }
0x1f33   :  { %17227 = vmatprep.mubr.msk.f32.mxu0 %vm5926_vm3, %v15191_v57 }
0x1f34   :  { %17228 = vmatmul.mubr.msk.f32.vlgmr.msra.gmra.mrb[154].mxu0 %vm5926_vm3, %v15192_v43 }
0x2007   :  { %v17229_v56 = vpop.f32.mrb[154].mxu0 }
0x2008   :  { %v15275_v18 = vadd.f32 %v17229_v56, %v15105_v27  ;;  %v15265_v46 = vpop.f32.mrb[155].mxu0 }
0x2009   :  { %v15274_v5 = vadd.f32 %v15265_v46, %v15104_v4 }
0x200a   :  { %v15281_v41 = vadd.f32 %v15279_v22, %v15275_v18 }
0x200b   :  { %v15280_v2 = vadd.f32 %v15279_v22, %v15274_v5  ;;  %v15380_v22 = vld [vmem:[%s20958_s14 + $0x20] sm:$0xff] }
0x200c   :  { %v15285_v1 = vsel %vm10546_vm8, %v15281_v41, 0.0  ;;  %v15384_v56 = vrot.slane %v15380_v22, %v20976_v62  ;;  %v15485_v5 = vrot.slane %v15380_v22, %v19212_v50 }
0x200d   :  { %15286 = vadd.xlane.f32.xlu0 %v15285_v1  ;;  %v15282_v16 = vsel %vm1071_vm15, %v15280_v2, 0.0 }
0x200e   :  { %15283 = vadd.xlane.f32.xlu1 %v15282_v16 }
0x209a   :  { %v15287_v0 = vpop.xlane.xlu0 %15286 }
0x209b   :  { %v15289_v10 = vmul.f32 0.03125, %v15287_v0  ;;  %v15284_v60 = vpop.xlane.xlu1 %15283 }
0x209c   :  { %v15288_v45 = vmul.f32 0.03125, %v15284_v60 }
0x209d   :  { %v15291_v39 = vsub.f32 %v15281_v41, %v15289_v10 }
0x209e   :  { %v15290_v47 = vsub.f32 %v15280_v2, %v15288_v45 }
0x209f   :  { %v15293_v51 = vmul.f32 %v15291_v39, %v15291_v39 }
0x20a0   :  { %v15292_v25 = vmul.f32 %v15290_v47, %v15290_v47 }
0x20a1   :  { %v15297_v33 = vsel %vm10546_vm8, %v15293_v51, 0.0 }
0x20a2   :  { %15298 = vadd.xlane.f32.xlu0 %v15297_v33  ;;  %v15294_v34 = vsel %vm1071_vm15, %v15292_v25, 0.0 }
0x20a3   :  { %15295 = vadd.xlane.f32.xlu1 %v15294_v34 }
0x212f   :  { %v15299_v3 = vpop.xlane.xlu0 %15298 }
0x2130   :  { %v15301_v52 = vmul.f32 0.03125, %v15299_v3  ;;  %v15296_v35 = vpop.xlane.xlu1 %15295 }
0x2131   :  { %v15300_v6 = vmul.f32 0.03125, %v15296_v35 }
0x2132   :  { %v15303_v29 = vadd.f32 1e-05, %v15301_v52 }
0x2133   :  { %v15302_v37 = vadd.f32 1e-05, %v15300_v6 }
0x2134   :  { %17712 = vrsqrt.f32 %v15303_v29 }
0x2135   :  { %17714 = vrsqrt.f32 %v15302_v37 }
0x213e   :  { %v17713_v15 = vpop.eup %17712 }
0x213f   :  { %v17715_v30 = vpop.eup %17714  ;;  %v15307_v24 = vmul.f32 %v17713_v15, %v15291_v39 }
0x2140   :  { %v15306_v31 = vmul.f32 %v17715_v30, %v15290_v47 }
0x2141   :  { %v15313_v4 = vmul.f32 %v15311_v28, %v15307_v24 }
0x2142   :  { %v15312_v14 = vmul.f32 %v15311_v28, %v15306_v31 }
0x2143   :  { %v15319_v7 = vadd.f32 %v15317_v63, %v15313_v4 }
0x2144   :  { %v15318_v13 = vadd.f32 %v15317_v63, %v15312_v14 }
0x2145   :  { %v15367_v27 = vrot.slane %v15319_v7, %v20977_v61 }
0x2146   :  { %v15322_v38 = vcombine.high %v15318_v13, %v15318_v13  ;;  %v15329_v48 = vrot.slane %v15318_v13, %v20977_v61 }
0x2147   :  { %v15368_v53 = vcombine.high %v15367_v27, %v15367_v27 }
0x2148   :  { %v15336_v40 = vrot.slane %v15322_v38, %v20977_v61  ;;  %v15337_v17 = vcombine.high %v15329_v48, %v15329_v48  ;;  %v15344_v58 = vrot.slane %v15329_v48, %v20977_v61 }
0x2149   :  { %v15375_v32 = vrot.slane %v15368_v53, %v20977_v61 }
0x214a   :  { %v15351_v11 = vrot.slane %v15336_v40, %v20977_v61  ;;  %v15358_v55 = vrot.slane %v15337_v17, %v20977_v61 }
0x214c   :  { %v15359_v21 = vcombine.high %v15351_v11, %v15351_v11  ;;  %v15360_v8 = vcombine.high %v15358_v55, %v15358_v55 }
0x214e   :  { %v15385_v59 = vcombine.low %v15344_v58, %v15360_v8  ;;  %v15386_v54 = vcombine.low %v15359_v21, %v15375_v32 }
0x2150   :  { %v15393_v49 = vrot.slane %v15385_v59, %v20977_v61  ;;  %v15400_v42 = vrot.slane %v15386_v54, %v20977_v61 }
0x2152   :  { %v15401_v57 = vcombine.low %v15393_v49, %v15400_v42 }
0x2154   :  { %v15408_v43 = vrot.slane %v15401_v57, %v20977_v61  ;;  %v15494_v61 = vrot.slane %v15380_v22, %v19282_v26 }
0x2156   :  { %17239 = vmatmul.mubr.msk.f32.vlgmr.msra.gmra.mrb[154].mxu1 %vm1071_vm15, %v15408_v43 }
0x2229   :  { %v15477_v18 = vpop.f32.mrb[154].mxu1 }
0x222a   :  { %v15478_v46 = vadd.f32 %v15477_v18, %v15384_v56  ;;  %v17240_v41 = vpop.f32.mrb[155].mxu1 }
0x222c   :  { %v15481_v2 = vmax.f32 %v15478_v46, 0.0 }
0x222e   :  { %v15486_v1 = vmul.f32 %v15485_v5, %v15481_v2 }
0x2230   :  { %v15488_v16 = vsel %vm15487_vm9, %v15486_v1, 0.0 }
0x2231   :  { %15489 = vadd.xlane.f32.xlu1 %v15488_v16 }
0x22be   :  { %v15490_v0 = vpop.xlane.xlu1 %15489 }
0x22bf   :  { %v15495_v10 = vadd.f32 %v15494_v61, %v15490_v0 }
0x22c1   :  { %v15497_v60 = vsel %vm15496_vm10, %v15495_v10, 0.0 }
0x22c2   :  { %v15499_v45 = vsel %vm15498_vm11, %v15497_v60, 0.0 }
0x22c3   :  { %15500 = vst [vmem:[%s20959_s15] sm:$0xff] %v15499_v45 }

</bundles_post_ra>
